<compile_context>
chip_gen: v7x
topology: tpu7x:2x2x1
jax: 0.10.0
libtpu: 0.0.40
codegen_flags: <defaults>
</compile_context>

<pallas_src>
import functools

import jax
import jax.numpy as jnp
import numpy as np
from jax.experimental import pallas as pl
from jax.experimental.pallas import tpu as pltpu


def _round_up(n, m):
    return ((n + m - 1) // m) * m


def _choose_tile(D, max_tile=1024):
    """Pick a lane-aligned feature tile and the padded feature count."""
    Dp = _round_up(D, 128)
    if Dp <= max_tile:
        return Dp, Dp                   # single grid step
    tile = max_tile                     # multiple of 128
    return tile, _round_up(D, tile)


# -----------------------------------------------------------------------------
# Encoder kernel: grid over tiles of the (padded) feature axis D.
#   per tile:  h1 = relu(x * w1x + feat_lin)                      (B, Td, Hh)
#              h2 = relu((B*Td, Hh) @ W2 + b2)   [one 2-D MXU op] (B*Td, K)
#              c_acc += sum_d(h2 * mask)                          (B, K)
#   last tile: enc_out = relu(c_acc @ Wm1 + bm1) @ Wm2 + bm2      (B, 2L)
#              pz_proj = relu(mu @ Wz1 + bz1) @ Wj1_z  (z = mu)   (B, Hd)
# -----------------------------------------------------------------------------
def _encoder_kernel(x_ref, m_ref, fl_ref,
                    w1x_ref, w2_ref, b2_ref,
                    wm1_ref, bm1_ref, wm2_ref, bm2_ref,
                    wz1_ref, bz1_ref, wj1z_ref,
                    enc_ref, pzp_ref,
                    c_acc):
    i = pl.program_id(0)

    @pl.when(i == 0)
    def _init():
        c_acc[...] = jnp.zeros_like(c_acc)

    x = x_ref[...]                     # (B, Td)
    m = m_ref[...]                     # (B, Td)
    fl = fl_ref[...]                   # (Td, Hh)  precomputed fe@w1f + fb*w1b + b1
    B, Td = x.shape
    Hh = fl.shape[1]

    # h_layer, first linear: only x is batch dependent (single input column).
    h1 = jnp.maximum(x[:, :, None] * w1x_ref[...][None, :, :] + fl[None, :, :],
                     0.0)              # (B, Td, Hh)

    # h_layer, second linear: one well-shaped 2-D MXU matmul (no batched einsum).
    h1_2d = h1.reshape(B * Td, Hh)
    h2_2d = jnp.dot(h1_2d, w2_ref[...],
                    preferred_element_type=jnp.float32) + b2_ref[...]
    h2_2d = jnp.maximum(h2_2d, 0.0)    # (B*Td, K)
    h2 = h2_2d.reshape(B, Td, h2_2d.shape[1])

    # Masked aggregation over observed features (padded features have mask=0).
    c_acc[...] += jnp.sum(h2 * m[:, :, None], axis=1)          # (B, K)

    @pl.when(i == pl.num_programs(0) - 1)
    def _finalize():
        enc_h = jnp.maximum(
            jnp.dot(c_acc[...], wm1_ref[...], preferred_element_type=jnp.float32)
            + bm1_ref[...], 0.0)                               # (B, He)
        enc_out = (jnp.dot(enc_h, wm2_ref[...], preferred_element_type=jnp.float32)
                   + bm2_ref[...])                             # (B, 2L)
        enc_ref[...] = enc_out                                 # merged mu|logvar

        # Fused decoder prologue (eval mode: z = mu).
        latent = enc_out.shape[1] // 2
        mu = enc_out[:, :latent]
        pz = jnp.maximum(
            jnp.dot(mu, wz1_ref[...], preferred_element_type=jnp.float32)
            + bz1_ref[...], 0.0)                               # (B, Hd)
        pzp_ref[...] = jnp.dot(pz, wj1z_ref[...],
                               preferred_element_type=jnp.float32)  # (B, Hd)


# -----------------------------------------------------------------------------
# Decoder kernel: embarrassingly parallel over tiles of D.
#   j1_T  = relu(pz_proj[:, :, None] + feat_lin_dec^T)          (B, Hd, Td) dense
#   recon = sum_h(j1_T * wj2) + bj2                             (B, Td) lane-dense
# -----------------------------------------------------------------------------
def _decoder_kernel(pzp_ref, flT_ref, wj2_ref, bj2_ref, rec_ref):
    pzp = pzp_ref[...]                 # (B, Hd)
    flT = flT_ref[...]                 # (Hd, Td) precomputed (fe@wj1f + fb*wj1b + bj1)^T
    j1 = jnp.maximum(pzp[:, :, None] + flT[None, :, :], 0.0)    # (B, Hd, Td)
    out = jnp.sum(j1 * wj2_ref[...][None, :, :], axis=1)        # (B, Td)
    rec_ref[...] = out + bj2_ref[...]


# -----------------------------------------------------------------------------
# Wrappers
# -----------------------------------------------------------------------------
def encoder_forward(x, mask, enc_fl, p, tile):
    B, Dp = x.shape
    Hh = enc_fl.shape[1]
    K = p['w2'].shape[1]
    He = p['wm1'].shape[1]
    L2 = p['wm2'].shape[1]
    L = L2 // 2
    Hd = p['wz1'].shape[1]
    grid = (Dp // tile,)

    full = lambda shape: pl.BlockSpec(shape, lambda i: (0, 0))

    enc_out, pzp = pl.pallas_call(
        _encoder_kernel,
        out_shape=(jax.ShapeDtypeStruct((B, L2), jnp.float32),
                   jax.ShapeDtypeStruct((B, Hd), jnp.float32)),
        grid_spec=pltpu.PrefetchScalarGridSpec(
            num_scalar_prefetch=0,
            grid=grid,
            in_specs=[
                pl.BlockSpec((B, tile), lambda i: (0, i)),   # x
                pl.BlockSpec((B, tile), lambda i: (0, i)),   # mask
                pl.BlockSpec((tile, Hh), lambda i: (i, 0)),  # encoder feat_lin
                full((1, Hh)),                               # w1x
                full((Hh, K)),                               # w2
                full((1, K)),                                # b2
                full((K, He)),                               # wm1
                full((1, He)),                               # bm1
                full((He, L2)),                              # wm2
                full((1, L2)),                               # bm2
                full((L, Hd)),                               # wz1
                full((1, Hd)),                               # bz1
                full((Hd, Hd)),                              # wj1z
            ],
            out_specs=[pl.BlockSpec((B, L2), lambda i: (0, 0)),
                       pl.BlockSpec((B, Hd), lambda i: (0, 0))],
            scratch_shapes=[pltpu.VMEM((B, K), jnp.float32)],
        ),
        compiler_params=pltpu.CompilerParams(
            dimension_semantics=("arbitrary",)),   # D-axis is a reduction
    )(x, mask, enc_fl,
      p['w1x'], p['w2'], p['b2'],
      p['wm1'], p['bm1'], p['wm2'], p['bm2'],
      p['wz1'], p['bz1'], p['wj1z'])
    return enc_out, pzp


def decoder_forward(pzp, dec_flT, p, tile):
    B, Hd = pzp.shape
    Dp = dec_flT.shape[1]
    grid = (Dp // tile,)

    full = lambda shape: pl.BlockSpec(shape, lambda i: (0, 0))

    rec = pl.pallas_call(
        _decoder_kernel,
        out_shape=jax.ShapeDtypeStruct((B, Dp), jnp.float32),
        grid_spec=pltpu.PrefetchScalarGridSpec(
            num_scalar_prefetch=0,
            grid=grid,
            in_specs=[
                full((B, Hd)),                                # pz_proj
                pl.BlockSpec((Hd, tile), lambda i: (0, i)),   # decoder feat_lin^T
                full((Hd, 1)),                                # wj2
                full((1, 1)),                                 # bj2
            ],
            out_specs=pl.BlockSpec((B, tile), lambda i: (0, i)),
        ),
        compiler_params=pltpu.CompilerParams(
            dimension_semantics=("parallel",)),    # shardable across TCs
    )(pzp, dec_flT, p['wj2'], p['bj2'])
    return rec


@functools.partial(jax.jit, static_argnames=("max_tile",))
def partial_vae_forward(x, mask, p, *, max_tile=1024):
    B, D = x.shape
    tile, Dp = _choose_tile(D, max_tile)

    # Batch-independent feature-linear terms, computed once as well-shaped matmuls.
    enc_fl = p['fe'] @ p['w1f'] + p['fb'] * p['w1b'] + p['b1']          # (D, Hh)
    dec_flT = (p['fe'] @ p['wj1f'] + p['fb'] * p['wj1b'] + p['bj1']).T  # (Hd, D)

    pad = Dp - D
    if pad:
        x = jnp.pad(x, ((0, 0), (0, pad)))
        mask = jnp.pad(mask, ((0, 0), (0, pad)))        # padded features are "missing"
        enc_fl = jnp.pad(enc_fl, ((0, pad), (0, 0)))
        dec_flT = jnp.pad(dec_flT, ((0, 0), (0, pad)))

    enc_out, pzp = encoder_forward(x, mask, enc_fl, p, tile)
    L = enc_out.shape[1] // 2
    mu, logvar = enc_out[:, :L], enc_out[:, L:]
    # TODO(synk): training-mode reparameterization (z = mu + eps*std) not
    # implemented; eval-mode z = mu is fused into the encoder finalize step.
    rec = decoder_forward(pzp, dec_flT, p, tile)
    return rec[:, :D], mu, logvar


# -----------------------------------------------------------------------------
# Pure-JAX reference (mirrors the PyTorch module, dropout=0, eval mode)
# -----------------------------------------------------------------------------
def ref_forward(x, mask, p):
    B, D = x.shape
    K = p['fe'].shape[1]
    # encoder h_layer
    W1 = jnp.concatenate([p['w1x'], p['w1f'], p['w1b']], axis=0)     # (2+K, Hh)
    x_flat = x.reshape(-1, 1)
    F_embed = jnp.broadcast_to(p['fe'][None], (B, D, K)).reshape(-1, K)
    b_embed = jnp.broadcast_to(p['fb'][None], (B, D, 1)).reshape(-1, 1)
    h_in = jnp.concatenate([x_flat, F_embed, b_embed], axis=1)
    h1 = jax.nn.relu(h_in @ W1 + p['b1'])
    h2 = jax.nn.relu(h1 @ p['w2'] + p['b2']).reshape(B, D, K)
    c = jnp.sum(h2 * mask[:, :, None], axis=1)
    enc_h = jax.nn.relu(c @ p['wm1'] + p['bm1'])
    enc_out = enc_h @ p['wm2'] + p['bm2']
    L = enc_out.shape[-1] // 2
    mu, logvar = enc_out[:, :L], enc_out[:, L:]
    z = mu
    # decoder
    pz = jax.nn.relu(z @ p['wz1'] + p['bz1'])                        # (B, Hd)
    Hd = pz.shape[1]
    Wj1 = jnp.concatenate([p['wj1z'], p['wj1f'], p['wj1b']], axis=0)  # (Hd+K+1, Hd)
    pz_exp = jnp.broadcast_to(pz[:, None, :], (B, D, Hd)).reshape(-1, Hd)
    j_in = jnp.concatenate([pz_exp, F_embed, b_embed], axis=1)
    j1 = jax.nn.relu(j_in @ Wj1 + p['bj1'])
    recon = (j1 @ p['wj2'] + p['bj2']).reshape(B, D)
    return recon, mu, logvar


# -----------------------------------------------------------------------------
# Parameter construction (deterministic, synthetic)
# -----------------------------------------------------------------------------
def init_params(key, *, input_dim, code_dim, h_hidden_dim, encoder_hidden_dim,
                latent_dim, decoder_hidden_dim):
    ks = jax.random.split(key, 16)
    s = 0.1
    f32 = jnp.float32
    p = dict(
        # encoder feature embedding / bias
        fe=jax.random.normal(ks[0], (input_dim, code_dim), f32),
        fb=jnp.zeros((input_dim, 1), f32),
        # encoder h_layer: Linear(1+K+1, Hh) split into [x | F | b] row blocks
        w1x=s * jax.random.normal(ks[1], (1, h_hidden_dim), f32),
        w1f=s * jax.random.normal(ks[2], (code_dim, h_hidden_dim), f32),
        w1b=s * jax.random.normal(ks[3], (1, h_hidden_dim), f32),
        b1=s * jax.random.normal(ks[4], (1, h_hidden_dim), f32),
        w2=s * jax.random.normal(ks[5], (h_hidden_dim, code_dim), f32),
        b2=s * jax.random.normal(ks[6], (1, code_dim), f32),
        # encoder_mlp
        wm1=s * jax.random.normal(ks[7], (code_dim, encoder_hidden_dim), f32),
        bm1=s * jax.random.normal(ks[8], (1, encoder_hidden_dim), f32),
        wm2=s * jax.random.normal(ks[9], (encoder_hidden_dim, 2 * latent_dim), f32),
        bm2=s * jax.random.normal(ks[10], (1, 2 * latent_dim), f32),
        # decoder z_processor
        wz1=s * jax.random.normal(ks[11], (latent_dim, decoder_hidden_dim), f32),
        bz1=s * jax.random.normal(ks[12], (1, decoder_hidden_dim), f32),
        # decoder j_layer: Linear(Hd+K+1, Hd) split into [pz | F | b] row blocks
        wj1z=s * jax.random.normal(ks[13], (decoder_hidden_dim, decoder_hidden_dim), f32),
        wj1f=s * jax.random.normal(ks[14], (code_dim, decoder_hidden_dim), f32),
        wj1b=s * jax.random.normal(ks[15], (1, decoder_hidden_dim), f32),
        bj1=jnp.zeros((1, decoder_hidden_dim), f32),
        wj2=s * jax.random.normal(jax.random.fold_in(key, 99),
                                  (decoder_hidden_dim, 1), f32),
        bj2=jnp.zeros((1, 1), f32),
    )
    return p


if __name__ == "__main__":
    # Small shapes consistent with the module's forward
    B = 8            # batch
    D = 256          # input_dim (number of junctions)
    K = 16           # code_dim
    Hh = 32          # h_hidden_dim
    He = 64          # encoder_hidden_dim
    L = 8            # latent_dim
    Hd = 32          # decoder_hidden_dim

    root = jax.random.PRNGKey(0)
    kx, km, kp = jax.random.split(root, 3)

    x = jax.random.uniform(kx, (B, D), jnp.float32)
    mask = (jax.random.uniform(km, (B, D)) > 0.3).astype(jnp.float32)
    x = x * mask  # missing entries zeroed (masked out anyway)

    params = init_params(kp, input_dim=D, code_dim=K, h_hidden_dim=Hh,
                         encoder_hidden_dim=He, latent_dim=L,
                         decoder_hidden_dim=Hd)

    recon, mu, logvar = partial_vae_forward(x, mask, params)
    jax.block_until_ready((recon, mu, logvar))

    # Sanity check against the pure-JAX reference of the PyTorch forward
    recon_r, mu_r, logvar_r = ref_forward(x, mask, params)
    np.testing.assert_allclose(np.asarray(mu), np.asarray(mu_r), rtol=2e-3, atol=2e-3)
    np.testing.assert_allclose(np.asarray(logvar), np.asarray(logvar_r), rtol=2e-3, atol=2e-3)
    np.testing.assert_allclose(np.asarray(recon), np.asarray(recon_r), rtol=2e-3, atol=2e-3)

    assert recon.shape == (B, D) and mu.shape == (B, L) and logvar.shape == (B, L)
    print("KERNEL_OK")
</pallas_src>

<mosaic_0001>
module attributes {stable_mosaic.version = 11 : i64} {
  func.func @_encoder_kernel(%arg0: i32, %arg1: memref<8x256xf32, #tpu.memory_space<vmem>>, %arg2: memref<8x256xf32, #tpu.memory_space<vmem>>, %arg3: memref<256x32xf32, #tpu.memory_space<vmem>>, %arg4: memref<1x32xf32, #tpu.memory_space<vmem>>, %arg5: memref<32x16xf32, #tpu.memory_space<vmem>>, %arg6: memref<1x16xf32, #tpu.memory_space<vmem>>, %arg7: memref<16x64xf32, #tpu.memory_space<vmem>>, %arg8: memref<1x64xf32, #tpu.memory_space<vmem>>, %arg9: memref<64x16xf32, #tpu.memory_space<vmem>>, %arg10: memref<1x16xf32, #tpu.memory_space<vmem>>, %arg11: memref<8x32xf32, #tpu.memory_space<vmem>>, %arg12: memref<1x32xf32, #tpu.memory_space<vmem>>, %arg13: memref<32x32xf32, #tpu.memory_space<vmem>>, %arg14: memref<8x16xf32, #tpu.memory_space<vmem>>, %arg15: memref<8x32xf32, #tpu.memory_space<vmem>>, %arg16: memref<8x16xf32, #tpu.memory_space<vmem>>) attributes {dimension_semantics = [#tpu.dimension_semantics<arbitrary>], iteration_bounds = array<i64: 1>, scalar_prefetch = 0 : i64, scratch_operands = 1 : i64, tpu.core_type = #tpu.core_type<tc>, window_params = [{transform_indices = @transform_0, window_bounds = array<i64: 8, 256>}, {transform_indices = @transform_1, window_bounds = array<i64: 8, 256>}, {transform_indices = @transform_2, window_bounds = array<i64: 256, 32>}, {pipeline_mode = #tpu.pipeline_mode<synchronous>, transform_indices = @transform_3, window_bounds = array<i64: 1, 32>}, {pipeline_mode = #tpu.pipeline_mode<synchronous>, transform_indices = @transform_4, window_bounds = array<i64: 32, 16>}, {pipeline_mode = #tpu.pipeline_mode<synchronous>, transform_indices = @transform_5, window_bounds = array<i64: 1, 16>}, {pipeline_mode = #tpu.pipeline_mode<synchronous>, transform_indices = @transform_6, window_bounds = array<i64: 16, 64>}, {pipeline_mode = #tpu.pipeline_mode<synchronous>, transform_indices = @transform_7, window_bounds = array<i64: 1, 64>}, {pipeline_mode = #tpu.pipeline_mode<synchronous>, transform_indices = @transform_8, window_bounds = array<i64: 64, 16>}, {pipeline_mode = #tpu.pipeline_mode<synchronous>, transform_indices = @transform_9, window_bounds = array<i64: 1, 16>}, {pipeline_mode = #tpu.pipeline_mode<synchronous>, transform_indices = @transform_10, window_bounds = array<i64: 8, 32>}, {pipeline_mode = #tpu.pipeline_mode<synchronous>, transform_indices = @transform_11, window_bounds = array<i64: 1, 32>}, {pipeline_mode = #tpu.pipeline_mode<synchronous>, transform_indices = @transform_12, window_bounds = array<i64: 32, 32>}, {pipeline_mode = #tpu.pipeline_mode<synchronous>, transform_indices = @transform_13, window_bounds = array<i64: 8, 16>}, {pipeline_mode = #tpu.pipeline_mode<synchronous>, transform_indices = @transform_14, window_bounds = array<i64: 8, 32>}]} {
    %c0_i32 = arith.constant 0 : i32
    %0 = arith.cmpi eq, %arg0, %c0_i32 : i32
    %1 = arith.extui %0 : i1 to i32
    %c0_i32_0 = arith.constant 0 : i32
    %2 = arith.cmpi ne, %1, %c0_i32_0 : i32
    scf.if %2 {
      %cst_21 = arith.constant 0.000000e+00 : f32
      %36 = vector.broadcast %cst_21 : f32 to vector<8x16xf32>
      %c0_22 = arith.constant 0 : index
      %c0_23 = arith.constant 0 : index
      %37 = vector.load %arg16[%c0_22, %c0_23] : memref<8x16xf32, #tpu.memory_space<vmem>>, vector<8x16xf32>
      tpu.vector_store %arg16[%c0_22, %c0_23], %36 {strides = array<i32>} : memref<8x16xf32, #tpu.memory_space<vmem>>, vector<8x16xf32>,
    } else {
    }
    %c0 = arith.constant 0 : index
    %c0_1 = arith.constant 0 : index
    %3 = vector.load %arg1[%c0, %c0_1] : memref<8x256xf32, #tpu.memory_space<vmem>>, vector<8x256xf32>
    %c0_2 = arith.constant 0 : index
    %c0_3 = arith.constant 0 : index
    %4 = vector.load %arg2[%c0_2, %c0_3] : memref<8x256xf32, #tpu.memory_space<vmem>>, vector<8x256xf32>
    %c0_4 = arith.constant 0 : index
    %c0_5 = arith.constant 0 : index
    %5 = vector.load %arg3[%c0_4, %c0_5] : memref<256x32xf32, #tpu.memory_space<vmem>>, vector<256x32xf32>
    %6 = vector.shape_cast %3 : vector<8x256xf32> to vector<8x256x1xf32>
    %c0_6 = arith.constant 0 : index
    %c0_7 = arith.constant 0 : index
    %7 = vector.load %arg4[%c0_6, %c0_7] : memref<1x32xf32, #tpu.memory_space<vmem>>, vector<1x32xf32>
    %8 = vector.shape_cast %7 : vector<1x32xf32> to vector<1x1x32xf32>
    %9 = vector.broadcast %6 : vector<8x256x1xf32> to vector<8x256x32xf32>
    %10 = vector.broadcast %8 : vector<1x1x32xf32> to vector<8x256x32xf32>
    %11 = arith.mulf %9, %10 : vector<8x256x32xf32>
    %12 = vector.shape_cast %5 : vector<256x32xf32> to vector<1x256x32xf32>
    %13 = vector.broadcast %12 : vector<1x256x32xf32> to vector<8x256x32xf32>
    %14 = arith.addf %11, %13 : vector<8x256x32xf32>
    %cst = arith.constant 0.000000e+00 : f32
    %15 = vector.broadcast %cst : f32 to vector<8x256x32xf32>
    %16 = arith.maximumf %14, %15 : vector<8x256x32xf32>
    %17 = vector.shape_cast %16 : vector<8x256x32xf32> to vector<2048x32xf32>
    %c0_8 = arith.constant 0 : index
    %c0_9 = arith.constant 0 : index
    %18 = vector.load %arg5[%c0_8, %c0_9] : memref<32x16xf32, #tpu.memory_space<vmem>>, vector<32x16xf32>
    %cst_10 = arith.constant dense<0.000000e+00> : vector<2048x16xf32>
    %19 = tpu.matmul %17, %18, %cst_10 {dimension_numbers = #tpu.dot_dimension_numbers<[1], [0], [0], [1], [0, 0, 1, 1], [], []>} : vector<2048x32xf32>, vector<32x16xf32>, vector<2048x16xf32> -> vector<2048x16xf32>
    %c0_11 = arith.constant 0 : index
    %c0_12 = arith.constant 0 : index
    %20 = vector.load %arg6[%c0_11, %c0_12] : memref<1x16xf32, #tpu.memory_space<vmem>>, vector<1x16xf32>
    %21 = vector.broadcast %20 : vector<1x16xf32> to vector<2048x16xf32>
    %22 = arith.addf %19, %21 : vector<2048x16xf32>
    %cst_13 = arith.constant 0.000000e+00 : f32
    %23 = vector.broadcast %cst_13 : f32 to vector<2048x16xf32>
    %24 = arith.maximumf %22, %23 : vector<2048x16xf32>
    %25 = vector.shape_cast %24 : vector<2048x16xf32> to vector<8x256x16xf32>
    %c0_14 = arith.constant 0 : index
    %c0_15 = arith.constant 0 : index
    %26 = vector.load %arg16[%c0_14, %c0_15] : memref<8x16xf32, #tpu.memory_space<vmem>>, vector<8x16xf32>
    %27 = vector.shape_cast %4 : vector<8x256xf32> to vector<8x256x1xf32>
    %28 = vector.broadcast %27 : vector<8x256x1xf32> to vector<8x256x16xf32>
    %29 = arith.mulf %25, %28 : vector<8x256x16xf32>
    %cst_16 = arith.constant dense<0.000000e+00> : vector<8x16xf32>
    %30 = vector.multi_reduction <add>, %29, %cst_16 [1] : vector<8x256x16xf32> to vector<8x16xf32>
    %31 = arith.addf %26, %30 : vector<8x16xf32>
    %c0_17 = arith.constant 0 : index
    %c0_18 = arith.constant 0 : index
    %32 = vector.load %arg16[%c0_17, %c0_18] : memref<8x16xf32, #tpu.memory_space<vmem>>, vector<8x16xf32>
    tpu.vector_store %arg16[%c0_17, %c0_18], %31 {strides = array<i32>} : memref<8x16xf32, #tpu.memory_space<vmem>>, vector<8x16xf32>,
    %c0_i32_19 = arith.constant 0 : i32
    %33 = arith.cmpi eq, %arg0, %c0_i32_19 : i32
    %34 = arith.extui %33 : i1 to i32
    %c0_i32_20 = arith.constant 0 : i32
    %35 = arith.cmpi ne, %34, %c0_i32_20 : i32
    scf.if %35 {
      %c0_21 = arith.constant 0 : index
      %c0_22 = arith.constant 0 : index
      %36 = vector.load %arg16[%c0_21, %c0_22] : memref<8x16xf32, #tpu.memory_space<vmem>>, vector<8x16xf32>
      %c0_23 = arith.constant 0 : index
      %c0_24 = arith.constant 0 : index
      %37 = vector.load %arg7[%c0_23, %c0_24] : memref<16x64xf32, #tpu.memory_space<vmem>>, vector<16x64xf32>
      %cst_25 = arith.constant dense<0.000000e+00> : vector<8x64xf32>
      %38 = tpu.matmul %36, %37, %cst_25 {dimension_numbers = #tpu.dot_dimension_numbers<[1], [0], [0], [1], [0, 0, 1, 1], [], []>} : vector<8x16xf32>, vector<16x64xf32>, vector<8x64xf32> -> vector<8x64xf32>
      %c0_26 = arith.constant 0 : index
      %c0_27 = arith.constant 0 : index
      %39 = vector.load %arg8[%c0_26, %c0_27] : memref<1x64xf32, #tpu.memory_space<vmem>>, vector<1x64xf32>
      %40 = vector.broadcast %39 : vector<1x64xf32> to vector<8x64xf32>
      %41 = arith.addf %38, %40 : vector<8x64xf32>
      %cst_28 = arith.constant 0.000000e+00 : f32
      %42 = vector.broadcast %cst_28 : f32 to vector<8x64xf32>
      %43 = arith.maximumf %41, %42 : vector<8x64xf32>
      %c0_29 = arith.constant 0 : index
      %c0_30 = arith.constant 0 : index
      %44 = vector.load %arg9[%c0_29, %c0_30] : memref<64x16xf32, #tpu.memory_space<vmem>>, vector<64x16xf32>
      %cst_31 = arith.constant dense<0.000000e+00> : vector<8x16xf32>
      %45 = tpu.matmul %43, %44, %cst_31 {dimension_numbers = #tpu.dot_dimension_numbers<[1], [0], [0], [1], [0, 0, 1, 1], [], []>} : vector<8x64xf32>, vector<64x16xf32>, vector<8x16xf32> -> vector<8x16xf32>
      %c0_32 = arith.constant 0 : index
      %c0_33 = arith.constant 0 : index
      %46 = vector.load %arg10[%c0_32, %c0_33] : memref<1x16xf32, #tpu.memory_space<vmem>>, vector<1x16xf32>
      %47 = vector.broadcast %46 : vector<1x16xf32> to vector<8x16xf32>
      %48 = arith.addf %45, %47 : vector<8x16xf32>
      %c0_34 = arith.constant 0 : index
      %c0_35 = arith.constant 0 : index
      %49 = vector.load %arg14[%c0_34, %c0_35] : memref<8x16xf32, #tpu.memory_space<vmem>>, vector<8x16xf32>
      tpu.vector_store %arg14[%c0_34, %c0_35], %48 {strides = array<i32>} : memref<8x16xf32, #tpu.memory_space<vmem>>, vector<8x16xf32>,
      %50 = vector.extract_strided_slice %48 {offsets = [0, 0], sizes = [8, 8], strides = [1, 1]} : vector<8x16xf32> to vector<8x8xf32>
      %c0_36 = arith.constant 0 : index
      %c0_37 = arith.constant 0 : index
      %51 = vector.load %arg11[%c0_36, %c0_37] : memref<8x32xf32, #tpu.memory_space<vmem>>, vector<8x32xf32>
      %cst_38 = arith.constant dense<0.000000e+00> : vector<8x32xf32>
      %52 = tpu.matmul %50, %51, %cst_38 {dimension_numbers = #tpu.dot_dimension_numbers<[1], [0], [0], [1], [0, 0, 1, 1], [], []>} : vector<8x8xf32>, vector<8x32xf32>, vector<8x32xf32> -> vector<8x32xf32>
      %c0_39 = arith.constant 0 : index
      %c0_40 = arith.constant 0 : index
      %53 = vector.load %arg12[%c0_39, %c0_40] : memref<1x32xf32, #tpu.memory_space<vmem>>, vector<1x32xf32>
      %54 = vector.broadcast %53 : vector<1x32xf32> to vector<8x32xf32>
      %55 = arith.addf %52, %54 : vector<8x32xf32>
      %cst_41 = arith.constant 0.000000e+00 : f32
      %56 = vector.broadcast %cst_41 : f32 to vector<8x32xf32>
      %57 = arith.maximumf %55, %56 : vector<8x32xf32>
      %c0_42 = arith.constant 0 : index
      %c0_43 = arith.constant 0 : index
      %58 = vector.load %arg13[%c0_42, %c0_43] : memref<32x32xf32, #tpu.memory_space<vmem>>, vector<32x32xf32>
      %cst_44 = arith.constant dense<0.000000e+00> : vector<8x32xf32>
      %59 = tpu.matmul %57, %58, %cst_44 {dimension_numbers = #tpu.dot_dimension_numbers<[1], [0], [0], [1], [0, 0, 1, 1], [], []>} : vector<8x32xf32>, vector<32x32xf32>, vector<8x32xf32> -> vector<8x32xf32>
      %c0_45 = arith.constant 0 : index
      %c0_46 = arith.constant 0 : index
      %60 = vector.load %arg15[%c0_45, %c0_46] : memref<8x32xf32, #tpu.memory_space<vmem>>, vector<8x32xf32>
      tpu.vector_store %arg15[%c0_45, %c0_46], %59 {strides = array<i32>} : memref<8x32xf32, #tpu.memory_space<vmem>>, vector<8x32xf32>,
    } else {
    }
    return
  }
  func.func @transform_0(%arg0: i32) -> (i32, i32) {
    %c0_i32 = arith.constant 0 : i32
    %c0_i32_0 = arith.constant 0 : i32
    return %c0_i32, %arg0 : i32, i32
  }
  func.func @transform_1(%arg0: i32) -> (i32, i32) {
    %c0_i32 = arith.constant 0 : i32
    %c0_i32_0 = arith.constant 0 : i32
    return %c0_i32, %arg0 : i32, i32
  }
  func.func @transform_2(%arg0: i32) -> (i32, i32) {
    %c0_i32 = arith.constant 0 : i32
    %c0_i32_0 = arith.constant 0 : i32
    return %arg0, %c0_i32 : i32, i32
  }
  func.func @transform_3(%arg0: i32) -> (i32, i32) {
    %c0_i32 = arith.constant 0 : i32
    %c0_i32_0 = arith.constant 0 : i32
    %c0_i32_1 = arith.constant 0 : i32
    return %c0_i32, %c0_i32_0 : i32, i32
  }
  func.func @transform_4(%arg0: i32) -> (i32, i32) {
    %c0_i32 = arith.constant 0 : i32
    %c0_i32_0 = arith.constant 0 : i32
    %c0_i32_1 = arith.constant 0 : i32
    return %c0_i32, %c0_i32_0 : i32, i32
  }
  func.func @transform_5(%arg0: i32) -> (i32, i32) {
    %c0_i32 = arith.constant 0 : i32
    %c0_i32_0 = arith.constant 0 : i32
    %c0_i32_1 = arith.constant 0 : i32
    return %c0_i32, %c0_i32_0 : i32, i32
  }
  func.func @transform_6(%arg0: i32) -> (i32, i32) {
    %c0_i32 = arith.constant 0 : i32
    %c0_i32_0 = arith.constant 0 : i32
    %c0_i32_1 = arith.constant 0 : i32
    return %c0_i32, %c0_i32_0 : i32, i32
  }
  func.func @transform_7(%arg0: i32) -> (i32, i32) {
    %c0_i32 = arith.constant 0 : i32
    %c0_i32_0 = arith.constant 0 : i32
    %c0_i32_1 = arith.constant 0 : i32
    return %c0_i32, %c0_i32_0 : i32, i32
  }
  func.func @transform_8(%arg0: i32) -> (i32, i32) {
    %c0_i32 = arith.constant 0 : i32
    %c0_i32_0 = arith.constant 0 : i32
    %c0_i32_1 = arith.constant 0 : i32
    return %c0_i32, %c0_i32_0 : i32, i32
  }
  func.func @transform_9(%arg0: i32) -> (i32, i32) {
    %c0_i32 = arith.constant 0 : i32
    %c0_i32_0 = arith.constant 0 : i32
    %c0_i32_1 = arith.constant 0 : i32
    return %c0_i32, %c0_i32_0 : i32, i32
  }
  func.func @transform_10(%arg0: i32) -> (i32, i32) {
    %c0_i32 = arith.constant 0 : i32
    %c0_i32_0 = arith.constant 0 : i32
    %c0_i32_1 = arith.constant 0 : i32
    return %c0_i32, %c0_i32_0 : i32, i32
  }
  func.func @transform_11(%arg0: i32) -> (i32, i32) {
    %c0_i32 = arith.constant 0 : i32
    %c0_i32_0 = arith.constant 0 : i32
    %c0_i32_1 = arith.constant 0 : i32
    return %c0_i32, %c0_i32_0 : i32, i32
  }
  func.func @transform_12(%arg0: i32) -> (i32, i32) {
    %c0_i32 = arith.constant 0 : i32
    %c0_i32_0 = arith.constant 0 : i32
    %c0_i32_1 = arith.constant 0 : i32
    return %c0_i32, %c0_i32_0 : i32, i32
  }
  func.func @transform_13(%arg0: i32) -> (i32, i32) {
    %c0_i32 = arith.constant 0 : i32
    %c0_i32_0 = arith.constant 0 : i32
    %c0_i32_1 = arith.constant 0 : i32
    return %c0_i32, %c0_i32_0 : i32, i32
  }
  func.func @transform_14(%arg0: i32) -> (i32, i32) {
    %c0_i32 = arith.constant 0 : i32
    %c0_i32_0 = arith.constant 0 : i32
    %c0_i32_1 = arith.constant 0 : i32
    return %c0_i32, %c0_i32_0 : i32, i32
  }
}

module attributes {stable_mosaic.version = 11 : i64} {
  func.func @_decoder_kernel(%arg0: i32, %arg1: memref<8x32xf32, #tpu.memory_space<vmem>>, %arg2: memref<32x256xf32, #tpu.memory_space<vmem>>, %arg3: memref<32x1xf32, #tpu.memory_space<vmem>>, %arg4: memref<1x1xf32, #tpu.memory_space<vmem>>, %arg5: memref<8x256xf32, #tpu.memory_space<vmem>>) attributes {dimension_semantics = [#tpu.dimension_semantics<parallel>], iteration_bounds = array<i64: 1>, scalar_prefetch = 0 : i64, scratch_operands = 0 : i64, tpu.core_type = #tpu.core_type<tc>, window_params = [{pipeline_mode = #tpu.pipeline_mode<synchronous>, transform_indices = @transform_0, window_bounds = array<i64: 8, 32>}, {transform_indices = @transform_1, window_bounds = array<i64: 32, 256>}, {pipeline_mode = #tpu.pipeline_mode<synchronous>, transform_indices = @transform_2, window_bounds = array<i64: 32, 1>}, {pipeline_mode = #tpu.pipeline_mode<synchronous>, transform_indices = @transform_3, window_bounds = array<i64: 1, 1>}, {transform_indices = @transform_4, window_bounds = array<i64: 8, 256>}]} {
    %c0 = arith.constant 0 : index
    %c0_0 = arith.constant 0 : index
    %0 = vector.load %arg1[%c0, %c0_0] : memref<8x32xf32, #tpu.memory_space<vmem>>, vector<8x32xf32>
    %c0_1 = arith.constant 0 : index
    %c0_2 = arith.constant 0 : index
    %1 = vector.load %arg2[%c0_1, %c0_2] : memref<32x256xf32, #tpu.memory_space<vmem>>, vector<32x256xf32>
    %2 = vector.shape_cast %0 : vector<8x32xf32> to vector<8x32x1xf32>
    %3 = vector.shape_cast %1 : vector<32x256xf32> to vector<1x32x256xf32>
    %4 = vector.broadcast %2 : vector<8x32x1xf32> to vector<8x32x256xf32>
    %5 = vector.broadcast %3 : vector<1x32x256xf32> to vector<8x32x256xf32>
    %6 = arith.addf %4, %5 : vector<8x32x256xf32>
    %cst = arith.constant 0.000000e+00 : f32
    %7 = vector.broadcast %cst : f32 to vector<8x32x256xf32>
    %8 = arith.maximumf %6, %7 : vector<8x32x256xf32>
    %c0_3 = arith.constant 0 : index
    %c0_4 = arith.constant 0 : index
    %9 = vector.load %arg3[%c0_3, %c0_4] : memref<32x1xf32, #tpu.memory_space<vmem>>, vector<32x1xf32>
    %10 = vector.shape_cast %9 : vector<32x1xf32> to vector<1x32x1xf32>
    %11 = vector.broadcast %10 : vector<1x32x1xf32> to vector<8x32x256xf32>
    %12 = arith.mulf %8, %11 : vector<8x32x256xf32>
    %cst_5 = arith.constant dense<0.000000e+00> : vector<8x256xf32>
    %13 = vector.multi_reduction <add>, %12, %cst_5 [1] : vector<8x32x256xf32> to vector<8x256xf32>
    %c0_6 = arith.constant 0 : index
    %c0_7 = arith.constant 0 : index
    %14 = vector.load %arg4[%c0_6, %c0_7] : memref<1x1xf32, #tpu.memory_space<vmem>>, vector<1x1xf32>
    %15 = vector.broadcast %14 : vector<1x1xf32> to vector<8x256xf32>
    %16 = arith.addf %13, %15 : vector<8x256xf32>
    %c0_8 = arith.constant 0 : index
    %c0_9 = arith.constant 0 : index
    %17 = vector.load %arg5[%c0_8, %c0_9] : memref<8x256xf32, #tpu.memory_space<vmem>>, vector<8x256xf32>
    tpu.vector_store %arg5[%c0_8, %c0_9], %16 {strides = array<i32>} : memref<8x256xf32, #tpu.memory_space<vmem>>, vector<8x256xf32>,
    return
  }
  func.func @transform_0(%arg0: i32) -> (i32, i32) {
    %c0_i32 = arith.constant 0 : i32
    %c0_i32_0 = arith.constant 0 : i32
    %c0_i32_1 = arith.constant 0 : i32
    return %c0_i32, %c0_i32_0 : i32, i32
  }
  func.func @transform_1(%arg0: i32) -> (i32, i32) {
    %c0_i32 = arith.constant 0 : i32
    %c0_i32_0 = arith.constant 0 : i32
    return %c0_i32, %arg0 : i32, i32
  }
  func.func @transform_2(%arg0: i32) -> (i32, i32) {
    %c0_i32 = arith.constant 0 : i32
    %c0_i32_0 = arith.constant 0 : i32
    %c0_i32_1 = arith.constant 0 : i32
    return %c0_i32, %c0_i32_0 : i32, i32
  }
  func.func @transform_3(%arg0: i32) -> (i32, i32) {
    %c0_i32 = arith.constant 0 : i32
    %c0_i32_0 = arith.constant 0 : i32
    %c0_i32_1 = arith.constant 0 : i32
    return %c0_i32, %c0_i32_0 : i32, i32
  }
  func.func @transform_4(%arg0: i32) -> (i32, i32) {
    %c0_i32 = arith.constant 0 : i32
    %c0_i32_0 = arith.constant 0 : i32
    return %c0_i32, %arg0 : i32, i32
  }
}

</mosaic_0001>

<bundles_post_ra>
// kernel: partial_vae_forward.3
= control target key start
LH: loop header
LB: loop body
LE: loop exit
PB: predicated region body
PF: predicated region fallthrough
CT: control target
= control target key end

     0   :  { %s964_s0 = inlined_call_operand.vmem [shape: f32[8,32], index: 0, kind: input, shape index: {}]   ;;  %s965_s1 = inlined_call_operand.vmem [shape: f32[32,256], index: 1, kind: input, shape index: {}]   ;;  %s966_s2 = inlined_call_operand.vmem [shape: f32[32,1], index: 2, kind: input, shape index: {}]   ;;  %s967_s3 = inlined_call_operand.<no memory space> [shape: f32[1,1], index: 3, kind: input, shape index: {}]   ;;  %s968_s4 = inlined_call_operand.hbm [shape: f32[8,256], index: 4, kind: output, shape index: {}]  }
   0x1   :  { %v9_v0 = vstv %s967_s3 }
   0x2   :  { %10 = vst [vmem:[#allocation2] sm:$0x1] %v9_v0 }
   0x3   :  { %v311_v1 = vld [vmem:[%s966_s2 + $0x10] sm:$0xff]  ;;  %v309_v2 = vld [vmem:[%s966_s2] sm:$0xff]  ;;  %v29_v3 = vlaneseq  ;;  %v651_v4 = vmov 0  }
   0x4   :  { %626 = vset.pattern.permute.xlu1 %v651_v4  ;;  %625 = vset.pattern.permute.xlu0 %v651_v4 }
   0x5   :  { %325 = vperm.xlu1 %626, %v311_v1   ;;  %315 = vperm.xlu0 %625, %v309_v2   ;;  %v30_v5 = vshrl.u32 %v29_v3, 7 }
   0x6   :  { %11 = vsyncpa [#allocation4], 0  ;;  %v310_v6 = vld [vmem:[%s966_s2 + $0x8] sm:$0xff]  ;;  %v20_v7 = vld [vmem:[%s964_s0] sm:$0xff]  ;;  %vm583_vm0 = vcmask 1041409   ;;  %vm585_vm1 = vcmask 1042434  }
   0x7   :  { %v31_v8 = vsub.s32 0, %v30_v5  ;;  %v50_v9 = vsub.s32 1, %v30_v5  ;;  %v69_v12 = vsub.s32 2, %v30_v5  ;;  %v312_v14 = vld [vmem:[%s966_s2 + $0x18] sm:$0xff]  ;;  %v88_v15 = vsub.s32 3, %v30_v5  ;;  %v705_v32 = vld [vmem:[%s965_s1] sm:$0xff] }
   0x8   :  { %v107_v17 = vsub.s32 4, %v30_v5  ;;  %v126_v19 = vsub.s32 5, %v30_v5  ;;  %v145_v21 = vsub.s32 6, %v30_v5  ;;  %v164_v23 = vsub.s32 7, %v30_v5  ;;  %v710_v33 = vld [vmem:[%s965_s1 + $0x8] sm:$0xff]  ;;  %v715_v34 = vld [vmem:[%s965_s1 + $0x10] sm:$0xff] }
   0x9   :  { %320 = vperm.xlu0 %625, %v310_v6   ;;  %v32_v10 = vrot.slane %v20_v7, %v31_v8  ;;  %v51_v11 = vrot.slane %v20_v7, %v50_v9  ;;  %v70_v13 = vrot.slane %v20_v7, %v69_v12  ;;  %v89_v16 = vrot.slane %v20_v7, %v88_v15  ;;  %v622_v25 = vld [vmem:[#allocation2] ss:$0 sm:$0xff]  ;;  %v720_v35 = vld [vmem:[%s965_s1 + $0x18] sm:$0xff]  ;;  %v744_v59 = vld [vmem:[%s965_s1 + $0x28] sm:$0xff] }
   0xa   :  { %v108_v18 = vrot.slane %v20_v7, %v107_v17  ;;  %v127_v20 = vrot.slane %v20_v7, %v126_v19  ;;  %v146_v22 = vrot.slane %v20_v7, %v145_v21  ;;  %v165_v24 = vrot.slane %v20_v7, %v164_v23  ;;  %v739_v58 = vld [vmem:[%s965_s1 + $0x20] sm:$0xff] }
   0xb   :  { %34 = vbcast.lane.b32.xlu1 %v32_v10, 256  ;;  %vm587_vm2 = vcmask 1043459   ;;  %vm589_vm3 = vcmask 1044484   ;;  %vm591_vm4 = vcmask 1045509   ;;  %vm593_vm5 = vcmask 1046534  }
   0xc   :  { %vm595_vm6 = vcmask 1047559  }
   0xd   :  { %38 = vbcast.lane.b32.xlu0 %v32_v10, 264 }
   0xf   :  { %53 = vbcast.lane.b32.xlu1 %v51_v11, 256 }
  0x11   :  { %57 = vbcast.lane.b32.xlu0 %v51_v11, 264 }
  0x13   :  { %72 = vbcast.lane.b32.xlu1 %v70_v13, 256 }
  0x15   :  { %76 = vbcast.lane.b32.xlu0 %v70_v13, 264 }
  0x17   :  { %330 = vperm.xlu1 %626, %v312_v14  }
  0x19   :  { %42 = vbcast.lane.b32.xlu0 %v32_v10, 272 }
  0x1b   :  { %61 = vbcast.lane.b32.xlu1 %v51_v11, 272 }
  0x1d   :  { %91 = vbcast.lane.b32.xlu0 %v89_v16, 256 }
  0x1f   :  { %95 = vbcast.lane.b32.xlu1 %v89_v16, 264 }
  0x21   :  { %80 = vbcast.lane.b32.xlu0 %v70_v13, 272 }
  0x23   :  { %110 = vbcast.lane.b32.xlu1 %v108_v18, 256 }
  0x25   :  { %114 = vbcast.lane.b32.xlu0 %v108_v18, 264 }
  0x27   :  { %46 = vbcast.lane.b32.xlu1 %v32_v10, 280 }
  0x29   :  { %65 = vbcast.lane.b32.xlu0 %v51_v11, 280 }
  0x2b   :  { %99 = vbcast.lane.b32.xlu1 %v89_v16, 272 }
  0x2d   :  { %129 = vbcast.lane.b32.xlu0 %v127_v20, 256 }
  0x2f   :  { %133 = vbcast.lane.b32.xlu1 %v127_v20, 264 }
  0x31   :  { %84 = vbcast.lane.b32.xlu0 %v70_v13, 280 }
  0x33   :  { %118 = vbcast.lane.b32.xlu1 %v108_v18, 272 }
  0x35   :  { %148 = vbcast.lane.b32.xlu0 %v146_v22, 256 }
  0x37   :  { %152 = vbcast.lane.b32.xlu1 %v146_v22, 264 }
  0x39   :  { %103 = vbcast.lane.b32.xlu0 %v89_v16, 280 }
  0x3b   :  { %137 = vbcast.lane.b32.xlu1 %v127_v20, 272 }
  0x3d   :  { %167 = vbcast.lane.b32.xlu0 %v165_v24, 256 }
  0x3f   :  { %171 = vbcast.lane.b32.xlu1 %v165_v24, 264 }
  0x41   :  { %122 = vbcast.lane.b32.xlu0 %v108_v18, 280 }
  0x43   :  { %156 = vbcast.lane.b32.xlu1 %v146_v22, 272 }
  0x45   :  { %141 = vbcast.lane.b32.xlu0 %v127_v20, 280 }
  0x47   :  { %175 = vbcast.lane.b32.xlu1 %v165_v24, 272 }
  0x49   :  { %160 = vbcast.lane.b32.xlu0 %v146_v22, 280 }
  0x4b   :  { %179 = vbcast.lane.b32.xlu1 %v165_v24, 280 }
  0x4d   :  { %548 = vperm.xlu0 %625, %v622_v25  }
  0x84   :  { %v696_v26 = vpop.permute.xlu1 %325  ;;  %v698_v27 = vpop.permute.xlu0 %315 }
  0x88   :  { %v700_v28 = vpop.permute.xlu0 %320  ;;  %v35_v29 = vpop.permute.xlu1 %34 }
  0x89   :  { %v181_v36 = vadd.f32 %v35_v29, %v705_v32  ;;  %v182_v37 = vadd.f32 %v35_v29, %v710_v33 }
  0x8b   :  { %v245_v46 = vmax.f32 %v181_v36, 0.0  ;;  %v246_v47 = vmax.f32 %v182_v37, 0.0 }
  0x8c   :  { %v39_v30 = vpop.permute.xlu0 %38  ;;  %v54_v31 = vpop.permute.xlu1 %53 }
  0x8d   :  { %v183_v39 = vadd.f32 %v39_v30, %v715_v34  ;;  %v184_v40 = vadd.f32 %v39_v30, %v720_v35  ;;  %v189_v41 = vadd.f32 %v54_v31, %v705_v32  ;;  %v190_v42 = vadd.f32 %v54_v31, %v710_v33 }
  0x8e   :  { %v333_v0 = vmul.f32 %v698_v27, %v245_v46  ;;  %v334_v1 = vmul.f32 %v698_v27, %v246_v47 }
  0x8f   :  { %v247_v53 = vmax.f32 %v183_v39, 0.0  ;;  %v248_v54 = vmax.f32 %v184_v40, 0.0  ;;  %v253_v55 = vmax.f32 %v189_v41, 0.0  ;;  %v254_v56 = vmax.f32 %v190_v42, 0.0 }
  0x90   :  { %v58_v38 = vpop.permute.xlu0 %57  ;;  %v73_v43 = vpop.permute.xlu1 %72 }
  0x91   :  { %v191_v44 = vadd.f32 %v58_v38, %v715_v34  ;;  %v192_v45 = vadd.f32 %v58_v38, %v720_v35  ;;  %v197_v49 = vadd.f32 %v73_v43, %v705_v32  ;;  %v198_v50 = vadd.f32 %v73_v43, %v710_v33 }
  0x92   :  { %v335_v7 = vmul.f32 %v700_v28, %v247_v53  ;;  %v336_v8 = vmul.f32 %v700_v28, %v248_v54  ;;  %v341_v9 = vmul.f32 %v698_v27, %v253_v55  ;;  %v342_v10 = vmul.f32 %v698_v27, %v254_v56 }
  0x93   :  { %v255_v60 = vmax.f32 %v191_v44, 0.0  ;;  %v256_v61 = vmax.f32 %v192_v45, 0.0  ;;  %v261_v3 = vmax.f32 %v197_v49, 0.0  ;;  %v262_v4 = vmax.f32 %v198_v50, 0.0 }
  0x94   :  { %v77_v48 = vpop.permute.xlu0 %76  ;;  %v397_v25 = vadd.f32 %v335_v7, %v333_v0  ;;  %v406_v29 = vadd.f32 %v336_v8, %v334_v1  ;;  %v783_v7 = vld [vmem:[%s965_s1 + $0x30] sm:$0xff]  ;;  %v788_v8 = vld [vmem:[%s965_s1 + $0x38] sm:$0xff]  ;;  %s652_s1 = smov [#allocation3]  }
  0x95   :  { %v199_v51 = vadd.f32 %v77_v48, %v715_v34  ;;  %v200_v52 = vadd.f32 %v77_v48, %v720_v35  ;;  %v343_v12 = vmul.f32 %v700_v28, %v255_v60  ;;  %v344_v13 = vmul.f32 %v700_v28, %v256_v61  ;;  %s614_s14 = sshll.u32 %s652_s1, 4  ;;  %s615_s14 = int_to_ptr.vmem [resolvable:$true] %s614_s14 }
  0x96   :  { %v734_v57 = vpop.permute.xlu1 %330  ;;  %v349_v21 = vmul.f32 %v698_v27, %v261_v3  ;;  %v350_v22 = vmul.f32 %v698_v27, %v262_v4  ;;  %s627_s15 = scalar_lea.vmem %s615_s14, 256  ;;  %p632_p1 = scmp.lt.s32.totalorder %s615_s14, %s615_s14 }
  0x97   :  { %v263_v62 = vmax.f32 %v199_v51, 0.0  ;;  %v264_v63 = vmax.f32 %v200_v52, 0.0  ;;  %v415_v37 = vadd.f32 %v343_v12, %v341_v9  ;;  %v424_v38 = vadd.f32 %v344_v13, %v342_v10  ;;  %p628_p0 = scmp.ne.s32.totalorder %s615_s14, %s627_s15  ;;  %p633_p2 = scmp.lt.s32.totalorder %s627_s15, %s627_s15 }
  0x98   :  { %v43_v2 = vpop.permute.xlu0 %42 }
  0x99   :  { %v185_v5 = vadd.f32 %v43_v2, %v739_v58  ;;  %v186_v6 = vadd.f32 %v43_v2, %v744_v59  ;;  %v351_v14 = vmul.f32 %v700_v28, %v263_v62  ;;  %v352_v15 = vmul.f32 %v700_v28, %v264_v63  ;;  %p634_p3 = por %p633_p2, %p632_p1 }
  0x9a   :  { %v62_v11 = vpop.permute.xlu1 %61 }
  0x9b   :  { %v249_v16 = vmax.f32 %v185_v5, 0.0  ;;  %v250_v17 = vmax.f32 %v186_v6, 0.0  ;;  %v193_v18 = vadd.f32 %v62_v11, %v739_v58  ;;  %v194_v19 = vadd.f32 %v62_v11, %v744_v59  ;;  %p635_p4 = pnand %p634_p3, %p628_p0 }
  0x9c   :  { %v92_v20 = vpop.permute.xlu0 %91  ;;  %v433_v39 = vadd.f32 %v351_v14, %v349_v21  ;;  %v442_v40 = vadd.f32 %v352_v15, %v350_v22 }
  0x9d   :  { %v205_v23 = vadd.f32 %v92_v20, %v705_v32  ;;  %v206_v24 = vadd.f32 %v92_v20, %v710_v33  ;;  %v257_v30 = vmax.f32 %v193_v18, 0.0  ;;  %v258_v31 = vmax.f32 %v194_v19, 0.0 }
  0x9e   :  { %v96_v36 = vpop.permute.xlu1 %95  ;;  %v337_v41 = vmul.f32 %v696_v26, %v249_v16  ;;  %v338_v42 = vmul.f32 %v696_v26, %v250_v17 }
  0x9f   :  { %v207_v43 = vadd.f32 %v96_v36, %v715_v34  ;;  %v208_v44 = vadd.f32 %v96_v36, %v720_v35  ;;  %v269_v46 = vmax.f32 %v205_v23, 0.0  ;;  %v270_v47 = vmax.f32 %v206_v24, 0.0 }
  0xa0   :  { %v81_v45 = vpop.permute.xlu0 %80  ;;  %v345_v50 = vmul.f32 %v696_v26, %v257_v30  ;;  %v346_v51 = vmul.f32 %v696_v26, %v258_v31  ;;  %v398_v62 = vadd.f32 %v397_v25, %v337_v41  ;;  %v407_v63 = vadd.f32 %v406_v29, %v338_v42 }
  0xa1   :  { %v201_v48 = vadd.f32 %v81_v45, %v739_v58  ;;  %v202_v49 = vadd.f32 %v81_v45, %v744_v59  ;;  %v271_v52 = vmax.f32 %v207_v43, 0.0  ;;  %v272_v53 = vmax.f32 %v208_v44, 0.0 }
  0xa2   :  { %v111_v54 = vpop.permute.xlu1 %110  ;;  %v357_v3 = vmul.f32 %v698_v27, %v269_v46  ;;  %v358_v4 = vmul.f32 %v698_v27, %v270_v47  ;;  %v416_v9 = vadd.f32 %v415_v37, %v345_v50  ;;  %v425_v10 = vadd.f32 %v424_v38, %v346_v51 }
  0xa3   :  { %v265_v55 = vmax.f32 %v201_v48, 0.0  ;;  %v266_v56 = vmax.f32 %v202_v49, 0.0  ;;  %v213_v60 = vadd.f32 %v111_v54, %v705_v32  ;;  %v214_v61 = vadd.f32 %v111_v54, %v710_v33 }
  0xa4   :  { %v359_v0 = vmul.f32 %v700_v28, %v271_v52  ;;  %v360_v1 = vmul.f32 %v700_v28, %v272_v53  ;;  %v115_v2 = vpop.permute.xlu0 %114 }
  0xa5   :  { %v353_v5 = vmul.f32 %v696_v26, %v265_v55  ;;  %v354_v6 = vmul.f32 %v696_v26, %v266_v56  ;;  %v215_v11 = vadd.f32 %v115_v2, %v715_v34  ;;  %v216_v12 = vadd.f32 %v115_v2, %v720_v35 }
  0xa6   :  { %v47_v13 = vpop.permute.xlu1 %46  ;;  %v792_v14 = vadd.f32 %v359_v0, %v357_v3  ;;  %v794_v15 = vadd.f32 %v360_v1, %v358_v4  ;;  %v277_v16 = vmax.f32 %v213_v60, 0.0  ;;  %v278_v17 = vmax.f32 %v214_v61, 0.0 }
  0xa7   :  { %v279_v18 = vmax.f32 %v215_v11, 0.0  ;;  %v280_v19 = vmax.f32 %v216_v12, 0.0  ;;  %v187_v20 = vadd.f32 %v47_v13, %v783_v7  ;;  %v188_v21 = vadd.f32 %v47_v13, %v788_v8 }
  0xa8   :  { %v66_v22 = vpop.permute.xlu0 %65  ;;  %v798_v23 = vadd.f32 %v433_v39, %v353_v5  ;;  %v800_v24 = vadd.f32 %v442_v40, %v354_v6  ;;  %v365_v40 = vmul.f32 %v698_v27, %v277_v16  ;;  %v366_v44 = vmul.f32 %v698_v27, %v278_v17 }
  0xa9   :  { %v195_v25 = vadd.f32 %v66_v22, %v783_v7  ;;  %v196_v29 = vadd.f32 %v66_v22, %v788_v8  ;;  %v367_v30 = vmul.f32 %v700_v28, %v279_v18  ;;  %v368_v31 = vmul.f32 %v700_v28, %v280_v19 }
  0xaa   :  { %v251_v36 = vmax.f32 %v187_v20, 0.0  ;;  %v252_v37 = vmax.f32 %v188_v21, 0.0  ;;  %v100_v38 = vpop.permute.xlu1 %99 }
  0xab   :  { %v259_v41 = vmax.f32 %v195_v25, 0.0  ;;  %v260_v42 = vmax.f32 %v196_v29, 0.0  ;;  %v209_v43 = vadd.f32 %v100_v38, %v739_v58  ;;  %v210_v39 = vadd.f32 %v100_v38, %v744_v59 }
  0xac   :  { %v339_v45 = vmul.f32 %v734_v57, %v251_v36  ;;  %v340_v46 = vmul.f32 %v734_v57, %v252_v37  ;;  %v130_v47 = vpop.permute.xlu0 %129  ;;  %v816_v60 = vadd.f32 %v367_v30, %v365_v40  ;;  %v818_v61 = vadd.f32 %v368_v31, %v366_v44 }
  0xad   :  { %v347_v48 = vmul.f32 %v734_v57, %v259_v41  ;;  %v348_v49 = vmul.f32 %v734_v57, %v260_v42  ;;  %v273_v50 = vmax.f32 %v209_v43, 0.0  ;;  %v274_v51 = vmax.f32 %v210_v39, 0.0 }
  0xae   :  { %v399_v52 = vadd.f32 %v398_v62, %v339_v45  ;;  %v408_v53 = vadd.f32 %v407_v63, %v340_v46  ;;  %v221_v54 = vadd.f32 %v130_v47, %v705_v32  ;;  %v222_v55 = vadd.f32 %v130_v47, %v710_v33  ;;  %v134_v56 = vpop.permute.xlu1 %133 }
  0xaf   :  { %v417_v0 = vadd.f32 %v416_v9, %v347_v48  ;;  %v426_v1 = vadd.f32 %v425_v10, %v348_v49  ;;  %v361_v62 = vmul.f32 %v696_v26, %v273_v50  ;;  %v362_v63 = vmul.f32 %v696_v26, %v274_v51 }
  0xb0   :  { %v400_v2 = vrot.slane %v399_v52, 4  ;;  %v409_v3 = vrot.slane %v408_v53, 4  ;;  %v285_v4 = vmax.f32 %v221_v54, 0.0  ;;  %v286_v5 = vmax.f32 %v222_v55, 0.0  ;;  %v85_v6 = vpop.permute.xlu0 %84 }
  0xb1   :  { %v418_v11 = vrot.slane %v417_v0, 4  ;;  %v427_v12 = vrot.slane %v426_v1, 4  ;;  %v223_v20 = vadd.f32 %v134_v56, %v715_v34  ;;  %v224_v21 = vadd.f32 %v134_v56, %v720_v35 }
  0xb2   :  { %v401_v13 = vadd.f32 %v400_v2, %v399_v52  ;;  %v410_v16 = vadd.f32 %v409_v3, %v408_v53  ;;  %v373_v17 = vmul.f32 %v698_v27, %v285_v4  ;;  %v374_v18 = vmul.f32 %v698_v27, %v286_v5  ;;  %v119_v19 = vpop.permute.xlu1 %118 }
  0xb3   :  { %v419_v9 = vadd.f32 %v418_v11, %v417_v0  ;;  %v428_v10 = vadd.f32 %v427_v12, %v426_v1  ;;  %v203_v29 = vadd.f32 %v85_v6, %v783_v7  ;;  %v204_v30 = vadd.f32 %v85_v6, %v788_v8 }
  0xb4   :  { %v402_v22 = vrot.slane %v401_v13, 2  ;;  %v411_v25 = vrot.slane %v410_v16, 2  ;;  %v287_v37 = vmax.f32 %v223_v20, 0.0  ;;  %v288_v38 = vmax.f32 %v224_v21, 0.0  ;;  %v149_v41 = vpop.permute.xlu0 %148 }
  0xb5   :  { %v420_v31 = vrot.slane %v419_v9, 2  ;;  %v429_v36 = vrot.slane %v428_v10, 2  ;;  %v267_v39 = vmax.f32 %v203_v29, 0.0  ;;  %v268_v40 = vmax.f32 %v204_v30, 0.0 }
  0xb6   :  { %v403_v42 = vadd.f32 %v402_v22, %v401_v13  ;;  %v412_v43 = vadd.f32 %v411_v25, %v410_v16  ;;  %v153_v44 = vpop.permute.xlu1 %152  ;;  %v375_v47 = vmul.f32 %v700_v28, %v287_v37  ;;  %v376_v48 = vmul.f32 %v700_v28, %v288_v38 }
  0xb7   :  { %v421_v45 = vadd.f32 %v420_v31, %v419_v9  ;;  %v430_v46 = vadd.f32 %v429_v36, %v428_v10  ;;  %v355_v51 = vmul.f32 %v734_v57, %v267_v39  ;;  %v356_v52 = vmul.f32 %v734_v57, %v268_v40 }
  0xb8   :  { %v404_v49 = vrot.slane %v403_v42, 1  ;;  %v413_v50 = vrot.slane %v412_v43, 1  ;;  %v833_v55 = vadd.f32 %v792_v14, %v361_v62  ;;  %v836_v56 = vadd.f32 %v794_v15, %v362_v63  ;;  %v104_v11 = vpop.permute.xlu0 %103 }
  0xb9   :  { %v422_v53 = vrot.slane %v421_v45, 1  ;;  %v431_v54 = vrot.slane %v430_v46, 1  ;;  %v838_v0 = vadd.f32 %v375_v47, %v373_v17  ;;  %v840_v1 = vadd.f32 %v376_v48, %v374_v18 }
  0xba   :  { %v435_v2 = vadd.f32 %v798_v23, %v355_v51  ;;  %v444_v3 = vadd.f32 %v800_v24, %v356_v52  ;;  %v844_v4 = vadd.f32 %v404_v49, %v403_v42  ;;  %v846_v5 = vadd.f32 %v413_v50, %v412_v43  ;;  %v138_v13 = vpop.permute.xlu1 %137 }
  0xbb   :  { %v217_v6 = vadd.f32 %v119_v19, %v739_v58  ;;  %v218_v14 = vadd.f32 %v119_v19, %v744_v59  ;;  %v229_v62 = vadd.f32 %v149_v41, %v705_v32  ;;  %v230_v63 = vadd.f32 %v149_v41, %v710_v33 }
  0xbc   :  { %v436_v12 = vrot.slane %v435_v2, 4  ;;  %v445_v15 = vrot.slane %v444_v3, 4  ;;  %v231_v24 = vadd.f32 %v153_v44, %v715_v34  ;;  %v232_v17 = vadd.f32 %v153_v44, %v720_v35  ;;  %v168_v43 = vpop.permute.xlu0 %167 }
  0xbd   :  { %v281_v16 = vmax.f32 %v217_v6, 0.0  ;;  %v282_v23 = vmax.f32 %v218_v14, 0.0  ;;  %v293_v10 = vmax.f32 %v229_v62, 0.0  ;;  %v294_v20 = vmax.f32 %v230_v63, 0.0 }
  0xbe   :  { %v437_v18 = vadd.f32 %v436_v12, %v435_v2  ;;  %v446_v9 = vadd.f32 %v445_v15, %v444_v3  ;;  %v295_v22 = vmax.f32 %v231_v24, 0.0  ;;  %v296_v25 = vmax.f32 %v232_v17, 0.0  ;;  %v172_v47 = vpop.permute.xlu1 %171 }
  0xbf   :  { %v369_v19 = vmul.f32 %v696_v26, %v281_v16  ;;  %v370_v21 = vmul.f32 %v696_v26, %v282_v23  ;;  %v856_v29 = vadd.f32 %v422_v53, %v421_v45  ;;  %v858_v30 = vadd.f32 %v431_v54, %v430_v46 }
  0xc0   :  { %v438_v31 = vrot.slane %v437_v18, 2  ;;  %v447_v36 = vrot.slane %v446_v9, 2  ;;  %v381_v37 = vmul.f32 %v698_v27, %v293_v10  ;;  %v382_v38 = vmul.f32 %v698_v27, %v294_v20  ;;  %v123_v16 = vpop.permute.xlu0 %122 }
  0xc1   :  { %v383_v41 = vmul.f32 %v700_v28, %v295_v22  ;;  %v384_v42 = vmul.f32 %v700_v28, %v296_v25  ;;  %v211_v44 = vadd.f32 %v104_v11, %v783_v7  ;;  %v212_v45 = vadd.f32 %v104_v11, %v788_v8 }
  0xc2   :  { %v439_v39 = vadd.f32 %v438_v31, %v437_v18  ;;  %v448_v40 = vadd.f32 %v447_v36, %v446_v9  ;;  %v470_v46 = vadd.f32 %v816_v60, %v369_v19  ;;  %v479_v48 = vadd.f32 %v818_v61, %v370_v21  ;;  %v157_v17 = vpop.permute.xlu1 %156 }
  0xc3   :  { %v225_v49 = vadd.f32 %v138_v13, %v739_v58  ;;  %v226_v50 = vadd.f32 %v138_v13, %v744_v59  ;;  %v275_v53 = vmax.f32 %v211_v44, 0.0  ;;  %v276_v54 = vmax.f32 %v212_v45, 0.0 }
  0xc4   :  { %v440_v51 = vrot.slane %v439_v39, 1  ;;  %v449_v52 = vrot.slane %v448_v40, 1  ;;  %v237_v6 = vadd.f32 %v168_v43, %v705_v32  ;;  %v238_v14 = vadd.f32 %v168_v43, %v710_v33  ;;  %v142_v43 = vpop.permute.xlu0 %141 }
  0xc5   :  { %v289_v2 = vmax.f32 %v225_v49, 0.0  ;;  %v290_v3 = vmax.f32 %v226_v50, 0.0  ;;  %v505_v11 = vadd.f32 %v383_v41, %v381_v37  ;;  %v514_v12 = vadd.f32 %v384_v42, %v382_v38 }
  0xc6   :  { %v363_v60 = vmul.f32 %v734_v57, %v275_v53  ;;  %v364_v61 = vmul.f32 %v734_v57, %v276_v54  ;;  %v874_v15 = vadd.f32 %v440_v51, %v439_v39  ;;  %v876_v62 = vadd.f32 %v449_v52, %v448_v40 }
  0xc7   :  { %v377_v63 = vmul.f32 %v696_v26, %v289_v2  ;;  %v378_v13 = vmul.f32 %v696_v26, %v290_v3  ;;  %v239_v33 = vadd.f32 %v172_v47, %v715_v34  ;;  %v240_v24 = vadd.f32 %v172_v47, %v720_v35  ;;  %v176_v2 = vpop.permute.xlu1 %175 }
  0xc8   :  { %v453_v23 = vadd.f32 %v833_v55, %v363_v60  ;;  %v462_v32 = vadd.f32 %v836_v56, %v364_v61  ;;  %v301_v10 = vmax.f32 %v237_v6, 0.0  ;;  %v302_v20 = vmax.f32 %v238_v14, 0.0 }
  0xc9   :  { %v488_v18 = vadd.f32 %v838_v0, %v377_v63  ;;  %v497_v9 = vadd.f32 %v840_v1, %v378_v13  ;;  %v303_v22 = vmax.f32 %v239_v33, 0.0  ;;  %v304_v25 = vmax.f32 %v240_v24, 0.0  ;;  %v161_v24 = vpop.permute.xlu0 %160 }
  0xca   :  { %v454_v19 = vrot.slane %v453_v23, 4  ;;  %v463_v21 = vrot.slane %v462_v32, 4  ;;  %v219_v31 = vadd.f32 %v123_v16, %v783_v7  ;;  %v220_v55 = vadd.f32 %v123_v16, %v788_v8 }
  0xcb   :  { %v233_v56 = vadd.f32 %v157_v17, %v739_v58  ;;  %v234_v34 = vadd.f32 %v157_v17, %v744_v59  ;;  %v391_v0 = vmul.f32 %v700_v28, %v303_v22  ;;  %v392_v1 = vmul.f32 %v700_v28, %v304_v25 }
  0xcc   :  { %v455_v35 = vadd.f32 %v454_v19, %v453_v23  ;;  %v464_v36 = vadd.f32 %v463_v21, %v462_v32  ;;  %v283_v37 = vmax.f32 %v219_v31, 0.0  ;;  %v284_v38 = vmax.f32 %v220_v55, 0.0 }
  0xcd   :  { %v297_v41 = vmax.f32 %v233_v56, 0.0  ;;  %v298_v42 = vmax.f32 %v234_v34, 0.0  ;;  %v389_v44 = vmul.f32 %v698_v27, %v301_v10  ;;  %v390_v45 = vmul.f32 %v698_v27, %v302_v20 }
  0xce   :  { %v456_v39 = vrot.slane %v455_v35, 2  ;;  %v465_v40 = vrot.slane %v464_v36, 2  ;;  %v371_v47 = vmul.f32 %v734_v57, %v283_v37  ;;  %v372_v49 = vmul.f32 %v734_v57, %v284_v38 }
  0xcf   :  { %v385_v50 = vmul.f32 %v696_v26, %v297_v41  ;;  %v386_v51 = vmul.f32 %v696_v26, %v298_v42  ;;  %v227_v53 = vadd.f32 %v142_v43, %v783_v7  ;;  %v228_v54 = vadd.f32 %v142_v43, %v788_v8 }
  0xd0   :  { %v457_v28 = vadd.f32 %v456_v39, %v455_v35  ;;  %v466_v52 = vadd.f32 %v465_v40, %v464_v36  ;;  %v523_v3 = vadd.f32 %v391_v0, %v389_v44  ;;  %v532_v6 = vadd.f32 %v392_v1, %v390_v45  ;;  %v180_v1 = vpop.permute.xlu1 %179 }
  0xd1   :  { %v471_v14 = vadd.f32 %v470_v46, %v371_v47  ;;  %v480_v60 = vadd.f32 %v479_v48, %v372_v49  ;;  %v291_v63 = vmax.f32 %v227_v53, 0.0  ;;  %v292_v13 = vmax.f32 %v228_v54, 0.0 }
  0xd2   :  { %v458_v27 = vrot.slane %v457_v28, 1  ;;  %v467_v61 = vrot.slane %v466_v52, 1  ;;  %v241_v32 = vadd.f32 %v176_v2, %v739_v58  ;;  %v242_v33 = vadd.f32 %v176_v2, %v744_v59 }
  0xd3   :  { %v472_v16 = vrot.slane %v471_v14, 4  ;;  %v481_v23 = vrot.slane %v480_v60, 4  ;;  %v506_v17 = vadd.f32 %v505_v11, %v385_v50  ;;  %v515_v10 = vadd.f32 %v514_v12, %v386_v51 }
  0xd4   :  { %v379_v20 = vmul.f32 %v734_v57, %v291_v63  ;;  %v380_v19 = vmul.f32 %v734_v57, %v292_v13  ;;  %v305_v48 = vmax.f32 %v241_v32, 0.0  ;;  %v306_v22 = vmax.f32 %v242_v33, 0.0 }
  0xd5   :  { %v473_v21 = vadd.f32 %v472_v16, %v471_v14  ;;  %v482_v46 = vadd.f32 %v481_v23, %v480_v60  ;;  %v235_v55 = vadd.f32 %v161_v24, %v783_v7  ;;  %v236_v56 = vadd.f32 %v161_v24, %v788_v8 }
  0xd6   :  { %v489_v25 = vadd.f32 %v488_v18, %v379_v20  ;;  %v498_v31 = vadd.f32 %v497_v9, %v380_v19  ;;  %v906_v58 = vadd.f32 %v458_v27, %v457_v28  ;;  %v908_v59 = vadd.f32 %v467_v61, %v466_v52  ;;  %v916_v61 = vpop.permute.xlu0 %548 }
  0xd7   :  { %v474_v11 = vrot.slane %v473_v21, 2  ;;  %v483_v12 = vrot.slane %v482_v46, 2  ;;  %v299_v36 = vmax.f32 %v235_v55, 0.0  ;;  %v300_v0 = vmax.f32 %v236_v56, 0.0 }
  0xd8   :  { %v490_v34 = vrot.slane %v489_v25, 4  ;;  %v499_v35 = vrot.slane %v498_v31, 4  ;;  %v393_v18 = vmul.f32 %v696_v26, %v305_v48  ;;  %v394_v9 = vmul.f32 %v696_v26, %v306_v22 }
  0xd9   :  { %v475_v37 = vadd.f32 %v474_v11, %v473_v21  ;;  %v484_v38 = vadd.f32 %v483_v12, %v482_v46  ;;  %v387_v43 = vmul.f32 %v734_v57, %v299_v36  ;;  %v388_v39 = vmul.f32 %v734_v57, %v300_v0 }
  0xda   :  { %v491_v41 = vadd.f32 %v490_v34, %v489_v25  ;;  %v500_v42 = vadd.f32 %v499_v35, %v498_v31  ;;  %v243_v45 = vadd.f32 %v180_v1, %v783_v7  ;;  %v244_v47 = vadd.f32 %v180_v1, %v788_v8 }
  0xdb   :  { %v476_v40 = vrot.slane %v475_v37, 1  ;;  %v485_v44 = vrot.slane %v484_v38, 1  ;;  %v507_v51 = vadd.f32 %v506_v17, %v387_v43  ;;  %v516_v28 = vadd.f32 %v515_v10, %v388_v39 }
  0xdc   :  { %v492_v49 = vrot.slane %v491_v41, 2  ;;  %v501_v50 = vrot.slane %v500_v42, 2  ;;  %v524_v52 = vadd.f32 %v523_v3, %v393_v18  ;;  %v533_v53 = vadd.f32 %v532_v6, %v394_v9 }
  0xdd   :  { %v307_v26 = vmax.f32 %v243_v45, 0.0  ;;  %v308_v54 = vmax.f32 %v244_v47, 0.0  ;;  %v508_v60 = vrot.slane %v507_v51, 4  ;;  %v517_v27 = vrot.slane %v516_v28, 4 }
  0xde   :  { %v493_v2 = vadd.f32 %v492_v49, %v491_v41  ;;  %v502_v14 = vadd.f32 %v501_v50, %v500_v42  ;;  %v477_v63 = vadd.f32 %v476_v40, %v475_v37  ;;  %v486_v7 = vadd.f32 %v485_v44, %v484_v38 }
  0xdf   :  { %v395_v8 = vmul.f32 %v734_v57, %v307_v26  ;;  %v396_v13 = vmul.f32 %v734_v57, %v308_v54  ;;  %v509_v32 = vadd.f32 %v508_v60, %v507_v51  ;;  %v518_v3 = vadd.f32 %v517_v27, %v516_v28 }
  0xe0   :  { %v494_v16 = vrot.slane %v493_v2, 1  ;;  %v503_v23 = vrot.slane %v502_v14, 1  ;;  %v551_v24 = vadd.f32 %v916_v61, %v844_v4  ;;  %v552_v17 = vadd.f32 %v916_v61, %v846_v5 }
  0xe1   :  { %v525_v6 = vadd.f32 %v524_v52, %v395_v8  ;;  %v534_v33 = vadd.f32 %v533_v53, %v396_v13  ;;  %v510_v10 = vrot.slane %v509_v32, 2  ;;  %v519_v20 = vrot.slane %v518_v3, 2 }
  0xe2   :  { %v553_v19 = vadd.f32 %v916_v61, %v856_v29  ;;  %v554_v57 = vadd.f32 %v916_v61, %v858_v30  ;;  %v495_v21 = vadd.f32 %v494_v16, %v493_v2  ;;  %v504_v46 = vadd.f32 %v503_v23, %v502_v14 }
  0xe3   :  { %v526_v48 = vrot.slane %v525_v6, 4  ;;  %v535_v22 = vrot.slane %v534_v33, 4  ;;  %v511_v25 = vadd.f32 %v510_v10, %v509_v32  ;;  %v520_v31 = vadd.f32 %v519_v20, %v518_v3 }
  0xe4   :  { %v555_v4 = vadd.f32 %v916_v61, %v874_v15  ;;  %v556_v5 = vadd.f32 %v916_v61, %v876_v62  ;;  %v557_v29 = vadd.f32 %v916_v61, %v906_v58  ;;  %v558_v30 = vadd.f32 %v916_v61, %v908_v59 }
  0xe5   :  { %v527_v55 = vadd.f32 %v526_v48, %v525_v6  ;;  %v536_v56 = vadd.f32 %v535_v22, %v534_v33  ;;  %v512_v11 = vrot.slane %v511_v25, 1  ;;  %v521_v12 = vrot.slane %v520_v31, 1 }
  0xe6   :  { %v559_v34 = vadd.f32 %v916_v61, %v477_v63  ;;  %v560_v35 = vadd.f32 %v916_v61, %v486_v7  ;;  %v584_v15 = vsel %vm583_vm0, %v553_v19, %v551_v24  ;;  %v597_v62 = vsel %vm583_vm0, %v554_v57, %v552_v17 }
  0xe7   :  { %v528_v36 = vrot.slane %v527_v55, 2  ;;  %v537_v0 = vrot.slane %v536_v56, 2  ;;  %v513_v1 = vadd.f32 %v512_v11, %v511_v25  ;;  %v522_v37 = vadd.f32 %v521_v12, %v520_v31 }
  0xe8   :  { %v586_v38 = vsel %vm585_vm1, %v555_v4, %v584_v15  ;;  %v598_v58 = vsel %vm585_vm1, %v556_v5, %v597_v62  ;;  %v561_v9 = vadd.f32 %v916_v61, %v495_v21  ;;  %v562_v41 = vadd.f32 %v916_v61, %v504_v46 }
  0xe9   :  { %v529_v18 = vadd.f32 %v528_v36, %v527_v55  ;;  %v538_v59 = vadd.f32 %v537_v0, %v536_v56  ;;  %v563_v42 = vadd.f32 %v916_v61, %v513_v1  ;;  %v564_v43 = vadd.f32 %v916_v61, %v522_v37 }
  0xea   :  { %v588_v44 = vsel %vm587_vm2, %v557_v29, %v586_v38  ;;  %v599_v45 = vsel %vm587_vm2, %v558_v30, %v598_v58 }
  0xeb   :  { %v530_v39 = vrot.slane %v529_v18, 1  ;;  %v539_v40 = vrot.slane %v538_v59, 1  ;;  %v590_v47 = vsel %vm589_vm3, %v559_v34, %v588_v44  ;;  %v600_v49 = vsel %vm589_vm3, %v560_v35, %v599_v45 }
  0xec   :  { %v592_v28 = vsel %vm591_vm4, %v561_v9, %v590_v47  ;;  %v601_v52 = vsel %vm591_vm4, %v562_v41, %v600_v49 }
  0xed   :  { %v531_v50 = vadd.f32 %v530_v39, %v529_v18  ;;  %v540_v51 = vadd.f32 %v539_v40, %v538_v59  ;;  %v594_v53 = vsel %vm593_vm5, %v563_v42, %v592_v28  ;;  %v602_v26 = vsel %vm593_vm5, %v564_v43, %v601_v52 }
  0xef   :  { %v565_v54 = vadd.f32 %v916_v61, %v531_v50  ;;  %v566_v2 = vadd.f32 %v916_v61, %v540_v51 }
  0xf1   :  { %v596_v14 = vsel %vm595_vm6, %v565_v54, %v594_v53  ;;  %v603_v60 = vsel %vm595_vm6, %v566_v2, %v602_v26 }
  0xf2   :  { %606 = vst [vmem:[#allocation3] sm:$0xff] %v596_v14  ;;  %607 = vst [vmem:[#allocation3 + $0x8] sm:$0xff] %v603_v60 }
  0xf3   :  { %638 = shalt.err (!%p635_p4)
}
  0xf4   :  { %s639_s18 = scalar_lea.hbm %s968_s4, 256 }
  0xf5   :  { %p640_p5 = scmp.ne.s32.totalorder %s968_s4, %s639_s18  ;;  %p643_p6 = scmp.lt.u32.totalorder %s639_s18, %s968_s4 }
  0xf7   :  { %p645_p7 = pnand %p643_p6, %p640_p5 }
  0xf9   :  { %648 = shalt.err (!%p645_p7)
}
  0xfa   :  { %617 = dma.vmem_to_hbm [thread:$0]  %s615_s14, 256, %s968_s4, [#allocation4]  }
  0xfb   :  { %649 = dma.done.wait [#allocation4], 256  }
  0xfc   :  { %650 = vsyncadd [#allocation4], 4294967040 }
  0xfd   :  { %621 = vsyncpa [#allocation4], 1 }

// kernel: partial_vae_forward.2
= control target key start
LH: loop header
LB: loop body
LE: loop exit
PB: predicated region body
PF: predicated region fallthrough
CT: control target
= control target key end

     0   :  { %v88_v0 = vlaneseq  ;;  %vm1946_vm0 = vcmask 261120   ;;  %vm50_vm1 = vcmask 130048   ;;  %vm7657_vm2 = vmmov 0   ;;  %s11111_s0 = inlined_call_operand.vmem [shape: f32[8,256], index: 0, kind: input, shape index: {}]   ;;  %s11112_s4 = inlined_call_operand.vmem [shape: f32[32,16], index: 4, kind: input, shape index: {}]   ;;  %s11113_s3 = inlined_call_operand.vmem [shape: f32[1,32], index: 3, kind: input, shape index: {}]   ;;  %s11114_s2 = inlined_call_operand.vmem [shape: f32[256,32], index: 2, kind: input, shape index: {}]   ;;  %s11115_s1 = inlined_call_operand.vmem [shape: f32[8,256], index: 1, kind: input, shape index: {}]   ;;  %s11116_s5 = inlined_call_operand.vmem [shape: f32[1,16], index: 5, kind: input, shape index: {}]   ;;  %s11117_s6 = inlined_call_operand.vmem [shape: f32[16,64], index: 6, kind: input, shape index: {}]   ;;  %s11118_s8 = inlined_call_operand.vmem [shape: f32[64,16], index: 8, kind: input, shape index: {}]   ;;  %s11119_s7 = inlined_call_operand.vmem [shape: f32[1,64], index: 7, kind: input, shape index: {}]   ;;  %s11120_s10 = inlined_call_operand.vmem [shape: f32[8,32], index: 10, kind: input, shape index: {}]   ;;  %s11121_s12 = inlined_call_operand.vmem [shape: f32[32,32], index: 12, kind: input, shape index: {}]   ;;  %s11122_s9 = inlined_call_operand.vmem [shape: f32[1,16], index: 9, kind: input, shape index: {}]   ;;  %s11123_s13 = inlined_call_operand.vmem [shape: f32[8,16], index: 13, kind: output, shape index: {0}]   ;;  %s11124_s11 = inlined_call_operand.vmem [shape: f32[1,32], index: 11, kind: input, shape index: {}]   ;;  %s11125_s14 = inlined_call_operand.vmem [shape: f32[8,32], index: 14, kind: output, shape index: {1}]  }
   0x1   :  { %v1935_v2 = vld [vmem:[%s11112_s4] sm:$0xff]  ;;  %v1936_v3 = vld [vmem:[%s11112_s4 + $0x8] sm:$0xff]  ;;  %v1937_v6 = vld [vmem:[%s11112_s4 + $0x10] sm:$0xff]  ;;  %vm6206_vm3 = vcmask 1041409   ;;  %vm6208_vm4 = vcmask 1042434   ;;  %vm6210_vm5 = vcmask 1043459  }
   0x2   :  { %v7733_v1 = vshrl.u32 %v88_v0, 7  ;;  %v7744_v4 = vld [vmem:[%s11111_s0] sm:$0xff]  ;;  %v7547_v5 = vpack.c.bf16 %v1936_v3, %v1935_v2  ;;  %v1938_v8 = vld [vmem:[%s11112_s4 + $0x18] sm:$0xff]  ;;  %v7760_v11 = vld [vmem:[%s11111_s0 + $0x8] sm:$0xff]  ;;  %vm6212_vm6 = vcmask 1044484   ;;  %vm6214_vm7 = vcmask 1045509  }
   0x3   :  { %v7551_v9 = vpack.c.bf16 %v1938_v8, %v1937_v6  ;;  %v7793_v18 = vld [vmem:[%s11113_s3] ss:$0 sm:$0xff]  ;;  %v7811_v25 = vld [vmem:[%s11114_s2 + $0x10] sm:$0xff]  ;;  %v7817_v28 = vld [vmem:[%s11114_s2 + $0x8] sm:$0xff]  ;;  %vm6216_vm8 = vcmask 1046534   ;;  %vm6218_vm9 = vcmask 1047559  }
   0x4   :  { %v7750_v7 = vsub.s32 0, %v7733_v1  ;;  %7548 = vmatprep.subr.bf16.mxu0 %v7547_v5  ;;  %7576 = vmatprep.subr.bf16.mxu1 %v7547_v5  ;;  %v7765_v13 = vsub.s32 1, %v7733_v1  ;;  %v7770_v15 = vsub.s32 4, %v7733_v1  ;;  %v7802_v22 = vld [vmem:[%s11114_s2] sm:$0xff]  ;;  %v7825_v34 = vld [vmem:[%s11114_s2 + $0x18] sm:$0xff]  ;;  %v7840_v41 = vld [vmem:[%s11114_s2 + $0x28] sm:$0xff] }
   0x5   :  { %7550 = vmatpush3.bf16.msra.mxu0 %v7547_v5  ;;  %7578 = vmatpush3.bf16.msra.mxu1 %v7547_v5  ;;  %v7834_v37 = vld [vmem:[%s11114_s2 + $0x20] sm:$0xff]  ;;  %v7853_v48 = vld [vmem:[%s11114_s2 + $0x30] sm:$0xff]  ;;  %v7860_v54 = vld [vmem:[%s11114_s2 + $0x38] sm:$0xff]  ;;  %vm6325_vm10 = vcmask 523264   ;;  %vm6408_vm11 = vcmask 64512  }
   0x6   :  { %v91_v10 = vrot.slane %v7744_v4, %v7750_v7  ;;  %7552 = vmatprep.subr.bf16.mxu0 %v7551_v9  ;;  %7577 = vmatprep.subr.bf16.mxu1 %v7551_v9  ;;  %v158_v12 = vrot.slane %v7760_v11, %v7750_v7  ;;  %v225_v14 = vrot.slane %v7744_v4, %v7765_v13  ;;  %v7870_v58 = vld [vmem:[%s11114_s2 + $0x40] sm:$0xff]  ;;  %v7876_v62 = vld [vmem:[%s11114_s2 + $0x48] sm:$0xff]  ;;  %v7889_v6 = vld [vmem:[%s11114_s2 + $0x50] sm:$0xff] }
   0x7   :  { %11130 = vst [vmem:[#allocation3_spill] sm:$0xff] %v7770_v15  ;;  %v7774_v16 = vrot.slane %v7744_v4, %v7770_v15  ;;  %v7784_v17 = vrot.slane %v7760_v11, %v7765_v13  ;;  %v7797_v19 = vrot.slane %v7760_v11, %v7770_v15 }
   0x8   :  { %101 = vbcast.lane.b32.xlu1 %v91_v10, 272  ;;  %93 = vbcast.lane.b32.xlu0 %v91_v10, 256 }
   0x9   :  { %7554 = vmatpush3.bf16.msra.mxu0 %v7551_v9  ;;  %7579 = vmatpush3.bf16.msra.mxu1 %v7551_v9 }
   0xc   :  { %105 = vbcast.lane.b32.xlu1 %v91_v10, 280  ;;  %97 = vbcast.lane.b32.xlu0 %v91_v10, 264 }
  0x10   :  { %113 = vbcast.lane.b32.xlu1 %v91_v10, 296  ;;  %109 = vbcast.lane.b32.xlu0 %v91_v10, 288 }
  0x14   :  { %121 = vbcast.lane.b32.xlu1 %v91_v10, 312  ;;  %117 = vbcast.lane.b32.xlu0 %v91_v10, 304 }
  0x18   :  { %129 = vbcast.lane.b32.xlu1 %v91_v10, 328  ;;  %125 = vbcast.lane.b32.xlu0 %v91_v10, 320 }
  0x1c   :  { %137 = vbcast.lane.b32.xlu1 %v91_v10, 344  ;;  %133 = vbcast.lane.b32.xlu0 %v91_v10, 336 }
  0x20   :  { %145 = vbcast.lane.b32.xlu1 %v91_v10, 360  ;;  %141 = vbcast.lane.b32.xlu0 %v91_v10, 352 }
  0x24   :  { %153 = vbcast.lane.b32.xlu1 %v91_v10, 376  ;;  %149 = vbcast.lane.b32.xlu0 %v91_v10, 368 }
  0x28   :  { %164 = vbcast.lane.b32.xlu1 %v158_v12, 264  ;;  %160 = vbcast.lane.b32.xlu0 %v158_v12, 256 }
  0x2c   :  { %172 = vbcast.lane.b32.xlu1 %v158_v12, 280  ;;  %168 = vbcast.lane.b32.xlu0 %v158_v12, 272 }
  0x30   :  { %180 = vbcast.lane.b32.xlu1 %v158_v12, 296  ;;  %176 = vbcast.lane.b32.xlu0 %v158_v12, 288 }
  0x34   :  { %188 = vbcast.lane.b32.xlu1 %v158_v12, 312  ;;  %184 = vbcast.lane.b32.xlu0 %v158_v12, 304 }
  0x38   :  { %196 = vbcast.lane.b32.xlu1 %v158_v12, 328  ;;  %192 = vbcast.lane.b32.xlu0 %v158_v12, 320 }
  0x3c   :  { %204 = vbcast.lane.b32.xlu1 %v158_v12, 344  ;;  %200 = vbcast.lane.b32.xlu0 %v158_v12, 336 }
  0x40   :  { %212 = vbcast.lane.b32.xlu1 %v158_v12, 360  ;;  %208 = vbcast.lane.b32.xlu0 %v158_v12, 352 }
  0x44   :  { %220 = vbcast.lane.b32.xlu1 %v158_v12, 376  ;;  %216 = vbcast.lane.b32.xlu0 %v158_v12, 368 }
  0x48   :  { %231 = vbcast.lane.b32.xlu1 %v225_v14, 264  ;;  %227 = vbcast.lane.b32.xlu0 %v225_v14, 256 }
  0x4c   :  { %239 = vbcast.lane.b32.xlu1 %v225_v14, 280  ;;  %235 = vbcast.lane.b32.xlu0 %v225_v14, 272 }
  0x50   :  { %247 = vbcast.lane.b32.xlu1 %v225_v14, 296  ;;  %243 = vbcast.lane.b32.xlu0 %v225_v14, 288 }
  0x54   :  { %255 = vbcast.lane.b32.xlu1 %v225_v14, 312  ;;  %251 = vbcast.lane.b32.xlu0 %v225_v14, 304 }
  0x58   :  { %263 = vbcast.lane.b32.xlu1 %v225_v14, 328  ;;  %259 = vbcast.lane.b32.xlu0 %v225_v14, 320 }
  0x5c   :  { %267 = vbcast.lane.b32.xlu1 %v225_v14, 336  ;;  %661 = vbcast.lane.b32.xlu0 %v7774_v16, 320 }
  0x60   :  { %271 = vbcast.lane.b32.xlu1 %v225_v14, 344  ;;  %665 = vbcast.lane.b32.xlu0 %v7774_v16, 328 }
  0x64   :  { %275 = vbcast.lane.b32.xlu1 %v225_v14, 352  ;;  %669 = vbcast.lane.b32.xlu0 %v7774_v16, 336 }
  0x68   :  { %279 = vbcast.lane.b32.xlu1 %v225_v14, 360  ;;  %673 = vbcast.lane.b32.xlu0 %v7774_v16, 344 }
  0x6c   :  { %283 = vbcast.lane.b32.xlu1 %v225_v14, 368  ;;  %677 = vbcast.lane.b32.xlu0 %v7774_v16, 352 }
  0x70   :  { %287 = vbcast.lane.b32.xlu1 %v225_v14, 376  ;;  %681 = vbcast.lane.b32.xlu0 %v7774_v16, 360 }
  0x74   :  { %294 = vbcast.lane.b32.xlu1 %v7784_v17, 256  ;;  %685 = vbcast.lane.b32.xlu0 %v7774_v16, 368 }
  0x78   :  { %298 = vbcast.lane.b32.xlu1 %v7784_v17, 264  ;;  %689 = vbcast.lane.b32.xlu0 %v7774_v16, 376 }
  0x7a   :  { %v102_v20 = vpop.permute.xlu1 %101  ;;  %v94_v21 = vpop.permute.xlu0 %93 }
  0x7b   :  { %v1167_v23 = vmul.f32 %v7793_v18, %v94_v21  ;;  %v1169_v24 = vmul.f32 %v7793_v18, %v102_v20  ;;  %v7896_v20 = vld [vmem:[%s11114_s2 + $0x58] sm:$0xff] }
  0x7c   :  { %302 = vbcast.lane.b32.xlu1 %v7784_v17, 272  ;;  %696 = vbcast.lane.b32.xlu0 %v7797_v19, 256 }
  0x7d   :  { %v1423_v26 = vadd.f32 %v1167_v23, %v7802_v22  ;;  %v1425_v33 = vadd.f32 %v1169_v24, %v7811_v25 }
  0x7e   :  { %v106_v27 = vpop.permute.xlu1 %105  ;;  %v98_v29 = vpop.permute.xlu0 %97 }
  0x7f   :  { %v1170_v30 = vmul.f32 %v7793_v18, %v106_v27  ;;  %v1168_v31 = vmul.f32 %v7793_v18, %v98_v29  ;;  %v1679_v32 = vmax.f32 %v1423_v26, 0.0  ;;  %v1681_v44 = vmax.f32 %v1425_v33, 0.0  ;;  %v7906_v26 = vld [vmem:[%s11114_s2 + $0x60] sm:$0xff] }
  0x80   :  { %306 = vbcast.lane.b32.xlu1 %v7784_v17, 280  ;;  %700 = vbcast.lane.b32.xlu0 %v7797_v19, 264 }
  0x81   :  { %v1424_v35 = vadd.f32 %v1168_v31, %v7817_v28  ;;  %7121 = vmatprep.mubr.msk.f32.mxu0 %vm1946_vm0, %v1679_v32  ;;  %v1426_v39 = vadd.f32 %v1170_v30, %v7825_v34  ;;  %v7912_v31 = vld [vmem:[%s11114_s2 + $0x68] sm:$0xff] }
  0x82   :  { %v114_v36 = vpop.permute.xlu1 %113  ;;  %v110_v38 = vpop.permute.xlu0 %109 }
  0x83   :  { %v1680_v40 = vmax.f32 %v1424_v35, 0.0  ;;  %v1172_v42 = vmul.f32 %v7793_v18, %v114_v36  ;;  %v1171_v43 = vmul.f32 %v7793_v18, %v110_v38  ;;  %v1682_v50 = vmax.f32 %v1426_v39, 0.0  ;;  %v7925_v39 = vld [vmem:[%s11114_s2 + $0x70] sm:$0xff] }
  0x84   :  { %310 = vbcast.lane.b32.xlu1 %v7784_v17, 288  ;;  %704 = vbcast.lane.b32.xlu0 %v7797_v19, 272 }
  0x85   :  { %v1427_v45 = vadd.f32 %v1171_v43, %v7834_v37  ;;  %7122 = vmatmul.mubr.msk.f32.vlgmr.msra.gmra.mrb[0].mxu0 %vm1946_vm0, %v1680_v40  ;;  %v1428_v46 = vadd.f32 %v1172_v42, %v7840_v41 }
  0x86   :  { %v122_v47 = vpop.permute.xlu1 %121  ;;  %7124 = vmatprep.mubr.msk.f32.mxu0 %vm1946_vm0, %v1681_v44  ;;  %v118_v49 = vpop.permute.xlu0 %117 }
  0x87   :  { %v1683_v51 = vmax.f32 %v1427_v45, 0.0  ;;  %v1174_v52 = vmul.f32 %v7793_v18, %v122_v47  ;;  %v1173_v53 = vmul.f32 %v7793_v18, %v118_v49  ;;  %v1684_v56 = vmax.f32 %v1428_v46, 0.0  ;;  %v7932_v46 = vld [vmem:[%s11114_s2 + $0x78] sm:$0xff] }
  0x88   :  { %314 = vbcast.lane.b32.xlu1 %v7784_v17, 296  ;;  %708 = vbcast.lane.b32.xlu0 %v7797_v19, 280 }
  0x89   :  { %v1429_v55 = vadd.f32 %v1173_v53, %v7853_v48  ;;  %7125 = vmatmul.mubr.msk.f32.gmra.mrb[2].mxu0 %vm1946_vm0, %v1682_v50  ;;  %v1430_v60 = vadd.f32 %v1174_v52, %v7860_v54 }
  0x8a   :  { %v130_v57 = vpop.permute.xlu1 %129  ;;  %7127 = vmatprep.mubr.msk.f32.mxu0 %vm1946_vm0, %v1683_v51  ;;  %v126_v59 = vpop.permute.xlu0 %125  ;;  %v7942_v51 = vld [vmem:[%s11114_s2 + $0x80] sm:$0xff] }
  0x8b   :  { %v1685_v61 = vmax.f32 %v1429_v55, 0.0  ;;  %v1176_v63 = vmul.f32 %v7793_v18, %v130_v57  ;;  %v1175_v0 = vmul.f32 %v7793_v18, %v126_v59  ;;  %v1686_v9 = vmax.f32 %v1430_v60, 0.0 }
  0x8c   :  { %318 = vbcast.lane.b32.xlu1 %v7784_v17, 304  ;;  %712 = vbcast.lane.b32.xlu0 %v7797_v19, 288 }
  0x8d   :  { %v1431_v2 = vadd.f32 %v1175_v0, %v7870_v58  ;;  %7128 = vmatmul.mubr.msk.f32.gmra.mrb[4].mxu0 %vm1946_vm0, %v1684_v56  ;;  %v1432_v3 = vadd.f32 %v1176_v63, %v7876_v62  ;;  %v7948_v56 = vld [vmem:[%s11114_s2 + $0x88] sm:$0xff]  ;;  %v7961_v0 = vld [vmem:[%s11114_s2 + $0x90] sm:$0xff] }
  0x8e   :  { %v138_v5 = vpop.permute.xlu1 %137  ;;  %7130 = vmatprep.mubr.msk.f32.mxu0 %vm1946_vm0, %v1685_v61  ;;  %v134_v8 = vpop.permute.xlu0 %133 }
  0x8f   :  { %v1687_v10 = vmax.f32 %v1431_v2, 0.0  ;;  %v1178_v12 = vmul.f32 %v7793_v18, %v138_v5  ;;  %v1177_v14 = vmul.f32 %v7793_v18, %v134_v8  ;;  %v1688_v23 = vmax.f32 %v1432_v3, 0.0 }
  0x90   :  { %322 = vbcast.lane.b32.xlu1 %v7784_v17, 312  ;;  %716 = vbcast.lane.b32.xlu0 %v7797_v19, 296 }
  0x91   :  { %v1433_v21 = vadd.f32 %v1177_v14, %v7889_v6  ;;  %7131 = vmatmul.mubr.msk.f32.gmra.mrb[6].mxu0 %vm1946_vm0, %v1686_v9  ;;  %v1434_v29 = vadd.f32 %v1178_v12, %v7896_v20 }
  0x92   :  { %v146_v24 = vpop.permute.xlu1 %145  ;;  %7133 = vmatprep.mubr.msk.f32.mxu0 %vm1946_vm0, %v1687_v10  ;;  %v142_v27 = vpop.permute.xlu0 %141  ;;  %v7968_v10 = vld [vmem:[%s11114_s2 + $0x98] sm:$0xff] }
  0x93   :  { %v1689_v30 = vmax.f32 %v1433_v21, 0.0  ;;  %v1180_v32 = vmul.f32 %v7793_v18, %v146_v24  ;;  %v1179_v33 = vmul.f32 %v7793_v18, %v142_v27  ;;  %v1690_v42 = vmax.f32 %v1434_v29, 0.0 }
  0x94   :  { %326 = vbcast.lane.b32.xlu1 %v7784_v17, 320  ;;  %720 = vbcast.lane.b32.xlu0 %v7797_v19, 304 }
  0x95   :  { %v1435_v35 = vadd.f32 %v1179_v33, %v7906_v26  ;;  %7134 = vmatmul.mubr.msk.f32.gmra.mrb[8].mxu0 %vm1946_vm0, %v1688_v23  ;;  %v1436_v36 = vadd.f32 %v1180_v32, %v7912_v31  ;;  %v7978_v23 = vld [vmem:[%s11114_s2 + $0xa0] sm:$0xff] }
  0x96   :  { %v154_v38 = vpop.permute.xlu1 %153  ;;  %7136 = vmatprep.mubr.msk.f32.mxu0 %vm1946_vm0, %v1689_v30  ;;  %v150_v40 = vpop.permute.xlu0 %149  ;;  %v7984_v30 = vld [vmem:[%s11114_s2 + $0xa8] sm:$0xff] }
  0x97   :  { %v1691_v43 = vmax.f32 %v1435_v35, 0.0  ;;  %v1182_v44 = vmul.f32 %v7793_v18, %v154_v38  ;;  %v1181_v45 = vmul.f32 %v7793_v18, %v150_v40  ;;  %v1692_v49 = vmax.f32 %v1436_v36, 0.0  ;;  %v7997_v40 = vld [vmem:[%s11114_s2 + $0xb0] sm:$0xff] }
  0x98   :  { %330 = vbcast.lane.b32.xlu1 %v7784_v17, 328  ;;  %724 = vbcast.lane.b32.xlu0 %v7797_v19, 312 }
  0x99   :  { %v1437_v47 = vadd.f32 %v1181_v45, %v7925_v39  ;;  %7137 = vmatmul.mubr.msk.f32.gmra.mrb[10].mxu0 %vm1946_vm0, %v1690_v42  ;;  %v1438_v53 = vadd.f32 %v1182_v44, %v7932_v46 }
  0x9a   :  { %v165_v50 = vpop.permute.xlu1 %164  ;;  %7139 = vmatprep.mubr.msk.f32.mxu0 %vm1946_vm0, %v1691_v43  ;;  %v161_v52 = vpop.permute.xlu0 %160 }
  0x9b   :  { %v1693_v55 = vmax.f32 %v1437_v47, 0.0  ;;  %v1184_v57 = vmul.f32 %v7793_v18, %v165_v50  ;;  %v1183_v59 = vmul.f32 %v7793_v18, %v161_v52  ;;  %v1694_v3 = vmax.f32 %v1438_v53, 0.0 }
  0x9c   :  { %334 = vbcast.lane.b32.xlu1 %v7784_v17, 336  ;;  %728 = vbcast.lane.b32.xlu0 %v7797_v19, 320 }
  0x9d   :  { %v1439_v60 = vadd.f32 %v1183_v59, %v7942_v51  ;;  %7140 = vmatmul.mubr.msk.f32.gmra.mrb[12].mxu0 %vm1946_vm0, %v1692_v49  ;;  %v1440_v61 = vadd.f32 %v1184_v57, %v7948_v56  ;;  %v8004_v49 = vld [vmem:[%s11114_s2 + $0xb8] sm:$0xff] }
  0x9e   :  { %v173_v63 = vpop.permute.xlu1 %172  ;;  %7142 = vmatprep.mubr.msk.f32.mxu0 %vm1946_vm0, %v1693_v55  ;;  %v169_v2 = vpop.permute.xlu0 %168  ;;  %v8014_v55 = vld [vmem:[%s11114_s2 + $0xc0] sm:$0xff] }
  0x9f   :  { %v1695_v5 = vmax.f32 %v1439_v60, 0.0  ;;  %v1186_v8 = vmul.f32 %v7793_v18, %v173_v63  ;;  %v1185_v9 = vmul.f32 %v7793_v18, %v169_v2  ;;  %v1696_v14 = vmax.f32 %v1440_v61, 0.0  ;;  %v8020_v61 = vld [vmem:[%s11114_s2 + $0xc8] sm:$0xff] }
  0xa0   :  { %338 = vbcast.lane.b32.xlu1 %v7784_v17, 344  ;;  %732 = vbcast.lane.b32.xlu0 %v7797_v19, 328 }
  0xa1   :  { %v1441_v12 = vadd.f32 %v1185_v9, %v7961_v0  ;;  %7143 = vmatmul.mubr.msk.f32.gmra.mrb[14].mxu0 %vm1946_vm0, %v1694_v3  ;;  %v1442_v27 = vadd.f32 %v1186_v8, %v7968_v10  ;;  %v8027_v3 = vsub.s32 2, %v7733_v1 }
  0xa2   :  { %v181_v21 = vpop.permute.xlu1 %180  ;;  %7145 = vmatprep.mubr.msk.f32.mxu0 %vm1946_vm0, %v1695_v5  ;;  %v177_v24 = vpop.permute.xlu0 %176 }
  0xa3   :  { %v1697_v29 = vmax.f32 %v1441_v12, 0.0  ;;  %v1188_v32 = vmul.f32 %v7793_v18, %v181_v21  ;;  %v1187_v33 = vmul.f32 %v7793_v18, %v177_v24  ;;  %v1698_v43 = vmax.f32 %v1442_v27, 0.0  ;;  %v8036_v12 = vld [vmem:[%s11114_s2 + $0xd0] sm:$0xff] }
  0xa4   :  { %342 = vbcast.lane.b32.xlu1 %v7784_v17, 352  ;;  %736 = vbcast.lane.b32.xlu0 %v7797_v19, 336 }
  0xa5   :  { %v1443_v35 = vadd.f32 %v1187_v33, %v7978_v23  ;;  %7146 = vmatmul.mubr.msk.f32.gmra.mrb[16].mxu0 %vm1946_vm0, %v1696_v14  ;;  %v1444_v36 = vadd.f32 %v1188_v32, %v7984_v30  ;;  %v8043_v32 = vld [vmem:[%s11114_s2 + $0xd8] sm:$0xff]  ;;  %v8049_v33 = vrot.slane %v7744_v4, %v8027_v3 }
  0xa6   :  { %v189_v38 = vpop.permute.xlu1 %188  ;;  %7148 = vmatprep.mubr.msk.f32.mxu0 %vm1946_vm0, %v1697_v29  ;;  %v185_v42 = vpop.permute.xlu0 %184 }
  0xa7   :  { %v1699_v44 = vmax.f32 %v1443_v35, 0.0  ;;  %v1190_v45 = vmul.f32 %v7793_v18, %v189_v38  ;;  %v1189_v47 = vmul.f32 %v7793_v18, %v185_v42  ;;  %v1700_v52 = vmax.f32 %v1444_v36, 0.0  ;;  %v8057_v42 = vld [vmem:[%s11114_s2 + $0xe0] sm:$0xff] }
  0xa8   :  { %346 = vbcast.lane.b32.xlu1 %v7784_v17, 360  ;;  %740 = vbcast.lane.b32.xlu0 %v7797_v19, 344 }
  0xa9   :  { %v1445_v50 = vadd.f32 %v1189_v47, %v7997_v40  ;;  %7149 = vmatmul.mubr.msk.f32.gmra.mrb[18].mxu0 %vm1946_vm0, %v1698_v43  ;;  %v1446_v59 = vadd.f32 %v1190_v45, %v8004_v49  ;;  %v8063_v45 = vld [vmem:[%s11114_s2 + $0xe8] sm:$0xff] }
  0xaa   :  { %v197_v53 = vpop.permute.xlu1 %196  ;;  %7151 = vmatprep.mubr.msk.f32.mxu0 %vm1946_vm0, %v1699_v44  ;;  %v193_v57 = vpop.permute.xlu0 %192 }
  0xab   :  { %v1701_v60 = vmax.f32 %v1445_v50, 0.0  ;;  %v1192_v63 = vmul.f32 %v7793_v18, %v197_v53  ;;  %v1191_v2 = vmul.f32 %v7793_v18, %v193_v57  ;;  %v1702_v21 = vmax.f32 %v1446_v59, 0.0 }
  0xac   :  { %350 = vbcast.lane.b32.xlu1 %v7784_v17, 368  ;;  %744 = vbcast.lane.b32.xlu0 %v7797_v19, 352 }
  0xad   :  { %v1447_v5 = vadd.f32 %v1191_v2, %v8014_v55  ;;  %7152 = vmatmul.mubr.msk.f32.gmra.mrb[20].mxu0 %vm1946_vm0, %v1700_v52  ;;  %v1448_v8 = vadd.f32 %v1192_v63, %v8020_v61  ;;  %v8070_v52 = vsub.s32 5, %v7733_v1 }
  0xae   :  { %v205_v9 = vpop.permute.xlu1 %204  ;;  %7154 = vmatprep.mubr.msk.f32.mxu0 %vm1946_vm0, %v1701_v60  ;;  %v201_v14 = vpop.permute.xlu0 %200  ;;  %v8079_v60 = vld [vmem:[%s11114_s2 + $0xf0] sm:$0xff] }
  0xaf   :  { %v1703_v24 = vmax.f32 %v1447_v5, 0.0  ;;  %v1194_v27 = vmul.f32 %v7793_v18, %v205_v9  ;;  %v1193_v29 = vmul.f32 %v7793_v18, %v201_v14  ;;  %v1704_v36 = vmax.f32 %v1448_v8, 0.0  ;;  %11131 = vst [vmem:[#allocation4_spill] sm:$0xff] %v8070_v52  ;;  %v8086_v14 = vld [vmem:[%s11114_s2 + $0xf8] sm:$0xff] }
  0xb0   :  { %354 = vbcast.lane.b32.xlu1 %v7784_v17, 376  ;;  %748 = vbcast.lane.b32.xlu0 %v7797_v19, 360 }
  0xb1   :  { %v1449_v35 = vadd.f32 %v1193_v29, %v8036_v12  ;;  %7155 = vmatmul.mubr.msk.f32.gmra.mrb[22].mxu0 %vm1946_vm0, %v1702_v21  ;;  %v1450_v43 = vadd.f32 %v1194_v27, %v8043_v32  ;;  %v8092_v21 = vrot.slane %v7744_v4, %v8070_v52 }
  0xb2   :  { %v213_v38 = vpop.permute.xlu1 %212  ;;  %7157 = vmatprep.mubr.msk.f32.mxu0 %vm1946_vm0, %v1703_v24  ;;  %v209_v17 = vpop.permute.xlu0 %208 }
  0xb3   :  { %v1705_v44 = vmax.f32 %v1449_v35, 0.0  ;;  %v1196_v47 = vmul.f32 %v7793_v18, %v213_v38  ;;  %v1195_v50 = vmul.f32 %v7793_v18, %v209_v17  ;;  %v1706_v2 = vmax.f32 %v1450_v43, 0.0 }
  0xb4   :  { %361 = vbcast.lane.b32.xlu1 %v8049_v33, 256  ;;  %752 = vbcast.lane.b32.xlu0 %v7797_v19, 368 }
  0xb5   :  { %v1451_v53 = vadd.f32 %v1195_v50, %v8057_v42  ;;  %7158 = vmatmul.mubr.msk.f32.gmra.mrb[24].mxu0 %vm1946_vm0, %v1704_v36  ;;  %v1452_v57 = vadd.f32 %v1196_v47, %v8063_v45 }
  0xb6   :  { %v221_v59 = vpop.permute.xlu1 %220  ;;  %7160 = vmatprep.mubr.msk.f32.mxu0 %vm1946_vm0, %v1705_v44  ;;  %v217_v63 = vpop.permute.xlu0 %216 }
  0xb7   :  { %v1707_v5 = vmax.f32 %v1451_v53, 0.0  ;;  %v1198_v8 = vmul.f32 %v7793_v18, %v221_v59  ;;  %v1197_v9 = vmul.f32 %v7793_v18, %v217_v63  ;;  %v1708_v27 = vmax.f32 %v1452_v57, 0.0 }
  0xb8   :  { %365 = vbcast.lane.b32.xlu1 %v8049_v33, 264  ;;  %756 = vbcast.lane.b32.xlu0 %v7797_v19, 376 }
  0xb9   :  { %v1453_v24 = vadd.f32 %v1197_v9, %v8079_v60  ;;  %7161 = vmatmul.mubr.msk.f32.gmra.mrb[26].mxu0 %vm1946_vm0, %v1706_v2  ;;  %v1454_v36 = vadd.f32 %v1198_v8, %v8086_v14 }
  0xba   :  { %v232_v29 = vpop.permute.xlu1 %231  ;;  %7163 = vmatprep.mubr.msk.f32.mxu0 %vm1946_vm0, %v1707_v5  ;;  %v228_v35 = vpop.permute.xlu0 %227 }
  0xbb   :  { %v1709_v38 = vmax.f32 %v1453_v24, 0.0  ;;  %v1200_v17 = vmul.f32 %v7793_v18, %v232_v29  ;;  %v1199_v19 = vmul.f32 %v7793_v18, %v228_v35  ;;  %v1710_v50 = vmax.f32 %v1454_v36, 0.0 }
  0xbc   :  { %369 = vbcast.lane.b32.xlu1 %v8049_v33, 272  ;;  %763 = vbcast.lane.b32.xlu0 %v8092_v21, 256 }
  0xbd   :  { %v1455_v4 = vadd.f32 %v1199_v19, %v7802_v22  ;;  %7164 = vmatmul.mubr.msk.f32.gmra.mrb[28].mxu0 %vm1946_vm0, %v1708_v27  ;;  %v1456_v43 = vadd.f32 %v1200_v17, %v7817_v28 }
  0xbe   :  { %v240_v44 = vpop.permute.xlu1 %239  ;;  %7166 = vmatprep.mubr.msk.f32.mxu0 %vm1946_vm0, %v1709_v38  ;;  %v236_v47 = vpop.permute.xlu0 %235 }
  0xbf   :  { %v1711_v53 = vmax.f32 %v1455_v4, 0.0  ;;  %v1202_v57 = vmul.f32 %v7793_v18, %v240_v44  ;;  %v1201_v59 = vmul.f32 %v7793_v18, %v236_v47  ;;  %v1712_v63 = vmax.f32 %v1456_v43, 0.0 }
  0xc0   :  { %373 = vbcast.lane.b32.xlu1 %v8049_v33, 280  ;;  %767 = vbcast.lane.b32.xlu0 %v8092_v21, 264 }
  0xc1   :  { %v1457_v22 = vadd.f32 %v1201_v59, %v7811_v25  ;;  %7167 = vmatmul.mubr.msk.f32.gmra.mrb[30].mxu0 %vm1946_vm0, %v1710_v50  ;;  %v1458_v5 = vadd.f32 %v1202_v57, %v7825_v34 }
  0xc2   :  { %v248_v28 = vpop.permute.xlu1 %247  ;;  %7169 = vmatprep.mubr.msk.f32.mxu0 %vm1946_vm0, %v1711_v53  ;;  %v244_v2 = vpop.permute.xlu0 %243 }
  0xc3   :  { %v1713_v8 = vmax.f32 %v1457_v22, 0.0  ;;  %v1204_v9 = vmul.f32 %v7793_v18, %v248_v28  ;;  %v1203_v24 = vmul.f32 %v7793_v18, %v244_v2  ;;  %v1714_v34 = vmax.f32 %v1458_v5, 0.0 }
  0xc4   :  { %377 = vbcast.lane.b32.xlu1 %v8049_v33, 288  ;;  %771 = vbcast.lane.b32.xlu0 %v8092_v21, 272 }
  0xc5   :  { %v1459_v25 = vadd.f32 %v1203_v24, %v7834_v37  ;;  %7170 = vmatmul.mubr.msk.f32.gmra.mrb[32].mxu0 %vm1946_vm0, %v1712_v63  ;;  %v1460_v27 = vadd.f32 %v1204_v9, %v7840_v41 }
  0xc6   :  { %v256_v29 = vpop.permute.xlu1 %255  ;;  %7172 = vmatprep.mubr.msk.f32.mxu0 %vm1946_vm0, %v1713_v8  ;;  %v252_v35 = vpop.permute.xlu0 %251 }
  0xc7   :  { %v1715_v36 = vmax.f32 %v1459_v25, 0.0  ;;  %v1206_v38 = vmul.f32 %v7793_v18, %v256_v29  ;;  %v1205_v17 = vmul.f32 %v7793_v18, %v252_v35  ;;  %v1716_v19 = vmax.f32 %v1460_v27, 0.0 }
  0xc8   :  { %381 = vbcast.lane.b32.xlu1 %v8049_v33, 296  ;;  %775 = vbcast.lane.b32.xlu0 %v8092_v21, 280 }
  0xc9   :  { %v1461_v37 = vadd.f32 %v1205_v17, %v7853_v48  ;;  %7173 = vmatmul.mubr.msk.f32.gmra.mrb[34].mxu0 %vm1946_vm0, %v1714_v34  ;;  %v1462_v43 = vadd.f32 %v1206_v38, %v7860_v54 }
  0xca   :  { %v264_v41 = vpop.permute.xlu1 %263  ;;  %7175 = vmatprep.mubr.msk.f32.mxu0 %vm1946_vm0, %v1715_v36  ;;  %v260_v4 = vpop.permute.xlu0 %259 }
  0xcb   :  { %v1717_v44 = vmax.f32 %v1461_v37, 0.0  ;;  %v1208_v47 = vmul.f32 %v7793_v18, %v264_v41  ;;  %v1207_v50 = vmul.f32 %v7793_v18, %v260_v4  ;;  %v1718_v54 = vmax.f32 %v1462_v43, 0.0 }
  0xcc   :  { %385 = vbcast.lane.b32.xlu1 %v8049_v33, 304  ;;  %779 = vbcast.lane.b32.xlu0 %v8092_v21, 288 }
  0xcd   :  { %v1463_v48 = vadd.f32 %v1207_v50, %v7870_v58  ;;  %7176 = vmatmul.mubr.msk.f32.gmra.mrb[36].mxu0 %vm1946_vm0, %v1716_v19  ;;  %v1464_v53 = vadd.f32 %v1208_v47, %v7876_v62 }
  0xce   :  { %v268_v57 = vpop.permute.xlu1 %267  ;;  %7178 = vmatprep.mubr.msk.f32.mxu0 %vm1946_vm0, %v1717_v44  ;;  %v662_v59 = vpop.permute.xlu0 %661 }
  0xcf   :  { %v1719_v22 = vmax.f32 %v1463_v48, 0.0  ;;  %v1209_v63 = vmul.f32 %v7793_v18, %v268_v57  ;;  %v1303_v28 = vmul.f32 %v7793_v18, %v662_v59  ;;  %v1720_v8 = vmax.f32 %v1464_v53, 0.0 }
  0xd0   :  { %389 = vbcast.lane.b32.xlu1 %v8049_v33, 312  ;;  %783 = vbcast.lane.b32.xlu0 %v8092_v21, 296 }
  0xd1   :  { %v1465_v2 = vadd.f32 %v1209_v63, %v7889_v6  ;;  %7179 = vmatmul.mubr.msk.f32.gmra.mrb[38].mxu0 %vm1946_vm0, %v1718_v54  ;;  %v1559_v5 = vadd.f32 %v1303_v28, %v7870_v58 }
  0xd2   :  { %v272_v9 = vpop.permute.xlu1 %271  ;;  %7181 = vmatprep.mubr.msk.f32.mxu0 %vm1946_vm0, %v1719_v22  ;;  %v666_v24 = vpop.permute.xlu0 %665 }
  0xd3   :  { %v1721_v25 = vmax.f32 %v1465_v2, 0.0  ;;  %v1210_v27 = vmul.f32 %v7793_v18, %v272_v9  ;;  %v1304_v29 = vmul.f32 %v7793_v18, %v666_v24  ;;  %v1815_v35 = vmax.f32 %v1559_v5, 0.0 }
  0xd4   :  { %393 = vbcast.lane.b32.xlu1 %v8049_v33, 320  ;;  %787 = vbcast.lane.b32.xlu0 %v8092_v21, 304 }
  0xd5   :  { %v1466_v34 = vadd.f32 %v1210_v27, %v7896_v20  ;;  %v1560_v36 = vadd.f32 %v1304_v29, %v7876_v62  ;;  %7182 = vmatmul.mubr.msk.f32.gmra.mrb[40].mxu0 %vm1946_vm0, %v1720_v8  ;;  %7325 = vmatprep.mubr.msk.f32.mxu1 %vm1946_vm0, %v1815_v35 }
  0xd6   :  { %v276_v58 = vpop.permute.xlu1 %275  ;;  %7184 = vmatprep.mubr.msk.f32.mxu0 %vm1946_vm0, %v1721_v25  ;;  %v670_v38 = vpop.permute.xlu0 %669 }
  0xd7   :  { %v1722_v17 = vmax.f32 %v1466_v34, 0.0  ;;  %v1816_v37 = vmax.f32 %v1560_v36, 0.0  ;;  %v1211_v19 = vmul.f32 %v7793_v18, %v276_v58  ;;  %v1305_v41 = vmul.f32 %v7793_v18, %v670_v38 }
  0xd8   :  { %397 = vbcast.lane.b32.xlu1 %v8049_v33, 328  ;;  %791 = vbcast.lane.b32.xlu0 %v8092_v21, 312 }
  0xd9   :  { %v1467_v62 = vadd.f32 %v1211_v19, %v7906_v26  ;;  %v1561_v4 = vadd.f32 %v1305_v41, %v7889_v6  ;;  %7185 = vmatmul.mubr.msk.f32.gmra.mrb[42].mxu0 %vm1946_vm0, %v1722_v17  ;;  %7326 = vmatmul.mubr.msk.f32.vlgmr.msra.gmra.mrb[0].mxu1 %vm1946_vm0, %v1816_v37 }
  0xda   :  { %v280_v43 = vpop.permute.xlu1 %279  ;;  %v674_v44 = vpop.permute.xlu0 %673 }
  0xdb   :  { %v1723_v47 = vmax.f32 %v1467_v62, 0.0  ;;  %v1817_v50 = vmax.f32 %v1561_v4, 0.0  ;;  %v1212_v48 = vmul.f32 %v7793_v18, %v280_v43  ;;  %v1306_v53 = vmul.f32 %v7793_v18, %v674_v44 }
  0xdc   :  { %401 = vbcast.lane.b32.xlu1 %v8049_v33, 336  ;;  %795 = vbcast.lane.b32.xlu0 %v8092_v21, 320 }
  0xdd   :  { %v1468_v57 = vadd.f32 %v1212_v48, %v7912_v31  ;;  %v1562_v6 = vadd.f32 %v1306_v53, %v7896_v20  ;;  %7328 = vmatprep.mubr.msk.f32.mxu1 %vm1946_vm0, %v1817_v50  ;;  %7187 = vmatprep.mubr.msk.f32.mxu0 %vm1946_vm0, %v1723_v47 }
  0xde   :  { %v284_v59 = vpop.permute.xlu1 %283  ;;  %v678_v54 = vpop.permute.xlu0 %677 }
  0xdf   :  { %v1724_v22 = vmax.f32 %v1468_v57, 0.0  ;;  %v1818_v63 = vmax.f32 %v1562_v6, 0.0  ;;  %v1213_v28 = vmul.f32 %v7793_v18, %v284_v59  ;;  %v1307_v2 = vmul.f32 %v7793_v18, %v678_v54 }
  0xe0   :  { %405 = vbcast.lane.b32.xlu1 %v8049_v33, 344  ;;  %799 = vbcast.lane.b32.xlu0 %v8092_v21, 328 }
  0xe1   :  { %v1469_v5 = vadd.f32 %v1213_v28, %v7925_v39  ;;  %v1563_v20 = vadd.f32 %v1307_v2, %v7906_v26  ;;  %7188 = vmatmul.mubr.msk.f32.gmra.mrb[44].mxu0 %vm1946_vm0, %v1724_v22  ;;  %7329 = vmatmul.mubr.msk.f32.gmra.mrb[2].mxu1 %vm1946_vm0, %v1818_v63  ;;  %v8209_v22 = vrot.slane %v7760_v11, %v8027_v3 }
  0xe2   :  { %v288_v8 = vpop.permute.xlu1 %287  ;;  %v682_v9 = vpop.permute.xlu0 %681 }
  0xe3   :  { %v1725_v24 = vmax.f32 %v1469_v5, 0.0  ;;  %v1819_v25 = vmax.f32 %v1563_v20, 0.0  ;;  %v1214_v27 = vmul.f32 %v7793_v18, %v288_v8  ;;  %v1308_v29 = vmul.f32 %v7793_v18, %v682_v9 }
  0xe4   :  { %409 = vbcast.lane.b32.xlu1 %v8049_v33, 352  ;;  %803 = vbcast.lane.b32.xlu0 %v8092_v21, 336 }
  0xe5   :  { %v1470_v35 = vadd.f32 %v1214_v27, %v7932_v46  ;;  %v1564_v26 = vadd.f32 %v1308_v29, %v7912_v31  ;;  %7331 = vmatprep.mubr.msk.f32.mxu1 %vm1946_vm0, %v1819_v25  ;;  %7190 = vmatprep.mubr.msk.f32.mxu0 %vm1946_vm0, %v1725_v24 }
  0xe6   :  { %v295_v34 = vpop.permute.xlu1 %294  ;;  %v686_v36 = vpop.permute.xlu0 %685 }
  0xe7   :  { %v1726_v58 = vmax.f32 %v1470_v35, 0.0  ;;  %v1820_v38 = vmax.f32 %v1564_v26, 0.0  ;;  %v1215_v17 = vmul.f32 %v7793_v18, %v295_v34  ;;  %v1309_v37 = vmul.f32 %v7793_v18, %v686_v36 }
  0xe8   :  { %413 = vbcast.lane.b32.xlu1 %v8049_v33, 360  ;;  %807 = vbcast.lane.b32.xlu0 %v8092_v21, 344  ;;  %v8229_v34 = vrot.slane %v7760_v11, %v8070_v52 }
  0xe9   :  { %v1471_v19 = vadd.f32 %v1215_v17, %v7942_v51  ;;  %v1565_v31 = vadd.f32 %v1309_v37, %v7925_v39  ;;  %7191 = vmatmul.mubr.msk.f32.gmra.mrb[46].mxu0 %vm1946_vm0, %v1726_v58  ;;  %7332 = vmatmul.mubr.msk.f32.gmra.mrb[4].mxu1 %vm1946_vm0, %v1820_v38 }
  0xea   :  { %v299_v41 = vpop.permute.xlu1 %298  ;;  %v690_v62 = vpop.permute.xlu0 %689 }
  0xeb   :  { %v1727_v4 = vmax.f32 %v1471_v19, 0.0  ;;  %v1821_v43 = vmax.f32 %v1565_v31, 0.0  ;;  %v1216_v44 = vmul.f32 %v7793_v18, %v299_v41  ;;  %v1310_v47 = vmul.f32 %v7793_v18, %v690_v62 }
  0xec   :  { %417 = vbcast.lane.b32.xlu1 %v8049_v33, 368  ;;  %811 = vbcast.lane.b32.xlu0 %v8092_v21, 352 }
  0xed   :  { %v1472_v50 = vadd.f32 %v1216_v44, %v7948_v56  ;;  %v1566_v39 = vadd.f32 %v1310_v47, %v7932_v46  ;;  %7334 = vmatprep.mubr.msk.f32.mxu1 %vm1946_vm0, %v1821_v43  ;;  %7193 = vmatprep.mubr.msk.f32.mxu0 %vm1946_vm0, %v1727_v4 }
  0xee   :  { %v303_v48 = vpop.permute.xlu1 %302  ;;  %v697_v53 = vpop.permute.xlu0 %696 }
  0xef   :  { %v1728_v57 = vmax.f32 %v1472_v50, 0.0  ;;  %v1822_v6 = vmax.f32 %v1566_v39, 0.0  ;;  %v1217_v59 = vmul.f32 %v7793_v18, %v303_v48  ;;  %v1311_v54 = vmul.f32 %v7793_v18, %v697_v53 }
  0xf0   :  { %421 = vbcast.lane.b32.xlu1 %v8049_v33, 376  ;;  %815 = vbcast.lane.b32.xlu0 %v8092_v21, 360 }
  0xf1   :  { %v1473_v46 = vadd.f32 %v1217_v59, %v7961_v0  ;;  %v1567_v63 = vadd.f32 %v1311_v54, %v7942_v51  ;;  %7194 = vmatmul.mubr.msk.f32.gmra.mrb[48].mxu0 %vm1946_vm0, %v1728_v57  ;;  %7335 = vmatmul.mubr.msk.f32.gmra.mrb[6].mxu1 %vm1946_vm0, %v1822_v6 }
  0xf2   :  { %v307_v28 = vpop.permute.xlu1 %306  ;;  %v701_v2 = vpop.permute.xlu0 %700 }
  0xf3   :  { %v1729_v5 = vmax.f32 %v1473_v46, 0.0  ;;  %v1823_v20 = vmax.f32 %v1567_v63, 0.0  ;;  %v1218_v33 = vmul.f32 %v7793_v18, %v307_v28  ;;  %v1312_v8 = vmul.f32 %v7793_v18, %v701_v2 }
  0xf4   :  { %428 = vbcast.lane.b32.xlu1 %v8209_v22, 256  ;;  %819 = vbcast.lane.b32.xlu0 %v8092_v21, 368 }
  0xf5   :  { %v1474_v9 = vadd.f32 %v1218_v33, %v7968_v10  ;;  %v1568_v51 = vadd.f32 %v1312_v8, %v7948_v56  ;;  %7337 = vmatprep.mubr.msk.f32.mxu1 %vm1946_vm0, %v1823_v20  ;;  %7196 = vmatprep.mubr.msk.f32.mxu0 %vm1946_vm0, %v1729_v5 }
  0xf6   :  { %v311_v24 = vpop.permute.xlu1 %310  ;;  %v705_v25 = vpop.permute.xlu0 %704 }
  0xf7   :  { %v1730_v27 = vmax.f32 %v1474_v9, 0.0  ;;  %v1824_v29 = vmax.f32 %v1568_v51, 0.0  ;;  %v1219_v35 = vmul.f32 %v7793_v18, %v311_v24  ;;  %v1313_v26 = vmul.f32 %v7793_v18, %v705_v25 }
  0xf8   :  { %432 = vbcast.lane.b32.xlu1 %v8209_v22, 264  ;;  %823 = vbcast.lane.b32.xlu0 %v8092_v21, 376 }
  0xf9   :  { %v1475_v56 = vadd.f32 %v1219_v35, %v7978_v23  ;;  %v1569_v36 = vadd.f32 %v1313_v26, %v7961_v0  ;;  %7197 = vmatmul.mubr.msk.f32.gmra.mrb[50].mxu0 %vm1946_vm0, %v1730_v27  ;;  %7338 = vmatmul.mubr.msk.f32.gmra.mrb[8].mxu1 %vm1946_vm0, %v1824_v29 }
  0xfa   :  { %v315_v58 = vpop.permute.xlu1 %314  ;;  %v709_v38 = vpop.permute.xlu0 %708 }
  0xfb   :  { %v1731_v17 = vmax.f32 %v1475_v56, 0.0  ;;  %v1825_v37 = vmax.f32 %v1569_v36, 0.0  ;;  %v1220_v19 = vmul.f32 %v7793_v18, %v315_v58  ;;  %v1314_v21 = vmul.f32 %v7793_v18, %v709_v38 }
  0xfc   :  { %436 = vbcast.lane.b32.xlu1 %v8209_v22, 272  ;;  %830 = vbcast.lane.b32.xlu0 %v8229_v34, 256 }
  0xfd   :  { %v1476_v11 = vadd.f32 %v1220_v19, %v7984_v30  ;;  %v1570_v0 = vadd.f32 %v1314_v21, %v7968_v10  ;;  %7340 = vmatprep.mubr.msk.f32.mxu1 %vm1946_vm0, %v1825_v37  ;;  %7199 = vmatprep.mubr.msk.f32.mxu0 %vm1946_vm0, %v1731_v17 }
  0xfe   :  { %v319_v31 = vpop.permute.xlu1 %318  ;;  %v713_v41 = vpop.permute.xlu0 %712 }
  0xff   :  { %v1732_v62 = vmax.f32 %v1476_v11, 0.0  ;;  %v1826_v4 = vmax.f32 %v1570_v0, 0.0  ;;  %v1221_v43 = vmul.f32 %v7793_v18, %v319_v31  ;;  %v1315_v44 = vmul.f32 %v7793_v18, %v713_v41 }
 0x100   :  { %440 = vbcast.lane.b32.xlu1 %v8209_v22, 280  ;;  %834 = vbcast.lane.b32.xlu0 %v8229_v34, 264 }
 0x101   :  { %v1477_v47 = vadd.f32 %v1221_v43, %v7997_v40  ;;  %v1571_v10 = vadd.f32 %v1315_v44, %v7978_v23  ;;  %7200 = vmatmul.mubr.msk.f32.gmra.mrb[52].mxu0 %vm1946_vm0, %v1732_v62  ;;  %7341 = vmatmul.mubr.msk.f32.gmra.mrb[10].mxu1 %vm1946_vm0, %v1826_v4 }
 0x102   :  { %v323_v50 = vpop.permute.xlu1 %322  ;;  %v717_v39 = vpop.permute.xlu0 %716 }
 0x103   :  { %v1733_v48 = vmax.f32 %v1477_v47, 0.0  ;;  %v1827_v53 = vmax.f32 %v1571_v10, 0.0  ;;  %v1222_v57 = vmul.f32 %v7793_v18, %v323_v50  ;;  %v1316_v6 = vmul.f32 %v7793_v18, %v717_v39 }
 0x104   :  { %444 = vbcast.lane.b32.xlu1 %v8209_v22, 288  ;;  %838 = vbcast.lane.b32.xlu0 %v8229_v34, 272 }
 0x105   :  { %v1478_v59 = vadd.f32 %v1222_v57, %v8004_v49  ;;  %v1572_v23 = vadd.f32 %v1316_v6, %v7984_v30  ;;  %7343 = vmatprep.mubr.msk.f32.mxu1 %vm1946_vm0, %v1827_v53  ;;  %7202 = vmatprep.mubr.msk.f32.mxu0 %vm1946_vm0, %v1733_v48 }
 0x106   :  { %v327_v54 = vpop.permute.xlu1 %326  ;;  %v721_v46 = vpop.permute.xlu0 %720 }
 0x107   :  { %v1734_v63 = vmax.f32 %v1478_v59, 0.0  ;;  %v1828_v28 = vmax.f32 %v1572_v23, 0.0  ;;  %v1223_v2 = vmul.f32 %v7793_v18, %v327_v54  ;;  %v1317_v5 = vmul.f32 %v7793_v18, %v721_v46 }
 0x108   :  { %448 = vbcast.lane.b32.xlu1 %v8209_v22, 296  ;;  %842 = vbcast.lane.b32.xlu0 %v8229_v34, 280 }
 0x109   :  { %v1479_v20 = vadd.f32 %v1223_v2, %v8014_v55  ;;  %v1573_v30 = vadd.f32 %v1317_v5, %v7997_v40  ;;  %7203 = vmatmul.mubr.msk.f32.gmra.mrb[54].mxu0 %vm1946_vm0, %v1734_v63  ;;  %7344 = vmatmul.mubr.msk.f32.gmra.mrb[12].mxu1 %vm1946_vm0, %v1828_v28 }
 0x10a   :  { %v331_v33 = vpop.permute.xlu1 %330  ;;  %v725_v8 = vpop.permute.xlu0 %724 }
 0x10b   :  { %v1735_v9 = vmax.f32 %v1479_v20, 0.0  ;;  %v1829_v51 = vmax.f32 %v1573_v30, 0.0  ;;  %v1224_v24 = vmul.f32 %v7793_v18, %v331_v33  ;;  %v1318_v25 = vmul.f32 %v7793_v18, %v725_v8 }
 0x10c   :  { %452 = vbcast.lane.b32.xlu1 %v8209_v22, 304  ;;  %846 = vbcast.lane.b32.xlu0 %v8229_v34, 288 }
 0x10d   :  { %v1480_v27 = vadd.f32 %v1224_v24, %v8020_v61  ;;  %v1574_v40 = vadd.f32 %v1318_v25, %v8004_v49  ;;  %7346 = vmatprep.mubr.msk.f32.mxu1 %vm1946_vm0, %v1829_v51  ;;  %7205 = vmatprep.mubr.msk.f32.mxu0 %vm1946_vm0, %v1735_v9 }
 0x10e   :  { %v335_v29 = vpop.permute.xlu1 %334  ;;  %v729_v35 = vpop.permute.xlu0 %728 }
 0x10f   :  { %v1736_v26 = vmax.f32 %v1480_v27, 0.0  ;;  %v1830_v56 = vmax.f32 %v1574_v40, 0.0  ;;  %v1225_v36 = vmul.f32 %v7793_v18, %v335_v29  ;;  %v1319_v58 = vmul.f32 %v7793_v18, %v729_v35 }
 0x110   :  { %456 = vbcast.lane.b32.xlu1 %v8209_v22, 312  ;;  %850 = vbcast.lane.b32.xlu0 %v8229_v34, 296 }
 0x111   :  { %v1481_v38 = vadd.f32 %v1225_v36, %v8036_v12  ;;  %v1575_v49 = vadd.f32 %v1319_v58, %v8014_v55  ;;  %7206 = vmatmul.mubr.msk.f32.gmra.mrb[56].mxu0 %vm1946_vm0, %v1736_v26  ;;  %7347 = vmatmul.mubr.msk.f32.gmra.mrb[14].mxu1 %vm1946_vm0, %v1830_v56 }
 0x112   :  { %v339_v17 = vpop.permute.xlu1 %338  ;;  %v733_v37 = vpop.permute.xlu0 %732 }
 0x113   :  { %v1737_v19 = vmax.f32 %v1481_v38, 0.0  ;;  %v1831_v21 = vmax.f32 %v1575_v49, 0.0  ;;  %v1226_v11 = vmul.f32 %v7793_v18, %v339_v17  ;;  %v1320_v0 = vmul.f32 %v7793_v18, %v733_v37 }
 0x114   :  { %460 = vbcast.lane.b32.xlu1 %v8209_v22, 320  ;;  %854 = vbcast.lane.b32.xlu0 %v8229_v34, 304 }
 0x115   :  { %v1482_v31 = vadd.f32 %v1226_v11, %v8043_v32  ;;  %v1576_v55 = vadd.f32 %v1320_v0, %v8020_v61  ;;  %7349 = vmatprep.mubr.msk.f32.mxu1 %vm1946_vm0, %v1831_v21  ;;  %7208 = vmatprep.mubr.msk.f32.mxu0 %vm1946_vm0, %v1737_v19  ;;  %v8346_v21 = vsub.s32 3, %v7733_v1 }
 0x116   :  { %v343_v41 = vpop.permute.xlu1 %342  ;;  %v737_v62 = vpop.permute.xlu0 %736 }
 0x117   :  { %v1738_v4 = vmax.f32 %v1482_v31, 0.0  ;;  %v1832_v43 = vmax.f32 %v1576_v55, 0.0  ;;  %v1227_v44 = vmul.f32 %v7793_v18, %v343_v41  ;;  %v1321_v47 = vmul.f32 %v7793_v18, %v737_v62  ;;  %v8302_v18 = vld [vmem:[%s11113_s3] ss:$0 sm:$0xff] }
 0x118   :  { %464 = vbcast.lane.b32.xlu1 %v8209_v22, 328  ;;  %858 = vbcast.lane.b32.xlu0 %v8229_v34, 312 }
 0x119   :  { %v1483_v10 = vadd.f32 %v1227_v44, %v8057_v42  ;;  %v1577_v61 = vadd.f32 %v1321_v47, %v8036_v12  ;;  %7209 = vmatmul.mubr.msk.f32.gmra.mrb[58].mxu0 %vm1946_vm0, %v1738_v4  ;;  %7350 = vmatmul.mubr.msk.f32.gmra.mrb[16].mxu1 %vm1946_vm0, %v1832_v43  ;;  %v8373_v47 = vld [vmem:[%s11114_s2 + $0x10] sm:$0xff] }
 0x11a   :  { %v347_v50 = vpop.permute.xlu1 %346  ;;  %v741_v39 = vpop.permute.xlu0 %740 }
 0x11b   :  { %v1739_v48 = vmax.f32 %v1483_v10, 0.0  ;;  %v1833_v53 = vmax.f32 %v1577_v61, 0.0  ;;  %v1228_v57 = vmul.f32 %v8302_v18, %v347_v50  ;;  %v1322_v6 = vmul.f32 %v8302_v18, %v741_v39 }
 0x11c   :  { %468 = vbcast.lane.b32.xlu1 %v8209_v22, 336  ;;  %862 = vbcast.lane.b32.xlu0 %v8229_v34, 320 }
 0x11d   :  { %v1484_v12 = vadd.f32 %v1228_v57, %v8063_v45  ;;  %v1578_v59 = vadd.f32 %v1322_v6, %v8043_v32  ;;  %7352 = vmatprep.mubr.msk.f32.mxu1 %vm1946_vm0, %v1833_v53  ;;  %7211 = vmatprep.mubr.msk.f32.mxu0 %vm1946_vm0, %v1739_v48  ;;  %v8384_v6 = vsub.s32 6, %v7733_v1 }
 0x11e   :  { %v351_v23 = vpop.permute.xlu1 %350  ;;  %v745_v54 = vpop.permute.xlu0 %744 }
 0x11f   :  { %v1740_v46 = vmax.f32 %v1484_v12, 0.0  ;;  %v1834_v63 = vmax.f32 %v1578_v59, 0.0  ;;  %v1229_v28 = vmul.f32 %v8302_v18, %v351_v23  ;;  %v1323_v2 = vmul.f32 %v8302_v18, %v745_v54  ;;  %11132 = vst [vmem:[#allocation5_spill] sm:$0xff] %v8384_v6  ;;  %v8389_v12 = vld [vmem:[%s11114_s2 + $0x18] sm:$0xff] }
 0x120   :  { %472 = vbcast.lane.b32.xlu1 %v8209_v22, 344  ;;  %866 = vbcast.lane.b32.xlu0 %v8229_v34, 328 }
 0x121   :  { %v1485_v5 = vadd.f32 %v1229_v28, %v8079_v60  ;;  %v1579_v32 = vadd.f32 %v1323_v2, %v8057_v42  ;;  %7212 = vmatmul.mubr.msk.f32.gmra.mrb[60].mxu0 %vm1946_vm0, %v1740_v46  ;;  %7353 = vmatmul.mubr.msk.f32.gmra.mrb[18].mxu1 %vm1946_vm0, %v1834_v63 }
 0x122   :  { %v355_v20 = vpop.permute.xlu1 %354  ;;  %v749_v30 = vpop.permute.xlu0 %748 }
 0x123   :  { %v1741_v33 = vmax.f32 %v1485_v5, 0.0  ;;  %v1835_v8 = vmax.f32 %v1579_v32, 0.0  ;;  %v1230_v9 = vmul.f32 %v8302_v18, %v355_v20  ;;  %v1324_v51 = vmul.f32 %v8302_v18, %v749_v30  ;;  %v8406_v20 = vld [vmem:[%s11114_s2 + $0x20] sm:$0xff] }
 0x124   :  { %476 = vbcast.lane.b32.xlu1 %v8209_v22, 352  ;;  %870 = vbcast.lane.b32.xlu0 %v8229_v34, 336 }
 0x125   :  { %v1486_v24 = vadd.f32 %v1230_v9, %v8086_v14  ;;  %v1580_v42 = vadd.f32 %v1324_v51, %v8063_v45  ;;  %7355 = vmatprep.mubr.msk.f32.mxu1 %vm1946_vm0, %v1835_v8  ;;  %7214 = vmatprep.mubr.msk.f32.mxu0 %vm1946_vm0, %v1741_v33  ;;  %v8335_v45 = vld [vmem:[%s11114_s2] sm:$0xff] }
 0x126   :  { %v362_v25 = vpop.permute.xlu1 %361  ;;  %v753_v27 = vpop.permute.xlu0 %752 }
 0x127   :  { %v1742_v40 = vmax.f32 %v1486_v24, 0.0  ;;  %v1836_v29 = vmax.f32 %v1580_v42, 0.0  ;;  %v1231_v35 = vmul.f32 %v8302_v18, %v362_v25  ;;  %v1325_v26 = vmul.f32 %v8302_v18, %v753_v27  ;;  %v8419_v25 = vld [vmem:[%s11114_s2 + $0x28] sm:$0xff] }
 0x128   :  { %480 = vbcast.lane.b32.xlu1 %v8209_v22, 360  ;;  %874 = vbcast.lane.b32.xlu0 %v8229_v34, 344 }
 0x129   :  { %v1487_v56 = vadd.f32 %v8335_v45, %v1231_v35  ;;  %v1581_v36 = vadd.f32 %v1325_v26, %v8079_v60  ;;  %7215 = vmatmul.mubr.msk.f32.gmra.mrb[62].mxu0 %vm1946_vm0, %v1742_v40  ;;  %7356 = vmatmul.mubr.msk.f32.gmra.mrb[20].mxu1 %vm1946_vm0, %v1836_v29  ;;  %v8351_v60 = vld [vmem:[%s11114_s2 + $0x8] sm:$0xff] }
 0x12a   :  { %v366_v58 = vpop.permute.xlu1 %365  ;;  %v757_v38 = vpop.permute.xlu0 %756 }
 0x12b   :  { %v1743_v49 = vmax.f32 %v1487_v56, 0.0  ;;  %v1837_v17 = vmax.f32 %v1581_v36, 0.0  ;;  %v1232_v37 = vmul.f32 %v8302_v18, %v366_v58  ;;  %v1326_v19 = vmul.f32 %v8302_v18, %v757_v38  ;;  %v8432_v38 = vld [vmem:[%s11114_s2 + $0x30] sm:$0xff] }
 0x12c   :  { %484 = vbcast.lane.b32.xlu1 %v8209_v22, 368  ;;  %878 = vbcast.lane.b32.xlu0 %v8229_v34, 352 }
 0x12d   :  { %v1488_v11 = vadd.f32 %v8351_v60, %v1232_v37  ;;  %v1582_v0 = vadd.f32 %v1326_v19, %v8086_v14  ;;  %7358 = vmatprep.mubr.msk.f32.mxu1 %vm1946_vm0, %v1837_v17  ;;  %7217 = vmatprep.mubr.msk.f32.mxu0 %vm1946_vm0, %v1743_v49  ;;  %v8364_v14 = vld [vmem:[%s11111_s0] sm:$0xff] }
 0x12e   :  { %v370_v31 = vpop.permute.xlu1 %369  ;;  %v764_v55 = vpop.permute.xlu0 %763  ;;  %v8368_v44 = vrot.slane %v8364_v14, %v8346_v21  ;;  %v8401_v32 = vrot.slane %v8364_v14, %v8384_v6 }
 0x12f   :  { %v1744_v41 = vmax.f32 %v1488_v11, 0.0  ;;  %v1838_v62 = vmax.f32 %v1582_v0, 0.0  ;;  %v1233_v4 = vmul.f32 %v8302_v18, %v370_v31  ;;  %v1327_v43 = vmul.f32 %v8302_v18, %v764_v55 }
 0x130   :  { %488 = vbcast.lane.b32.xlu1 %v8209_v22, 376  ;;  %882 = vbcast.lane.b32.xlu0 %v8229_v34, 360 }
 0x131   :  { %v1489_v10 = vadd.f32 %v8373_v47, %v1233_v4  ;;  %v1583_v22 = vadd.f32 %v8335_v45, %v1327_v43  ;;  %7218 = vmatmul.mubr.msk.f32.gmra.mrb[64].mxu0 %vm1946_vm0, %v1744_v41  ;;  %7359 = vmatmul.mubr.msk.f32.gmra.mrb[22].mxu1 %vm1946_vm0, %v1838_v62  ;;  %v8445_v41 = vld [vmem:[%s11114_s2 + $0x38] sm:$0xff] }
 0x132   :  { %v374_v61 = vpop.permute.xlu1 %373  ;;  %v768_v50 = vpop.permute.xlu0 %767 }
 0x133   :  { %v1745_v39 = vmax.f32 %v1489_v10, 0.0  ;;  %v1839_v48 = vmax.f32 %v1583_v22, 0.0  ;;  %v1234_v53 = vmul.f32 %v8302_v18, %v374_v61  ;;  %v1328_v57 = vmul.f32 %v8302_v18, %v768_v50 }
 0x134   :  { %495 = vbcast.lane.b32.xlu1 %v8368_v44, 256  ;;  %886 = vbcast.lane.b32.xlu0 %v8229_v34, 368 }
 0x135   :  { %v1490_v59 = vadd.f32 %v8389_v12, %v1234_v53  ;;  %v1584_v23 = vadd.f32 %v8351_v60, %v1328_v57  ;;  %7361 = vmatprep.mubr.msk.f32.mxu1 %vm1946_vm0, %v1839_v48  ;;  %7220 = vmatprep.mubr.msk.f32.mxu0 %vm1946_vm0, %v1745_v39  ;;  %v8458_v48 = vld [vmem:[%s11114_s2 + $0x40] sm:$0xff] }
 0x136   :  { %v378_v54 = vpop.permute.xlu1 %377  ;;  %v772_v46 = vpop.permute.xlu0 %771 }
 0x137   :  { %v1746_v63 = vmax.f32 %v1490_v59, 0.0  ;;  %v1840_v28 = vmax.f32 %v1584_v23, 0.0  ;;  %v1235_v2 = vmul.f32 %v8302_v18, %v378_v54  ;;  %v1329_v5 = vmul.f32 %v8302_v18, %v772_v46 }
 0x138   :  { %499 = vbcast.lane.b32.xlu1 %v8368_v44, 264  ;;  %890 = vbcast.lane.b32.xlu0 %v8229_v34, 376 }
 0x139   :  { %v1491_v30 = vadd.f32 %v8406_v20, %v1235_v2  ;;  %v1585_v33 = vadd.f32 %v8373_v47, %v1329_v5  ;;  %7221 = vmatmul.mubr.msk.f32.gmra.mrb[66].mxu0 %vm1946_vm0, %v1746_v63  ;;  %7362 = vmatmul.mubr.msk.f32.gmra.mrb[24].mxu1 %vm1946_vm0, %v1840_v28  ;;  %v8471_v2 = vld [vmem:[%s11114_s2 + $0x48] sm:$0xff] }
 0x13a   :  { %v382_v8 = vpop.permute.xlu1 %381  ;;  %v776_v9 = vpop.permute.xlu0 %775 }
 0x13b   :  { %v1747_v34 = vmax.f32 %v1491_v30, 0.0  ;;  %v1841_v51 = vmax.f32 %v1585_v33, 0.0  ;;  %v1236_v24 = vmul.f32 %v8302_v18, %v382_v8  ;;  %v1330_v42 = vmul.f32 %v8302_v18, %v776_v9 }
 0x13c   :  { %503 = vbcast.lane.b32.xlu1 %v8368_v44, 272  ;;  %897 = vbcast.lane.b32.xlu0 %v8401_v32, 256 }
 0x13d   :  { %v1492_v27 = vadd.f32 %v8419_v25, %v1236_v24  ;;  %v1586_v40 = vadd.f32 %v8389_v12, %v1330_v42  ;;  %7364 = vmatprep.mubr.msk.f32.mxu1 %vm1946_vm0, %v1841_v51  ;;  %7223 = vmatprep.mubr.msk.f32.mxu0 %vm1946_vm0, %v1747_v34  ;;  %v8484_v42 = vld [vmem:[%s11114_s2 + $0x50] sm:$0xff] }
 0x13e   :  { %v386_v29 = vpop.permute.xlu1 %385  ;;  %v780_v35 = vpop.permute.xlu0 %779 }
 0x13f   :  { %v1748_v26 = vmax.f32 %v1492_v27, 0.0  ;;  %v1842_v56 = vmax.f32 %v1586_v40, 0.0  ;;  %v1237_v36 = vmul.f32 %v8302_v18, %v386_v29  ;;  %v1331_v58 = vmul.f32 %v8302_v18, %v780_v35 }
 0x140   :  { %507 = vbcast.lane.b32.xlu1 %v8368_v44, 280  ;;  %901 = vbcast.lane.b32.xlu0 %v8401_v32, 264 }
 0x141   :  { %v1493_v49 = vadd.f32 %v8432_v38, %v1237_v36  ;;  %v1587_v17 = vadd.f32 %v8406_v20, %v1331_v58  ;;  %7224 = vmatmul.mubr.msk.f32.gmra.mrb[68].mxu0 %vm1946_vm0, %v1748_v26  ;;  %7365 = vmatmul.mubr.msk.f32.gmra.mrb[26].mxu1 %vm1946_vm0, %v1842_v56 }
 0x142   :  { %v390_v37 = vpop.permute.xlu1 %389  ;;  %v784_v19 = vpop.permute.xlu0 %783 }
 0x143   :  { %v1749_v11 = vmax.f32 %v1493_v49, 0.0  ;;  %v1843_v0 = vmax.f32 %v1587_v17, 0.0  ;;  %v1238_v31 = vmul.f32 %v8302_v18, %v390_v37  ;;  %v1332_v55 = vmul.f32 %v8302_v18, %v784_v19  ;;  %v8497_v49 = vld [vmem:[%s11114_s2 + $0x58] sm:$0xff] }
 0x144   :  { %511 = vbcast.lane.b32.xlu1 %v8368_v44, 288  ;;  %905 = vbcast.lane.b32.xlu0 %v8401_v32, 272 }
 0x145   :  { %v1494_v62 = vadd.f32 %v8445_v41, %v1238_v31  ;;  %v1588_v4 = vadd.f32 %v8419_v25, %v1332_v55  ;;  %7367 = vmatprep.mubr.msk.f32.mxu1 %vm1946_vm0, %v1843_v0  ;;  %7226 = vmatprep.mubr.msk.f32.mxu0 %vm1946_vm0, %v1749_v11 }
 0x146   :  { %v394_v43 = vpop.permute.xlu1 %393  ;;  %v788_v10 = vpop.permute.xlu0 %787 }
 0x147   :  { %v1750_v22 = vmax.f32 %v1494_v62, 0.0  ;;  %v1844_v61 = vmax.f32 %v1588_v4, 0.0  ;;  %v1239_v50 = vmul.f32 %v8302_v18, %v394_v43  ;;  %v1333_v39 = vmul.f32 %v8302_v18, %v788_v10  ;;  %v8512_v43 = vld [vmem:[%s11114_s2 + $0x60] sm:$0xff] }
 0x148   :  { %515 = vbcast.lane.b32.xlu1 %v8368_v44, 296  ;;  %909 = vbcast.lane.b32.xlu0 %v8401_v32, 280 }
 0x149   :  { %v1495_v53 = vadd.f32 %v8458_v48, %v1239_v50  ;;  %v1589_v57 = vadd.f32 %v8432_v38, %v1333_v39  ;;  %7227 = vmatmul.mubr.msk.f32.gmra.mrb[70].mxu0 %vm1946_vm0, %v1750_v22  ;;  %7368 = vmatmul.mubr.msk.f32.gmra.mrb[28].mxu1 %vm1946_vm0, %v1844_v61 }
 0x14a   :  { %v398_v59 = vpop.permute.xlu1 %397  ;;  %v792_v23 = vpop.permute.xlu0 %791 }
 0x14b   :  { %v1751_v54 = vmax.f32 %v1495_v53, 0.0  ;;  %v1845_v46 = vmax.f32 %v1589_v57, 0.0  ;;  %v1240_v63 = vmul.f32 %v8302_v18, %v398_v59  ;;  %v1334_v28 = vmul.f32 %v8302_v18, %v792_v23 }
 0x14c   :  { %519 = vbcast.lane.b32.xlu1 %v8368_v44, 304  ;;  %913 = vbcast.lane.b32.xlu0 %v8401_v32, 288 }
 0x14d   :  { %v1496_v5 = vadd.f32 %v8471_v2, %v1240_v63  ;;  %v1590_v30 = vadd.f32 %v8445_v41, %v1334_v28  ;;  %7370 = vmatprep.mubr.msk.f32.mxu1 %vm1946_vm0, %v1845_v46  ;;  %7229 = vmatprep.mubr.msk.f32.mxu0 %vm1946_vm0, %v1751_v54  ;;  %v8529_v46 = vld [vmem:[%s11114_s2 + $0x68] sm:$0xff] }
 0x14e   :  { %v402_v33 = vpop.permute.xlu1 %401  ;;  %v796_v8 = vpop.permute.xlu0 %795 }
 0x14f   :  { %v1752_v9 = vmax.f32 %v1496_v5, 0.0  ;;  %v1846_v34 = vmax.f32 %v1590_v30, 0.0  ;;  %v1241_v51 = vmul.f32 %v8302_v18, %v402_v33  ;;  %v1335_v24 = vmul.f32 %v8302_v18, %v796_v8 }
 0x150   :  { %523 = vbcast.lane.b32.xlu1 %v8368_v44, 312  ;;  %917 = vbcast.lane.b32.xlu0 %v8401_v32, 296 }
 0x151   :  { %v1497_v27 = vadd.f32 %v8484_v42, %v1241_v51  ;;  %v1591_v40 = vadd.f32 %v8458_v48, %v1335_v24  ;;  %7230 = vmatmul.mubr.msk.f32.gmra.mrb[72].mxu0 %vm1946_vm0, %v1752_v9  ;;  %7371 = vmatmul.mubr.msk.f32.gmra.mrb[30].mxu1 %vm1946_vm0, %v1846_v34 }
 0x152   :  { %v406_v29 = vpop.permute.xlu1 %405  ;;  %v800_v35 = vpop.permute.xlu0 %799 }
 0x153   :  { %v1753_v26 = vmax.f32 %v1497_v27, 0.0  ;;  %v1847_v56 = vmax.f32 %v1591_v40, 0.0  ;;  %v1242_v36 = vmul.f32 %v8302_v18, %v406_v29  ;;  %v1336_v58 = vmul.f32 %v8302_v18, %v800_v35  ;;  %v8546_v27 = vld [vmem:[%s11114_s2 + $0x70] sm:$0xff] }
 0x154   :  { %527 = vbcast.lane.b32.xlu1 %v8368_v44, 320  ;;  %921 = vbcast.lane.b32.xlu0 %v8401_v32, 304 }
 0x155   :  { %v1498_v17 = vadd.f32 %v8497_v49, %v1242_v36  ;;  %v1592_v37 = vadd.f32 %v8471_v2, %v1336_v58  ;;  %7373 = vmatprep.mubr.msk.f32.mxu1 %vm1946_vm0, %v1847_v56  ;;  %7232 = vmatprep.mubr.msk.f32.mxu0 %vm1946_vm0, %v1753_v26 }
 0x156   :  { %v410_v19 = vpop.permute.xlu1 %409  ;;  %v804_v11 = vpop.permute.xlu0 %803 }
 0x157   :  { %v1754_v0 = vmax.f32 %v1498_v17, 0.0  ;;  %v1848_v31 = vmax.f32 %v1592_v37, 0.0  ;;  %v1243_v55 = vmul.f32 %v8302_v18, %v410_v19  ;;  %v1337_v62 = vmul.f32 %v8302_v18, %v804_v11  ;;  %v8563_v11 = vld [vmem:[%s11114_s2 + $0x78] sm:$0xff] }
 0x158   :  { %531 = vbcast.lane.b32.xlu1 %v8368_v44, 328  ;;  %v8506_v4 = vpop.f32.mrb[0].mxu0  ;;  %925 = vbcast.lane.b32.xlu0 %v8401_v32, 312 }
 0x159   :  { %v1499_v10 = vadd.f32 %v8512_v43, %v1243_v55  ;;  %v1593_v22 = vadd.f32 %v8484_v42, %v1337_v62  ;;  %v8516_v61 = vpop.f32.mrb[1].mxu0  ;;  %7233 = vmatmul.mubr.msk.f32.gmra.mrb[74].mxu0 %vm1946_vm0, %v1754_v0  ;;  %7374 = vmatmul.mubr.msk.f32.gmra.mrb[32].mxu1 %vm1946_vm0, %v1848_v31 }
 0x15a   :  { %v414_v50 = vpop.permute.xlu1 %413  ;;  %v808_v39 = vpop.permute.xlu0 %807 }
 0x15b   :  { %v1755_v53 = vmax.f32 %v1499_v10, 0.0  ;;  %v1849_v57 = vmax.f32 %v1593_v22, 0.0  ;;  %v1244_v59 = vmul.f32 %v8302_v18, %v414_v50  ;;  %v1338_v23 = vmul.f32 %v8302_v18, %v808_v39 }
 0x15c   :  { %535 = vbcast.lane.b32.xlu1 %v8368_v44, 336  ;;  %v8523_v54 = vpop.f32.mrb[2].mxu0  ;;  %929 = vbcast.lane.b32.xlu0 %v8401_v32, 320 }
 0x15d   :  { %11133 = vst [vmem:[#allocation6_spill] sm:$0xff] %v8523_v54  ;;  %v1500_v63 = vadd.f32 %v8529_v46, %v1244_v59  ;;  %v8532_v28 = vpop.f32.mrb[3].mxu0  ;;  %7376 = vmatprep.mubr.msk.f32.mxu1 %vm1946_vm0, %v1849_v57  ;;  %7235 = vmatprep.mubr.msk.f32.mxu0 %vm1946_vm0, %v1755_v53  ;;  %v1594_v5 = vadd.f32 %v8497_v49, %v1338_v23  ;;  %v8580_v59 = vld [vmem:[%s11114_s2 + $0x80] sm:$0xff] }
 0x15e   :  { %11134 = vst [vmem:[#allocation7_spill] sm:$0xff] %v8532_v28  ;;  %v418_v30 = vpop.permute.xlu1 %417  ;;  %v812_v33 = vpop.permute.xlu0 %811 }
 0x15f   :  { %v1756_v8 = vmax.f32 %v1500_v63, 0.0  ;;  %v1245_v9 = vmul.f32 %v8302_v18, %v418_v30  ;;  %v1339_v34 = vmul.f32 %v8302_v18, %v812_v33  ;;  %v1850_v51 = vmax.f32 %v1594_v5, 0.0 }
 0x160   :  { %539 = vbcast.lane.b32.xlu1 %v8368_v44, 344  ;;  %v8540_v24 = vpop.f32.mrb[4].mxu0  ;;  %933 = vbcast.lane.b32.xlu0 %v8401_v32, 328 }
 0x161   :  { %11135 = vst [vmem:[#allocation8_spill] sm:$0xff] %v8540_v24  ;;  %v1501_v40 = vadd.f32 %v8546_v27, %v1245_v9  ;;  %v1595_v29 = vadd.f32 %v8512_v43, %v1339_v34  ;;  %v8550_v35 = vpop.f32.mrb[5].mxu0  ;;  %7236 = vmatmul.mubr.msk.f32.gmra.mrb[76].mxu0 %vm1946_vm0, %v1756_v8  ;;  %7377 = vmatmul.mubr.msk.f32.gmra.mrb[34].mxu1 %vm1946_vm0, %v1850_v51 }
 0x162   :  { %11136 = vst [vmem:[#allocation9_spill] sm:$0xff] %v8550_v35  ;;  %v422_v26 = vpop.permute.xlu1 %421  ;;  %v816_v56 = vpop.permute.xlu0 %815 }
 0x163   :  { %v1757_v36 = vmax.f32 %v1501_v40, 0.0  ;;  %v1851_v58 = vmax.f32 %v1595_v29, 0.0  ;;  %v1246_v17 = vmul.f32 %v8302_v18, %v422_v26  ;;  %v1340_v37 = vmul.f32 %v8302_v18, %v816_v56  ;;  %v8597_v29 = vld [vmem:[%s11114_s2 + $0x88] sm:$0xff] }
 0x164   :  { %543 = vbcast.lane.b32.xlu1 %v8368_v44, 352  ;;  %v8557_v19 = vpop.f32.mrb[6].mxu0  ;;  %937 = vbcast.lane.b32.xlu0 %v8401_v32, 336 }
 0x165   :  { %11137 = vst [vmem:[#allocation10_spill] sm:$0xff] %v8557_v19  ;;  %v1502_v0 = vadd.f32 %v8563_v11, %v1246_v17  ;;  %v8566_v31 = vpop.f32.mrb[7].mxu0  ;;  %7379 = vmatprep.mubr.msk.f32.mxu1 %vm1946_vm0, %v1851_v58  ;;  %7238 = vmatprep.mubr.msk.f32.mxu0 %vm1946_vm0, %v1757_v36  ;;  %v1596_v55 = vadd.f32 %v8529_v46, %v1340_v37 }
 0x166   :  { %11138 = vst [vmem:[#allocation11_spill] sm:$0xff] %v8566_v31  ;;  %v429_v62 = vpop.permute.xlu1 %428  ;;  %v820_v10 = vpop.permute.xlu0 %819 }
 0x167   :  { %v1758_v22 = vmax.f32 %v1502_v0, 0.0  ;;  %v1247_v50 = vmul.f32 %v8302_v18, %v429_v62  ;;  %v1341_v39 = vmul.f32 %v8302_v18, %v820_v10  ;;  %v1852_v53 = vmax.f32 %v1596_v55, 0.0 }
 0x168   :  { %547 = vbcast.lane.b32.xlu1 %v8368_v44, 360  ;;  %v8574_v57 = vpop.f32.mrb[8].mxu0  ;;  %941 = vbcast.lane.b32.xlu0 %v8401_v32, 344 }
 0x169   :  { %11139 = vst [vmem:[#allocation12_spill] sm:$0xff] %v8574_v57  ;;  %v1503_v23 = vadd.f32 %v8580_v59, %v1247_v50  ;;  %v1597_v63 = vadd.f32 %v8546_v27, %v1341_v39  ;;  %v8584_v5 = vpop.f32.mrb[9].mxu0  ;;  %7239 = vmatmul.mubr.msk.f32.gmra.mrb[78].mxu0 %vm1946_vm0, %v1758_v22  ;;  %7380 = vmatmul.mubr.msk.f32.gmra.mrb[36].mxu1 %vm1946_vm0, %v1852_v53  ;;  %v8614_v22 = vld [vmem:[%s11111_s0 + $0x8] sm:$0xff]  ;;  %v8623_v39 = vld [vmem:[%s11114_s2 + $0x90] sm:$0xff] }
 0x16a   :  { %11140 = vst [vmem:[#allocation13_spill] sm:$0xff] %v8584_v5  ;;  %v433_v30 = vpop.permute.xlu1 %432  ;;  %v824_v33 = vpop.permute.xlu0 %823  ;;  %v8618_v50 = vrot.slane %v8614_v22, %v8346_v21 }
 0x16b   :  { %v1759_v8 = vmax.f32 %v1503_v23, 0.0  ;;  %v1853_v9 = vmax.f32 %v1597_v63, 0.0  ;;  %v1248_v34 = vmul.f32 %v8302_v18, %v433_v30  ;;  %v1342_v51 = vmul.f32 %v8302_v18, %v824_v33 }
 0x16c   :  { %551 = vbcast.lane.b32.xlu1 %v8368_v44, 368  ;;  %v8591_v40 = vpop.f32.mrb[10].mxu0  ;;  %945 = vbcast.lane.b32.xlu0 %v8401_v32, 352 }
 0x16d   :  { %11141 = vst [vmem:[#allocation14_spill] sm:$0xff] %v8591_v40  ;;  %v1504_v26 = vadd.f32 %v8597_v29, %v1248_v34  ;;  %v8600_v56 = vpop.f32.mrb[11].mxu0  ;;  %7382 = vmatprep.mubr.msk.f32.mxu1 %vm1946_vm0, %v1853_v9  ;;  %7241 = vmatprep.mubr.msk.f32.mxu0 %vm1946_vm0, %v1759_v8  ;;  %v1598_v36 = vadd.f32 %v8563_v11, %v1342_v51 }
 0x16e   :  { %11142 = vst [vmem:[#allocation15_spill] sm:$0xff] %v8600_v56  ;;  %v437_v58 = vpop.permute.xlu1 %436  ;;  %v831_v17 = vpop.permute.xlu0 %830 }
 0x16f   :  { %v1760_v37 = vmax.f32 %v1504_v26, 0.0  ;;  %v1249_v0 = vmul.f32 %v8302_v18, %v437_v58  ;;  %v1343_v55 = vmul.f32 %v8302_v18, %v831_v17  ;;  %v1854_v62 = vmax.f32 %v1598_v36, 0.0  ;;  %v8640_v26 = vld [vmem:[%s11114_s2 + $0x98] sm:$0xff] }
 0x170   :  { %555 = vbcast.lane.b32.xlu1 %v8368_v44, 376  ;;  %v8608_v10 = vpop.f32.mrb[12].mxu0  ;;  %949 = vbcast.lane.b32.xlu0 %v8401_v32, 360 }
 0x171   :  { %11143 = vst [vmem:[#allocation16_spill] sm:$0xff] %v8608_v10  ;;  %v1505_v44 = vadd.f32 %v8623_v39, %v1249_v0  ;;  %v1599_v53 = vadd.f32 %v8580_v59, %v1343_v55  ;;  %v8627_v23 = vpop.f32.mrb[13].mxu0  ;;  %7242 = vmatmul.mubr.msk.f32.gmra.mrb[80].mxu0 %vm1946_vm0, %v1760_v37  ;;  %7383 = vmatmul.mubr.msk.f32.gmra.mrb[38].mxu1 %vm1946_vm0, %v1854_v62 }
 0x172   :  { %11144 = vst [vmem:[#allocation17_spill] sm:$0xff] %v8627_v23  ;;  %v441_v63 = vpop.permute.xlu1 %440  ;;  %v835_v30 = vpop.permute.xlu0 %834 }
 0x173   :  { %v1761_v33 = vmax.f32 %v1505_v44, 0.0  ;;  %v1855_v8 = vmax.f32 %v1599_v53, 0.0  ;;  %v1250_v9 = vmul.f32 %v8302_v18, %v441_v63  ;;  %v1344_v34 = vmul.f32 %v8302_v18, %v835_v30 }
 0x174   :  { %562 = vbcast.lane.b32.xlu1 %v8618_v50, 256  ;;  %v8634_v51 = vpop.f32.mrb[14].mxu0  ;;  %953 = vbcast.lane.b32.xlu0 %v8401_v32, 368  ;;  %v8656_v30 = vrot.slane %v8614_v22, %v8384_v6 }
 0x175   :  { %11145 = vst [vmem:[#allocation18_spill] sm:$0xff] %v8634_v51  ;;  %v1506_v36 = vadd.f32 %v8640_v26, %v1250_v9  ;;  %v8643_v58 = vpop.f32.mrb[15].mxu0  ;;  %7385 = vmatprep.mubr.msk.f32.mxu1 %vm1946_vm0, %v1855_v8  ;;  %7244 = vmatprep.mubr.msk.f32.mxu0 %vm1946_vm0, %v1761_v33  ;;  %v1600_v17 = vadd.f32 %v8597_v29, %v1344_v34  ;;  %v8661_v33 = vld [vmem:[%s11114_s2 + $0xa0] sm:$0xff] }
 0x176   :  { %11146 = vst [vmem:[#allocation19_spill] sm:$0xff] %v8643_v58  ;;  %v445_v37 = vpop.permute.xlu1 %444  ;;  %v839_v0 = vpop.permute.xlu0 %838 }
 0x177   :  { %v1762_v55 = vmax.f32 %v1506_v36, 0.0  ;;  %v1251_v62 = vmul.f32 %v8302_v18, %v445_v37  ;;  %v1345_v44 = vmul.f32 %v8302_v18, %v839_v0  ;;  %v1856_v53 = vmax.f32 %v1600_v17, 0.0 }
 0x178   :  { %566 = vbcast.lane.b32.xlu1 %v8618_v50, 264  ;;  %v8651_v63 = vpop.f32.mrb[16].mxu0  ;;  %957 = vbcast.lane.b32.xlu0 %v8401_v32, 376 }
 0x179   :  { %11147 = vst [vmem:[#allocation20_spill] sm:$0xff] %v8651_v63  ;;  %v1507_v8 = vadd.f32 %v8661_v33, %v1251_v62  ;;  %v1601_v9 = vadd.f32 %v8623_v39, %v1345_v44  ;;  %v8665_v34 = vpop.f32.mrb[17].mxu0  ;;  %7245 = vmatmul.mubr.msk.f32.gmra.mrb[82].mxu0 %vm1946_vm0, %v1762_v55  ;;  %7386 = vmatmul.mubr.msk.f32.gmra.mrb[40].mxu1 %vm1946_vm0, %v1856_v53  ;;  %v8678_v55 = vld [vmem:[%s11114_s2 + $0xa8] sm:$0xff] }
 0x17a   :  { %11148 = vst [vmem:[#allocation21_spill] sm:$0xff] %v8665_v34  ;;  %v449_v32 = vpop.permute.xlu1 %448  ;;  %v843_v36 = vpop.permute.xlu0 %842 }
 0x17b   :  { %v1763_v17 = vmax.f32 %v1507_v8, 0.0  ;;  %v1857_v37 = vmax.f32 %v1601_v9, 0.0  ;;  %v1252_v0 = vmul.f32 %v8302_v18, %v449_v32  ;;  %v1346_v63 = vmul.f32 %v8302_v18, %v843_v36 }
 0x17c   :  { %570 = vbcast.lane.b32.xlu1 %v8618_v50, 272  ;;  %v8672_v51 = vpop.f32.mrb[18].mxu0  ;;  %964 = vbcast.lane.b32.xlu0 %v8656_v30, 256 }
 0x17d   :  { %11149 = vst [vmem:[#allocation22_spill] sm:$0xff] %v8672_v51  ;;  %v1508_v62 = vadd.f32 %v8678_v55, %v1252_v0  ;;  %v8681_v44 = vpop.f32.mrb[19].mxu0  ;;  %7388 = vmatprep.mubr.msk.f32.mxu1 %vm1946_vm0, %v1857_v37  ;;  %7247 = vmatprep.mubr.msk.f32.mxu0 %vm1946_vm0, %v1763_v17  ;;  %v1602_v53 = vadd.f32 %v8640_v26, %v1346_v63  ;;  %v8695_v17 = vld [vmem:[%s11114_s2 + $0xb0] sm:$0xff] }
 0x17e   :  { %11150 = vst [vmem:[#allocation23_spill] sm:$0xff] %v8681_v44  ;;  %v453_v8 = vpop.permute.xlu1 %452  ;;  %v847_v9 = vpop.permute.xlu0 %846 }
 0x17f   :  { %v1764_v32 = vmax.f32 %v1508_v62, 0.0  ;;  %v1253_v36 = vmul.f32 %v8302_v18, %v453_v8  ;;  %v1347_v51 = vmul.f32 %v8302_v18, %v847_v9  ;;  %v1858_v34 = vmax.f32 %v1602_v53, 0.0 }
 0x180   :  { %574 = vbcast.lane.b32.xlu1 %v8618_v50, 280  ;;  %v8689_v58 = vpop.f32.mrb[20].mxu0  ;;  %968 = vbcast.lane.b32.xlu0 %v8656_v30, 264 }
 0x181   :  { %11151 = vst [vmem:[#allocation24_spill] sm:$0xff] %v8689_v58  ;;  %v1509_v63 = vadd.f32 %v8695_v17, %v1253_v36  ;;  %v1603_v37 = vadd.f32 %v8661_v33, %v1347_v51  ;;  %v8699_v0 = vpop.f32.mrb[21].mxu0  ;;  %7248 = vmatmul.mubr.msk.f32.gmra.mrb[84].mxu0 %vm1946_vm0, %v1764_v32  ;;  %7389 = vmatmul.mubr.msk.f32.gmra.mrb[42].mxu1 %vm1946_vm0, %v1858_v34  ;;  %v8712_v51 = vld [vmem:[%s11114_s2 + $0xb8] sm:$0xff] }
 0x182   :  { %11152 = vst [vmem:[#allocation25_spill] sm:$0xff] %v8699_v0  ;;  %v457_v62 = vpop.permute.xlu1 %456  ;;  %v851_v53 = vpop.permute.xlu0 %850 }
 0x183   :  { %v1765_v8 = vmax.f32 %v1509_v63, 0.0  ;;  %v1859_v9 = vmax.f32 %v1603_v37, 0.0  ;;  %v1254_v58 = vmul.f32 %v8302_v18, %v457_v62  ;;  %v1348_v44 = vmul.f32 %v8302_v18, %v851_v53 }
 0x184   :  { %578 = vbcast.lane.b32.xlu1 %v8618_v50, 288  ;;  %v8706_v10 = vpop.f32.mrb[22].mxu0  ;;  %972 = vbcast.lane.b32.xlu0 %v8656_v30, 272 }
 0x185   :  { %11153 = vst [vmem:[#allocation26_spill] sm:$0xff] %v8706_v10  ;;  %v1510_v34 = vadd.f32 %v8712_v51, %v1254_v58  ;;  %v8715_v32 = vpop.f32.mrb[23].mxu0  ;;  %7391 = vmatprep.mubr.msk.f32.mxu1 %vm1946_vm0, %v1859_v9  ;;  %7250 = vmatprep.mubr.msk.f32.mxu0 %vm1946_vm0, %v1765_v8  ;;  %v1604_v36 = vadd.f32 %v8678_v55, %v1348_v44  ;;  %v8729_v58 = vld [vmem:[%s11114_s2 + $0xc0] sm:$0xff] }
 0x186   :  { %11154 = vst [vmem:[#allocation27_spill] sm:$0xff] %v8715_v32  ;;  %v461_v63 = vpop.permute.xlu1 %460  ;;  %v855_v37 = vpop.permute.xlu0 %854 }
 0x187   :  { %v1766_v62 = vmax.f32 %v1510_v34, 0.0  ;;  %v1255_v53 = vmul.f32 %v8302_v18, %v461_v63  ;;  %v1349_v10 = vmul.f32 %v8302_v18, %v855_v37  ;;  %v1860_v0 = vmax.f32 %v1604_v36, 0.0 }
 0x188   :  { %582 = vbcast.lane.b32.xlu1 %v8618_v50, 296  ;;  %v8723_v23 = vpop.f32.mrb[24].mxu0  ;;  %976 = vbcast.lane.b32.xlu0 %v8656_v30, 280 }
 0x189   :  { %11155 = vst [vmem:[#allocation28_spill] sm:$0xff] %v8723_v23  ;;  %v1511_v44 = vadd.f32 %v8729_v58, %v1255_v53  ;;  %v1605_v8 = vadd.f32 %v8695_v17, %v1349_v10  ;;  %v8733_v9 = vpop.f32.mrb[25].mxu0  ;;  %7251 = vmatmul.mubr.msk.f32.gmra.mrb[86].mxu0 %vm1946_vm0, %v1766_v62  ;;  %7392 = vmatmul.mubr.msk.f32.gmra.mrb[44].mxu1 %vm1946_vm0, %v1860_v0  ;;  %v8746_v10 = vld [vmem:[%s11114_s2 + $0xc8] sm:$0xff] }
 0x18a   :  { %11156 = vst [vmem:[#allocation29_spill] sm:$0xff] %v8733_v9  ;;  %v465_v34 = vpop.permute.xlu1 %464  ;;  %v859_v36 = vpop.permute.xlu0 %858 }
 0x18b   :  { %v1767_v63 = vmax.f32 %v1511_v44, 0.0  ;;  %v1861_v37 = vmax.f32 %v1605_v8, 0.0  ;;  %v1256_v23 = vmul.f32 %v8302_v18, %v465_v34  ;;  %v1350_v32 = vmul.f32 %v8302_v18, %v859_v36 }
 0x18c   :  { %586 = vbcast.lane.b32.xlu1 %v8618_v50, 304  ;;  %v8740_v56 = vpop.f32.mrb[26].mxu0  ;;  %980 = vbcast.lane.b32.xlu0 %v8656_v30, 288 }
 0x18d   :  { %11157 = vst [vmem:[#allocation30_spill] sm:$0xff] %v8740_v56  ;;  %v1512_v0 = vadd.f32 %v8746_v10, %v1256_v23  ;;  %v8749_v62 = vpop.f32.mrb[27].mxu0  ;;  %7394 = vmatprep.mubr.msk.f32.mxu1 %vm1946_vm0, %v1861_v37  ;;  %7253 = vmatprep.mubr.msk.f32.mxu0 %vm1946_vm0, %v1767_v63  ;;  %v1606_v53 = vadd.f32 %v8712_v51, %v1350_v32  ;;  %v8763_v23 = vld [vmem:[%s11114_s2 + $0xd0] sm:$0xff] }
 0x18e   :  { %11158 = vst [vmem:[#allocation31_spill] sm:$0xff] %v8749_v62  ;;  %v469_v44 = vpop.permute.xlu1 %468  ;;  %v863_v8 = vpop.permute.xlu0 %862 }
 0x18f   :  { %v1768_v34 = vmax.f32 %v1512_v0, 0.0  ;;  %v1257_v36 = vmul.f32 %v8302_v18, %v469_v44  ;;  %v1351_v56 = vmul.f32 %v8302_v18, %v863_v8  ;;  %v1862_v9 = vmax.f32 %v1606_v53, 0.0 }
 0x190   :  { %590 = vbcast.lane.b32.xlu1 %v8618_v50, 312  ;;  %v8757_v40 = vpop.f32.mrb[28].mxu0  ;;  %984 = vbcast.lane.b32.xlu0 %v8656_v30, 296 }
 0x191   :  { %11159 = vst [vmem:[#allocation32_spill] sm:$0xff] %v8757_v40  ;;  %v1513_v32 = vadd.f32 %v8763_v23, %v1257_v36  ;;  %v1607_v63 = vadd.f32 %v8729_v58, %v1351_v56  ;;  %v8767_v37 = vpop.f32.mrb[29].mxu0  ;;  %7254 = vmatmul.mubr.msk.f32.gmra.mrb[88].mxu0 %vm1946_vm0, %v1768_v34  ;;  %7395 = vmatmul.mubr.msk.f32.gmra.mrb[46].mxu1 %vm1946_vm0, %v1862_v9  ;;  %v8780_v56 = vld [vmem:[%s11114_s2 + $0xd8] sm:$0xff] }
 0x192   :  { %11160 = vst [vmem:[#allocation33_spill] sm:$0xff] %v8767_v37  ;;  %v473_v0 = vpop.permute.xlu1 %472  ;;  %v867_v53 = vpop.permute.xlu0 %866 }
 0x193   :  { %v1769_v44 = vmax.f32 %v1513_v32, 0.0  ;;  %v1863_v8 = vmax.f32 %v1607_v63, 0.0  ;;  %v1258_v40 = vmul.f32 %v8302_v18, %v473_v0  ;;  %v1352_v62 = vmul.f32 %v8302_v18, %v867_v53 }
 0x194   :  { %594 = vbcast.lane.b32.xlu1 %v8618_v50, 320  ;;  %v8774_v57 = vpop.f32.mrb[30].mxu0  ;;  %988 = vbcast.lane.b32.xlu0 %v8656_v30, 304 }
 0x195   :  { %11161 = vst [vmem:[#allocation34_spill] sm:$0xff] %v8774_v57  ;;  %v1514_v9 = vadd.f32 %v8780_v56, %v1258_v40  ;;  %v8783_v34 = vpop.f32.mrb[31].mxu0  ;;  %7397 = vmatprep.mubr.msk.f32.mxu1 %vm1946_vm0, %v1863_v8  ;;  %7256 = vmatprep.mubr.msk.f32.mxu0 %vm1946_vm0, %v1769_v44  ;;  %v1608_v36 = vadd.f32 %v8746_v10, %v1352_v62  ;;  %v8797_v40 = vld [vmem:[%s11114_s2 + $0xe0] sm:$0xff] }
 0x196   :  { %11162 = vst [vmem:[#allocation35_spill] sm:$0xff] %v8783_v34  ;;  %v477_v32 = vpop.permute.xlu1 %476  ;;  %v871_v63 = vpop.permute.xlu0 %870 }
 0x197   :  { %v1770_v0 = vmax.f32 %v1514_v9, 0.0  ;;  %v1259_v53 = vmul.f32 %v8302_v18, %v477_v32  ;;  %v1353_v57 = vmul.f32 %v8302_v18, %v871_v63  ;;  %v1864_v37 = vmax.f32 %v1608_v36, 0.0 }
 0x198   :  { %598 = vbcast.lane.b32.xlu1 %v8618_v50, 328  ;;  %v8791_v5 = vpop.f32.mrb[32].mxu0  ;;  %992 = vbcast.lane.b32.xlu0 %v8656_v30, 312 }
 0x199   :  { %v1515_v62 = vadd.f32 %v8797_v40, %v1259_v53  ;;  %v1609_v44 = vadd.f32 %v8763_v23, %v1353_v57  ;;  %v8801_v8 = vpop.f32.mrb[33].mxu0  ;;  %7257 = vmatmul.mubr.msk.f32.gmra.mrb[90].mxu0 %vm1946_vm0, %v1770_v0  ;;  %7398 = vmatmul.mubr.msk.f32.gmra.mrb[48].mxu1 %vm1946_vm0, %v1864_v37  ;;  %v8814_v57 = vld [vmem:[%s11114_s2 + $0xe8] sm:$0xff] }
 0x19a   :  { %v481_v9 = vpop.permute.xlu1 %480  ;;  %v875_v36 = vpop.permute.xlu0 %874 }
 0x19b   :  { %v1771_v32 = vmax.f32 %v1515_v62, 0.0  ;;  %v1865_v63 = vmax.f32 %v1609_v44, 0.0  ;;  %v1260_v34 = vmul.f32 %v8302_v18, %v481_v9  ;;  %v1354_v19 = vmul.f32 %v8302_v18, %v875_v36 }
 0x19c   :  { %602 = vbcast.lane.b32.xlu1 %v8618_v50, 336  ;;  %v8808_v31 = vpop.f32.mrb[34].mxu0  ;;  %996 = vbcast.lane.b32.xlu0 %v8656_v30, 320 }
 0x19d   :  { %11163 = vst [vmem:[#allocation36_spill] sm:$0xff] %v8808_v31  ;;  %v1516_v37 = vadd.f32 %v8814_v57, %v1260_v34  ;;  %v8817_v0 = vpop.f32.mrb[35].mxu0  ;;  %7400 = vmatprep.mubr.msk.f32.mxu1 %vm1946_vm0, %v1865_v63  ;;  %7259 = vmatprep.mubr.msk.f32.mxu0 %vm1946_vm0, %v1771_v32  ;;  %v1610_v53 = vadd.f32 %v8780_v56, %v1354_v19  ;;  %v8831_v34 = vld [vmem:[%s11114_s2 + $0xf0] sm:$0xff] }
 0x19e   :  { %11164 = vst [vmem:[#allocation37_spill] sm:$0xff] %v8817_v0  ;;  %v485_v62 = vpop.permute.xlu1 %484  ;;  %v879_v44 = vpop.permute.xlu0 %878 }
 0x19f   :  { %v1772_v9 = vmax.f32 %v1516_v37, 0.0  ;;  %v1261_v36 = vmul.f32 %v8302_v18, %v485_v62  ;;  %v1355_v24 = vmul.f32 %v8302_v18, %v879_v44  ;;  %v1866_v35 = vmax.f32 %v1610_v53, 0.0 }
 0x1a0   :  { %606 = vbcast.lane.b32.xlu1 %v8618_v50, 344  ;;  %v8825_v31 = vpop.f32.mrb[36].mxu0  ;;  %1000 = vbcast.lane.b32.xlu0 %v8656_v30, 328 }
 0x1a1   :  { %11165 = vst [vmem:[#allocation38_spill] sm:$0xff] %v8825_v31  ;;  %v1517_v19 = vadd.f32 %v8831_v34, %v1261_v36  ;;  %v1611_v32 = vadd.f32 %v8797_v40, %v1355_v24  ;;  %v8835_v63 = vpop.f32.mrb[37].mxu0  ;;  %7260 = vmatmul.mubr.msk.f32.gmra.mrb[92].mxu0 %vm1946_vm0, %v1772_v9  ;;  %7401 = vmatmul.mubr.msk.f32.gmra.mrb[50].mxu1 %vm1946_vm0, %v1866_v35  ;;  %v8848_v24 = vld [vmem:[%s11114_s2 + $0xf8] sm:$0xff] }
 0x1a2   :  { %11166 = vst [vmem:[#allocation39_spill] sm:$0xff] %v8835_v63  ;;  %v489_v37 = vpop.permute.xlu1 %488  ;;  %v883_v53 = vpop.permute.xlu0 %882 }
 0x1a3   :  { %v1773_v62 = vmax.f32 %v1517_v19, 0.0  ;;  %v1867_v44 = vmax.f32 %v1611_v32, 0.0  ;;  %v1262_v31 = vmul.f32 %v8302_v18, %v489_v37  ;;  %v1356_v54 = vmul.f32 %v8302_v18, %v883_v53 }
 0x1a4   :  { %610 = vbcast.lane.b32.xlu1 %v8618_v50, 352  ;;  %v8842_v28 = vpop.f32.mrb[38].mxu0  ;;  %1004 = vbcast.lane.b32.xlu0 %v8656_v30, 336 }
 0x1a5   :  { %11167 = vst [vmem:[#allocation40_spill] sm:$0xff] %v8842_v28  ;;  %v1518_v35 = vadd.f32 %v8848_v24, %v1262_v31  ;;  %v8851_v9 = vpop.f32.mrb[39].mxu0  ;;  %7403 = vmatprep.mubr.msk.f32.mxu1 %vm1946_vm0, %v1867_v44  ;;  %7262 = vmatprep.mubr.msk.f32.mxu0 %vm1946_vm0, %v1773_v62  ;;  %v1612_v36 = vadd.f32 %v8814_v57, %v1356_v54 }
 0x1a6   :  { %11168 = vst [vmem:[#allocation41_spill] sm:$0xff] %v8851_v9  ;;  %v496_v19 = vpop.permute.xlu1 %495  ;;  %v887_v32 = vpop.permute.xlu0 %886 }
 0x1a7   :  { %v1774_v37 = vmax.f32 %v1518_v35, 0.0  ;;  %v1263_v53 = vmul.f32 %v8302_v18, %v496_v19  ;;  %v1357_v28 = vmul.f32 %v8302_v18, %v887_v32  ;;  %v1868_v63 = vmax.f32 %v1612_v36, 0.0 }
 0x1a8   :  { %614 = vbcast.lane.b32.xlu1 %v8618_v50, 360  ;;  %v8859_v0 = vpop.f32.mrb[40].mxu0  ;;  %1008 = vbcast.lane.b32.xlu0 %v8656_v30, 344 }
 0x1a9   :  { %11169 = vst [vmem:[#allocation42_spill] sm:$0xff] %v8859_v0  ;;  %v1519_v31 = vadd.f32 %v8335_v45, %v1263_v53  ;;  %v1613_v62 = vadd.f32 %v8831_v34, %v1357_v28  ;;  %v8864_v44 = vpop.f32.mrb[41].mxu0  ;;  %7263 = vmatmul.mubr.msk.f32.gmra.mrb[94].mxu0 %vm1946_vm0, %v1774_v37  ;;  %7404 = vmatmul.mubr.msk.f32.gmra.mrb[52].mxu1 %vm1946_vm0, %v1868_v63 }
 0x1aa   :  { %11170 = vst [vmem:[#allocation43_spill] sm:$0xff] %v8864_v44  ;;  %v500_v54 = vpop.permute.xlu1 %499  ;;  %v891_v35 = vpop.permute.xlu0 %890 }
 0x1ab   :  { %v1775_v19 = vmax.f32 %v1519_v31, 0.0  ;;  %v1869_v36 = vmax.f32 %v1613_v62, 0.0  ;;  %v1264_v32 = vmul.f32 %v8302_v18, %v500_v54  ;;  %v1358_v0 = vmul.f32 %v8302_v18, %v891_v35 }
 0x1ac   :  { %618 = vbcast.lane.b32.xlu1 %v8618_v50, 368  ;;  %v8871_v9 = vpop.f32.mrb[42].mxu0  ;;  %v8873_v53 = vpop.f32.mrb[0].mxu1  ;;  %1012 = vbcast.lane.b32.xlu0 %v8656_v30, 352 }
 0x1ad   :  { %11171 = vst [vmem:[#allocation44_spill] sm:$0xff] %v8871_v9  ;;  %11172 = vst [vmem:[#allocation45_spill] sm:$0xff] %v8873_v53  ;;  %v1520_v28 = vadd.f32 %v8351_v60, %v1264_v32  ;;  %v8877_v37 = vpop.f32.mrb[43].mxu0  ;;  %v8879_v63 = vpop.f32.mrb[1].mxu1  ;;  %7406 = vmatprep.mubr.msk.f32.mxu1 %vm1946_vm0, %v1869_v36  ;;  %7265 = vmatprep.mubr.msk.f32.mxu0 %vm1946_vm0, %v1775_v19  ;;  %v1614_v31 = vadd.f32 %v8848_v24, %v1358_v0 }
 0x1ae   :  { %11173 = vst [vmem:[#allocation46_spill] sm:$0xff] %v8879_v63  ;;  %v504_v62 = vpop.permute.xlu1 %503  ;;  %v898_v54 = vpop.permute.xlu0 %897 }
 0x1af   :  { %v1776_v35 = vmax.f32 %v1520_v28, 0.0  ;;  %v1265_v9 = vmul.f32 %v8302_v18, %v504_v62  ;;  %v1870_v53 = vmax.f32 %v1614_v31, 0.0  ;;  %v1359_v44 = vmul.f32 %v8302_v18, %v898_v54 }
 0x1b0   :  { %622 = vbcast.lane.b32.xlu1 %v8618_v50, 376  ;;  %1016 = vbcast.lane.b32.xlu0 %v8656_v30, 360 }
 0x1b1   :  { %v1521_v32 = vadd.f32 %v8373_v47, %v1265_v9  ;;  %7266 = vmatmul.mubr.msk.f32.gmra.mrb[96].mxu0 %vm1946_vm0, %v1776_v35  ;;  %v1615_v19 = vadd.f32 %v8335_v45, %v1359_v44  ;;  %7407 = vmatmul.mubr.msk.f32.gmra.mrb[54].mxu1 %vm1946_vm0, %v1870_v53  ;;  %v8901_v45 = vsub.s32 7, %v7733_v1  ;;  %v8914_v1 = vld [vmem:[%s11113_s3] ss:$0 sm:$0xff] }
 0x1b2   :  { %v508_v0 = vpop.permute.xlu1 %507  ;;  %v902_v36 = vpop.permute.xlu0 %901 }
 0x1b3   :  { %v1777_v28 = vmax.f32 %v1521_v32, 0.0  ;;  %v1266_v62 = vmul.f32 %v8302_v18, %v508_v0  ;;  %v1360_v31 = vmul.f32 %v8302_v18, %v902_v36  ;;  %v1871_v54 = vmax.f32 %v1615_v19, 0.0  ;;  %11175 = vst [vmem:[#allocation48_spill] sm:$0xff] %v8901_v45 }
 0x1b4   :  { %629 = vbcast.lane.b32.xlu1 %v7774_v16, 256  ;;  %v8895_v50 = vpop.f32.mrb[44].mxu0  ;;  %v8897_v63 = vpop.f32.mrb[2].mxu1  ;;  %1020 = vbcast.lane.b32.xlu0 %v8656_v30, 368 }
 0x1b5   :  { %11174 = vst [vmem:[#allocation47_spill] sm:$0xff] %v8895_v50  ;;  %v1522_v9 = vadd.f32 %v8389_v12, %v1266_v62  ;;  %v1616_v44 = vadd.f32 %v8351_v60, %v1360_v31  ;;  %v8905_v53 = vpop.f32.mrb[45].mxu0  ;;  %v8907_v35 = vpop.f32.mrb[3].mxu1  ;;  %7268 = vmatprep.mubr.msk.f32.mxu0 %vm1946_vm0, %v1777_v28  ;;  %7409 = vmatprep.mubr.msk.f32.mxu1 %vm1946_vm0, %v1871_v54 }
 0x1b6   :  { %v512_v18 = vpop.permute.xlu1 %511  ;;  %v906_v32 = vpop.permute.xlu0 %905  ;;  %v8922_v28 = vrot.slane %v8364_v14, %v8901_v45 }
 0x1b7   :  { %v1778_v19 = vmax.f32 %v1522_v9, 0.0  ;;  %v1872_v0 = vmax.f32 %v1616_v44, 0.0  ;;  %v1267_v36 = vmul.f32 %v8914_v1, %v512_v18  ;;  %v1361_v60 = vmul.f32 %v8914_v1, %v906_v32 }
 0x1b8   :  { %633 = vbcast.lane.b32.xlu1 %v7774_v16, 264  ;;  %1024 = vbcast.lane.b32.xlu0 %v8656_v30, 376 }
 0x1b9   :  { %7269 = vmatmul.mubr.msk.f32.gmra.mrb[98].mxu0 %vm1946_vm0, %v1778_v19  ;;  %7410 = vmatmul.mubr.msk.f32.gmra.mrb[56].mxu1 %vm1946_vm0, %v1872_v0  ;;  %v1523_v62 = vadd.f32 %v8406_v20, %v1267_v36  ;;  %v1617_v31 = vadd.f32 %v8373_v47, %v1361_v60 }
 0x1ba   :  { %v516_v54 = vpop.permute.xlu1 %515  ;;  %v910_v9 = vpop.permute.xlu0 %909 }
 0x1bb   :  { %v1268_v44 = vmul.f32 %v8914_v1, %v516_v54  ;;  %v1362_v18 = vmul.f32 %v8914_v1, %v910_v9  ;;  %v1779_v32 = vmax.f32 %v1523_v62, 0.0  ;;  %v1873_v30 = vmax.f32 %v1617_v31, 0.0 }
 0x1bc   :  { %637 = vbcast.lane.b32.xlu1 %v7774_v16, 272  ;;  %v8931_v14 = vpop.f32.mrb[46].mxu0  ;;  %v8933_v50 = vpop.f32.mrb[4].mxu1  ;;  %1031 = vbcast.lane.b32.xlu0 %v8922_v28, 256 }
 0x1bd   :  { %11176 = vst [vmem:[#allocation49_spill] sm:$0xff] %v8931_v14  ;;  %11177 = vst [vmem:[#allocation50_spill] sm:$0xff] %v8933_v50  ;;  %v1524_v19 = vadd.f32 %v8419_v25, %v1268_v44  ;;  %v1618_v47 = vadd.f32 %v8389_v12, %v1362_v18  ;;  %v8938_v0 = vpop.f32.mrb[47].mxu0  ;;  %v8940_v36 = vpop.f32.mrb[5].mxu1  ;;  %7412 = vmatprep.mubr.msk.f32.mxu1 %vm1946_vm0, %v1873_v30  ;;  %7271 = vmatprep.mubr.msk.f32.mxu0 %vm1946_vm0, %v1779_v32 }
 0x1be   :  { %11178 = vst [vmem:[#allocation51_spill] sm:$0xff] %v8938_v0  ;;  %11179 = vst [vmem:[#allocation52_spill] sm:$0xff] %v8940_v36  ;;  %v520_v60 = vpop.permute.xlu1 %519  ;;  %v914_v62 = vpop.permute.xlu0 %913 }
 0x1bf   :  { %v1780_v31 = vmax.f32 %v1524_v19, 0.0  ;;  %v1874_v54 = vmax.f32 %v1618_v47, 0.0  ;;  %v1269_v9 = vmul.f32 %v8914_v1, %v520_v60  ;;  %v1363_v14 = vmul.f32 %v8914_v1, %v914_v62 }
 0x1c0   :  { %641 = vbcast.lane.b32.xlu1 %v7774_v16, 280  ;;  %1035 = vbcast.lane.b32.xlu0 %v8922_v28, 264 }
 0x1c1   :  { %7272 = vmatmul.mubr.msk.f32.gmra.mrb[100].mxu0 %vm1946_vm0, %v1780_v31  ;;  %7413 = vmatmul.mubr.msk.f32.gmra.mrb[58].mxu1 %vm1946_vm0, %v1874_v54  ;;  %v1525_v12 = vadd.f32 %v8432_v38, %v1269_v9  ;;  %v1619_v44 = vadd.f32 %v8406_v20, %v1363_v14 }
 0x1c2   :  { %v524_v18 = vpop.permute.xlu1 %523  ;;  %v918_v32 = vpop.permute.xlu0 %917 }
 0x1c3   :  { %v1270_v30 = vmul.f32 %v8914_v1, %v524_v18  ;;  %v1364_v19 = vmul.f32 %v8914_v1, %v918_v32  ;;  %v1781_v47 = vmax.f32 %v1525_v12, 0.0  ;;  %v1875_v60 = vmax.f32 %v1619_v44, 0.0 }
 0x1c4   :  { %645 = vbcast.lane.b32.xlu1 %v7774_v16, 288  ;;  %v8955_v62 = vpop.f32.mrb[48].mxu0  ;;  %v8957_v50 = vpop.f32.mrb[6].mxu1  ;;  %1039 = vbcast.lane.b32.xlu0 %v8922_v28, 272 }
 0x1c5   :  { %11180 = vst [vmem:[#allocation53_spill] sm:$0xff] %v8955_v62  ;;  %11181 = vst [vmem:[#allocation54_spill] sm:$0xff] %v8957_v50  ;;  %v1526_v31 = vadd.f32 %v8445_v41, %v1270_v30  ;;  %v1620_v20 = vadd.f32 %v8419_v25, %v1364_v19  ;;  %v8962_v14 = vpop.f32.mrb[49].mxu0  ;;  %v8964_v54 = vpop.f32.mrb[7].mxu1  ;;  %7415 = vmatprep.mubr.msk.f32.mxu1 %vm1946_vm0, %v1875_v60  ;;  %7274 = vmatprep.mubr.msk.f32.mxu0 %vm1946_vm0, %v1781_v47 }
 0x1c6   :  { %11182 = vst [vmem:[#allocation55_spill] sm:$0xff] %v8962_v14  ;;  %11183 = vst [vmem:[#allocation56_spill] sm:$0xff] %v8964_v54  ;;  %v528_v9 = vpop.permute.xlu1 %527  ;;  %v922_v12 = vpop.permute.xlu0 %921 }
 0x1c7   :  { %v1782_v44 = vmax.f32 %v1526_v31, 0.0  ;;  %v1876_v18 = vmax.f32 %v1620_v20, 0.0  ;;  %v1271_v32 = vmul.f32 %v8914_v1, %v528_v9  ;;  %v1365_v62 = vmul.f32 %v8914_v1, %v922_v12 }
 0x1c8   :  { %649 = vbcast.lane.b32.xlu1 %v7774_v16, 296  ;;  %1043 = vbcast.lane.b32.xlu0 %v8922_v28, 280 }
 0x1c9   :  { %7275 = vmatmul.mubr.msk.f32.gmra.mrb[102].mxu0 %vm1946_vm0, %v1782_v44  ;;  %7416 = vmatmul.mubr.msk.f32.gmra.mrb[60].mxu1 %vm1946_vm0, %v1876_v18  ;;  %v1527_v25 = vadd.f32 %v8458_v48, %v1271_v32  ;;  %v1621_v30 = vadd.f32 %v8432_v38, %v1365_v62 }
 0x1ca   :  { %v532_v19 = vpop.permute.xlu1 %531  ;;  %v926_v47 = vpop.permute.xlu0 %925 }
 0x1cb   :  { %v1272_v60 = vmul.f32 %v8914_v1, %v532_v19  ;;  %v1366_v31 = vmul.f32 %v8914_v1, %v926_v47  ;;  %v1783_v20 = vmax.f32 %v1527_v25, 0.0  ;;  %v1877_v9 = vmax.f32 %v1621_v30, 0.0 }
 0x1cc   :  { %653 = vbcast.lane.b32.xlu1 %v7774_v16, 304  ;;  %v8979_v12 = vpop.f32.mrb[50].mxu0  ;;  %v8981_v50 = vpop.f32.mrb[8].mxu1  ;;  %1047 = vbcast.lane.b32.xlu0 %v8922_v28, 288 }
 0x1cd   :  { %11184 = vst [vmem:[#allocation57_spill] sm:$0xff] %v8979_v12  ;;  %11185 = vst [vmem:[#allocation58_spill] sm:$0xff] %v8981_v50  ;;  %v1528_v44 = vadd.f32 %v8471_v2, %v1272_v60  ;;  %v1622_v38 = vadd.f32 %v8445_v41, %v1366_v31  ;;  %v8986_v62 = vpop.f32.mrb[51].mxu0  ;;  %v8988_v18 = vpop.f32.mrb[9].mxu1  ;;  %7418 = vmatprep.mubr.msk.f32.mxu1 %vm1946_vm0, %v1877_v9  ;;  %7277 = vmatprep.mubr.msk.f32.mxu0 %vm1946_vm0, %v1783_v20 }
 0x1ce   :  { %11186 = vst [vmem:[#allocation59_spill] sm:$0xff] %v8986_v62  ;;  %11187 = vst [vmem:[#allocation60_spill] sm:$0xff] %v8988_v18  ;;  %v536_v32 = vpop.permute.xlu1 %535  ;;  %v930_v25 = vpop.permute.xlu0 %929 }
 0x1cf   :  { %v1784_v30 = vmax.f32 %v1528_v44, 0.0  ;;  %v1878_v19 = vmax.f32 %v1622_v38, 0.0  ;;  %v1273_v47 = vmul.f32 %v8914_v1, %v536_v32  ;;  %v1367_v12 = vmul.f32 %v8914_v1, %v930_v25 }
 0x1d0   :  { %657 = vbcast.lane.b32.xlu1 %v7774_v16, 312  ;;  %1051 = vbcast.lane.b32.xlu0 %v8922_v28, 296 }
 0x1d1   :  { %7278 = vmatmul.mubr.msk.f32.gmra.mrb[104].mxu0 %vm1946_vm0, %v1784_v30  ;;  %7419 = vmatmul.mubr.msk.f32.gmra.mrb[62].mxu1 %vm1946_vm0, %v1878_v19  ;;  %v1529_v41 = vadd.f32 %v8484_v42, %v1273_v47  ;;  %v1623_v60 = vadd.f32 %v8458_v48, %v1367_v12 }
 0x1d2   :  { %v540_v31 = vpop.permute.xlu1 %539  ;;  %v934_v20 = vpop.permute.xlu0 %933 }
 0x1d3   :  { %v1274_v9 = vmul.f32 %v8914_v1, %v540_v31  ;;  %v1368_v44 = vmul.f32 %v8914_v1, %v934_v20  ;;  %v1785_v38 = vmax.f32 %v1529_v41, 0.0  ;;  %v1879_v32 = vmax.f32 %v1623_v60, 0.0 }
 0x1d4   :  { %1059 = vbcast.lane.b32.xlu1 %v8922_v28, 312  ;;  %v9003_v16 = vpop.f32.mrb[52].mxu0  ;;  %v9005_v25 = vpop.f32.mrb[10].mxu1  ;;  %1055 = vbcast.lane.b32.xlu0 %v8922_v28, 304 }
 0x1d5   :  { %11188 = vst [vmem:[#allocation61_spill] sm:$0xff] %v9003_v16  ;;  %11189 = vst [vmem:[#allocation62_spill] sm:$0xff] %v9005_v25  ;;  %v1530_v30 = vadd.f32 %v8497_v49, %v1274_v9  ;;  %v1624_v48 = vadd.f32 %v8471_v2, %v1368_v44  ;;  %v9010_v12 = vpop.f32.mrb[53].mxu0  ;;  %v9012_v19 = vpop.f32.mrb[11].mxu1  ;;  %7421 = vmatprep.mubr.msk.f32.mxu1 %vm1946_vm0, %v1879_v32  ;;  %7280 = vmatprep.mubr.msk.f32.mxu0 %vm1946_vm0, %v1785_v38 }
 0x1d6   :  { %11190 = vst [vmem:[#allocation63_spill] sm:$0xff] %v9010_v12  ;;  %11191 = vst [vmem:[#allocation64_spill] sm:$0xff] %v9012_v19  ;;  %v544_v47 = vpop.permute.xlu1 %543  ;;  %v938_v41 = vpop.permute.xlu0 %937 }
 0x1d7   :  { %v1786_v60 = vmax.f32 %v1530_v30, 0.0  ;;  %v1880_v31 = vmax.f32 %v1624_v48, 0.0  ;;  %v1275_v20 = vmul.f32 %v8914_v1, %v544_v47  ;;  %v1369_v16 = vmul.f32 %v8914_v1, %v938_v41 }
 0x1d8   :  { %1067 = vbcast.lane.b32.xlu1 %v8922_v28, 328  ;;  %1063 = vbcast.lane.b32.xlu0 %v8922_v28, 320 }
 0x1d9   :  { %7281 = vmatmul.mubr.msk.f32.gmra.mrb[106].mxu0 %vm1946_vm0, %v1786_v60  ;;  %7422 = vmatmul.mubr.msk.f32.gmra.mrb[64].mxu1 %vm1946_vm0, %v1880_v31  ;;  %v1531_v2 = vadd.f32 %v8512_v43, %v1275_v20  ;;  %v1625_v9 = vadd.f32 %v8484_v42, %v1369_v16 }
 0x1da   :  { %v548_v44 = vpop.permute.xlu1 %547  ;;  %v942_v38 = vpop.permute.xlu0 %941 }
 0x1db   :  { %v1276_v32 = vmul.f32 %v8914_v1, %v548_v44  ;;  %v1370_v30 = vmul.f32 %v8914_v1, %v942_v38  ;;  %v1787_v48 = vmax.f32 %v1531_v2, 0.0  ;;  %v1881_v47 = vmax.f32 %v1625_v9, 0.0 }
 0x1dc   :  { %1075 = vbcast.lane.b32.xlu1 %v8922_v28, 344  ;;  %v9027_v41 = vpop.f32.mrb[54].mxu0  ;;  %v9029_v25 = vpop.f32.mrb[12].mxu1  ;;  %1071 = vbcast.lane.b32.xlu0 %v8922_v28, 336 }
 0x1dd   :  { %11192 = vst [vmem:[#allocation65_spill] sm:$0xff] %v9027_v41  ;;  %11193 = vst [vmem:[#allocation66_spill] sm:$0xff] %v9029_v25  ;;  %v1532_v60 = vadd.f32 %v8529_v46, %v1276_v32  ;;  %v1626_v42 = vadd.f32 %v8497_v49, %v1370_v30  ;;  %v9034_v16 = vpop.f32.mrb[55].mxu0  ;;  %v9036_v31 = vpop.f32.mrb[13].mxu1  ;;  %7424 = vmatprep.mubr.msk.f32.mxu1 %vm1946_vm0, %v1881_v47  ;;  %7283 = vmatprep.mubr.msk.f32.mxu0 %vm1946_vm0, %v1787_v48 }
 0x1de   :  { %11194 = vst [vmem:[#allocation67_spill] sm:$0xff] %v9034_v16  ;;  %11195 = vst [vmem:[#allocation68_spill] sm:$0xff] %v9036_v31  ;;  %v552_v20 = vpop.permute.xlu1 %551  ;;  %v946_v2 = vpop.permute.xlu0 %945 }
 0x1df   :  { %v1788_v9 = vmax.f32 %v1532_v60, 0.0  ;;  %v1882_v44 = vmax.f32 %v1626_v42, 0.0  ;;  %v1277_v38 = vmul.f32 %v8914_v1, %v552_v20  ;;  %v1371_v41 = vmul.f32 %v8914_v1, %v946_v2 }
 0x1e0   :  { %1083 = vbcast.lane.b32.xlu1 %v8922_v28, 360  ;;  %1079 = vbcast.lane.b32.xlu0 %v8922_v28, 352 }
 0x1e1   :  { %7284 = vmatmul.mubr.msk.f32.gmra.mrb[108].mxu0 %vm1946_vm0, %v1788_v9  ;;  %7425 = vmatmul.mubr.msk.f32.gmra.mrb[66].mxu1 %vm1946_vm0, %v1882_v44  ;;  %v1533_v49 = vadd.f32 %v8546_v27, %v1277_v38  ;;  %v1627_v32 = vadd.f32 %v8512_v43, %v1371_v41  ;;  %v9058_v9 = vrot.slane %v8614_v22, %v8901_v45 }
 0x1e2   :  { %v556_v30 = vpop.permute.xlu1 %555  ;;  %v950_v48 = vpop.permute.xlu0 %949 }
 0x1e3   :  { %v1278_v47 = vmul.f32 %v8914_v1, %v556_v30  ;;  %v1372_v60 = vmul.f32 %v8914_v1, %v950_v48  ;;  %v1789_v42 = vmax.f32 %v1533_v49, 0.0  ;;  %v1883_v20 = vmax.f32 %v1627_v32, 0.0 }
 0x1e4   :  { %1091 = vbcast.lane.b32.xlu1 %v8922_v28, 376  ;;  %v9051_v2 = vpop.f32.mrb[56].mxu0  ;;  %v9053_v25 = vpop.f32.mrb[14].mxu1  ;;  %1087 = vbcast.lane.b32.xlu0 %v8922_v28, 368 }
 0x1e5   :  { %11196 = vst [vmem:[#allocation69_spill] sm:$0xff] %v9051_v2  ;;  %11197 = vst [vmem:[#allocation70_spill] sm:$0xff] %v9053_v25  ;;  %v1534_v43 = vadd.f32 %v8563_v11, %v1278_v47  ;;  %v1628_v41 = vadd.f32 %v8529_v46, %v1372_v60  ;;  %v9062_v44 = vpop.f32.mrb[57].mxu0  ;;  %v9064_v38 = vpop.f32.mrb[15].mxu1  ;;  %7427 = vmatprep.mubr.msk.f32.mxu1 %vm1946_vm0, %v1883_v20  ;;  %7286 = vmatprep.mubr.msk.f32.mxu0 %vm1946_vm0, %v1789_v42 }
 0x1e6   :  { %11198 = vst [vmem:[#allocation71_spill] sm:$0xff] %v9062_v44  ;;  %11199 = vst [vmem:[#allocation72_spill] sm:$0xff] %v9064_v38  ;;  %v563_v49 = vpop.permute.xlu1 %562  ;;  %v954_v32 = vpop.permute.xlu0 %953 }
 0x1e7   :  { %v1790_v30 = vmax.f32 %v1534_v43, 0.0  ;;  %v1884_v28 = vmax.f32 %v1628_v41, 0.0  ;;  %v1279_v48 = vmul.f32 %v8914_v1, %v563_v49  ;;  %v1373_v22 = vmul.f32 %v8914_v1, %v954_v32 }
 0x1e8   :  { %1102 = vbcast.lane.b32.xlu1 %v9058_v9, 264  ;;  %1098 = vbcast.lane.b32.xlu0 %v9058_v9, 256 }
 0x1e9   :  { %7287 = vmatmul.mubr.msk.f32.gmra.mrb[110].mxu0 %vm1946_vm0, %v1790_v30  ;;  %7428 = vmatmul.mubr.msk.f32.gmra.mrb[68].mxu1 %vm1946_vm0, %v1884_v28  ;;  %v1535_v46 = vadd.f32 %v8580_v59, %v1279_v48  ;;  %v1629_v47 = vadd.f32 %v8546_v27, %v1373_v22 }
 0x1ea   :  { %v567_v60 = vpop.permute.xlu1 %566  ;;  %v958_v42 = vpop.permute.xlu0 %957 }
 0x1eb   :  { %v1280_v20 = vmul.f32 %v8914_v1, %v567_v60  ;;  %v1374_v43 = vmul.f32 %v8914_v1, %v958_v42  ;;  %v1791_v41 = vmax.f32 %v1535_v46, 0.0  ;;  %v1885_v49 = vmax.f32 %v1629_v47, 0.0 }
 0x1ec   :  { %1110 = vbcast.lane.b32.xlu1 %v9058_v9, 280  ;;  %v9079_v32 = vpop.f32.mrb[58].mxu0  ;;  %v9081_v2 = vpop.f32.mrb[16].mxu1  ;;  %1106 = vbcast.lane.b32.xlu0 %v9058_v9, 272 }
 0x1ed   :  { %11200 = vst [vmem:[#allocation73_spill] sm:$0xff] %v9079_v32  ;;  %11201 = vst [vmem:[#allocation74_spill] sm:$0xff] %v9081_v2  ;;  %v1536_v30 = vadd.f32 %v8597_v29, %v1280_v20  ;;  %v1630_v27 = vadd.f32 %v8563_v11, %v1374_v43  ;;  %v9086_v28 = vpop.f32.mrb[59].mxu0  ;;  %v9088_v48 = vpop.f32.mrb[17].mxu1  ;;  %7430 = vmatprep.mubr.msk.f32.mxu1 %vm1946_vm0, %v1885_v49  ;;  %7289 = vmatprep.mubr.msk.f32.mxu0 %vm1946_vm0, %v1791_v41 }
 0x1ee   :  { %11202 = vst [vmem:[#allocation75_spill] sm:$0xff] %v9086_v28  ;;  %11203 = vst [vmem:[#allocation76_spill] sm:$0xff] %v9088_v48  ;;  %v571_v22 = vpop.permute.xlu1 %570  ;;  %v965_v46 = vpop.permute.xlu0 %964 }
 0x1ef   :  { %v1792_v47 = vmax.f32 %v1536_v30, 0.0  ;;  %v1886_v60 = vmax.f32 %v1630_v27, 0.0  ;;  %v1281_v42 = vmul.f32 %v8914_v1, %v571_v22  ;;  %v1375_v32 = vmul.f32 %v8914_v1, %v965_v46 }
 0x1f0   :  { %1118 = vbcast.lane.b32.xlu1 %v9058_v9, 296  ;;  %1114 = vbcast.lane.b32.xlu0 %v9058_v9, 288 }
 0x1f1   :  { %7290 = vmatmul.mubr.msk.f32.gmra.mrb[112].mxu0 %vm1946_vm0, %v1792_v47  ;;  %7431 = vmatmul.mubr.msk.f32.gmra.mrb[70].mxu1 %vm1946_vm0, %v1886_v60  ;;  %v1537_v11 = vadd.f32 %v8623_v39, %v1281_v42  ;;  %v1631_v20 = vadd.f32 %v8580_v59, %v1375_v32 }
 0x1f2   :  { %v575_v43 = vpop.permute.xlu1 %574  ;;  %v969_v41 = vpop.permute.xlu0 %968 }
 0x1f3   :  { %v1282_v49 = vmul.f32 %v8914_v1, %v575_v43  ;;  %v1376_v30 = vmul.f32 %v8914_v1, %v969_v41  ;;  %v1793_v27 = vmax.f32 %v1537_v11, 0.0  ;;  %v1887_v22 = vmax.f32 %v1631_v20, 0.0 }
 0x1f4   :  { %1126 = vbcast.lane.b32.xlu1 %v9058_v9, 312  ;;  %v9103_v46 = vpop.f32.mrb[60].mxu0  ;;  %v9105_v2 = vpop.f32.mrb[18].mxu1  ;;  %1122 = vbcast.lane.b32.xlu0 %v9058_v9, 304 }
 0x1f5   :  { %11204 = vst [vmem:[#allocation77_spill] sm:$0xff] %v9103_v46  ;;  %11205 = vst [vmem:[#allocation78_spill] sm:$0xff] %v9105_v2  ;;  %v1538_v47 = vadd.f32 %v8640_v26, %v1282_v49  ;;  %v1632_v59 = vadd.f32 %v8597_v29, %v1376_v30  ;;  %v9110_v32 = vpop.f32.mrb[61].mxu0  ;;  %v9112_v60 = vpop.f32.mrb[19].mxu1  ;;  %7433 = vmatprep.mubr.msk.f32.mxu1 %vm1946_vm0, %v1887_v22  ;;  %7292 = vmatprep.mubr.msk.f32.mxu0 %vm1946_vm0, %v1793_v27 }
 0x1f6   :  { %11206 = vst [vmem:[#allocation79_spill] sm:$0xff] %v9110_v32  ;;  %11207 = vst [vmem:[#allocation80_spill] sm:$0xff] %v9112_v60  ;;  %v579_v42 = vpop.permute.xlu1 %578  ;;  %v973_v11 = vpop.permute.xlu0 %972 }
 0x1f7   :  { %v1794_v20 = vmax.f32 %v1538_v47, 0.0  ;;  %v1888_v43 = vmax.f32 %v1632_v59, 0.0  ;;  %v1283_v41 = vmul.f32 %v8914_v1, %v579_v42  ;;  %v1377_v46 = vmul.f32 %v8914_v1, %v973_v11 }
 0x1f8   :  { %1134 = vbcast.lane.b32.xlu1 %v9058_v9, 328  ;;  %1130 = vbcast.lane.b32.xlu0 %v9058_v9, 320 }
 0x1f9   :  { %7293 = vmatmul.mubr.msk.f32.gmra.mrb[114].mxu0 %vm1946_vm0, %v1794_v20  ;;  %7434 = vmatmul.mubr.msk.f32.gmra.mrb[72].mxu1 %vm1946_vm0, %v1888_v43  ;;  %v1539_v29 = vadd.f32 %v8661_v33, %v1283_v41  ;;  %v1633_v49 = vadd.f32 %v8623_v39, %v1377_v46 }
 0x1fa   :  { %v583_v30 = vpop.permute.xlu1 %582  ;;  %v977_v27 = vpop.permute.xlu0 %976 }
 0x1fb   :  { %v1284_v22 = vmul.f32 %v8914_v1, %v583_v30  ;;  %v1378_v47 = vmul.f32 %v8914_v1, %v977_v27  ;;  %v1795_v59 = vmax.f32 %v1539_v29, 0.0  ;;  %v1889_v42 = vmax.f32 %v1633_v49, 0.0 }
 0x1fc   :  { %1142 = vbcast.lane.b32.xlu1 %v9058_v9, 344  ;;  %v9127_v11 = vpop.f32.mrb[62].mxu0  ;;  %v9129_v2 = vpop.f32.mrb[20].mxu1  ;;  %1138 = vbcast.lane.b32.xlu0 %v9058_v9, 336 }
 0x1fd   :  { %11208 = vst [vmem:[#allocation81_spill] sm:$0xff] %v9127_v11  ;;  %11209 = vst [vmem:[#allocation82_spill] sm:$0xff] %v9129_v2  ;;  %v1540_v20 = vadd.f32 %v8678_v55, %v1284_v22  ;;  %v1634_v39 = vadd.f32 %v8640_v26, %v1378_v47  ;;  %v9134_v46 = vpop.f32.mrb[63].mxu0  ;;  %v9136_v43 = vpop.f32.mrb[21].mxu1  ;;  %7436 = vmatprep.mubr.msk.f32.mxu1 %vm1946_vm0, %v1889_v42  ;;  %7295 = vmatprep.mubr.msk.f32.mxu0 %vm1946_vm0, %v1795_v59  ;;  %v9149_v26 = vld [vmem:[%s11115_s1] sm:$0xff] }
 0x1fe   :  { %11210 = vst [vmem:[#allocation83_spill] sm:$0xff] %v9134_v46  ;;  %11211 = vst [vmem:[#allocation84_spill] sm:$0xff] %v9136_v43  ;;  %v587_v41 = vpop.permute.xlu1 %586  ;;  %v981_v29 = vpop.permute.xlu0 %980 }
 0x1ff   :  { %v1796_v49 = vmax.f32 %v1540_v20, 0.0  ;;  %v1890_v30 = vmax.f32 %v1634_v39, 0.0  ;;  %v1285_v27 = vmul.f32 %v8914_v1, %v587_v41  ;;  %v1379_v11 = vmul.f32 %v8914_v1, %v981_v29 }
 0x200   :  { %1150 = vbcast.lane.b32.xlu1 %v9058_v9, 360  ;;  %1146 = vbcast.lane.b32.xlu0 %v9058_v9, 352 }
 0x201   :  { %7296 = vmatmul.mubr.msk.f32.gmra.mrb[116].mxu0 %vm1946_vm0, %v1796_v49  ;;  %7437 = vmatmul.mubr.msk.f32.gmra.mrb[74].mxu1 %vm1946_vm0, %v1890_v30  ;;  %v1541_v22 = vadd.f32 %v8695_v17, %v1285_v27  ;;  %v1635_v47 = vadd.f32 %v8661_v33, %v1379_v11  ;;  %v9163_v27 = vrot.slane %v9149_v26, %v7750_v7 }
 0x202   :  { %v591_v59 = vpop.permute.xlu1 %590  ;;  %v985_v42 = vpop.permute.xlu0 %984 }
 0x203   :  { %v1286_v20 = vmul.f32 %v8914_v1, %v591_v59  ;;  %v1380_v39 = vmul.f32 %v8914_v1, %v985_v42  ;;  %v1797_v41 = vmax.f32 %v1541_v22, 0.0  ;;  %v1891_v29 = vmax.f32 %v1635_v47, 0.0 }
 0x204   :  { %1158 = vbcast.lane.b32.xlu1 %v9058_v9, 376  ;;  %v9156_v49 = vpop.f32.mrb[64].mxu0  ;;  %v9158_v30 = vpop.f32.mrb[22].mxu1  ;;  %1154 = vbcast.lane.b32.xlu0 %v9058_v9, 368 }
 0x205   :  { %11212 = vst [vmem:[#allocation85_spill] sm:$0xff] %v9158_v30  ;;  %v1542_v33 = vadd.f32 %v8712_v51, %v1286_v20  ;;  %v1636_v11 = vadd.f32 %v8678_v55, %v1380_v39  ;;  %v9167_v59 = vpop.f32.mrb[65].mxu0  ;;  %v9169_v22 = vpop.f32.mrb[23].mxu1  ;;  %7439 = vmatprep.mubr.msk.f32.mxu1 %vm1946_vm0, %v1891_v29  ;;  %7298 = vmatprep.mubr.msk.f32.mxu0 %vm1946_vm0, %v1797_v41 }
 0x206   :  { %11213 = vst [vmem:[#allocation86_spill] sm:$0xff] %v9169_v22  ;;  %v595_v47 = vpop.permute.xlu1 %594  ;;  %v989_v42 = vpop.permute.xlu0 %988  ;;  %v9179_v55 = vrot.slane %v9149_v26, %v7765_v13 }
 0x207   :  { %v1798_v30 = vmax.f32 %v1542_v33, 0.0  ;;  %v1892_v9 = vmax.f32 %v1636_v11, 0.0  ;;  %v1287_v2 = vmul.f32 %v8914_v1, %v595_v47  ;;  %v1381_v46 = vmul.f32 %v8914_v1, %v989_v42 }
 0x208   :  { %4326 = vbcast.lane.b32.xlu1 %v9163_v27, 264  ;;  %4322 = vbcast.lane.b32.xlu0 %v9163_v27, 256 }
 0x209   :  { %7299 = vmatmul.mubr.msk.f32.gmra.mrb[118].mxu0 %vm1946_vm0, %v1798_v30  ;;  %7440 = vmatmul.mubr.msk.f32.gmra.mrb[76].mxu1 %vm1946_vm0, %v1892_v9  ;;  %v1543_v20 = vadd.f32 %v8729_v58, %v1287_v2  ;;  %v1637_v39 = vadd.f32 %v8695_v17, %v1381_v46  ;;  %v9195_v2 = vrot.slane %v9149_v26, %v8027_v3 }
 0x20a   :  { %v599_v41 = vpop.permute.xlu1 %598  ;;  %v993_v29 = vpop.permute.xlu0 %992 }
 0x20b   :  { %v1288_v33 = vmul.f32 %v8914_v1, %v599_v41  ;;  %v1382_v11 = vmul.f32 %v8914_v1, %v993_v29  ;;  %v1799_v47 = vmax.f32 %v1543_v20, 0.0  ;;  %v1893_v42 = vmax.f32 %v1637_v39, 0.0 }
 0x20c   :  { %4460 = vbcast.lane.b32.xlu1 %v9179_v55, 264  ;;  %v9188_v22 = vpop.f32.mrb[66].mxu0  ;;  %v9190_v43 = vpop.f32.mrb[24].mxu1  ;;  %4456 = vbcast.lane.b32.xlu0 %v9179_v55, 256 }
 0x20d   :  { %v1544_v17 = vadd.f32 %v8746_v10, %v1288_v33  ;;  %v1638_v46 = vadd.f32 %v8712_v51, %v1382_v11  ;;  %v9199_v30 = vpop.f32.mrb[67].mxu0  ;;  %v9201_v9 = vpop.f32.mrb[25].mxu1  ;;  %7442 = vmatprep.mubr.msk.f32.mxu1 %vm1946_vm0, %v1893_v42  ;;  %7301 = vmatprep.mubr.msk.f32.mxu0 %vm1946_vm0, %v1799_v47 }
 0x20e   :  { %v603_v20 = vpop.permute.xlu1 %602  ;;  %v997_v39 = vpop.permute.xlu0 %996 }
 0x20f   :  { %v1800_v41 = vmax.f32 %v1544_v17, 0.0  ;;  %v1894_v29 = vmax.f32 %v1638_v46, 0.0  ;;  %v1289_v32 = vmul.f32 %v8914_v1, %v603_v20  ;;  %v1383_v60 = vmul.f32 %v8914_v1, %v997_v39 }
 0x210   :  { %4594 = vbcast.lane.b32.xlu1 %v9195_v2, 264  ;;  %4590 = vbcast.lane.b32.xlu0 %v9195_v2, 256 }
 0x211   :  { %7302 = vmatmul.mubr.msk.f32.gmra.mrb[120].mxu0 %vm1946_vm0, %v1800_v41  ;;  %7443 = vmatmul.mubr.msk.f32.gmra.mrb[78].mxu1 %vm1946_vm0, %v1894_v29  ;;  %v1545_v51 = vadd.f32 %v8763_v23, %v1289_v32  ;;  %v1639_v33 = vadd.f32 %v8729_v58, %v1383_v60  ;;  %v9223_v32 = vrot.slane %v9149_v26, %v8346_v21 }
 0x212   :  { %v607_v11 = vpop.permute.xlu1 %606  ;;  %v1001_v47 = vpop.permute.xlu0 %1000 }
 0x213   :  { %v1290_v42 = vmul.f32 %v8914_v1, %v607_v11  ;;  %v1384_v17 = vmul.f32 %v8914_v1, %v1001_v47  ;;  %v1801_v46 = vmax.f32 %v1545_v51, 0.0  ;;  %v1895_v20 = vmax.f32 %v1639_v33, 0.0 }
 0x214   :  { %4464 = vbcast.lane.b32.xlu1 %v9179_v55, 272  ;;  %v9216_v39 = vpop.f32.mrb[68].mxu0  ;;  %v9218_v28 = vpop.f32.mrb[26].mxu1  ;;  %4330 = vbcast.lane.b32.xlu0 %v9163_v27, 272 }
 0x215   :  { %v1546_v58 = vadd.f32 %v8780_v56, %v1290_v42  ;;  %v1640_v60 = vadd.f32 %v8746_v10, %v1384_v17  ;;  %v9227_v41 = vpop.f32.mrb[69].mxu0  ;;  %v9229_v29 = vpop.f32.mrb[27].mxu1  ;;  %7445 = vmatprep.mubr.msk.f32.mxu1 %vm1946_vm0, %v1895_v20  ;;  %7304 = vmatprep.mubr.msk.f32.mxu0 %vm1946_vm0, %v1801_v46  ;;  %v9239_v10 = vrot.slane %v9149_v26, %v7770_v15  ;;  %v11268_v15 = vld [vmem:[#allocation9_spill] sm:$0xff] }
 0x216   :  { %v611_v51 = vpop.permute.xlu1 %610  ;;  %v1005_v33 = vpop.permute.xlu0 %1004 }
 0x217   :  { %v1802_v11 = vmax.f32 %v1546_v58, 0.0  ;;  %v1896_v47 = vmax.f32 %v1640_v60, 0.0  ;;  %v1291_v48 = vmul.f32 %v8914_v1, %v611_v51  ;;  %v1385_v25 = vmul.f32 %v8914_v1, %v1005_v33 }
 0x218   :  { %4728 = vbcast.lane.b32.xlu1 %v9223_v32, 264  ;;  %4724 = vbcast.lane.b32.xlu0 %v9223_v32, 256 }
 0x219   :  { %7305 = vmatmul.mubr.msk.f32.gmra.mrb[122].mxu0 %vm1946_vm0, %v1802_v11  ;;  %7446 = vmatmul.mubr.msk.f32.gmra.mrb[80].mxu1 %vm1946_vm0, %v1896_v47  ;;  %v1547_v42 = vadd.f32 %v8797_v40, %v1291_v48  ;;  %v1641_v17 = vadd.f32 %v8763_v23, %v1385_v25 }
 0x21a   :  { %v615_v46 = vpop.permute.xlu1 %614  ;;  %v1009_v20 = vpop.permute.xlu0 %1008 }
 0x21b   :  { %v1292_v58 = vmul.f32 %v8914_v1, %v615_v46  ;;  %v1386_v60 = vmul.f32 %v8914_v1, %v1009_v20  ;;  %v1803_v51 = vmax.f32 %v1547_v42, 0.0  ;;  %v1897_v33 = vmax.f32 %v1641_v17, 0.0 }
 0x21c   :  { %4858 = vbcast.lane.b32.xlu1 %v9239_v10, 256  ;;  %v9248_v44 = vpop.f32.mrb[70].mxu0  ;;  %v9250_v38 = vpop.f32.mrb[28].mxu1  ;;  %4598 = vbcast.lane.b32.xlu0 %v9195_v2, 272 }
 0x21d   :  { %v1548_v48 = vadd.f32 %v8814_v57, %v1292_v58  ;;  %v1642_v23 = vadd.f32 %v8780_v56, %v1386_v60  ;;  %v9255_v25 = vpop.f32.mrb[71].mxu0  ;;  %v9257_v11 = vpop.f32.mrb[29].mxu1  ;;  %7448 = vmatprep.mubr.msk.f32.mxu1 %vm1946_vm0, %v1897_v33  ;;  %7307 = vmatprep.mubr.msk.f32.mxu0 %vm1946_vm0, %v1803_v51 }
 0x21e   :  { %v619_v47 = vpop.permute.xlu1 %618  ;;  %v1013_v42 = vpop.permute.xlu0 %1012 }
 0x21f   :  { %v1804_v17 = vmax.f32 %v1548_v48, 0.0  ;;  %v1898_v46 = vmax.f32 %v1642_v23, 0.0  ;;  %v1293_v20 = vmul.f32 %v8914_v1, %v619_v47  ;;  %v1387_v16 = vmul.f32 %v8914_v1, %v1013_v42 }
 0x220   :  { %4334 = vbcast.lane.b32.xlu1 %v9163_v27, 280  ;;  %4862 = vbcast.lane.b32.xlu0 %v9239_v10, 264 }
 0x221   :  { %7308 = vmatmul.mubr.msk.f32.gmra.mrb[124].mxu0 %vm1946_vm0, %v1804_v17  ;;  %7449 = vmatmul.mubr.msk.f32.gmra.mrb[82].mxu1 %vm1946_vm0, %v1898_v46  ;;  %v1549_v56 = vadd.f32 %v8831_v34, %v1293_v20  ;;  %v1643_v58 = vadd.f32 %v8797_v40, %v1387_v16  ;;  %v9279_v17 = vrot.slane %v9149_v26, %v8070_v52 }
 0x222   :  { %v623_v60 = vpop.permute.xlu1 %622  ;;  %v1017_v51 = vpop.permute.xlu0 %1016 }
 0x223   :  { %v1294_v33 = vmul.f32 %v8914_v1, %v623_v60  ;;  %v1388_v48 = vmul.f32 %v8914_v1, %v1017_v51  ;;  %v1805_v23 = vmax.f32 %v1549_v56, 0.0  ;;  %v1899_v47 = vmax.f32 %v1643_v58, 0.0 }
 0x224   :  { %4732 = vbcast.lane.b32.xlu1 %v9223_v32, 272  ;;  %v9272_v42 = vpop.f32.mrb[72].mxu0  ;;  %v9274_v31 = vpop.f32.mrb[30].mxu1  ;;  %4468 = vbcast.lane.b32.xlu0 %v9179_v55, 280 }
 0x225   :  { %v1550_v40 = vadd.f32 %v8848_v24, %v1294_v33  ;;  %v1644_v16 = vadd.f32 %v8814_v57, %v1388_v48  ;;  %v9283_v46 = vpop.f32.mrb[73].mxu0  ;;  %v9285_v20 = vpop.f32.mrb[31].mxu1  ;;  %7451 = vmatprep.mubr.msk.f32.mxu1 %vm1946_vm0, %v1899_v47  ;;  %7310 = vmatprep.mubr.msk.f32.mxu0 %vm1946_vm0, %v1805_v23  ;;  %v7619_v57 = vld [vmem:[%s11114_s2] sm:$0xff] }
 0x226   :  { %v630_v56 = vpop.permute.xlu1 %629  ;;  %v1021_v58 = vpop.permute.xlu0 %1020 }
 0x227   :  { %v1806_v60 = vmax.f32 %v1550_v40, 0.0  ;;  %v1900_v51 = vmax.f32 %v1644_v16, 0.0  ;;  %v1295_v12 = vmul.f32 %v8914_v1, %v630_v56  ;;  %v1389_v19 = vmul.f32 %v8914_v1, %v1021_v58 }
 0x228   :  { %4996 = vbcast.lane.b32.xlu1 %v9279_v17, 264  ;;  %4992 = vbcast.lane.b32.xlu0 %v9279_v17, 256 }
 0x229   :  { %7311 = vmatmul.mubr.msk.f32.gmra.mrb[126].mxu0 %vm1946_vm0, %v1806_v60  ;;  %7452 = vmatmul.mubr.msk.f32.gmra.mrb[84].mxu1 %vm1946_vm0, %v1900_v51  ;;  %v1551_v33 = vadd.f32 %v7619_v57, %v1295_v12  ;;  %v1645_v48 = vadd.f32 %v8831_v34, %v1389_v19  ;;  %v9309_v12 = vrot.slane %v9149_v26, %v8384_v6  ;;  %v7620_v34 = vld [vmem:[%s11114_s2 + $0x8] sm:$0xff] }
 0x22a   :  { %v634_v23 = vpop.permute.xlu1 %633  ;;  %v1025_v47 = vpop.permute.xlu0 %1024 }
 0x22b   :  { %v1296_v40 = vmul.f32 %v8914_v1, %v634_v23  ;;  %v1390_v16 = vmul.f32 %v8914_v1, %v1025_v47  ;;  %v1807_v56 = vmax.f32 %v1551_v33, 0.0  ;;  %v1901_v58 = vmax.f32 %v1645_v48, 0.0 }
 0x22c   :  { %4866 = vbcast.lane.b32.xlu1 %v9239_v10, 272  ;;  %v9302_v60 = vpop.f32.mrb[74].mxu0  ;;  %v9304_v51 = vpop.f32.mrb[32].mxu1  ;;  %4602 = vbcast.lane.b32.xlu0 %v9195_v2, 280 }
 0x22d   :  { %11214 = vst [vmem:[#allocation87_spill] sm:$0xff] %v9302_v60  ;;  %11215 = vst [vmem:[#allocation88_spill] sm:$0xff] %v9304_v51  ;;  %v1552_v19 = vadd.f32 %v7620_v34, %v1296_v40  ;;  %v1646_v33 = vadd.f32 %v8848_v24, %v1390_v16  ;;  %v9315_v48 = vpop.f32.mrb[75].mxu0  ;;  %v9317_v23 = vpop.f32.mrb[33].mxu1  ;;  %7454 = vmatprep.mubr.msk.f32.mxu1 %vm1946_vm0, %v1901_v58  ;;  %7313 = vmatprep.mubr.msk.f32.mxu0 %vm1946_vm0, %v1807_v56  ;;  %v7621_v24 = vld [vmem:[%s11114_s2 + $0x10] sm:$0xff] }
 0x22e   :  { %11216 = vst [vmem:[#allocation89_spill] sm:$0xff] %v9315_v48  ;;  %11217 = vst [vmem:[#allocation90_spill] sm:$0xff] %v9317_v23  ;;  %v638_v47 = vpop.permute.xlu1 %637  ;;  %v1032_v50 = vpop.permute.xlu0 %1031 }
 0x22f   :  { %v1808_v62 = vmax.f32 %v1552_v19, 0.0  ;;  %v1902_v18 = vmax.f32 %v1646_v33, 0.0  ;;  %v1297_v14 = vmul.f32 %v8914_v1, %v638_v47  ;;  %v1391_v54 = vmul.f32 %v8914_v1, %v1032_v50 }
 0x230   :  { %5130 = vbcast.lane.b32.xlu1 %v9309_v12, 264  ;;  %5126 = vbcast.lane.b32.xlu0 %v9309_v12, 256 }
 0x231   :  { %7314 = vmatmul.mubr.msk.f32.gmra.mrb[128].mxu0 %vm1946_vm0, %v1808_v62  ;;  %7455 = vmatmul.mubr.msk.f32.gmra.mrb[86].mxu1 %vm1946_vm0, %v1902_v18  ;;  %v1553_v40 = vadd.f32 %v7621_v24, %v1297_v14  ;;  %v1647_v16 = vadd.f32 %v7619_v57, %v1391_v54  ;;  %v7622_v62 = vld [vmem:[%s11114_s2 + $0x18] sm:$0xff] }
 0x232   :  { %v642_v56 = vpop.permute.xlu1 %641  ;;  %v1036_v58 = vpop.permute.xlu0 %1035 }
 0x233   :  { %v1298_v19 = vmul.f32 %v8914_v1, %v642_v56  ;;  %v1392_v50 = vmul.f32 %v8914_v1, %v1036_v58  ;;  %v1809_v33 = vmax.f32 %v1553_v40, 0.0  ;;  %v1903_v47 = vmax.f32 %v1647_v16, 0.0 }
 0x234   :  { %4472 = vbcast.lane.b32.xlu1 %v9179_v55, 288  ;;  %v9333_v0 = vpop.f32.mrb[76].mxu0  ;;  %4338 = vbcast.lane.b32.xlu0 %v9163_v27, 288  ;;  %v9339_v18 = vpop.f32.mrb[34].mxu1 }
 0x235   :  { %11218 = vst [vmem:[#allocation91_spill] sm:$0xff] %v9333_v0  ;;  %v1554_v14 = vadd.f32 %v7622_v62, %v1298_v19  ;;  %v1648_v54 = vadd.f32 %v7620_v34, %v1392_v50  ;;  %11219 = vst [vmem:[#allocation92_spill] sm:$0xff] %v9339_v18  ;;  %v9341_v57 = vpop.f32.mrb[77].mxu0  ;;  %v9343_v56 = vpop.f32.mrb[35].mxu1  ;;  %7457 = vmatprep.mubr.msk.f32.mxu1 %vm1946_vm0, %v1903_v47  ;;  %7316 = vmatprep.mubr.msk.f32.mxu0 %vm1946_vm0, %v1809_v33  ;;  %v7623_v19 = vld [vmem:[%s11114_s2 + $0x20] sm:$0xff] }
 0x236   :  { %11220 = vst [vmem:[#allocation93_spill] sm:$0xff] %v9341_v57  ;;  %11221 = vst [vmem:[#allocation94_spill] sm:$0xff] %v9343_v56  ;;  %v646_v40 = vpop.permute.xlu1 %645  ;;  %v1040_v0 = vpop.permute.xlu0 %1039  ;;  %v9353_v34 = vrot.slane %v9149_v26, %v8901_v45 }
 0x237   :  { %v1810_v16 = vmax.f32 %v1554_v14, 0.0  ;;  %v1904_v58 = vmax.f32 %v1648_v54, 0.0  ;;  %v1299_v36 = vmul.f32 %v8914_v1, %v646_v40  ;;  %v1393_v6 = vmul.f32 %v8914_v1, %v1040_v0 }
 0x238   :  { %5000 = vbcast.lane.b32.xlu1 %v9279_v17, 272  ;;  %4736 = vbcast.lane.b32.xlu0 %v9223_v32, 280 }
 0x239   :  { %7317 = vmatmul.mubr.msk.f32.gmra.mrb[130].mxu0 %vm1946_vm0, %v1810_v16  ;;  %7458 = vmatmul.mubr.msk.f32.gmra.mrb[88].mxu1 %vm1946_vm0, %v1904_v58  ;;  %v1555_v50 = vadd.f32 %v7623_v19, %v1299_v36  ;;  %v1649_v33 = vadd.f32 %v7621_v24, %v1393_v6  ;;  %v7624_v16 = vld [vmem:[%s11114_s2 + $0x28] sm:$0xff] }
 0x23a   :  { %v650_v47 = vpop.permute.xlu1 %649  ;;  %v1044_v14 = vpop.permute.xlu0 %1043 }
 0x23b   :  { %v1300_v0 = vmul.f32 %v8914_v1, %v650_v47  ;;  %v1811_v54 = vmax.f32 %v1555_v50, 0.0  ;;  %v1905_v40 = vmax.f32 %v1649_v33, 0.0  ;;  %v1394_v18 = vmul.f32 %v8914_v1, %v1044_v14 }
 0x23c   :  { %5264 = vbcast.lane.b32.xlu1 %v9353_v34, 264  ;;  %v9363_v26 = vpop.f32.mrb[78].mxu0  ;;  %5260 = vbcast.lane.b32.xlu0 %v9353_v34, 256  ;;  %v9369_v6 = vpop.f32.mrb[36].mxu1 }
 0x23d   :  { %11222 = vst [vmem:[#allocation95_spill] sm:$0xff] %v9363_v26  ;;  %v1556_v36 = vadd.f32 %v7624_v16, %v1300_v0  ;;  %11223 = vst [vmem:[#allocation96_spill] sm:$0xff] %v9369_v6  ;;  %v9371_v24 = vpop.f32.mrb[79].mxu0  ;;  %v1650_v58 = vadd.f32 %v7622_v62, %v1394_v18  ;;  %v9373_v50 = vpop.f32.mrb[37].mxu1  ;;  %7460 = vmatprep.mubr.msk.f32.mxu1 %vm1946_vm0, %v1905_v40  ;;  %7319 = vmatprep.mubr.msk.f32.mxu0 %vm1946_vm0, %v1811_v54  ;;  %v7625_v62 = vld [vmem:[%s11114_s2 + $0x30] sm:$0xff] }
 0x23e   :  { %11224 = vst [vmem:[#allocation97_spill] sm:$0xff] %v9371_v24  ;;  %11225 = vst [vmem:[#allocation98_spill] sm:$0xff] %v9373_v50  ;;  %v654_v33 = vpop.permute.xlu1 %653  ;;  %v1048_v26 = vpop.permute.xlu0 %1047 }
 0x23f   :  { %v1812_v47 = vmax.f32 %v1556_v36, 0.0  ;;  %v1301_v14 = vmul.f32 %v8914_v1, %v654_v33  ;;  %v1906_v45 = vmax.f32 %v1650_v58, 0.0  ;;  %v1395_v56 = vmul.f32 %v8914_v1, %v1048_v26 }
 0x240   :  { %4870 = vbcast.lane.b32.xlu1 %v9239_v10, 280  ;;  %4606 = vbcast.lane.b32.xlu0 %v9195_v2, 288 }
 0x241   :  { %v1557_v18 = vadd.f32 %v7625_v62, %v1301_v14  ;;  %7320 = vmatmul.mubr.msk.f32.gmra.mrb[132].mxu0 %vm1946_vm0, %v1812_v47  ;;  %v1651_v0 = vadd.f32 %v7623_v19, %v1395_v56  ;;  %7461 = vmatmul.mubr.msk.f32.gmra.mrb[90].mxu1 %vm1946_vm0, %v1906_v45  ;;  %v7626_v56 = vld [vmem:[%s11114_s2 + $0x38] sm:$0xff] }
 0x242   :  { %v658_v54 = vpop.permute.xlu1 %657  ;;  %v1052_v58 = vpop.permute.xlu0 %1051 }
 0x243   :  { %v1813_v40 = vmax.f32 %v1557_v18, 0.0  ;;  %v1302_v36 = vmul.f32 %v8914_v1, %v658_v54  ;;  %v1907_v26 = vmax.f32 %v1651_v0, 0.0  ;;  %v1396_v33 = vmul.f32 %v8914_v1, %v1052_v58  ;;  %v9406_v54 = vld [vmem:[%s11113_s3] ss:$0 sm:$0xff] }
 0x244   :  { %4342 = vbcast.lane.b32.xlu1 %v9163_v27, 296  ;;  %v9389_v6 = vpop.f32.mrb[80].mxu0  ;;  %5134 = vbcast.lane.b32.xlu0 %v9309_v12, 272  ;;  %v9395_v45 = vpop.f32.mrb[38].mxu1 }
 0x245   :  { %11226 = vst [vmem:[#allocation99_spill] sm:$0xff] %v9389_v6  ;;  %v1558_v19 = vadd.f32 %v7626_v56, %v1302_v36  ;;  %11227 = vst [vmem:[#allocation100_spill] sm:$0xff] %v9395_v45  ;;  %v9397_v47 = vpop.f32.mrb[81].mxu0  ;;  %7322 = vmatprep.mubr.msk.f32.mxu0 %vm1946_vm0, %v1813_v40  ;;  %v1652_v14 = vadd.f32 %v7624_v16, %v1396_v33  ;;  %v9400_v18 = vpop.f32.mrb[39].mxu1  ;;  %7463 = vmatprep.mubr.msk.f32.mxu1 %vm1946_vm0, %v1907_v26 }
 0x246   :  { %11228 = vst [vmem:[#allocation101_spill] sm:$0xff] %v9397_v47  ;;  %11229 = vst [vmem:[#allocation102_spill] sm:$0xff] %v9400_v18  ;;  %v1060_v1 = vpop.permute.xlu1 %1059  ;;  %v1056_v58 = vpop.permute.xlu0 %1055 }
 0x247   :  { %v1814_v0 = vmax.f32 %v1558_v19, 0.0  ;;  %v1398_v36 = vmul.f32 %v9406_v54, %v1060_v1  ;;  %v1908_v6 = vmax.f32 %v1652_v14, 0.0  ;;  %v1397_v45 = vmul.f32 %v9406_v54, %v1056_v58 }
 0x248   :  { %4740 = vbcast.lane.b32.xlu1 %v9223_v32, 288  ;;  %4476 = vbcast.lane.b32.xlu0 %v9179_v55, 296 }
 0x249   :  { %v1654_v16 = vadd.f32 %v7626_v56, %v1398_v36  ;;  %7323 = vmatmul.mubr.msk.f32.gmra.mrb[134].mxu0 %vm1946_vm0, %v1814_v0  ;;  %v1653_v40 = vadd.f32 %v7625_v62, %v1397_v45  ;;  %7464 = vmatmul.mubr.msk.f32.gmra.mrb[92].mxu1 %vm1946_vm0, %v1908_v6  ;;  %v7628_v62 = vld [vmem:[%s11114_s2 + $0x48] sm:$0xff]  ;;  %v7629_v0 = vld [vmem:[%s11114_s2 + $0x40] sm:$0xff] }
 0x24a   :  { %v1068_v26 = vpop.permute.xlu1 %1067  ;;  %v1064_v47 = vpop.permute.xlu0 %1063 }
 0x24b   :  { %v1910_v33 = vmax.f32 %v1654_v16, 0.0  ;;  %v1400_v19 = vmul.f32 %v9406_v54, %v1068_v26  ;;  %v1909_v1 = vmax.f32 %v1653_v40, 0.0  ;;  %v1399_v14 = vmul.f32 %v9406_v54, %v1064_v47 }
 0x24c   :  { %5268 = vbcast.lane.b32.xlu1 %v9353_v34, 272  ;;  %v9417_v58 = vpop.f32.mrb[82].mxu0  ;;  %5004 = vbcast.lane.b32.xlu0 %v9279_v17, 280  ;;  %v9423_v6 = vpop.f32.mrb[40].mxu1 }
 0x24d   :  { %11230 = vst [vmem:[#allocation103_spill] sm:$0xff] %v9417_v58  ;;  %v1656_v56 = vadd.f32 %v7628_v62, %v1400_v19  ;;  %11231 = vst [vmem:[#allocation104_spill] sm:$0xff] %v9423_v6  ;;  %v9425_v45 = vpop.f32.mrb[83].mxu0  ;;  %v1655_v47 = vadd.f32 %v7629_v0, %v1399_v14  ;;  %v9430_v36 = vpop.f32.mrb[41].mxu1  ;;  %7466 = vmatprep.mubr.msk.f32.mxu1 %vm1946_vm0, %v1909_v1  ;;  %v7630_v14 = vld [vmem:[%s11114_s2 + $0x58] sm:$0xff]  ;;  %v7631_v1 = vld [vmem:[%s11114_s2 + $0x50] sm:$0xff] }
 0x24e   :  { %11232 = vst [vmem:[#allocation105_spill] sm:$0xff] %v9425_v45  ;;  %11233 = vst [vmem:[#allocation106_spill] sm:$0xff] %v9430_v36  ;;  %v1076_v16 = vpop.permute.xlu1 %1075  ;;  %7467 = vmatmul.mubr.msk.f32.gmra.mrb[94].mxu1 %vm1946_vm0, %v1910_v33  ;;  %v1072_v19 = vpop.permute.xlu0 %1071 }
 0x24f   :  { %v1912_v40 = vmax.f32 %v1656_v56, 0.0  ;;  %v1402_v26 = vmul.f32 %v9406_v54, %v1076_v16  ;;  %v1911_v62 = vmax.f32 %v1655_v47, 0.0  ;;  %v1401_v58 = vmul.f32 %v9406_v54, %v1072_v19 }
 0x250   :  { %4874 = vbcast.lane.b32.xlu1 %v9239_v10, 288  ;;  %4610 = vbcast.lane.b32.xlu0 %v9195_v2, 296 }
 0x251   :  { %v1658_v0 = vadd.f32 %v7630_v14, %v1402_v26  ;;  %v1657_v56 = vadd.f32 %v7631_v1, %v1401_v58  ;;  %7469 = vmatprep.mubr.msk.f32.mxu1 %vm1946_vm0, %v1911_v62  ;;  %v7632_v58 = vld [vmem:[%s11114_s2 + $0x68] sm:$0xff] }
 0x252   :  { %v1084_v33 = vpop.permute.xlu1 %1083  ;;  %7470 = vmatmul.mubr.msk.f32.gmra.mrb[96].mxu1 %vm1946_vm0, %v1912_v40  ;;  %v1080_v19 = vpop.permute.xlu0 %1079  ;;  %v7633_v40 = vld [vmem:[%s11114_s2 + $0x60] sm:$0xff] }
 0x253   :  { %v1914_v47 = vmax.f32 %v1658_v0, 0.0  ;;  %v1404_v16 = vmul.f32 %v9406_v54, %v1084_v33  ;;  %v1913_v6 = vmax.f32 %v1657_v56, 0.0  ;;  %v1403_v45 = vmul.f32 %v9406_v54, %v1080_v19 }
 0x254   :  { %4346 = vbcast.lane.b32.xlu1 %v9163_v27, 304  ;;  %v9449_v26 = vpop.f32.mrb[84].mxu0  ;;  %5138 = vbcast.lane.b32.xlu0 %v9309_v12, 280  ;;  %v9455_v14 = vpop.f32.mrb[42].mxu1 }
 0x255   :  { %11234 = vst [vmem:[#allocation107_spill] sm:$0xff] %v9449_v26  ;;  %v1660_v62 = vadd.f32 %v7632_v58, %v1404_v16  ;;  %11235 = vst [vmem:[#allocation108_spill] sm:$0xff] %v9455_v14  ;;  %v9457_v0 = vpop.f32.mrb[85].mxu0  ;;  %v1659_v1 = vadd.f32 %v7633_v40, %v1403_v45  ;;  %v9462_v56 = vpop.f32.mrb[43].mxu1  ;;  %7472 = vmatprep.mubr.msk.f32.mxu1 %vm1946_vm0, %v1913_v6  ;;  %v7634_v45 = vld [vmem:[%s11114_s2 + $0x78] sm:$0xff]  ;;  %v7635_v6 = vld [vmem:[%s11114_s2 + $0x70] sm:$0xff] }
 0x256   :  { %11236 = vst [vmem:[#allocation109_spill] sm:$0xff] %v9457_v0  ;;  %11237 = vst [vmem:[#allocation110_spill] sm:$0xff] %v9462_v56  ;;  %v1092_v33 = vpop.permute.xlu1 %1091  ;;  %7473 = vmatmul.mubr.msk.f32.gmra.mrb[98].mxu1 %vm1946_vm0, %v1914_v47  ;;  %v1088_v16 = vpop.permute.xlu0 %1087 }
 0x257   :  { %v1916_v19 = vmax.f32 %v1660_v62, 0.0  ;;  %v1406_v26 = vmul.f32 %v9406_v54, %v1092_v33  ;;  %v1915_v58 = vmax.f32 %v1659_v1, 0.0  ;;  %v1405_v14 = vmul.f32 %v9406_v54, %v1088_v16 }
 0x258   :  { %4744 = vbcast.lane.b32.xlu1 %v9223_v32, 296  ;;  %4480 = vbcast.lane.b32.xlu0 %v9179_v55, 304 }
 0x259   :  { %v1662_v40 = vadd.f32 %v7634_v45, %v1406_v26  ;;  %v1661_v62 = vadd.f32 %v7635_v6, %v1405_v14  ;;  %7475 = vmatprep.mubr.msk.f32.mxu1 %vm1946_vm0, %v1915_v58  ;;  %v7636_v14 = vld [vmem:[%s11114_s2 + $0x88] sm:$0xff] }
 0x25a   :  { %v1103_v47 = vpop.permute.xlu1 %1102  ;;  %7476 = vmatmul.mubr.msk.f32.gmra.mrb[100].mxu1 %vm1946_vm0, %v1916_v19  ;;  %v1099_v16 = vpop.permute.xlu0 %1098  ;;  %v7637_v19 = vld [vmem:[%s11114_s2 + $0x80] sm:$0xff] }
 0x25b   :  { %v1918_v1 = vmax.f32 %v1662_v40, 0.0  ;;  %v1408_v33 = vmul.f32 %v9406_v54, %v1103_v47  ;;  %v1917_v0 = vmax.f32 %v1661_v62, 0.0  ;;  %v1407_v56 = vmul.f32 %v9406_v54, %v1099_v16 }
 0x25c   :  { %5272 = vbcast.lane.b32.xlu1 %v9353_v34, 280  ;;  %v9481_v26 = vpop.f32.mrb[86].mxu0  ;;  %5008 = vbcast.lane.b32.xlu0 %v9279_v17, 288  ;;  %v9487_v45 = vpop.f32.mrb[44].mxu1 }
 0x25d   :  { %11238 = vst [vmem:[#allocation111_spill] sm:$0xff] %v9481_v26  ;;  %v1664_v58 = vadd.f32 %v7636_v14, %v1408_v33  ;;  %11239 = vst [vmem:[#allocation112_spill] sm:$0xff] %v9487_v45  ;;  %v9489_v40 = vpop.f32.mrb[87].mxu0  ;;  %v1663_v6 = vadd.f32 %v7637_v19, %v1407_v56  ;;  %v9494_v62 = vpop.f32.mrb[45].mxu1  ;;  %7478 = vmatprep.mubr.msk.f32.mxu1 %vm1946_vm0, %v1917_v0  ;;  %v7638_v56 = vld [vmem:[%s11114_s2 + $0x98] sm:$0xff]  ;;  %v7639_v0 = vld [vmem:[%s11114_s2 + $0x90] sm:$0xff] }
 0x25e   :  { %11240 = vst [vmem:[#allocation113_spill] sm:$0xff] %v9489_v40  ;;  %11241 = vst [vmem:[#allocation114_spill] sm:$0xff] %v9494_v62  ;;  %v1111_v47 = vpop.permute.xlu1 %1110  ;;  %7479 = vmatmul.mubr.msk.f32.gmra.mrb[102].mxu1 %vm1946_vm0, %v1918_v1  ;;  %v1107_v33 = vpop.permute.xlu0 %1106 }
 0x25f   :  { %v1920_v16 = vmax.f32 %v1664_v58, 0.0  ;;  %v1410_v26 = vmul.f32 %v9406_v54, %v1111_v47  ;;  %v1919_v14 = vmax.f32 %v1663_v6, 0.0  ;;  %v1409_v45 = vmul.f32 %v9406_v54, %v1107_v33 }
 0x260   :  { %4878 = vbcast.lane.b32.xlu1 %v9239_v10, 296  ;;  %4614 = vbcast.lane.b32.xlu0 %v9195_v2, 304 }
 0x261   :  { %v1666_v19 = vadd.f32 %v7638_v56, %v1410_v26  ;;  %v1665_v58 = vadd.f32 %v7639_v0, %v1409_v45  ;;  %7481 = vmatprep.mubr.msk.f32.mxu1 %vm1946_vm0, %v1919_v14  ;;  %v7640_v45 = vld [vmem:[%s11114_s2 + $0xa8] sm:$0xff] }
 0x262   :  { %v1119_v1 = vpop.permute.xlu1 %1118  ;;  %7482 = vmatmul.mubr.msk.f32.gmra.mrb[104].mxu1 %vm1946_vm0, %v1920_v16  ;;  %v1115_v33 = vpop.permute.xlu0 %1114  ;;  %v7641_v16 = vld [vmem:[%s11114_s2 + $0xa0] sm:$0xff] }
 0x263   :  { %v1922_v6 = vmax.f32 %v1666_v19, 0.0  ;;  %v1412_v47 = vmul.f32 %v9406_v54, %v1119_v1  ;;  %v1921_v40 = vmax.f32 %v1665_v58, 0.0  ;;  %v1411_v62 = vmul.f32 %v9406_v54, %v1115_v33 }
 0x264   :  { %4350 = vbcast.lane.b32.xlu1 %v9163_v27, 312  ;;  %v9513_v26 = vpop.f32.mrb[88].mxu0  ;;  %5142 = vbcast.lane.b32.xlu0 %v9309_v12, 288  ;;  %v9519_v56 = vpop.f32.mrb[46].mxu1 }
 0x265   :  { %11242 = vst [vmem:[#allocation115_spill] sm:$0xff] %v9513_v26  ;;  %v1668_v14 = vadd.f32 %v7640_v45, %v1412_v47  ;;  %11243 = vst [vmem:[#allocation116_spill] sm:$0xff] %v9519_v56  ;;  %v9521_v19 = vpop.f32.mrb[89].mxu0  ;;  %v1667_v0 = vadd.f32 %v7641_v16, %v1411_v62  ;;  %v9526_v58 = vpop.f32.mrb[47].mxu1  ;;  %7484 = vmatprep.mubr.msk.f32.mxu1 %vm1946_vm0, %v1921_v40  ;;  %v7642_v62 = vld [vmem:[%s11114_s2 + $0xb8] sm:$0xff]  ;;  %v7643_v40 = vld [vmem:[%s11114_s2 + $0xb0] sm:$0xff] }
 0x266   :  { %11244 = vst [vmem:[#allocation117_spill] sm:$0xff] %v9521_v19  ;;  %11245 = vst [vmem:[#allocation118_spill] sm:$0xff] %v9526_v58  ;;  %v1127_v1 = vpop.permute.xlu1 %1126  ;;  %7485 = vmatmul.mubr.msk.f32.gmra.mrb[106].mxu1 %vm1946_vm0, %v1922_v6  ;;  %v1123_v47 = vpop.permute.xlu0 %1122 }
 0x267   :  { %v1924_v33 = vmax.f32 %v1668_v14, 0.0  ;;  %v1414_v26 = vmul.f32 %v9406_v54, %v1127_v1  ;;  %v1923_v45 = vmax.f32 %v1667_v0, 0.0  ;;  %v1413_v56 = vmul.f32 %v9406_v54, %v1123_v47 }
 0x268   :  { %4748 = vbcast.lane.b32.xlu1 %v9223_v32, 304  ;;  %4484 = vbcast.lane.b32.xlu0 %v9179_v55, 312 }
 0x269   :  { %v1670_v16 = vadd.f32 %v7642_v62, %v1414_v26  ;;  %v1669_v14 = vadd.f32 %v7643_v40, %v1413_v56  ;;  %7487 = vmatprep.mubr.msk.f32.mxu1 %vm1946_vm0, %v1923_v45  ;;  %v7644_v56 = vld [vmem:[%s11114_s2 + $0xc8] sm:$0xff] }
 0x26a   :  { %v1135_v6 = vpop.permute.xlu1 %1134  ;;  %7488 = vmatmul.mubr.msk.f32.gmra.mrb[108].mxu1 %vm1946_vm0, %v1924_v33  ;;  %v1131_v47 = vpop.permute.xlu0 %1130  ;;  %v7645_v33 = vld [vmem:[%s11114_s2 + $0xc0] sm:$0xff] }
 0x26b   :  { %v1926_v0 = vmax.f32 %v1670_v16, 0.0  ;;  %v1416_v1 = vmul.f32 %v9406_v54, %v1135_v6  ;;  %v1925_v19 = vmax.f32 %v1669_v14, 0.0  ;;  %v1415_v58 = vmul.f32 %v9406_v54, %v1131_v47 }
 0x26c   :  { %5276 = vbcast.lane.b32.xlu1 %v9353_v34, 288  ;;  %v9545_v26 = vpop.f32.mrb[90].mxu0  ;;  %5012 = vbcast.lane.b32.xlu0 %v9279_v17, 296  ;;  %v9551_v62 = vpop.f32.mrb[48].mxu1 }
 0x26d   :  { %11246 = vst [vmem:[#allocation119_spill] sm:$0xff] %v9545_v26  ;;  %v1672_v45 = vadd.f32 %v7644_v56, %v1416_v1  ;;  %11247 = vst [vmem:[#allocation120_spill] sm:$0xff] %v9551_v62  ;;  %v9553_v16 = vpop.f32.mrb[91].mxu0  ;;  %v1671_v40 = vadd.f32 %v7645_v33, %v1415_v58  ;;  %v9558_v14 = vpop.f32.mrb[49].mxu1  ;;  %7490 = vmatprep.mubr.msk.f32.mxu1 %vm1946_vm0, %v1925_v19  ;;  %v7646_v58 = vld [vmem:[%s11114_s2 + $0xd8] sm:$0xff] }
 0x26e   :  { %11248 = vst [vmem:[#allocation121_spill] sm:$0xff] %v9553_v16  ;;  %11249 = vst [vmem:[#allocation122_spill] sm:$0xff] %v9558_v14  ;;  %v1143_v6 = vpop.permute.xlu1 %1142  ;;  %7491 = vmatmul.mubr.msk.f32.gmra.mrb[110].mxu1 %vm1946_vm0, %v1926_v0  ;;  %v1139_v1 = vpop.permute.xlu0 %1138  ;;  %v9572_v19 = vld [vmem:[%s11116_s5] ss:$0 sm:$0xff]  ;;  %v7647_v0 = vld [vmem:[%s11114_s2 + $0xd0] sm:$0xff] }
 0x26f   :  { %v1928_v47 = vmax.f32 %v1672_v45, 0.0  ;;  %v1418_v26 = vmul.f32 %v9406_v54, %v1143_v6  ;;  %v1927_v56 = vmax.f32 %v1671_v40, 0.0  ;;  %v1417_v62 = vmul.f32 %v9406_v54, %v1139_v1 }
 0x270   :  { %4882 = vbcast.lane.b32.xlu1 %v9239_v10, 304  ;;  %4618 = vbcast.lane.b32.xlu0 %v9195_v2, 312 }
 0x271   :  { %v1674_v33 = vadd.f32 %v7646_v58, %v1418_v26  ;;  %v1673_v45 = vadd.f32 %v7647_v0, %v1417_v62  ;;  %7493 = vmatprep.mubr.msk.f32.mxu1 %vm1946_vm0, %v1927_v56  ;;  %v2787_v62 = vadd.f32 %v8506_v4, %v9572_v19  ;;  %v7648_v56 = vld [vmem:[%s11114_s2 + $0xe8] sm:$0xff] }
 0x272   :  { %v1151_v40 = vpop.permute.xlu1 %1150  ;;  %7494 = vmatmul.mubr.msk.f32.gmra.mrb[112].mxu1 %vm1946_vm0, %v1928_v47  ;;  %v1147_v16 = vpop.permute.xlu0 %1146 }
 0x273   :  { %v1930_v6 = vmax.f32 %v1674_v33, 0.0  ;;  %v1420_v1 = vmul.f32 %v9406_v54, %v1151_v40  ;;  %v1929_v26 = vmax.f32 %v1673_v45, 0.0  ;;  %v1419_v58 = vmul.f32 %v9406_v54, %v1147_v16  ;;  %v7649_v45 = vld [vmem:[%s11114_s2 + $0xe0] sm:$0xff] }
 0x274   :  { %4354 = vbcast.lane.b32.xlu1 %v9163_v27, 320  ;;  %v9582_v14 = vpop.f32.mrb[92].mxu0  ;;  %5146 = vbcast.lane.b32.xlu0 %v9309_v12, 296  ;;  %v9590_v0 = vpop.f32.mrb[50].mxu1  ;;  %v2782_v16 = vadd.f32 %v9572_v19, %v8516_v61  ;;  %v4061_v61 = vmax.f32 %v2787_v62, 0.0 }
 0x275   :  { %11250 = vst [vmem:[#allocation123_spill] sm:$0xff] %v9582_v14  ;;  %v1676_v33 = vadd.f32 %v7648_v56, %v1420_v1  ;;  %11251 = vst [vmem:[#allocation124_spill] sm:$0xff] %v9590_v0  ;;  %v9592_v47 = vpop.f32.mrb[93].mxu0  ;;  %v1675_v40 = vadd.f32 %v7649_v45, %v1419_v58  ;;  %v9599_v14 = vpop.f32.mrb[51].mxu1  ;;  %7496 = vmatprep.mubr.msk.f32.mxu1 %vm1946_vm0, %v1929_v26  ;;  %v2947_v58 = vadd.f32 %v8791_v5, %v9572_v19  ;;  %v7650_v26 = vld [vmem:[%s11114_s2 + $0xf8] sm:$0xff] }
 0x276   :  { %11252 = vst [vmem:[#allocation125_spill] sm:$0xff] %v9592_v47  ;;  %11253 = vst [vmem:[#allocation126_spill] sm:$0xff] %v9599_v14  ;;  %v1159_v4 = vpop.permute.xlu1 %1158  ;;  %7497 = vmatmul.mubr.msk.f32.gmra.mrb[114].mxu1 %vm1946_vm0, %v1930_v6  ;;  %v1155_v56 = vpop.permute.xlu0 %1154  ;;  %v4060_v45 = vmax.f32 %v2782_v16, 0.0  ;;  %v2942_v6 = vadd.f32 %v9572_v19, %v8801_v8 }
 0x277   :  { %v1932_v36 = vmax.f32 %v1676_v33, 0.0  ;;  %v1422_v1 = vmul.f32 %v9406_v54, %v1159_v4  ;;  %v1931_v0 = vmax.f32 %v1675_v40, 0.0  ;;  %v1421_v47 = vmul.f32 %v9406_v54, %v1155_v56  ;;  %v7651_v54 = vld [vmem:[%s11114_s2 + $0xf0] sm:$0xff] }
 0x278   :  { %4752 = vbcast.lane.b32.xlu1 %v9223_v32, 312  ;;  %4488 = vbcast.lane.b32.xlu0 %v9179_v55, 320  ;;  %v4093_v8 = vmax.f32 %v2947_v58, 0.0 }
 0x279   :  { %v1678_v33 = vadd.f32 %v7650_v26, %v1422_v1  ;;  %v1677_v40 = vadd.f32 %v7651_v54, %v1421_v47  ;;  %7499 = vmatprep.mubr.msk.f32.mxu1 %vm1946_vm0, %v1931_v0  ;;  %v3107_v47 = vadd.f32 %v9156_v49, %v9572_v19 }
 0x27a   :  { %v4327_v62 = vpop.permute.xlu1 %4326  ;;  %7500 = vmatmul.mubr.msk.f32.gmra.mrb[116].mxu1 %vm1946_vm0, %v1932_v36  ;;  %v4323_v56 = vpop.permute.xlu0 %4322  ;;  %v4092_v36 = vmax.f32 %v2942_v6, 0.0  ;;  %v11258_v6 = vld [vmem:[#allocation37_spill] sm:$0xff] }
 0x27b   :  { %v1934_v4 = vmax.f32 %v1678_v33, 0.0  ;;  %v5390_v5 = vmul.f32 %v4327_v62, %v4061_v61  ;;  %v1933_v14 = vmax.f32 %v1677_v40, 0.0  ;;  %v5389_v1 = vmul.f32 %v4323_v56, %v4060_v45 }
 0x27c   :  { %5280 = vbcast.lane.b32.xlu1 %v9353_v34, 296  ;;  %v9620_v16 = vpop.f32.mrb[94].mxu0  ;;  %5016 = vbcast.lane.b32.xlu0 %v9279_v17, 304  ;;  %v9626_v26 = vpop.f32.mrb[52].mxu1  ;;  %v3102_v33 = vadd.f32 %v9572_v19, %v9167_v59  ;;  %v2952_v59 = vadd.f32 %v9572_v19, %v11258_v6  ;;  %v4125_v56 = vmax.f32 %v3107_v47, 0.0 }
 0x27d   :  { %11254 = vst [vmem:[#allocation127_spill] sm:$0xff] %v9620_v16  ;;  %v5647_v0 = vsel %vm50_vm1, %v5390_v5, 0.0  ;;  %11255 = vst [vmem:[#allocation128_spill] sm:$0xff] %v9626_v26  ;;  %v9628_v61 = vpop.f32.mrb[95].mxu0  ;;  %v5646_v45 = vsel %vm50_vm1, %v5389_v1, 0.0  ;;  %v9633_v54 = vpop.f32.mrb[53].mxu1  ;;  %7502 = vmatprep.mubr.msk.f32.mxu1 %vm1946_vm0, %v1933_v14 }
 0x27e   :  { %11256 = vst [vmem:[#allocation129_spill] sm:$0xff] %v9628_v61  ;;  %11257 = vst [vmem:[#allocation130_spill] sm:$0xff] %v9633_v54  ;;  %v4461_v58 = vpop.permute.xlu1 %4460  ;;  %v5648_v40 = vadd.f32 %v5647_v0, %v5646_v45  ;;  %7503 = vmatmul.mubr.msk.f32.gmra.mrb[118].mxu1 %vm1946_vm0, %v1934_v4  ;;  %v4457_v49 = vpop.permute.xlu0 %4456  ;;  %v11259_v16 = vld [vmem:[#allocation7_spill] sm:$0xff]  ;;  %v4124_v26 = vmax.f32 %v3102_v33, 0.0  ;;  %v4094_v6 = vmax.f32 %v2952_v59, 0.0 }
 0x27f   :  { %v5422_v62 = vmul.f32 %v4461_v58, %v4093_v8  ;;  %v5421_v5 = vmul.f32 %v4457_v49, %v4092_v36  ;;  %v2792_v14 = vadd.f32 %v9572_v19, %v11259_v16 }
 0x280   :  { %4886 = vbcast.lane.b32.xlu1 %v9239_v10, 312  ;;  %4622 = vbcast.lane.b32.xlu0 %v9195_v2, 320 }
 0x281   :  { %v5716_v1 = vsel %vm50_vm1, %v5422_v62, 0.0  ;;  %v5715_v8 = vsel %vm50_vm1, %v5421_v5, 0.0  ;;  %v4062_v33 = vmax.f32 %v2792_v14, 0.0  ;;  %v3112_v14 = vadd.f32 %v9572_v19, %v9199_v30 }
 0x282   :  { %v4595_v0 = vpop.permute.xlu1 %4594  ;;  %v5717_v4 = vadd.f32 %v5716_v1, %v5715_v8  ;;  %v4591_v36 = vpop.permute.xlu0 %4590 }
 0x283   :  { %v5454_v45 = vmul.f32 %v4595_v0, %v4125_v56  ;;  %v5453_v58 = vmul.f32 %v4591_v36, %v4124_v26 }
 0x284   :  { %4358 = vbcast.lane.b32.xlu1 %v9163_v27, 328  ;;  %v7267_v49 = vpop.f32.mrb[96].mxu0  ;;  %5150 = vbcast.lane.b32.xlu0 %v9309_v12, 304  ;;  %v9649_v61 = vpop.f32.mrb[54].mxu1 }
 0x285   :  { %v5785_v47 = vsel %vm50_vm1, %v5454_v45, 0.0  ;;  %v3267_v62 = vadd.f32 %v7267_v49, %v9572_v19  ;;  %11260 = vst [vmem:[#allocation37_spill] sm:$0xff] %v9649_v61  ;;  %v3261_v16 = vpop.f32.mrb[97].mxu0  ;;  %v5784_v5 = vsel %vm50_vm1, %v5453_v58, 0.0  ;;  %v9653_v1 = vpop.f32.mrb[55].mxu1 }
 0x286   :  { %v3262_v56 = vadd.f32 %v9572_v19, %v3261_v16  ;;  %11261 = vst [vmem:[#allocation7_spill] sm:$0xff] %v9653_v1  ;;  %v4465_v26 = vpop.permute.xlu1 %4464  ;;  %v5786_v8 = vadd.f32 %v5785_v47, %v5784_v5  ;;  %v4331_v54 = vpop.permute.xlu0 %4330  ;;  %v11262_v5 = vld [vmem:[#allocation6_spill] sm:$0xff] }
 0x287   :  { %v4157_v0 = vmax.f32 %v3267_v62, 0.0  ;;  %v5423_v36 = vmul.f32 %v4465_v26, %v4094_v6  ;;  %v5391_v18 = vmul.f32 %v4331_v54, %v4062_v33 }
 0x288   :  { %v4156_v59 = vmax.f32 %v3262_v56, 0.0  ;;  %4756 = vbcast.lane.b32.xlu1 %v9223_v32, 320  ;;  %4492 = vbcast.lane.b32.xlu0 %v9179_v55, 328  ;;  %v2797_v56 = vadd.f32 %v11262_v5, %v9572_v19 }
 0x289   :  { %v5718_v45 = vsel %vm50_vm1, %v5423_v36, 0.0  ;;  %v5649_v49 = vsel %vm50_vm1, %v5391_v18, 0.0  ;;  %v4126_v18 = vmax.f32 %v3112_v14, 0.0 }
 0x28a   :  { %v5719_v58 = vadd.f32 %v5718_v45, %v5717_v4  ;;  %v4729_v16 = vpop.permute.xlu1 %4728  ;;  %v5650_v61 = vadd.f32 %v5649_v49, %v5648_v40  ;;  %v4725_v62 = vpop.permute.xlu0 %4724  ;;  %v4063_v49 = vmax.f32 %v2797_v56, 0.0  ;;  %v3587_v56 = vadd.f32 %v9190_v43, %v9572_v19 }
 0x28b   :  { %v5486_v47 = vmul.f32 %v4729_v16, %v4157_v0  ;;  %v5485_v6 = vmul.f32 %v4725_v62, %v4156_v59  ;;  %v11264_v62 = vld [vmem:[#allocation36_spill] sm:$0xff] }
 0x28c   :  { %5284 = vbcast.lane.b32.xlu1 %v9353_v34, 304  ;;  %v9662_v54 = vpop.f32.mrb[98].mxu0  ;;  %v7411_v33 = vpop.f32.mrb[56].mxu1  ;;  %5020 = vbcast.lane.b32.xlu0 %v9279_v17, 312  ;;  %v4221_v43 = vmax.f32 %v3587_v56, 0.0 }
 0x28d   :  { %v5854_v30 = vsel %vm50_vm1, %v5486_v47, 0.0  ;;  %v3271_v4 = vpop.f32.mrb[99].mxu0  ;;  %v3741_v26 = vpop.f32.mrb[57].mxu1  ;;  %v5853_v40 = vsel %vm50_vm1, %v5485_v6, 0.0  ;;  %v2957_v47 = vadd.f32 %v11264_v62, %v9572_v19 }
 0x28e   :  { %v9669_v0 = vpop.permute.xlu1 %4858  ;;  %v5855_v36 = vadd.f32 %v5854_v30, %v5853_v40  ;;  %v4599_v59 = vpop.permute.xlu0 %4598  ;;  %v3272_v16 = vadd.f32 %v9572_v19, %v3271_v4 }
 0x28f   :  { %11263 = vst [vmem:[#allocation6_spill] sm:$0xff] %v9669_v0  ;;  %v5455_v45 = vmul.f32 %v4599_v59, %v4126_v18 }
 0x290   :  { %4890 = vbcast.lane.b32.xlu1 %v9239_v10, 320  ;;  %4626 = vbcast.lane.b32.xlu0 %v9195_v2, 328  ;;  %v4158_v4 = vmax.f32 %v3272_v16, 0.0 }
 0x291   :  { %v5787_v5 = vsel %vm50_vm1, %v5455_v45, 0.0  ;;  %v4095_v45 = vmax.f32 %v2957_v47, 0.0 }
 0x292   :  { %v4335_v14 = vpop.permute.xlu1 %4334  ;;  %v5788_v1 = vadd.f32 %v5787_v5, %v5786_v8  ;;  %v9677_v24 = vpop.permute.xlu0 %4862 }
 0x293   :  { %v5392_v6 = vmul.f32 %v4335_v14, %v4063_v49  ;;  %11265 = vst [vmem:[#allocation36_spill] sm:$0xff] %v9677_v24  ;;  %v3582_v49 = vadd.f32 %v9572_v19, %v9201_v9 }
 0x294   :  { %4362 = vbcast.lane.b32.xlu1 %v9163_v27, 336  ;;  %v9680_v30 = vpop.f32.mrb[100].mxu0  ;;  %v9682_v18 = vpop.f32.mrb[58].mxu1  ;;  %5154 = vbcast.lane.b32.xlu0 %v9309_v12, 312 }
 0x295   :  { %v5651_v40 = vsel %vm50_vm1, %v5392_v6, 0.0  ;;  %v9688_v59 = vpop.f32.mrb[101].mxu0  ;;  %v9690_v8 = vpop.f32.mrb[59].mxu1  ;;  %v3117_v6 = vadd.f32 %v9188_v22, %v9572_v19  ;;  %v4220_v47 = vmax.f32 %v3582_v49, 0.0  ;;  %v3747_v22 = vadd.f32 %v7411_v33, %v9572_v19  ;;  %v11267_v33 = vld [vmem:[#allocation39_spill] sm:$0xff] }
 0x296   :  { %v9694_v62 = vadd.f32 %v5651_v40, %v5650_v61  ;;  %v4733_v5 = vpop.permute.xlu1 %4732  ;;  %v4469_v50 = vpop.permute.xlu0 %4468 }
 0x297   :  { %v5487_v14 = vmul.f32 %v4733_v5, %v4158_v4  ;;  %v5424_v52 = vmul.f32 %v4469_v50, %v4095_v45 }
 0x298   :  { %4760 = vbcast.lane.b32.xlu1 %v9223_v32, 328  ;;  %4496 = vbcast.lane.b32.xlu0 %v9179_v55, 336 }
 0x299   :  { %v5856_v16 = vsel %vm50_vm1, %v5487_v14, 0.0  ;;  %v5720_v9 = vsel %vm50_vm1, %v5424_v52, 0.0  ;;  %v3742_v14 = vadd.f32 %v9572_v19, %v3741_v26 }
 0x29a   :  { %v9701_v57 = vadd.f32 %v5856_v16, %v5855_v36  ;;  %v4997_v61 = vpop.permute.xlu1 %4996  ;;  %v5721_v40 = vadd.f32 %v5720_v9, %v5719_v58  ;;  %v4993_v5 = vpop.permute.xlu0 %4992  ;;  %v4127_v58 = vmax.f32 %v3117_v6, 0.0  ;;  %v2802_v6 = vadd.f32 %v9572_v19, %v11268_v15 }
 0x29b   :  { %v5550_v4 = vmul.f32 %v4997_v61, %v4221_v43  ;;  %v5549_v50 = vmul.f32 %v4993_v5, %v4220_v47  ;;  %v4253_v5 = vmax.f32 %v3747_v22, 0.0  ;;  %v4252_v0 = vmax.f32 %v3742_v14, 0.0 }
 0x29c   :  { %5288 = vbcast.lane.b32.xlu1 %v9353_v34, 312  ;;  %v9705_v45 = vpop.f32.mrb[102].mxu0  ;;  %v9707_v56 = vpop.f32.mrb[60].mxu1  ;;  %5024 = vbcast.lane.b32.xlu0 %v9279_v17, 320  ;;  %v3592_v15 = vadd.f32 %v9572_v19, %v9229_v29 }
 0x29d   :  { %v5992_v36 = vsel %vm50_vm1, %v5550_v4, 0.0  ;;  %v9712_v49 = vpop.f32.mrb[103].mxu0  ;;  %v9714_v52 = vpop.f32.mrb[61].mxu1  ;;  %v5991_v43 = vsel %vm50_vm1, %v5549_v50, 0.0  ;;  %v2962_v4 = vadd.f32 %v9572_v19, %v11267_v33  ;;  %v4064_v33 = vmax.f32 %v2802_v6, 0.0 }
 0x29e   :  { %v9718_v16 = vpop.permute.xlu1 %4866  ;;  %v5993_v47 = vadd.f32 %v5992_v36, %v5991_v43  ;;  %v4603_v9 = vpop.permute.xlu0 %4602  ;;  %v4222_v29 = vmax.f32 %v3592_v15, 0.0 }
 0x29f   :  { %11266 = vst [vmem:[#allocation131_spill] sm:$0xff] %v9718_v16  ;;  %v5456_v61 = vmul.f32 %v4603_v9, %v4127_v58  ;;  %v4096_v22 = vmax.f32 %v2962_v4, 0.0 }
 0x2a0   :  { %4894 = vbcast.lane.b32.xlu1 %v9239_v10, 328  ;;  %4630 = vbcast.lane.b32.xlu0 %v9195_v2, 336 }
 0x2a1   :  { %v5789_v26 = vsel %vm50_vm1, %v5456_v61, 0.0 }
 0x2a2   :  { %v5131_v50 = vpop.permute.xlu1 %5130  ;;  %v9727_v48 = vadd.f32 %v5789_v26, %v5788_v1  ;;  %v5127_v43 = vpop.permute.xlu0 %5126 }
 0x2a3   :  { %v5582_v36 = vmul.f32 %v5131_v50, %v4253_v5  ;;  %v5581_v58 = vmul.f32 %v5127_v43, %v4252_v0  ;;  %v3277_v0 = vadd.f32 %v9662_v54, %v9572_v19 }
 0x2a4   :  { %4366 = vbcast.lane.b32.xlu1 %v9163_v27, 344  ;;  %v9730_v9 = vpop.f32.mrb[104].mxu0  ;;  %v9732_v16 = vpop.f32.mrb[62].mxu1  ;;  %5158 = vbcast.lane.b32.xlu0 %v9309_v12, 320 }
 0x2a5   :  { %v6061_v14 = vsel %vm50_vm1, %v5582_v36, 0.0  ;;  %v9738_v61 = vpop.f32.mrb[105].mxu0  ;;  %v9740_v1 = vpop.f32.mrb[63].mxu1  ;;  %v6060_v5 = vsel %vm50_vm1, %v5581_v58, 0.0  ;;  %v4159_v51 = vmax.f32 %v3277_v0, 0.0 }
 0x2a6   :  { %v4473_v26 = vpop.permute.xlu1 %4472  ;;  %v6062_v50 = vadd.f32 %v6061_v14, %v6060_v5  ;;  %v4339_v24 = vpop.permute.xlu0 %4338 }
 0x2a7   :  { %v5425_v43 = vmul.f32 %v4473_v26, %v4096_v22  ;;  %v5393_v4 = vmul.f32 %v4339_v24, %v4064_v33 }
 0x2a8   :  { %4764 = vbcast.lane.b32.xlu1 %v9223_v32, 336  ;;  %4500 = vbcast.lane.b32.xlu0 %v9179_v55, 344 }
 0x2a9   :  { %v5722_v36 = vsel %vm50_vm1, %v5425_v43, 0.0  ;;  %v5653_v6 = vsel %vm50_vm1, %v5393_v4, 0.0 }
 0x2aa   :  { %v9748_v23 = vadd.f32 %v5722_v36, %v5721_v40  ;;  %v5001_v54 = vpop.permute.xlu1 %5000  ;;  %v5654_v58 = vadd.f32 %v5653_v6, %v9694_v62  ;;  %v4737_v14 = vpop.permute.xlu0 %4736  ;;  %v3122_v62 = vadd.f32 %v9572_v19, %v9227_v41  ;;  %v3752_v41 = vadd.f32 %v9572_v19, %v9690_v8  ;;  %v11278_v8 = vld [vmem:[#allocation38_spill] sm:$0xff] }
 0x2ab   :  { %v5551_v60 = vmul.f32 %v5001_v54, %v4222_v29  ;;  %v5488_v22 = vmul.f32 %v4737_v14, %v4159_v51 }
 0x2ac   :  { %5292 = vbcast.lane.b32.xlu1 %v9353_v34, 320  ;;  %v9753_v24 = vpop.f32.mrb[106].mxu0  ;;  %v9755_v33 = vpop.f32.mrb[64].mxu1  ;;  %5028 = vbcast.lane.b32.xlu0 %v9279_v17, 328  ;;  %v4128_v36 = vmax.f32 %v3122_v62, 0.0 }
 0x2ad   :  { %11269 = vst [vmem:[#allocation39_spill] sm:$0xff] %v9753_v24  ;;  %11270 = vst [vmem:[#allocation9_spill] sm:$0xff] %v9755_v33  ;;  %v5994_v15 = vsel %vm50_vm1, %v5551_v60, 0.0  ;;  %v9759_v40 = vpop.f32.mrb[107].mxu0  ;;  %v9761_v0 = vpop.f32.mrb[65].mxu1  ;;  %v5858_v51 = vsel %vm50_vm1, %v5488_v22, 0.0 }
 0x2ae   :  { %11271 = vst [vmem:[#allocation132_spill] sm:$0xff] %v9759_v40  ;;  %v9765_v5 = vadd.f32 %v5994_v15, %v5993_v47  ;;  %v9768_v26 = vpop.permute.xlu1 %5264  ;;  %v5859_v43 = vadd.f32 %v5858_v51, %v9701_v57  ;;  %v9771_v4 = vpop.permute.xlu0 %5260  ;;  %v11273_v60 = vld [vmem:[#allocation8_spill] sm:$0xff]  ;;  %v3282_v15 = vadd.f32 %v9572_v19, %v9688_v59 }
 0x2af   :  { %11272 = vst [vmem:[#allocation133_spill] sm:$0xff] %v9771_v4  ;;  %v2807_v29 = vadd.f32 %v11273_v60, %v9572_v19  ;;  %v2967_v60 = vadd.f32 %v11278_v8, %v9572_v19  ;;  %v3597_v8 = vadd.f32 %v9218_v28, %v9572_v19 }
 0x2b0   :  { %4898 = vbcast.lane.b32.xlu1 %v9239_v10, 336  ;;  %4634 = vbcast.lane.b32.xlu0 %v9195_v2, 344  ;;  %v4160_v59 = vmax.f32 %v3282_v15, 0.0 }
 0x2b1   :  { %v4065_v22 = vmax.f32 %v2807_v29, 0.0 }
 0x2b2   :  { %v9779_v47 = vpop.permute.xlu1 %4870  ;;  %v4607_v6 = vpop.permute.xlu0 %4606 }
 0x2b3   :  { %v5457_v54 = vmul.f32 %v4607_v6, %v4128_v36  ;;  %v4254_v36 = vmax.f32 %v3752_v41, 0.0 }
 0x2b4   :  { %4370 = vbcast.lane.b32.xlu1 %v9163_v27, 352  ;;  %v9782_v57 = vpop.f32.mrb[108].mxu0  ;;  %v9784_v14 = vpop.f32.mrb[66].mxu1  ;;  %5162 = vbcast.lane.b32.xlu0 %v9309_v12, 328 }
 0x2b5   :  { %11274 = vst [vmem:[#allocation8_spill] sm:$0xff] %v9782_v57  ;;  %11275 = vst [vmem:[#allocation134_spill] sm:$0xff] %v9784_v14  ;;  %v9789_v62 = vpop.f32.mrb[109].mxu0  ;;  %v9791_v51 = vpop.f32.mrb[67].mxu1  ;;  %v5791_v6 = vsel %vm50_vm1, %v5457_v54, 0.0 }
 0x2b6   :  { %11276 = vst [vmem:[#allocation135_spill] sm:$0xff] %v9789_v62  ;;  %11277 = vst [vmem:[#allocation136_spill] sm:$0xff] %v9791_v51  ;;  %v4343_v33 = vpop.permute.xlu1 %4342  ;;  %v5792_v57 = vadd.f32 %v5791_v6, %v9727_v48  ;;  %v5135_v40 = vpop.permute.xlu0 %5134  ;;  %v4097_v62 = vmax.f32 %v2967_v60, 0.0 }
 0x2b7   :  { %v5394_v14 = vmul.f32 %v4343_v33, %v4065_v22  ;;  %v5583_v24 = vmul.f32 %v5135_v40, %v4254_v36 }
 0x2b8   :  { %4768 = vbcast.lane.b32.xlu1 %v9223_v32, 344  ;;  %4504 = vbcast.lane.b32.xlu0 %v9179_v55, 352 }
 0x2b9   :  { %v5655_v29 = vsel %vm50_vm1, %v5394_v14, 0.0  ;;  %v6063_v54 = vsel %vm50_vm1, %v5583_v24, 0.0 }
 0x2ba   :  { %v5656_v41 = vadd.f32 %v5655_v29, %v5654_v58  ;;  %v4741_v51 = vpop.permute.xlu1 %4740  ;;  %v6064_v4 = vadd.f32 %v6063_v54, %v6062_v50  ;;  %v4477_v33 = vpop.permute.xlu0 %4476  ;;  %v3127_v50 = vadd.f32 %v9216_v39, %v9572_v19  ;;  %v4223_v58 = vmax.f32 %v3597_v8, 0.0  ;;  %v11282_v29 = vld [vmem:[#allocation11_spill] sm:$0xff] }
 0x2bb   :  { %v5489_v48 = vmul.f32 %v4741_v51, %v4160_v59  ;;  %v5426_v22 = vmul.f32 %v4477_v33, %v4097_v62  ;;  %v2812_v54 = vadd.f32 %v9572_v19, %v11282_v29  ;;  %v3757_v39 = vadd.f32 %v9682_v18, %v9572_v19 }
 0x2bc   :  { %5296 = vbcast.lane.b32.xlu1 %v9353_v34, 328  ;;  %v9804_v40 = vpop.f32.mrb[110].mxu0  ;;  %v9806_v36 = vpop.f32.mrb[68].mxu1  ;;  %5032 = vbcast.lane.b32.xlu0 %v9279_v17, 336  ;;  %v3287_v18 = vadd.f32 %v9680_v30, %v9572_v19 }
 0x2bd   :  { %11279 = vst [vmem:[#allocation38_spill] sm:$0xff] %v9804_v40  ;;  %11280 = vst [vmem:[#allocation137_spill] sm:$0xff] %v9806_v36  ;;  %v5860_v14 = vsel %vm50_vm1, %v5489_v48, 0.0  ;;  %v9810_v15 = vpop.f32.mrb[111].mxu0  ;;  %v9812_v28 = vpop.f32.mrb[69].mxu1  ;;  %v5724_v62 = vsel %vm50_vm1, %v5426_v22, 0.0 }
 0x2be   :  { %11281 = vst [vmem:[#allocation138_spill] sm:$0xff] %v9810_v15  ;;  %v5861_v24 = vadd.f32 %v5860_v14, %v5859_v43  ;;  %v9817_v51 = vpop.permute.xlu1 %5268  ;;  %v5725_v60 = vadd.f32 %v5724_v62, %v9748_v23  ;;  %v5005_v6 = vpop.permute.xlu0 %5004  ;;  %v4129_v48 = vmax.f32 %v3127_v50, 0.0  ;;  %v4066_v50 = vmax.f32 %v2812_v54, 0.0 }
 0x2bf   :  { %v5552_v59 = vmul.f32 %v5005_v6, %v4223_v58  ;;  %v4255_v29 = vmax.f32 %v3757_v39, 0.0  ;;  %v4161_v30 = vmax.f32 %v3287_v18, 0.0 }
 0x2c0   :  { %4902 = vbcast.lane.b32.xlu1 %v9239_v10, 344  ;;  %4638 = vbcast.lane.b32.xlu0 %v9195_v2, 352 }
 0x2c1   :  { %v5996_v43 = vsel %vm50_vm1, %v5552_v59, 0.0  ;;  %v11287_v59 = vld [vmem:[#allocation41_spill] sm:$0xff] }
 0x2c2   :  { %v9827_v8 = vpop.permute.xlu1 %4874  ;;  %v5997_v33 = vadd.f32 %v5996_v43, %v9765_v5  ;;  %v4611_v23 = vpop.permute.xlu0 %4610  ;;  %v2972_v5 = vadd.f32 %v9572_v19, %v11287_v59 }
 0x2c3   :  { %v5458_v22 = vmul.f32 %v4611_v23, %v4129_v48 }
 0x2c4   :  { %4374 = vbcast.lane.b32.xlu1 %v9163_v27, 360  ;;  %v9831_v14 = vpop.f32.mrb[112].mxu0  ;;  %v9833_v58 = vpop.f32.mrb[70].mxu1  ;;  %5166 = vbcast.lane.b32.xlu0 %v9309_v12, 336 }
 0x2c5   :  { %11283 = vst [vmem:[#allocation11_spill] sm:$0xff] %v9831_v14  ;;  %11284 = vst [vmem:[#allocation139_spill] sm:$0xff] %v9833_v58  ;;  %v9838_v62 = vpop.f32.mrb[113].mxu0  ;;  %v9840_v6 = vpop.f32.mrb[71].mxu1  ;;  %v5793_v48 = vsel %vm50_vm1, %v5458_v22, 0.0 }
 0x2c6   :  { %11285 = vst [vmem:[#allocation140_spill] sm:$0xff] %v9838_v62  ;;  %11286 = vst [vmem:[#allocation141_spill] sm:$0xff] %v9840_v6  ;;  %v4347_v43 = vpop.permute.xlu1 %4346  ;;  %v5794_v23 = vadd.f32 %v5793_v48, %v5792_v57  ;;  %v5139_v58 = vpop.permute.xlu0 %5138  ;;  %v4098_v62 = vmax.f32 %v2972_v5, 0.0  ;;  %v3602_v6 = vadd.f32 %v9572_v19, %v9257_v11 }
 0x2c7   :  { %v5395_v14 = vmul.f32 %v4347_v43, %v4066_v50  ;;  %v5584_v40 = vmul.f32 %v5139_v58, %v4255_v29 }
 0x2c8   :  { %4772 = vbcast.lane.b32.xlu1 %v9223_v32, 352  ;;  %4508 = vbcast.lane.b32.xlu0 %v9179_v55, 360 }
 0x2c9   :  { %v5657_v54 = vsel %vm50_vm1, %v5395_v14, 0.0  ;;  %v6065_v39 = vsel %vm50_vm1, %v5584_v40, 0.0 }
 0x2ca   :  { %v5658_v59 = vadd.f32 %v5657_v54, %v5656_v41  ;;  %v4745_v22 = vpop.permute.xlu1 %4744  ;;  %v6066_v36 = vadd.f32 %v6065_v39, %v6064_v4  ;;  %v4481_v50 = vpop.permute.xlu0 %4480  ;;  %v3132_v4 = vadd.f32 %v9572_v19, %v9255_v25  ;;  %v4224_v41 = vmax.f32 %v3602_v6, 0.0  ;;  %v11292_v39 = vld [vmem:[#allocation10_spill] sm:$0xff] }
 0x2cb   :  { %v5490_v57 = vmul.f32 %v4745_v22, %v4161_v30  ;;  %v5427_v48 = vmul.f32 %v4481_v50, %v4098_v62  ;;  %v2817_v22 = vadd.f32 %v11292_v39, %v9572_v19  ;;  %v3762_v25 = vadd.f32 %v9572_v19, %v9714_v52 }
 0x2cc   :  { %5300 = vbcast.lane.b32.xlu1 %v9353_v34, 336  ;;  %v9852_v58 = vpop.f32.mrb[114].mxu0  ;;  %v9854_v29 = vpop.f32.mrb[72].mxu1  ;;  %5036 = vbcast.lane.b32.xlu0 %v9279_v17, 344 }
 0x2cd   :  { %11288 = vst [vmem:[#allocation41_spill] sm:$0xff] %v9852_v58  ;;  %11289 = vst [vmem:[#allocation142_spill] sm:$0xff] %v9854_v29  ;;  %v5862_v14 = vsel %vm50_vm1, %v5490_v57, 0.0  ;;  %v9858_v18 = vpop.f32.mrb[115].mxu0  ;;  %v9860_v11 = vpop.f32.mrb[73].mxu1  ;;  %v5726_v62 = vsel %vm50_vm1, %v5427_v48, 0.0 }
 0x2ce   :  { %11290 = vst [vmem:[#allocation143_spill] sm:$0xff] %v9858_v18  ;;  %11291 = vst [vmem:[#allocation144_spill] sm:$0xff] %v9860_v11  ;;  %v5863_v40 = vadd.f32 %v5862_v14, %v5861_v24  ;;  %v9865_v5 = vpop.permute.xlu1 %5272  ;;  %v5727_v43 = vadd.f32 %v5726_v62, %v5725_v60  ;;  %v5009_v30 = vpop.permute.xlu0 %5008  ;;  %v4130_v57 = vmax.f32 %v3132_v4, 0.0  ;;  %v4067_v62 = vmax.f32 %v2817_v22, 0.0 }
 0x2cf   :  { %v5553_v54 = vmul.f32 %v5009_v30, %v4224_v41  ;;  %v3292_v4 = vadd.f32 %v9572_v19, %v9712_v49  ;;  %v4256_v39 = vmax.f32 %v3762_v25, 0.0 }
 0x2d0   :  { %4906 = vbcast.lane.b32.xlu1 %v9239_v10, 352  ;;  %4642 = vbcast.lane.b32.xlu0 %v9195_v2, 360 }
 0x2d1   :  { %v5998_v24 = vsel %vm50_vm1, %v5553_v54, 0.0  ;;  %v4162_v49 = vmax.f32 %v3292_v4, 0.0 }
 0x2d2   :  { %v9874_v6 = vpop.permute.xlu1 %4878  ;;  %v5999_v50 = vadd.f32 %v5998_v24, %v5997_v33  ;;  %v4615_v48 = vpop.permute.xlu0 %4614  ;;  %v11297_v33 = vld [vmem:[#allocation40_spill] sm:$0xff] }
 0x2d3   :  { %v5459_v60 = vmul.f32 %v4615_v48, %v4130_v57  ;;  %v2977_v54 = vadd.f32 %v11297_v33, %v9572_v19 }
 0x2d4   :  { %4378 = vbcast.lane.b32.xlu1 %v9163_v27, 368  ;;  %v9877_v14 = vpop.f32.mrb[116].mxu0  ;;  %v9879_v41 = vpop.f32.mrb[74].mxu1  ;;  %5170 = vbcast.lane.b32.xlu0 %v9309_v12, 344 }
 0x2d5   :  { %11293 = vst [vmem:[#allocation10_spill] sm:$0xff] %v9877_v14  ;;  %11294 = vst [vmem:[#allocation145_spill] sm:$0xff] %v9879_v41  ;;  %v9884_v52 = vpop.f32.mrb[117].mxu0  ;;  %v9886_v30 = vpop.f32.mrb[75].mxu1  ;;  %v5795_v57 = vsel %vm50_vm1, %v5459_v60, 0.0 }
 0x2d6   :  { %11295 = vst [vmem:[#allocation146_spill] sm:$0xff] %v9884_v52  ;;  %11296 = vst [vmem:[#allocation147_spill] sm:$0xff] %v9886_v30  ;;  %v4351_v24 = vpop.permute.xlu1 %4350  ;;  %v5796_v48 = vadd.f32 %v5795_v57, %v5794_v23  ;;  %v5143_v41 = vpop.permute.xlu0 %5142  ;;  %v4099_v52 = vmax.f32 %v2977_v54, 0.0  ;;  %v3607_v30 = vadd.f32 %v9250_v38, %v9572_v19 }
 0x2d7   :  { %v5396_v14 = vmul.f32 %v4351_v24, %v4067_v62  ;;  %v5585_v58 = vmul.f32 %v5143_v41, %v4256_v39 }
 0x2d8   :  { %4776 = vbcast.lane.b32.xlu1 %v9223_v32, 360  ;;  %4512 = vbcast.lane.b32.xlu0 %v9179_v55, 368 }
 0x2d9   :  { %v5659_v22 = vsel %vm50_vm1, %v5396_v14, 0.0  ;;  %v6067_v25 = vsel %vm50_vm1, %v5585_v58, 0.0 }
 0x2da   :  { %v5660_v33 = vadd.f32 %v5659_v22, %v5658_v59  ;;  %v4749_v60 = vpop.permute.xlu1 %4748  ;;  %v6068_v29 = vadd.f32 %v6067_v25, %v6066_v36  ;;  %v4485_v62 = vpop.permute.xlu0 %4484  ;;  %v3137_v36 = vadd.f32 %v9248_v44, %v9572_v19  ;;  %v4225_v59 = vmax.f32 %v3607_v30, 0.0  ;;  %v11302_v25 = vld [vmem:[#allocation13_spill] sm:$0xff] }
 0x2db   :  { %v5491_v23 = vmul.f32 %v4749_v60, %v4162_v49  ;;  %v5428_v57 = vmul.f32 %v4485_v62, %v4099_v52  ;;  %v2822_v60 = vadd.f32 %v9572_v19, %v11302_v25  ;;  %v3767_v44 = vadd.f32 %v9707_v56, %v9572_v19 }
 0x2dc   :  { %5304 = vbcast.lane.b32.xlu1 %v9353_v34, 344  ;;  %v9898_v41 = vpop.f32.mrb[118].mxu0  ;;  %v9900_v39 = vpop.f32.mrb[76].mxu1  ;;  %5040 = vbcast.lane.b32.xlu0 %v9279_v17, 352 }
 0x2dd   :  { %11298 = vst [vmem:[#allocation40_spill] sm:$0xff] %v9898_v41  ;;  %11299 = vst [vmem:[#allocation148_spill] sm:$0xff] %v9900_v39  ;;  %v5864_v14 = vsel %vm50_vm1, %v5491_v23, 0.0  ;;  %v9904_v4 = vpop.f32.mrb[119].mxu0  ;;  %v9906_v38 = vpop.f32.mrb[77].mxu1  ;;  %v5728_v52 = vsel %vm50_vm1, %v5428_v57, 0.0 }
 0x2de   :  { %11300 = vst [vmem:[#allocation149_spill] sm:$0xff] %v9904_v4  ;;  %11301 = vst [vmem:[#allocation150_spill] sm:$0xff] %v9906_v38  ;;  %v5865_v58 = vadd.f32 %v5864_v14, %v5863_v40  ;;  %v9911_v54 = vpop.permute.xlu1 %5276  ;;  %v5729_v24 = vadd.f32 %v5728_v52, %v5727_v43  ;;  %v5013_v49 = vpop.permute.xlu0 %5012  ;;  %v4131_v23 = vmax.f32 %v3137_v36, 0.0  ;;  %v4068_v52 = vmax.f32 %v2822_v60, 0.0 }
 0x2df   :  { %v5554_v22 = vmul.f32 %v5013_v49, %v4225_v59  ;;  %v3297_v36 = vadd.f32 %v9705_v45, %v9572_v19  ;;  %v4257_v25 = vmax.f32 %v3767_v44, 0.0 }
 0x2e0   :  { %4910 = vbcast.lane.b32.xlu1 %v9239_v10, 360  ;;  %4646 = vbcast.lane.b32.xlu0 %v9195_v2, 368 }
 0x2e1   :  { %v6000_v40 = vsel %vm50_vm1, %v5554_v22, 0.0  ;;  %v11307_v22 = vld [vmem:[#allocation43_spill] sm:$0xff]  ;;  %v4163_v45 = vmax.f32 %v3297_v36, 0.0 }
 0x2e2   :  { %v9920_v30 = vpop.permute.xlu1 %4882  ;;  %v6001_v62 = vadd.f32 %v6000_v40, %v5999_v50  ;;  %v4619_v57 = vpop.permute.xlu0 %4618  ;;  %v2982_v50 = vadd.f32 %v9572_v19, %v11307_v22 }
 0x2e3   :  { %v5460_v43 = vmul.f32 %v4619_v57, %v4131_v23 }
 0x2e4   :  { %4382 = vbcast.lane.b32.xlu1 %v9163_v27, 376  ;;  %v9923_v14 = vpop.f32.mrb[120].mxu0  ;;  %v9925_v59 = vpop.f32.mrb[78].mxu1  ;;  %5174 = vbcast.lane.b32.xlu0 %v9309_v12, 352 }
 0x2e5   :  { %11303 = vst [vmem:[#allocation13_spill] sm:$0xff] %v9923_v14  ;;  %11304 = vst [vmem:[#allocation151_spill] sm:$0xff] %v9925_v59  ;;  %v9930_v56 = vpop.f32.mrb[121].mxu0  ;;  %v9932_v49 = vpop.f32.mrb[79].mxu1  ;;  %v5797_v27 = vsel %vm50_vm1, %v5460_v43, 0.0 }
 0x2e6   :  { %11305 = vst [vmem:[#allocation152_spill] sm:$0xff] %v9930_v56  ;;  %11306 = vst [vmem:[#allocation153_spill] sm:$0xff] %v9932_v49  ;;  %v4355_v23 = vpop.permute.xlu1 %4354  ;;  %v5798_v40 = vadd.f32 %v5797_v27, %v5796_v48  ;;  %v5147_v14 = vpop.permute.xlu0 %5146  ;;  %v4100_v56 = vmax.f32 %v2982_v50, 0.0  ;;  %v3612_v49 = vadd.f32 %v9572_v19, %v9285_v20 }
 0x2e7   :  { %v5397_v57 = vmul.f32 %v4355_v23, %v4068_v52  ;;  %v5586_v59 = vmul.f32 %v5147_v14, %v4257_v25 }
 0x2e8   :  { %4780 = vbcast.lane.b32.xlu1 %v9223_v32, 368  ;;  %4516 = vbcast.lane.b32.xlu0 %v9179_v55, 376 }
 0x2e9   :  { %v5661_v60 = vsel %vm50_vm1, %v5397_v57, 0.0  ;;  %v6069_v44 = vsel %vm50_vm1, %v5586_v59, 0.0  ;;  %v4226_v59 = vmax.f32 %v3612_v49, 0.0 }
 0x2ea   :  { %v5662_v22 = vadd.f32 %v5661_v60, %v5660_v33  ;;  %v4753_v43 = vpop.permute.xlu1 %4752  ;;  %v6070_v41 = vadd.f32 %v6069_v44, %v6068_v29  ;;  %v4489_v52 = vpop.permute.xlu0 %4488  ;;  %v9957_v29 = vld [vmem:[%s11115_s1 + $0x8] sm:$0xff]  ;;  %v3142_v33 = vadd.f32 %v9572_v19, %v9283_v46 }
 0x2eb   :  { %v5492_v48 = vmul.f32 %v4753_v43, %v4163_v45  ;;  %v5429_v27 = vmul.f32 %v4489_v52, %v4100_v56  ;;  %v9968_v44 = vrot.slane %v9957_v29, %v7750_v7  ;;  %v11312_v43 = vld [vmem:[#allocation12_spill] sm:$0xff] }
 0x2ec   :  { %5308 = vbcast.lane.b32.xlu1 %v9353_v34, 352  ;;  %v9944_v14 = vpop.f32.mrb[122].mxu0  ;;  %v9946_v55 = vpop.f32.mrb[80].mxu1  ;;  %5044 = vbcast.lane.b32.xlu0 %v9279_v17, 360  ;;  %v2827_v46 = vadd.f32 %v11312_v43, %v9572_v19  ;;  %v4132_v49 = vmax.f32 %v3142_v33, 0.0  ;;  %v9987_v33 = vrot.slane %v9957_v29, %v7765_v13 }
 0x2ed   :  { %11308 = vst [vmem:[#allocation43_spill] sm:$0xff] %v9944_v14  ;;  %11309 = vst [vmem:[#allocation154_spill] sm:$0xff] %v9946_v55  ;;  %v5866_v36 = vsel %vm50_vm1, %v5492_v48, 0.0  ;;  %v9950_v50 = vpop.f32.mrb[123].mxu0  ;;  %v9952_v20 = vpop.f32.mrb[81].mxu1  ;;  %v5730_v25 = vsel %vm50_vm1, %v5429_v27, 0.0 }
 0x2ee   :  { %11310 = vst [vmem:[#allocation155_spill] sm:$0xff] %v9950_v50  ;;  %11311 = vst [vmem:[#allocation156_spill] sm:$0xff] %v9952_v20  ;;  %v5867_v56 = vadd.f32 %v5866_v36, %v5865_v58  ;;  %v9962_v23 = vpop.permute.xlu1 %5280  ;;  %v5731_v57 = vadd.f32 %v5730_v25, %v5729_v24  ;;  %v5017_v45 = vpop.permute.xlu0 %5016  ;;  %v3772_v58 = vadd.f32 %v9572_v19, %v9740_v1  ;;  %v4069_v1 = vmax.f32 %v2827_v46, 0.0  ;;  %v11331_v50 = vld [vmem:[#allocation90_spill] sm:$0xff] }
 0x2ef   :  { %v5555_v60 = vmul.f32 %v5017_v45, %v4226_v59  ;;  %v3302_v59 = vadd.f32 %v9572_v19, %v9738_v61  ;;  %v11317_v45 = vld [vmem:[#allocation42_spill] sm:$0xff] }
 0x2f0   :  { %4914 = vbcast.lane.b32.xlu1 %v9239_v10, 368  ;;  %4650 = vbcast.lane.b32.xlu0 %v9195_v2, 376  ;;  %v4258_v43 = vmax.f32 %v3772_v58, 0.0  ;;  %v11335_v20 = vld [vmem:[#allocation6_spill] sm:$0xff] }
 0x2f1   :  { %v6002_v48 = vsel %vm50_vm1, %v5555_v60, 0.0  ;;  %v2987_v60 = vadd.f32 %v11317_v45, %v9572_v19  ;;  %v4164_v61 = vmax.f32 %v3302_v59, 0.0  ;;  %v3617_v45 = vadd.f32 %v9274_v31, %v9572_v19 }
 0x2f2   :  { %v9975_v24 = vpop.permute.xlu1 %4886  ;;  %v9977_v52 = vadd.f32 %v6002_v48, %v6001_v62  ;;  %v4623_v27 = vpop.permute.xlu0 %4622  ;;  %v10018_v31 = vrot.slane %v9957_v29, %v8027_v3 }
 0x2f3   :  { %v5461_v36 = vmul.f32 %v4623_v27, %v4132_v49 }
 0x2f4   :  { %4389 = vbcast.lane.b32.xlu1 %v9968_v44, 256  ;;  %v9980_v2 = vpop.f32.mrb[124].mxu0  ;;  %v9982_v7 = vpop.f32.mrb[82].mxu1  ;;  %5178 = vbcast.lane.b32.xlu0 %v9309_v12, 360 }
 0x2f5   :  { %11313 = vst [vmem:[#allocation12_spill] sm:$0xff] %v9980_v2  ;;  %11314 = vst [vmem:[#allocation157_spill] sm:$0xff] %v9982_v7  ;;  %v9991_v62 = vpop.f32.mrb[125].mxu0  ;;  %v9993_v25 = vpop.f32.mrb[83].mxu1  ;;  %v5799_v49 = vsel %vm50_vm1, %v5461_v36, 0.0 }
 0x2f6   :  { %11315 = vst [vmem:[#allocation158_spill] sm:$0xff] %v9991_v62  ;;  %11316 = vst [vmem:[#allocation159_spill] sm:$0xff] %v9993_v25  ;;  %v4359_v48 = vpop.permute.xlu1 %4358  ;;  %v9998_v27 = vadd.f32 %v5799_v49, %v5798_v40  ;;  %v5151_v13 = vpop.permute.xlu0 %5150  ;;  %v4101_v62 = vmax.f32 %v2987_v60, 0.0  ;;  %v11330_v25 = vld [vmem:[#allocation87_spill] sm:$0xff] }
 0x2f7   :  { %v5398_v2 = vmul.f32 %v4359_v48, %v4069_v1  ;;  %v5587_v7 = vmul.f32 %v5151_v13, %v4258_v43 }
 0x2f8   :  { %4784 = vbcast.lane.b32.xlu1 %v9223_v32, 376  ;;  %4523 = vbcast.lane.b32.xlu0 %v9987_v33, 256 }
 0x2f9   :  { %v5663_v46 = vsel %vm50_vm1, %v5398_v2, 0.0  ;;  %v6071_v36 = vsel %vm50_vm1, %v5587_v7, 0.0 }
 0x2fa   :  { %v10005_v58 = vadd.f32 %v5663_v46, %v5662_v22  ;;  %v4757_v40 = vpop.permute.xlu1 %4756  ;;  %v10008_v49 = vadd.f32 %v6071_v36, %v6070_v41  ;;  %v4493_v43 = vpop.permute.xlu0 %4492  ;;  %v11320_v22 = vld [vmem:[#allocation14_spill] sm:$0xff]  ;;  %v11321_v41 = vld [vmem:[#allocation15_spill] sm:$0xff]  ;;  %v4227_v46 = vmax.f32 %v3617_v45, 0.0  ;;  %v10054_v45 = vadd.f32 %v9572_v19, %v8877_v37 }
 0x2fb   :  { %v5493_v1 = vmul.f32 %v4757_v40, %v4164_v61  ;;  %v5430_v48 = vmul.f32 %v4493_v43, %v4101_v62  ;;  %v10022_v2 = vadd.f32 %v11320_v22, %v9572_v19  ;;  %v2832_v7 = vadd.f32 %v9572_v19, %v11321_v41  ;;  %v11324_v43 = vld [vmem:[#allocation17_spill] sm:$0xff] }
 0x2fc   :  { %5312 = vbcast.lane.b32.xlu1 %v9353_v34, 360  ;;  %v10011_v32 = vpop.f32.mrb[126].mxu0  ;;  %v10013_v59 = vpop.f32.mrb[84].mxu1  ;;  %5048 = vbcast.lane.b32.xlu0 %v9279_v17, 368  ;;  %v3147_v61 = vadd.f32 %v9272_v42, %v9572_v19  ;;  %v10040_v22 = vadd.f32 %v9572_v19, %v11324_v43 }
 0x2fd   :  { %11318 = vst [vmem:[#allocation42_spill] sm:$0xff] %v10011_v32  ;;  %11319 = vst [vmem:[#allocation160_spill] sm:$0xff] %v10013_v59  ;;  %v5868_v62 = vsel %vm50_vm1, %v5493_v1, 0.0  ;;  %v10027_v60 = vpop.f32.mrb[127].mxu0  ;;  %v10029_v13 = vpop.f32.mrb[85].mxu1  ;;  %v5732_v3 = vsel %vm50_vm1, %v5430_v48, 0.0 }
 0x2fe   :  { %11322 = vst [vmem:[#allocation14_spill] sm:$0xff] %v10027_v60  ;;  %11323 = vst [vmem:[#allocation15_spill] sm:$0xff] %v10029_v13  ;;  %v10033_v36 = vadd.f32 %v5868_v62, %v5867_v56  ;;  %v10036_v40 = vpop.permute.xlu1 %5284  ;;  %v11325_v1 = vld [vmem:[#allocation44_spill] sm:$0xff]  ;;  %v11326_v59 = vld [vmem:[#allocation45_spill] sm:$0xff]  ;;  %v10050_v42 = vadd.f32 %v5732_v3, %v5731_v57  ;;  %v5021_v56 = vpop.permute.xlu0 %5020  ;;  %v4070_v43 = vmax.f32 %v2832_v7, 0.0 }
 0x2ff   :  { %v10044_v41 = vadd.f32 %v11325_v1, %v9572_v19  ;;  %v10048_v32 = vadd.f32 %v11326_v59, %v9572_v19  ;;  %v5556_v48 = vmul.f32 %v5021_v56, %v4227_v46  ;;  %v11327_v1 = vld [vmem:[#allocation46_spill] sm:$0xff]  ;;  %v4133_v59 = vmax.f32 %v3147_v61, 0.0 }
 0x300   :  { %4918 = vbcast.lane.b32.xlu1 %v9239_v10, 376  ;;  %4657 = vbcast.lane.b32.xlu0 %v10018_v31, 256  ;;  %v10061_v60 = vadd.f32 %v9572_v19, %v11327_v1  ;;  %v10066_v57 = vld [vmem:[%s11116_s5] ss:$0 sm:$0xff]  ;;  %v10094_v19 = vrot.slane %v9957_v29, %v8346_v21 }
 0x301   :  { %v10070_v37 = vadd.f32 %v10066_v57, %v8905_v53  ;;  %v3777_v10 = vadd.f32 %v10066_v57, %v9732_v16  ;;  %v6004_v46 = vsel %vm50_vm1, %v5556_v48, 0.0  ;;  %v4102_v53 = vmax.f32 %v10054_v45, 0.0 }
 0x302   :  { %v10075_v7 = vpop.permute.xlu1 %4890  ;;  %v10081_v1 = vadd.f32 %v6004_v46, %v9977_v52  ;;  %v4627_v62 = vpop.permute.xlu0 %4626  ;;  %v10086_v61 = vadd.f32 %v10066_v57, %v8907_v35  ;;  %v10099_v45 = vadd.f32 %v10066_v57, %v8897_v63  ;;  %v3307_v35 = vadd.f32 %v10066_v57, %v9730_v9 }
 0x303   :  { %v5462_v16 = vmul.f32 %v4627_v62, %v4133_v59  ;;  %v4259_v3 = vmax.f32 %v3777_v10, 0.0  ;;  %v10111_v63 = vadd.f32 %v10066_v57, %v11330_v25  ;;  %v3622_v10 = vadd.f32 %v10066_v57, %v11331_v50 }
 0x304   :  { %4393 = vbcast.lane.b32.xlu1 %v9968_v44, 264  ;;  %v7315_v48 = vpop.f32.mrb[128].mxu0  ;;  %v10089_v13 = vpop.f32.mrb[86].mxu1  ;;  %5182 = vbcast.lane.b32.xlu0 %v9309_v12, 368 }
 0x305   :  { %11328 = vst [vmem:[#allocation17_spill] sm:$0xff] %v10089_v13  ;;  %v3427_v62 = vadd.f32 %v10066_v57, %v7315_v48  ;;  %v3421_v59 = vpop.f32.mrb[129].mxu0  ;;  %v10104_v46 = vpop.f32.mrb[87].mxu1  ;;  %v5801_v21 = vsel %vm50_vm1, %v5462_v16, 0.0 }
 0x306   :  { %11329 = vst [vmem:[#allocation44_spill] sm:$0xff] %v10104_v46  ;;  %v3422_v13 = vadd.f32 %v10066_v57, %v3421_v59  ;;  %v4363_v52 = vpop.permute.xlu1 %4362  ;;  %v10114_v14 = vadd.f32 %v5801_v21, %v9998_v27  ;;  %v5155_v55 = vpop.permute.xlu0 %5154  ;;  %v11332_v59 = vld [vmem:[#allocation88_spill] sm:$0xff]  ;;  %v4165_v27 = vmax.f32 %v3307_v35, 0.0 }
 0x307   :  { %v4189_v9 = vmax.f32 %v3427_v62, 0.0  ;;  %v5399_v48 = vmul.f32 %v4363_v52, %v4070_v43  ;;  %v5588_v16 = vmul.f32 %v5155_v55, %v4259_v3  ;;  %v10123_v25 = vadd.f32 %v10066_v57, %v11332_v59  ;;  %v11333_v21 = vld [vmem:[#allocation36_spill] sm:$0xff]  ;;  %v11334_v52 = vld [vmem:[#allocation89_spill] sm:$0xff] }
 0x308   :  { %v4188_v56 = vmax.f32 %v3422_v13, 0.0  ;;  %4791 = vbcast.lane.b32.xlu1 %v10094_v19, 256  ;;  %4527 = vbcast.lane.b32.xlu0 %v9987_v33, 264  ;;  %v3152_v46 = vadd.f32 %v10066_v57, %v11334_v52 }
 0x309   :  { %v5518_v62 = vmul.f32 %v11333_v21, %v4189_v9  ;;  %v5665_v43 = vsel %vm50_vm1, %v5399_v48, 0.0  ;;  %v6073_v13 = vsel %vm50_vm1, %v5588_v16, 0.0  ;;  %v4228_v21 = vmax.f32 %v3622_v10, 0.0 }
 0x30a   :  { %v5517_v50 = vmul.f32 %v11335_v20, %v4188_v56  ;;  %v10131_v55 = vadd.f32 %v5665_v43, %v10005_v58  ;;  %v4761_v3 = vpop.permute.xlu1 %4760  ;;  %v10137_v35 = vadd.f32 %v6073_v13, %v10008_v49  ;;  %v4497_v48 = vpop.permute.xlu0 %4496  ;;  %v11336_v56 = vld [vmem:[#allocation3_spill] sm:$0xff] }
 0x30b   :  { %v5923_v59 = vsel %vm50_vm1, %v5518_v62, 0.0  ;;  %v5494_v9 = vmul.f32 %v4761_v3, %v4165_v27  ;;  %v5431_v4 = vmul.f32 %v4497_v48, %v4102_v53  ;;  %v10144_v16 = vrot.slane %v9957_v29, %v11336_v56 }
 0x30c   :  { %v5922_v52 = vsel %vm50_vm1, %v5517_v50, 0.0  ;;  %5316 = vbcast.lane.b32.xlu1 %v9353_v34, 368  ;;  %v7318_v20 = vpop.f32.mrb[130].mxu0  ;;  %v7459_v58 = vpop.f32.mrb[88].mxu1  ;;  %5052 = vbcast.lane.b32.xlu0 %v9279_v17, 376  ;;  %v4134_v56 = vmax.f32 %v3152_v46, 0.0 }
 0x30d   :  { %v5924_v62 = vadd.f32 %v5923_v59, %v5922_v52  ;;  %v5870_v49 = vsel %vm50_vm1, %v5494_v9, 0.0  ;;  %v3437_v27 = vadd.f32 %v10066_v57, %v7318_v20  ;;  %v3907_v10 = vadd.f32 %v10066_v57, %v7459_v58  ;;  %v3431_v43 = vpop.f32.mrb[131].mxu0  ;;  %v3901_v50 = vpop.f32.mrb[89].mxu1 }
 0x30e   :  { %v10150_v53 = vadd.f32 %v5870_v49, %v10033_v36  ;;  %v5734_v13 = vsel %vm50_vm1, %v5431_v4, 0.0  ;;  %v3432_v17 = vadd.f32 %v10066_v57, %v3431_v43  ;;  %v3902_v3 = vadd.f32 %v10066_v57, %v3901_v50  ;;  %v10155_v48 = vpop.permute.xlu1 %5288  ;;  %v5025_v58 = vpop.permute.xlu0 %5024  ;;  %v11337_v4 = vld [vmem:[#allocation93_spill] sm:$0xff] }
 0x30f   :  { %v10159_v9 = vadd.f32 %v5734_v13, %v10050_v42  ;;  %v4191_v52 = vmax.f32 %v3437_v27, 0.0  ;;  %v4285_v20 = vmax.f32 %v3907_v10, 0.0  ;;  %v5557_v49 = vmul.f32 %v5025_v58, %v4228_v21  ;;  %v11338_v27 = vld [vmem:[#allocation4_spill] sm:$0xff]  ;;  %v11339_v21 = vld [vmem:[#allocation131_spill] sm:$0xff] }
 0x310   :  { %v4190_v39 = vmax.f32 %v3432_v17, 0.0  ;;  %v4284_v36 = vmax.f32 %v3902_v3, 0.0  ;;  %4925 = vbcast.lane.b32.xlu1 %v10144_v16, 256  ;;  %4661 = vbcast.lane.b32.xlu0 %v10018_v31, 264  ;;  %v10165_v43 = vadd.f32 %v10066_v57, %v11337_v4  ;;  %v3782_v50 = vadd.f32 %v10066_v57, %v9761_v0  ;;  %v11340_v17 = vld [vmem:[#allocation133_spill] sm:$0xff]  ;;  %v11341_v4 = vld [vmem:[#allocation39_spill] sm:$0xff] }
 0x311   :  { %v5614_v42 = vmul.f32 %v9768_v26, %v4285_v20  ;;  %v10172_v10 = vrot.slane %v9957_v29, %v11338_v27  ;;  %v5520_v46 = vmul.f32 %v9779_v47, %v4191_v52  ;;  %v6006_v58 = vsel %vm50_vm1, %v5557_v49, 0.0  ;;  %v11342_v27 = vld [vmem:[#allocation5_spill] sm:$0xff] }
 0x312   :  { %v5519_v13 = vmul.f32 %v11339_v21, %v4190_v39  ;;  %v5613_v3 = vmul.f32 %v11340_v17, %v4284_v36  ;;  %v10178_v59 = vpop.permute.xlu1 %4894  ;;  %v10182_v38 = vadd.f32 %v10066_v57, %v11341_v4  ;;  %v10186_v26 = vadd.f32 %v6006_v58, %v10081_v1  ;;  %v4631_v20 = vpop.permute.xlu0 %4630  ;;  %v11343_v39 = vld [vmem:[#allocation132_spill] sm:$0xff] }
 0x313   :  { %v6130_v0 = vsel %vm50_vm1, %v5614_v42, 0.0  ;;  %v10190_v47 = vrot.slane %v9957_v29, %v11342_v27  ;;  %v3312_v52 = vadd.f32 %v10066_v57, %v11343_v39  ;;  %v5463_v21 = vmul.f32 %v4631_v20, %v4134_v56 }
 0x314   :  { %v5925_v36 = vsel %vm50_vm1, %v5519_v13, 0.0  ;;  %v6129_v49 = vsel %vm50_vm1, %v5613_v3, 0.0  ;;  %4397 = vbcast.lane.b32.xlu1 %v9968_v44, 272  ;;  %v7321_v17 = vpop.f32.mrb[132].mxu0  ;;  %5186 = vbcast.lane.b32.xlu0 %v9309_v12, 376  ;;  %v4260_v1 = vmax.f32 %v3782_v50, 0.0 }
 0x315   :  { %v5926_v42 = vadd.f32 %v5925_v36, %v5924_v62  ;;  %v6131_v58 = vadd.f32 %v6130_v0, %v6129_v49  ;;  %v3447_v4 = vadd.f32 %v10066_v57, %v7321_v17  ;;  %v7462_v27 = vpop.f32.mrb[90].mxu1  ;;  %v3441_v18 = vpop.f32.mrb[133].mxu0  ;;  %v5927_v11 = vsel %vm50_vm1, %v5520_v46, 0.0 }
 0x316   :  { %v5803_v39 = vsel %vm50_vm1, %v5463_v21, 0.0  ;;  %v3917_v13 = vadd.f32 %v10066_v57, %v7462_v27  ;;  %v3442_v56 = vadd.f32 %v10066_v57, %v3441_v18  ;;  %v3911_v3 = vpop.f32.mrb[91].mxu1  ;;  %v4367_v20 = vpop.permute.xlu1 %4366  ;;  %v11344_v46 = vmax.f32 %v10022_v2, 0.0  ;;  %v11345_v18 = vld [vmem:[#allocation9_spill] sm:$0xff] }
 0x317   :  { %v10204_v15 = vadd.f32 %v5803_v39, %v10114_v14  ;;  %v4193_v12 = vmax.f32 %v3447_v4, 0.0  ;;  %v5928_v62 = vadd.f32 %v5927_v11, %v5926_v42  ;;  %v3912_v50 = vadd.f32 %v10066_v57, %v3911_v3  ;;  %v5159_v0 = vpop.permute.xlu0 %5158 }
 0x318   :  { %v4287_v36 = vmax.f32 %v3917_v13, 0.0  ;;  %v4192_v49 = vmax.f32 %v3442_v56, 0.0  ;;  %v5400_v17 = vmul.f32 %v4367_v20, %v11344_v46  ;;  %v5589_v21 = vmul.f32 %v5159_v0, %v4260_v1  ;;  %4795 = vbcast.lane.b32.xlu1 %v10094_v19, 264  ;;  %4531 = vbcast.lane.b32.xlu0 %v9987_v33, 272 }
 0x319   :  { %v10213_v27 = vadd.f32 %v10066_v57, %v11345_v18  ;;  %v4166_v14 = vmax.f32 %v3312_v52, 0.0  ;;  %v5522_v11 = vmul.f32 %v9874_v6, %v4193_v12  ;;  %v4286_v42 = vmax.f32 %v3912_v50, 0.0 }
 0x31a   :  { %v5616_v4 = vmul.f32 %v9865_v5, %v4287_v36  ;;  %v5521_v39 = vmul.f32 %v9827_v8, %v4192_v49  ;;  %v5667_v2 = vsel %vm50_vm1, %v5400_v17, 0.0  ;;  %v6075_v1 = vsel %vm50_vm1, %v5589_v21, 0.0  ;;  %v4765_v13 = vpop.permute.xlu1 %4764 }
 0x31b   :  { %v11346_v56 = vmax.f32 %v10061_v60, 0.0  ;;  %v5615_v20 = vmul.f32 %v9817_v51, %v4286_v42  ;;  %v10225_v52 = vadd.f32 %v5667_v2, %v10131_v55  ;;  %v10228_v6 = vadd.f32 %v6075_v1, %v10137_v35  ;;  %v4501_v5 = vpop.permute.xlu0 %4500 }
 0x31c   :  { %v5931_v8 = vsel %vm50_vm1, %v5522_v11, 0.0  ;;  %v5929_v12 = vsel %vm50_vm1, %v5521_v39, 0.0  ;;  %v5495_v50 = vmul.f32 %v4765_v13, %v4166_v14  ;;  %v11347_v0 = vmax.f32 %v10044_v41, 0.0  ;;  %5320 = vbcast.lane.b32.xlu1 %v9353_v34, 376  ;;  %v7324_v60 = vpop.f32.mrb[134].mxu0  ;;  %5059 = vbcast.lane.b32.xlu0 %v10172_v10, 256 }
 0x31d   :  { %v5525_v3 = vmul.f32 %v10075_v7, %v11346_v56  ;;  %v6134_v51 = vsel %vm50_vm1, %v5616_v4, 0.0  ;;  %v5930_v7 = vadd.f32 %v5929_v12, %v5928_v62  ;;  %v6132_v55 = vsel %vm50_vm1, %v5615_v20, 0.0  ;;  %v7465_v49 = vpop.f32.mrb[92].mxu1  ;;  %v3451_v46 = vpop.f32.mrb[135].mxu0  ;;  %v11348_v56 = vld [vmem:[#allocation94_spill] sm:$0xff]  ;;  %v11350_v12 = vld [vmem:[#allocation48_spill] sm:$0xff] }
 0x31e   :  { %v5432_v36 = vmul.f32 %v4501_v5, %v11347_v0  ;;  %v3457_v35 = vadd.f32 %v10066_v57, %v7324_v60  ;;  %v6133_v17 = vadd.f32 %v6132_v55, %v6131_v58  ;;  %v5872_v21 = vsel %vm50_vm1, %v5495_v50, 0.0  ;;  %v3921_v34 = vpop.f32.mrb[93].mxu1  ;;  %v10242_v14 = vpop.permute.xlu1 %5292 }
 0x31f   :  { %v3927_v18 = vadd.f32 %v10066_v57, %v7465_v49  ;;  %v10245_v11 = vadd.f32 %v5872_v21, %v10150_v53  ;;  %v3452_v4 = vadd.f32 %v10066_v57, %v3451_v46  ;;  %v5029_v39 = vpop.permute.xlu0 %5028  ;;  %v5932_v2 = vadd.f32 %v5931_v8, %v5930_v7 }
 0x320   :  { %v5736_v41 = vsel %vm50_vm1, %v5432_v36, 0.0  ;;  %v4195_v42 = vmax.f32 %v3457_v35, 0.0  ;;  %v3922_v1 = vadd.f32 %v10066_v57, %v3921_v34  ;;  %v6135_v13 = vadd.f32 %v6134_v51, %v6133_v17  ;;  %4929 = vbcast.lane.b32.xlu1 %v10144_v16, 264  ;;  %4665 = vbcast.lane.b32.xlu0 %v10018_v31, 272 }
 0x321   :  { %v10248_v62 = vadd.f32 %v5736_v41, %v10159_v9  ;;  %v4289_v58 = vmax.f32 %v3927_v18, 0.0  ;;  %v10256_v53 = vadd.f32 %v10066_v57, %v11348_v56  ;;  %v4194_v20 = vmax.f32 %v3452_v4, 0.0  ;;  %v7468_v51 = vpop.f32.mrb[94].mxu1 }
 0x322   :  { %v11349_v9 = vmax.f32 %v10123_v25, 0.0  ;;  %v10262_v50 = vrot.slane %v9957_v29, %v11350_v12  ;;  %v4167_v8 = vmax.f32 %v10182_v38, 0.0  ;;  %v5524_v0 = vmul.f32 %v9975_v24, %v4195_v42  ;;  %v4899_v7 = vpop.permute.xlu1 %4898  ;;  %v3931_v46 = vpop.f32.mrb[95].mxu1 }
 0x323   :  { %v5618_v36 = vmul.f32 %v9962_v23, %v4289_v58  ;;  %v4288_v60 = vmax.f32 %v3922_v1, 0.0  ;;  %v4261_v55 = vmax.f32 %v10213_v27, 0.0  ;;  %v5523_v35 = vmul.f32 %v9920_v30, %v4194_v20  ;;  %v4635_v29 = vpop.permute.xlu0 %4634 }
 0x324   :  { %v5558_v5 = vmul.f32 %v5029_v39, %v11349_v9  ;;  %v3937_v49 = vadd.f32 %v10066_v57, %v7468_v51  ;;  %v5937_v17 = vsel %vm50_vm1, %v5525_v3, 0.0  ;;  %v11351_v38 = vmax.f32 %v10048_v32, 0.0  ;;  %4401 = vbcast.lane.b32.xlu1 %v9968_v44, 280  ;;  %5193 = vbcast.lane.b32.xlu0 %v10190_v47, 256 }
 0x325   :  { %v5617_v23 = vmul.f32 %v9911_v54, %v4288_v60  ;;  %v5933_v30 = vsel %vm50_vm1, %v5523_v35, 0.0  ;;  %v3932_v41 = vadd.f32 %v10066_v57, %v3931_v46  ;;  %v11352_v3 = vmax.f32 %v10111_v63, 0.0  ;;  %v7471_v34 = vpop.f32.mrb[96].mxu1 }
 0x326   :  { %v6008_v25 = vsel %vm50_vm1, %v5558_v5, 0.0  ;;  %v5526_v24 = vmul.f32 %v10178_v59, %v11351_v38  ;;  %v4291_v27 = vmax.f32 %v3937_v49, 0.0  ;;  %v5935_v32 = vsel %vm50_vm1, %v5524_v0, 0.0  ;;  %v4371_v42 = vpop.permute.xlu1 %4370  ;;  %v3941_v20 = vpop.f32.mrb[97].mxu1 }
 0x327   :  { %v10277_v21 = vadd.f32 %v6008_v25, %v10186_v26  ;;  %v5464_v18 = vmul.f32 %v4635_v29, %v11352_v3  ;;  %v6138_v59 = vsel %vm50_vm1, %v5618_v36, 0.0  ;;  %v5934_v54 = vadd.f32 %v5933_v30, %v5932_v2  ;;  %v5163_v9 = vpop.permute.xlu0 %5162 }
 0x328   :  { %v6136_v26 = vsel %vm50_vm1, %v5617_v23, 0.0  ;;  %v11353_v39 = vmax.f32 %v10086_v61, 0.0  ;;  %v4290_v1 = vmax.f32 %v3932_v41, 0.0  ;;  %v5620_v5 = vmul.f32 %v10155_v48, %v4291_v27  ;;  %4799 = vbcast.lane.b32.xlu1 %v10094_v19, 272  ;;  %4535 = vbcast.lane.b32.xlu0 %v9987_v33, 280 }
 0x329   :  { %v6137_v4 = vadd.f32 %v6136_v26, %v6135_v13  ;;  %v5805_v56 = vsel %vm50_vm1, %v5464_v18, 0.0  ;;  %v5936_v63 = vadd.f32 %v5935_v32, %v5934_v54  ;;  %v11354_v2 = vmax.f32 %v10040_v22, 0.0  ;;  %v10304_v35 = vpop.f32.mrb[98].mxu1 }
 0x32a   :  { %v5527_v58 = vmul.f32 %v4899_v7, %v11353_v39  ;;  %v10293_v12 = vadd.f32 %v5805_v56, %v10204_v15  ;;  %v5619_v13 = vmul.f32 %v10036_v40, %v4290_v1  ;;  %v3947_v36 = vadd.f32 %v10066_v57, %v7471_v34  ;;  %v4769_v22 = vpop.permute.xlu1 %4768  ;;  %v10311_v29 = vpop.f32.mrb[99].mxu1  ;;  %v6227_v39 = vld [vmem:[%s11117_s6] sm:$0xff] }
 0x32b   :  { %v5401_v0 = vmul.f32 %v4371_v42, %v11354_v2  ;;  %v6139_v61 = vadd.f32 %v6138_v59, %v6137_v4  ;;  %v3942_v60 = vadd.f32 %v10066_v57, %v3941_v20  ;;  %v5939_v51 = vsel %vm50_vm1, %v5526_v24, 0.0  ;;  %v4505_v38 = vpop.permute.xlu0 %4504  ;;  %v11357_v2 = vld [vmem:[#allocation136_spill] sm:$0xff] }
 0x32c   :  { %v5938_v48 = vadd.f32 %v5937_v17, %v5936_v63  ;;  %v5590_v7 = vmul.f32 %v5163_v9, %v4261_v55  ;;  %v5941_v25 = vsel %vm50_vm1, %v5527_v58, 0.0  ;;  %v6140_v40 = vsel %vm50_vm1, %v5619_v13, 0.0  ;;  %5327 = vbcast.lane.b32.xlu1 %v10262_v50, 256  ;;  %5063 = vbcast.lane.b32.xlu0 %v10172_v10, 264  ;;  %v11356_v58 = vld [vmem:[#allocation16_spill] sm:$0xff] }
 0x32d   :  { %v5669_v15 = vsel %vm50_vm1, %v5401_v0, 0.0  ;;  %v4292_v46 = vmax.f32 %v3942_v60, 0.0  ;;  %v6141_v24 = vadd.f32 %v6140_v40, %v6139_v61  ;;  %v5496_v30 = vmul.f32 %v4769_v22, %v4167_v8  ;;  %v10324_v8 = vpop.f32.mrb[100].mxu1  ;;  %v11358_v40 = vld [vmem:[#allocation135_spill] sm:$0xff] }
 0x32e   :  { %v10309_v49 = vadd.f32 %v5669_v15, %v10225_v52  ;;  %v5940_v23 = vadd.f32 %v5939_v51, %v5938_v48  ;;  %v6077_v17 = vsel %vm50_vm1, %v5590_v7, 0.0  ;;  %v6142_v55 = vsel %vm50_vm1, %v5620_v5, 0.0  ;;  %v5297_v26 = vpop.permute.xlu1 %5296 }
 0x32f   :  { %v4293_v27 = vmax.f32 %v3947_v36, 0.0  ;;  %v5621_v41 = vmul.f32 %v10242_v14, %v4292_v46  ;;  %v10318_v3 = vadd.f32 %v6077_v17, %v10228_v6  ;;  %v6143_v18 = vadd.f32 %v6142_v55, %v6141_v24  ;;  %v10331_v6 = vpop.f32.mrb[101].mxu1  ;;  %v5033_v4 = vpop.permute.xlu0 %5032 }
 0x330   :  { %v5942_v52 = vadd.f32 %v5941_v25, %v5940_v23  ;;  %v5874_v32 = vsel %vm50_vm1, %v5496_v30, 0.0  ;;  %v11355_v59 = vmax.f32 %v10070_v37, 0.0  ;;  %v4230_v34 = vmax.f32 %v10256_v53, 0.0  ;;  %v6228_v37 = vld [vmem:[%s11117_s6 + $0x8] sm:$0xff]  ;;  %4933 = vbcast.lane.b32.xlu1 %v10144_v16, 272  ;;  %4669 = vbcast.lane.b32.xlu0 %v10018_v31, 280 }
 0x331   :  { %v6144_v42 = vsel %vm50_vm1, %v5621_v41, 0.0  ;;  %v10329_v14 = vadd.f32 %v5874_v32, %v10245_v11  ;;  %v2847_v1 = vadd.f32 %v10066_v57, %v11356_v58  ;;  %v5622_v20 = vmul.f32 %v5297_v26, %v4293_v27  ;;  %v10352_v61 = vpop.f32.mrb[102].mxu1  ;;  %v11359_v23 = vld [vmem:[#allocation47_spill] sm:$0xff] }
 0x332   :  { %v5433_v54 = vmul.f32 %v4505_v38, %v11355_v59  ;;  %v6145_v53 = vadd.f32 %v6144_v42, %v6143_v18  ;;  %v4199_v11 = vmax.f32 %v10099_v45, 0.0  ;;  %v5559_v63 = vmul.f32 %v5033_v4, %v4230_v34  ;;  %v4903_v36 = vpop.permute.xlu1 %4902  ;;  %v10358_v15 = vpop.f32.mrb[103].mxu1  ;;  %v11360_v4 = vld [vmem:[#allocation92_spill] sm:$0xff] }
 0x333   :  { %v4136_v5 = vmax.f32 %v10165_v43, 0.0  ;;  %v3792_v0 = vadd.f32 %v10066_v57, %v11357_v2  ;;  %v6146_v13 = vsel %vm50_vm1, %v5622_v20, 0.0  ;;  %v7655_v60 = vmov 0.0|0.0   ;;  %v4639_v43 = vpop.permute.xlu0 %4638 }
 0x334   :  { %v5738_v56 = vsel %vm50_vm1, %v5433_v54, 0.0  ;;  %7555 = vmatprep.subr.bf16.mxu1 %v7655_v60  ;;  %v7556_v45 = vpack.c.bf16 %v6228_v37, %v6227_v39  ;;  %v10355_v51 = vadd.f32 %v6146_v13, %v6145_v53  ;;  %v5528_v48 = vmul.f32 %v4903_v36, %v4199_v11  ;;  %4405 = vbcast.lane.b32.xlu1 %v9968_v44, 288 }
 0x335   :  { %v10345_v9 = vadd.f32 %v5738_v56, %v10248_v62  ;;  %v6010_v62 = vsel %vm50_vm1, %v5559_v63, 0.0  ;;  %v5465_v22 = vmul.f32 %v4639_v43, %v4136_v5  ;;  %v4073_v25 = vmax.f32 %v2847_v1, 0.0  ;;  %5197 = vbcast.lane.b32.xlu0 %v10190_v47, 264  ;;  %v10374_v55 = vpop.f32.mrb[104].mxu1  ;;  %v11361_v63 = vld [vmem:[#allocation52_spill] sm:$0xff] }
 0x336   :  { %v10361_v7 = vadd.f32 %v6010_v62, %v10277_v21  ;;  %7557 = vmatpush3.bf16.msra.mxu1 %v7556_v45  ;;  %v3322_v46 = vadd.f32 %v10066_v57, %v11358_v40  ;;  %v5943_v38 = vsel %vm50_vm1, %v5528_v48, 0.0  ;;  %v3007_v24 = vadd.f32 %v10066_v57, %v11359_v23  ;;  %v4375_v27 = vpop.permute.xlu1 %4374  ;;  %v10379_v32 = vpop.f32.mrb[105].mxu1 }
 0x337   :  { %7558 = vmatprep.subr.bf16.mxu1 %v7655_v60  ;;  %v4262_v17 = vmax.f32 %v3792_v0, 0.0  ;;  %v10371_v21 = vadd.f32 %v5943_v38, %v5942_v52  ;;  %v5807_v30 = vsel %vm50_vm1, %v5465_v22, 0.0  ;;  %v5402_v18 = vmul.f32 %v4375_v27, %v4073_v25  ;;  %v5167_v59 = vpop.permute.xlu0 %5166  ;;  %v11362_v0 = vld [vmem:[#allocation91_spill] sm:$0xff] }
 0x338   :  { %v10377_v41 = vadd.f32 %v5807_v30, %v10293_v12  ;;  %4803 = vbcast.lane.b32.xlu1 %v10094_v19, 280  ;;  %v4168_v26 = vmax.f32 %v3322_v46, 0.0  ;;  %v3952_v52 = vadd.f32 %v10066_v57, %v10311_v29  ;;  %v4105_v42 = vmax.f32 %v3007_v24, 0.0  ;;  %v11363_v38 = vld [vmem:[#allocation19_spill] sm:$0xff]  ;;  %v11364_v30 = vld [vmem:[#allocation134_spill] sm:$0xff] }
 0x339   :  { %v5591_v54 = vmul.f32 %v5167_v59, %v4262_v17  ;;  %v5671_v34 = vsel %vm50_vm1, %v5402_v18, 0.0  ;;  %4539 = vbcast.lane.b32.xlu0 %v9987_v33, 288  ;;  %v3637_v12 = vadd.f32 %v10066_v57, %v11360_v4  ;;  %v10392_v58 = vpop.f32.mrb[106].mxu1  ;;  %v3482_v5 = vadd.f32 %v10066_v57, %v11361_v63 }
 0x33a   :  { %v10389_v39 = vadd.f32 %v5671_v34, %v10309_v49  ;;  %v4773_v1 = vpop.permute.xlu1 %4772  ;;  %v10397_v56 = vpop.f32.mrb[107].mxu1  ;;  %v4294_v49 = vmax.f32 %v3952_v52, 0.0  ;;  %v3167_v13 = vadd.f32 %v10066_v57, %v11362_v0  ;;  %v2852_v23 = vadd.f32 %v10066_v57, %v11363_v38 }
 0x33b   :  { %v6079_v37 = vsel %vm50_vm1, %v5591_v54, 0.0  ;;  %v5497_v29 = vmul.f32 %v4773_v1, %v4168_v26  ;;  %v4509_v20 = vpop.permute.xlu0 %4508 }
 0x33c   :  { %v10395_v53 = vadd.f32 %v6079_v37, %v10318_v3  ;;  %v5434_v11 = vmul.f32 %v4509_v20, %v4105_v42  ;;  %5331 = vbcast.lane.b32.xlu1 %v10262_v50, 264  ;;  %v4231_v3 = vmax.f32 %v3637_v12, 0.0  ;;  %v4137_v17 = vmax.f32 %v3167_v13, 0.0  ;;  %v11365_v37 = vld [vmem:[#allocation8_spill] sm:$0xff] }
 0x33d   :  { %v5876_v2 = vsel %vm50_vm1, %v5497_v29, 0.0  ;;  %5067 = vbcast.lane.b32.xlu0 %v10172_v10, 272  ;;  %v10410_v62 = vpop.f32.mrb[108].mxu1  ;;  %v4074_v12 = vmax.f32 %v2852_v23, 0.0  ;;  %v11366_v29 = vld [vmem:[#allocation51_spill] sm:$0xff] }
 0x33e   :  { %v10407_v36 = vadd.f32 %v5876_v2, %v10329_v14  ;;  %v5740_v45 = vsel %vm50_vm1, %v5434_v11, 0.0  ;;  %v5301_v48 = vpop.permute.xlu1 %5300  ;;  %v10415_v25 = vpop.f32.mrb[109].mxu1  ;;  %v4200_v14 = vmax.f32 %v3482_v5, 0.0  ;;  %v3012_v20 = vadd.f32 %v10066_v57, %v11366_v29 }
 0x33f   :  { %v10413_v43 = vadd.f32 %v5740_v45, %v10345_v9  ;;  %v5623_v22 = vmul.f32 %v5301_v48, %v4294_v49  ;;  %v5037_v40 = vpop.permute.xlu0 %5036  ;;  %v3797_v9 = vadd.f32 %v10066_v57, %v11364_v30 }
 0x340   :  { %v5560_v46 = vmul.f32 %v5037_v40, %v4231_v3  ;;  %4937 = vbcast.lane.b32.xlu1 %v10144_v16, 280  ;;  %v4106_v40 = vmax.f32 %v3012_v20, 0.0 }
 0x341   :  { %v6148_v24 = vsel %vm50_vm1, %v5623_v22, 0.0  ;;  %4673 = vbcast.lane.b32.xlu0 %v10018_v31, 288  ;;  %v10428_v59 = vpop.f32.mrb[110].mxu1 }
 0x342   :  { %v10425_v27 = vadd.f32 %v6148_v24, %v10355_v51  ;;  %v6012_v18 = vsel %vm50_vm1, %v5560_v46, 0.0  ;;  %v4907_v54 = vpop.permute.xlu1 %4906  ;;  %v10433_v34 = vpop.f32.mrb[111].mxu1  ;;  %v3327_v51 = vadd.f32 %v10066_v57, %v11365_v37  ;;  %v11367_v46 = vld [vmem:[#allocation98_spill] sm:$0xff] }
 0x343   :  { %v10431_v26 = vadd.f32 %v6012_v18, %v10361_v7  ;;  %v5529_v52 = vmul.f32 %v4907_v54, %v4200_v14  ;;  %v4643_v42 = vpop.permute.xlu0 %4642  ;;  %v4263_v7 = vmax.f32 %v3797_v9, 0.0  ;;  %v11368_v54 = vld [vmem:[#allocation50_spill] sm:$0xff] }
 0x344   :  { %v5466_v4 = vmul.f32 %v4643_v42, %v4137_v17  ;;  %4409 = vbcast.lane.b32.xlu1 %v9968_v44, 296  ;;  %v4169_v48 = vmax.f32 %v3327_v51, 0.0 }
 0x345   :  { %v5945_v1 = vsel %vm50_vm1, %v5529_v52, 0.0  ;;  %5201 = vbcast.lane.b32.xlu0 %v10190_v47, 272  ;;  %v10446_v5 = vpop.f32.mrb[112].mxu1  ;;  %v3487_v52 = vadd.f32 %v10066_v57, %v11368_v54 }
 0x346   :  { %v10443_v11 = vadd.f32 %v5945_v1, %v10371_v21  ;;  %v5809_v63 = vsel %vm50_vm1, %v5466_v4, 0.0  ;;  %v4379_v49 = vpop.permute.xlu1 %4378  ;;  %v10451_v13 = vpop.f32.mrb[113].mxu1  ;;  %v3957_v21 = vadd.f32 %v10066_v57, %v10304_v35  ;;  %v11369_v4 = vld [vmem:[#allocation97_spill] sm:$0xff] }
 0x347   :  { %v10449_v2 = vadd.f32 %v5809_v63, %v10377_v41  ;;  %v5403_v0 = vmul.f32 %v4379_v49, %v4074_v12  ;;  %v5171_v3 = vpop.permute.xlu0 %5170  ;;  %v3642_v41 = vadd.f32 %v10066_v57, %v11367_v46  ;;  %v3172_v12 = vadd.f32 %v10066_v57, %v11369_v4 }
 0x348   :  { %v5592_v45 = vmul.f32 %v5171_v3, %v4263_v7  ;;  %4807 = vbcast.lane.b32.xlu1 %v10094_v19, 288  ;;  %v4295_v42 = vmax.f32 %v3957_v21, 0.0  ;;  %v11370_v3 = vld [vmem:[#allocation18_spill] sm:$0xff] }
 0x349   :  { %v5673_v22 = vsel %vm50_vm1, %v5403_v0, 0.0  ;;  %4543 = vbcast.lane.b32.xlu0 %v9987_v33, 296  ;;  %v10462_v14 = vpop.f32.mrb[114].mxu1  ;;  %v4232_v37 = vmax.f32 %v3642_v41, 0.0  ;;  %v4138_v21 = vmax.f32 %v3172_v12, 0.0 }
 0x34a   :  { %v5674_v38 = vadd.f32 %v5673_v22, %v10389_v39  ;;  %v6081_v23 = vsel %vm50_vm1, %v5592_v45, 0.0  ;;  %v4777_v24 = vpop.permute.xlu1 %4776  ;;  %v10465_v9 = vpop.f32.mrb[115].mxu1  ;;  %v2857_v45 = vadd.f32 %v10066_v57, %v11370_v3  ;;  %v3802_v22 = vadd.f32 %v10066_v57, %v9812_v28 }
 0x34b   :  { %v6082_v17 = vadd.f32 %v6081_v23, %v10395_v53  ;;  %v5498_v30 = vmul.f32 %v4777_v24, %v4169_v48  ;;  %v4513_v35 = vpop.permute.xlu0 %4512  ;;  %v4201_v48 = vmax.f32 %v3487_v52, 0.0  ;;  %v11371_v52 = vld [vmem:[#allocation138_spill] sm:$0xff]  ;;  %v3962_v3 = vadd.f32 %v10066_v57, %v10331_v6 }
 0x34c   :  { %v5435_v18 = vmul.f32 %v4513_v35, %v4106_v40  ;;  %5335 = vbcast.lane.b32.xlu1 %v10262_v50, 272  ;;  %v4075_v54 = vmax.f32 %v2857_v45, 0.0  ;;  %v3332_v28 = vadd.f32 %v10066_v57, %v11371_v52  ;;  %v4264_v4 = vmax.f32 %v3802_v22, 0.0 }
 0x34d   :  { %v5878_v39 = vsel %vm50_vm1, %v5498_v30, 0.0  ;;  %5071 = vbcast.lane.b32.xlu0 %v10172_v10, 280  ;;  %v10476_v1 = vpop.f32.mrb[116].mxu1 }
 0x34e   :  { %v5879_v53 = vadd.f32 %v5878_v39, %v10407_v36  ;;  %v5742_v51 = vsel %vm50_vm1, %v5435_v18, 0.0  ;;  %v5305_v29 = vpop.permute.xlu1 %5304  ;;  %v10479_v63 = vpop.f32.mrb[117].mxu1 }
 0x34f   :  { %v5743_v20 = vadd.f32 %v5742_v51, %v10413_v43  ;;  %v5624_v7 = vmul.f32 %v5305_v29, %v4295_v42  ;;  %v5041_v49 = vpop.permute.xlu0 %5040  ;;  %v11372_v42 = vld [vmem:[#allocation49_spill] sm:$0xff] }
 0x350   :  { %v5561_v0 = vmul.f32 %v5041_v49, %v4232_v37  ;;  %4941 = vbcast.lane.b32.xlu1 %v10144_v16, 288  ;;  %v3017_v39 = vadd.f32 %v10066_v57, %v11372_v42 }
 0x351   :  { %v6150_v36 = vsel %vm50_vm1, %v5624_v7, 0.0  ;;  %4677 = vbcast.lane.b32.xlu0 %v10018_v31, 296  ;;  %v10490_v46 = vpop.f32.mrb[118].mxu1 }
 0x352   :  { %v6151_v43 = vadd.f32 %v6150_v36, %v10425_v27  ;;  %v6014_v40 = vsel %vm50_vm1, %v5561_v0, 0.0  ;;  %v4911_v41 = vpop.permute.xlu1 %4910  ;;  %v10493_v30 = vpop.f32.mrb[119].mxu1  ;;  %v4170_v0 = vmax.f32 %v3332_v28, 0.0  ;;  %v11375_v28 = vld [vmem:[#allocation95_spill] sm:$0xff] }
 0x353   :  { %v6015_v23 = vadd.f32 %v6014_v40, %v10431_v26  ;;  %v5530_v24 = vmul.f32 %v4911_v41, %v4201_v48  ;;  %v4647_v35 = vpop.permute.xlu0 %4646  ;;  %v4107_v48 = vmax.f32 %v3017_v39, 0.0 }
 0x354   :  { %v5467_v18 = vmul.f32 %v4647_v35, %v4138_v21  ;;  %4413 = vbcast.lane.b32.xlu1 %v9968_v44, 304 }
 0x355   :  { %v5947_v27 = vsel %vm50_vm1, %v5530_v24, 0.0  ;;  %5205 = vbcast.lane.b32.xlu0 %v10190_v47, 280 }
 0x356   :  { %v5948_v26 = vadd.f32 %v5947_v27, %v10443_v11  ;;  %v5811_v12 = vsel %vm50_vm1, %v5467_v18, 0.0  ;;  %v4383_v37 = vpop.permute.xlu1 %4382  ;;  %v11373_v11 = vld [vmem:[#allocation96_spill] sm:$0xff] }
 0x357   :  { %v5812_v51 = vadd.f32 %v5811_v12, %v10449_v2  ;;  %v5404_v29 = vmul.f32 %v4383_v37, %v4075_v54  ;;  %v5175_v7 = vpop.permute.xlu0 %5174  ;;  %v3647_v36 = vadd.f32 %v10066_v57, %v11373_v11  ;;  %v11374_v18 = vld [vmem:[#allocation56_spill] sm:$0xff]  ;;  %v4296_v54 = vmax.f32 %v3962_v3, 0.0 }
 0x358   :  { %v5593_v49 = vmul.f32 %v5175_v7, %v4264_v4  ;;  %4811 = vbcast.lane.b32.xlu1 %v10094_v19, 296  ;;  %v3492_v6 = vadd.f32 %v10066_v57, %v11374_v18  ;;  %v11376_v7 = vld [vmem:[#allocation21_spill] sm:$0xff]  ;;  %v11378_v18 = vld [vmem:[#allocation38_spill] sm:$0xff] }
 0x359   :  { %v5675_v45 = vsel %vm50_vm1, %v5404_v29, 0.0  ;;  %4547 = vbcast.lane.b32.xlu0 %v9987_v33, 304  ;;  %v4233_v27 = vmax.f32 %v3647_v36, 0.0 }
 0x35a   :  { %v5676_v21 = vadd.f32 %v5675_v45, %v5674_v38  ;;  %v6083_v2 = vsel %vm50_vm1, %v5593_v49, 0.0  ;;  %v4781_v22 = vpop.permute.xlu1 %4780  ;;  %v3177_v38 = vadd.f32 %v10066_v57, %v11375_v28  ;;  %v2862_v49 = vadd.f32 %v10066_v57, %v11376_v7 }
 0x35b   :  { %v6084_v40 = vadd.f32 %v6083_v2, %v6082_v17  ;;  %v5499_v41 = vmul.f32 %v4781_v22, %v4170_v0  ;;  %v4517_v24 = vpop.permute.xlu0 %4516  ;;  %v4202_v0 = vmax.f32 %v3492_v6, 0.0  ;;  %v3337_v6 = vadd.f32 %v10066_v57, %v11378_v18  ;;  %v11382_v18 = vld [vmem:[#allocation101_spill] sm:$0xff] }
 0x35c   :  { %v5436_v35 = vmul.f32 %v4517_v24, %v4107_v48  ;;  %5339 = vbcast.lane.b32.xlu1 %v10262_v50, 280  ;;  %v4139_v45 = vmax.f32 %v3177_v38, 0.0  ;;  %v11377_v48 = vld [vmem:[#allocation137_spill] sm:$0xff]  ;;  %v3967_v7 = vadd.f32 %v10066_v57, %v10324_v8 }
 0x35d   :  { %v5880_v52 = vsel %vm50_vm1, %v5499_v41, 0.0  ;;  %5075 = vbcast.lane.b32.xlu0 %v10172_v10, 288 }
 0x35e   :  { %v5881_v42 = vadd.f32 %v5880_v52, %v5879_v53  ;;  %v5744_v17 = vsel %vm50_vm1, %v5436_v35, 0.0  ;;  %v5309_v39 = vpop.permute.xlu1 %5308  ;;  %v3807_v53 = vadd.f32 %v10066_v57, %v11377_v48  ;;  %v4076_v35 = vmax.f32 %v2862_v49, 0.0  ;;  %v11379_v52 = vld [vmem:[#allocation55_spill] sm:$0xff] }
 0x35f   :  { %v5745_v4 = vadd.f32 %v5744_v17, %v5743_v20  ;;  %v5625_v12 = vmul.f32 %v5309_v39, %v4296_v54  ;;  %v5045_v37 = vpop.permute.xlu0 %5044 }
 0x360   :  { %v5562_v29 = vmul.f32 %v5045_v37, %v4233_v27  ;;  %4945 = vbcast.lane.b32.xlu1 %v10144_v16, 296  ;;  %v4265_v28 = vmax.f32 %v3807_v53, 0.0 }
 0x361   :  { %v6152_v3 = vsel %vm50_vm1, %v5625_v12, 0.0  ;;  %4681 = vbcast.lane.b32.xlu0 %v10018_v31, 304 }
 0x362   :  { %v6153_v11 = vadd.f32 %v6152_v3, %v6151_v43  ;;  %v6016_v20 = vsel %vm50_vm1, %v5562_v29, 0.0  ;;  %v4915_v36 = vpop.permute.xlu1 %4914  ;;  %v3022_v43 = vadd.f32 %v10066_v57, %v11379_v52  ;;  %v4171_v29 = vmax.f32 %v3337_v6, 0.0  ;;  %v11380_v3 = vld [vmem:[#allocation102_spill] sm:$0xff] }
 0x363   :  { %v6017_v2 = vadd.f32 %v6016_v20, %v6015_v23  ;;  %v5531_v22 = vmul.f32 %v4915_v36, %v4202_v0  ;;  %v4651_v41 = vpop.permute.xlu0 %4650 }
 0x364   :  { %v5468_v24 = vmul.f32 %v4651_v41, %v4139_v45  ;;  %4417 = vbcast.lane.b32.xlu1 %v9968_v44, 312  ;;  %v4108_v0 = vmax.f32 %v3022_v43, 0.0  ;;  %v11381_v41 = vld [vmem:[#allocation54_spill] sm:$0xff] }
 0x365   :  { %v5949_v54 = vsel %vm50_vm1, %v5531_v22, 0.0  ;;  %5209 = vbcast.lane.b32.xlu0 %v10190_v47, 288  ;;  %v3497_v8 = vadd.f32 %v10066_v57, %v11381_v41 }
 0x366   :  { %v5950_v38 = vadd.f32 %v5949_v54, %v5948_v26  ;;  %v5813_v23 = vsel %vm50_vm1, %v5468_v24, 0.0  ;;  %v4390_v27 = vpop.permute.xlu1 %4389  ;;  %v3652_v26 = vadd.f32 %v10066_v57, %v11380_v3  ;;  %v4297_v24 = vmax.f32 %v3967_v7, 0.0 }
 0x367   :  { %v5814_v17 = vadd.f32 %v5813_v23, %v5812_v51  ;;  %v5405_v39 = vmul.f32 %v4390_v27, %v4076_v35  ;;  %v5179_v12 = vpop.permute.xlu0 %5178 }
 0x368   :  { %v5594_v37 = vmul.f32 %v5179_v12, %v4265_v28  ;;  %4815 = vbcast.lane.b32.xlu1 %v10094_v19, 304  ;;  %v4234_v6 = vmax.f32 %v3652_v26, 0.0 }
 0x369   :  { %v5677_v49 = vsel %vm50_vm1, %v5405_v39, 0.0  ;;  %4551 = vbcast.lane.b32.xlu0 %v9987_v33, 312  ;;  %v11383_v39 = vld [vmem:[#allocation20_spill] sm:$0xff] }
 0x36a   :  { %v5678_v45 = vadd.f32 %v5677_v49, %v5676_v21  ;;  %v6085_v51 = vsel %vm50_vm1, %v5594_v37, 0.0  ;;  %v4785_v48 = vpop.permute.xlu1 %4784  ;;  %v3182_v21 = vadd.f32 %v10066_v57, %v11382_v18  ;;  %v2867_v12 = vadd.f32 %v10066_v57, %v11383_v39 }
 0x36b   :  { %v6086_v53 = vadd.f32 %v6085_v51, %v6084_v40  ;;  %v5500_v20 = vmul.f32 %v4785_v48, %v4171_v29  ;;  %v4524_v36 = vpop.permute.xlu0 %4523  ;;  %v4203_v37 = vmax.f32 %v3497_v8, 0.0 }
 0x36c   :  { %v5437_v22 = vmul.f32 %v4524_v36, %v4108_v0  ;;  %5343 = vbcast.lane.b32.xlu1 %v10262_v50, 288  ;;  %v4140_v7 = vmax.f32 %v3182_v21, 0.0  ;;  %v4077_v36 = vmax.f32 %v2867_v12, 0.0 }
 0x36d   :  { %v5882_v35 = vsel %vm50_vm1, %v5500_v20, 0.0  ;;  %5079 = vbcast.lane.b32.xlu0 %v10172_v10, 296 }
 0x36e   :  { %v5883_v54 = vadd.f32 %v5882_v35, %v5881_v42  ;;  %v5746_v40 = vsel %vm50_vm1, %v5437_v22, 0.0  ;;  %v5313_v52 = vpop.permute.xlu1 %5312  ;;  %v10561_v42 = vld [vmem:[%s11116_s5] ss:$0 sm:$0xff]  ;;  %v11385_v22 = vld [vmem:[#allocation140_spill] sm:$0xff] }
 0x36f   :  { %v5747_v43 = vadd.f32 %v5746_v40, %v5745_v4  ;;  %v5626_v28 = vmul.f32 %v5313_v52, %v4297_v24  ;;  %v5049_v23 = vpop.permute.xlu0 %5048  ;;  %v11384_v4 = vld [vmem:[#allocation141_spill] sm:$0xff]  ;;  %v3342_v41 = vadd.f32 %v10561_v42, %v11385_v22 }
 0x370   :  { %v5563_v27 = vmul.f32 %v5049_v23, %v4234_v6  ;;  %4949 = vbcast.lane.b32.xlu1 %v10144_v16, 304  ;;  %v3812_v49 = vadd.f32 %v10561_v42, %v11384_v4  ;;  %v11386_v24 = vld [vmem:[#allocation53_spill] sm:$0xff] }
 0x371   :  { %v6154_v29 = vsel %vm50_vm1, %v5626_v28, 0.0  ;;  %4685 = vbcast.lane.b32.xlu0 %v10018_v31, 312  ;;  %v4172_v23 = vmax.f32 %v3342_v41, 0.0 }
 0x372   :  { %v6155_v0 = vadd.f32 %v6154_v29, %v6153_v11  ;;  %v6018_v3 = vsel %vm50_vm1, %v5563_v27, 0.0  ;;  %v4919_v26 = vpop.permute.xlu1 %4918  ;;  %v3027_v11 = vadd.f32 %v10561_v42, %v11386_v24  ;;  %v4266_v35 = vmax.f32 %v3812_v49, 0.0 }
 0x373   :  { %v6019_v51 = vadd.f32 %v6018_v3, %v6017_v2  ;;  %v5532_v57 = vmul.f32 %v4919_v26, %v4203_v37  ;;  %v4658_v48 = vpop.permute.xlu0 %4657  ;;  %v3972_v27 = vadd.f32 %v10561_v42, %v10358_v15  ;;  %v11387_v37 = vld [vmem:[#allocation100_spill] sm:$0xff] }
 0x374   :  { %v5469_v20 = vmul.f32 %v4658_v48, %v4140_v7  ;;  %4421 = vbcast.lane.b32.xlu1 %v9968_v44, 320  ;;  %v4109_v12 = vmax.f32 %v3027_v11, 0.0 }
 0x375   :  { %v5951_v8 = vsel %vm50_vm1, %v5532_v57, 0.0  ;;  %5213 = vbcast.lane.b32.xlu0 %v10190_v47, 296  ;;  %v11388_v57 = vld [vmem:[#allocation60_spill] sm:$0xff]  ;;  %v4298_v48 = vmax.f32 %v3972_v27, 0.0  ;;  %v11391_v27 = vld [vmem:[#allocation139_spill] sm:$0xff] }
 0x376   :  { %v5952_v18 = vadd.f32 %v5951_v8, %v5950_v38  ;;  %v5815_v2 = vsel %vm50_vm1, %v5469_v20, 0.0  ;;  %v4394_v21 = vpop.permute.xlu1 %4393  ;;  %v3657_v38 = vadd.f32 %v10561_v42, %v11387_v37  ;;  %v3502_v15 = vadd.f32 %v10561_v42, %v11388_v57 }
 0x377   :  { %v5816_v6 = vadd.f32 %v5815_v2, %v5814_v17  ;;  %v5406_v40 = vmul.f32 %v4394_v21, %v4077_v36  ;;  %v5183_v52 = vpop.permute.xlu0 %5182  ;;  %v11389_v36 = vld [vmem:[#allocation99_spill] sm:$0xff] }
 0x378   :  { %v5595_v28 = vmul.f32 %v5183_v52, %v4266_v35  ;;  %4819 = vbcast.lane.b32.xlu1 %v10094_v19, 312  ;;  %v4235_v22 = vmax.f32 %v3657_v38, 0.0  ;;  %v11390_v21 = vld [vmem:[#allocation23_spill] sm:$0xff]  ;;  %v4204_v52 = vmax.f32 %v3502_v15, 0.0 }
 0x379   :  { %v5679_v39 = vsel %vm50_vm1, %v5406_v40, 0.0  ;;  %4555 = vbcast.lane.b32.xlu0 %v9987_v33, 320  ;;  %v2872_v40 = vadd.f32 %v10561_v42, %v11390_v21  ;;  %v11393_v15 = vld [vmem:[#allocation59_spill] sm:$0xff] }
 0x37a   :  { %v5680_v29 = vadd.f32 %v5679_v39, %v5678_v45  ;;  %v6087_v17 = vsel %vm50_vm1, %v5595_v28, 0.0  ;;  %v4792_v7 = vpop.permute.xlu1 %4791  ;;  %v3187_v45 = vadd.f32 %v10561_v42, %v11389_v36 }
 0x37b   :  { %v6088_v4 = vadd.f32 %v6087_v17, %v6086_v53  ;;  %v5501_v49 = vmul.f32 %v4792_v7, %v4172_v23  ;;  %v4528_v3 = vpop.permute.xlu0 %4527 }
 0x37c   :  { %v5438_v26 = vmul.f32 %v4528_v3, %v4109_v12  ;;  %5347 = vbcast.lane.b32.xlu1 %v10262_v50, 296  ;;  %v4141_v23 = vmax.f32 %v3187_v45, 0.0  ;;  %v11392_v3 = vld [vmem:[#allocation11_spill] sm:$0xff] }
 0x37d   :  { %v5884_v20 = vsel %vm50_vm1, %v5501_v49, 0.0  ;;  %5083 = vbcast.lane.b32.xlu0 %v10172_v10, 304  ;;  %v4078_v49 = vmax.f32 %v2872_v40, 0.0  ;;  %v11394_v40 = vld [vmem:[#allocation106_spill] sm:$0xff] }
 0x37e   :  { %v5885_v41 = vadd.f32 %v5884_v20, %v5883_v54  ;;  %v5748_v53 = vsel %vm50_vm1, %v5438_v26, 0.0  ;;  %v5317_v8 = vpop.permute.xlu1 %5316  ;;  %v3817_v54 = vadd.f32 %v10561_v42, %v11391_v27  ;;  %v3347_v26 = vadd.f32 %v10561_v42, %v11392_v3 }
 0x37f   :  { %v5749_v24 = vadd.f32 %v5748_v53, %v5747_v43  ;;  %v5627_v11 = vmul.f32 %v5317_v8, %v4298_v48  ;;  %v5053_v35 = vpop.permute.xlu0 %5052 }
 0x380   :  { %v5564_v2 = vmul.f32 %v5053_v35, %v4235_v22  ;;  %4953 = vbcast.lane.b32.xlu1 %v10144_v16, 312  ;;  %v4267_v48 = vmax.f32 %v3817_v54, 0.0  ;;  %v3977_v35 = vadd.f32 %v10561_v42, %v10352_v61 }
 0x381   :  { %v6156_v28 = vsel %vm50_vm1, %v5627_v11, 0.0  ;;  %4689 = vbcast.lane.b32.xlu0 %v10018_v31, 320  ;;  %v4173_v11 = vmax.f32 %v3347_v26, 0.0 }
 0x382   :  { %v6157_v39 = vadd.f32 %v6156_v28, %v6155_v0  ;;  %v6020_v43 = vsel %vm50_vm1, %v5564_v2, 0.0  ;;  %v4926_v12 = vpop.permute.xlu1 %4925  ;;  %v3032_v0 = vadd.f32 %v10561_v42, %v11393_v15 }
 0x383   :  { %v6021_v37 = vadd.f32 %v6020_v43, %v6019_v51  ;;  %v5533_v38 = vmul.f32 %v4926_v12, %v4204_v52  ;;  %v4662_v17 = vpop.permute.xlu0 %4661  ;;  %v11395_v12 = vld [vmem:[#allocation58_spill] sm:$0xff] }
 0x384   :  { %v5470_v7 = vmul.f32 %v4662_v17, %v4141_v23  ;;  %4425 = vbcast.lane.b32.xlu1 %v9968_v44, 328  ;;  %v4110_v21 = vmax.f32 %v3032_v0, 0.0  ;;  %v3507_v61 = vadd.f32 %v10561_v42, %v11395_v12  ;;  %v11400_v12 = vld [vmem:[#allocation57_spill] sm:$0xff] }
 0x385   :  { %v5953_v57 = vsel %vm50_vm1, %v5533_v38, 0.0  ;;  %5217 = vbcast.lane.b32.xlu0 %v10190_v47, 304  ;;  %v4299_v38 = vmax.f32 %v3977_v35, 0.0 }
 0x386   :  { %v5954_v20 = vadd.f32 %v5953_v57, %v5952_v18  ;;  %v5817_v51 = vsel %vm50_vm1, %v5470_v7, 0.0  ;;  %v4398_v36 = vpop.permute.xlu1 %4397  ;;  %v3662_v18 = vadd.f32 %v10561_v42, %v11394_v40  ;;  %v11396_v7 = vld [vmem:[#allocation105_spill] sm:$0xff] }
 0x387   :  { %v5818_v45 = vadd.f32 %v5817_v51, %v5816_v6  ;;  %v5407_v22 = vmul.f32 %v4398_v36, %v4078_v49  ;;  %v5187_v53 = vpop.permute.xlu0 %5186  ;;  %v11397_v51 = vld [vmem:[#allocation22_spill] sm:$0xff] }
 0x388   :  { %v5596_v8 = vmul.f32 %v5187_v53, %v4267_v48  ;;  %4823 = vbcast.lane.b32.xlu1 %v10094_v19, 320  ;;  %v4236_v49 = vmax.f32 %v3662_v18, 0.0  ;;  %v2877_v36 = vadd.f32 %v10561_v42, %v11397_v51  ;;  %v11401_v51 = vld [vmem:[#allocation104_spill] sm:$0xff] }
 0x389   :  { %v5681_v2 = vsel %vm50_vm1, %v5407_v22, 0.0  ;;  %4559 = vbcast.lane.b32.xlu0 %v9987_v33, 328  ;;  %v4205_v22 = vmax.f32 %v3507_v61, 0.0 }
 0x38a   :  { %v5682_v52 = vadd.f32 %v5681_v2, %v5680_v29  ;;  %v6089_v6 = vsel %vm50_vm1, %v5596_v8, 0.0  ;;  %v4796_v28 = vpop.permute.xlu1 %4795  ;;  %v3192_v29 = vadd.f32 %v10561_v42, %v11396_v7 }
 0x38b   :  { %v6090_v23 = vadd.f32 %v6089_v6, %v6088_v4  ;;  %v5502_v27 = vmul.f32 %v4796_v28, %v4173_v11  ;;  %v4532_v54 = vpop.permute.xlu0 %4531  ;;  %v11398_v11 = vld [vmem:[#allocation144_spill] sm:$0xff]  ;;  %v4079_v28 = vmax.f32 %v2877_v36, 0.0 }
 0x38c   :  { %v5439_v43 = vmul.f32 %v4532_v54, %v4110_v21  ;;  %5351 = vbcast.lane.b32.xlu1 %v10262_v50, 304  ;;  %v4142_v8 = vmax.f32 %v3192_v29, 0.0 }
 0x38d   :  { %v5886_v17 = vsel %vm50_vm1, %v5502_v27, 0.0  ;;  %5087 = vbcast.lane.b32.xlu0 %v10172_v10, 312  ;;  %v11399_v27 = vld [vmem:[#allocation143_spill] sm:$0xff] }
 0x38e   :  { %v5887_v3 = vadd.f32 %v5886_v17, %v5885_v41  ;;  %v5750_v4 = vsel %vm50_vm1, %v5439_v43, 0.0  ;;  %v5321_v26 = vpop.permute.xlu1 %5320  ;;  %v3822_v41 = vadd.f32 %v10561_v42, %v11398_v11  ;;  %v3352_v54 = vadd.f32 %v10561_v42, %v11399_v27 }
 0x38f   :  { %v5751_v57 = vadd.f32 %v5750_v4, %v5749_v24  ;;  %v5628_v15 = vmul.f32 %v5321_v26, %v4299_v38  ;;  %v5060_v0 = vpop.permute.xlu0 %5059 }
 0x390   :  { %v5565_v48 = vmul.f32 %v5060_v0, %v4236_v49  ;;  %4957 = vbcast.lane.b32.xlu1 %v10144_v16, 320  ;;  %v4268_v61 = vmax.f32 %v3822_v41, 0.0  ;;  %v4174_v26 = vmax.f32 %v3352_v54, 0.0 }
 0x391   :  { %v6158_v53 = vsel %vm50_vm1, %v5628_v15, 0.0  ;;  %4693 = vbcast.lane.b32.xlu0 %v10018_v31, 328  ;;  %v3982_v15 = vadd.f32 %v10561_v42, %v10379_v32 }
 0x392   :  { %v6159_v35 = vadd.f32 %v6158_v53, %v6157_v39  ;;  %v6022_v24 = vsel %vm50_vm1, %v5565_v48, 0.0  ;;  %v4930_v2 = vpop.permute.xlu1 %4929  ;;  %v3037_v39 = vadd.f32 %v10561_v42, %v11400_v12 }
 0x393   :  { %v6023_v21 = vadd.f32 %v6022_v24, %v6021_v37  ;;  %v5534_v40 = vmul.f32 %v4930_v2, %v4205_v22  ;;  %v4666_v18 = vpop.permute.xlu0 %4665  ;;  %v11402_v24 = vld [vmem:[#allocation64_spill] sm:$0xff]  ;;  %v4300_v2 = vmax.f32 %v3982_v15, 0.0 }
 0x394   :  { %v5471_v6 = vmul.f32 %v4666_v18, %v4142_v8  ;;  %4429 = vbcast.lane.b32.xlu1 %v9968_v44, 336  ;;  %v4111_v48 = vmax.f32 %v3037_v39, 0.0  ;;  %v3512_v32 = vadd.f32 %v10561_v42, %v11402_v24  ;;  %v11403_v18 = vld [vmem:[#allocation103_spill] sm:$0xff] }
 0x395   :  { %v5955_v43 = vsel %vm50_vm1, %v5534_v40, 0.0  ;;  %5221 = vbcast.lane.b32.xlu0 %v10190_v47, 312 }
 0x396   :  { %v5956_v38 = vadd.f32 %v5955_v43, %v5954_v20  ;;  %v5819_v37 = vsel %vm50_vm1, %v5471_v6, 0.0  ;;  %v4402_v17 = vpop.permute.xlu1 %4401  ;;  %v3667_v20 = vadd.f32 %v10561_v42, %v11401_v51 }
 0x397   :  { %v5820_v7 = vadd.f32 %v5819_v37, %v5818_v45  ;;  %v5408_v29 = vmul.f32 %v4402_v17, %v4079_v28  ;;  %v5194_v49 = vpop.permute.xlu0 %5193  ;;  %v4206_v17 = vmax.f32 %v3512_v32, 0.0 }
 0x398   :  { %v5597_v4 = vmul.f32 %v5194_v49, %v4268_v61  ;;  %4827 = vbcast.lane.b32.xlu1 %v10094_v19, 328  ;;  %v4237_v6 = vmax.f32 %v3667_v20, 0.0  ;;  %v11404_v61 = vld [vmem:[#allocation25_spill] sm:$0xff] }
 0x399   :  { %v5683_v0 = vsel %vm50_vm1, %v5408_v29, 0.0  ;;  %4563 = vbcast.lane.b32.xlu0 %v9987_v33, 336  ;;  %v2882_v37 = vadd.f32 %v10561_v42, %v11404_v61 }
 0x39a   :  { %v5684_v36 = vadd.f32 %v5683_v0, %v5682_v52  ;;  %v6091_v45 = vsel %vm50_vm1, %v5597_v4, 0.0  ;;  %v4800_v22 = vpop.permute.xlu1 %4799  ;;  %v3197_v52 = vadd.f32 %v10561_v42, %v11403_v18  ;;  %v11405_v4 = vld [vmem:[#allocation142_spill] sm:$0xff] }
 0x39b   :  { %v6092_v53 = vadd.f32 %v6091_v45, %v6090_v23  ;;  %v5503_v8 = vmul.f32 %v4800_v22, %v4174_v26  ;;  %v4536_v11 = vpop.permute.xlu0 %4535  ;;  %v4080_v45 = vmax.f32 %v2882_v37, 0.0  ;;  %v11406_v22 = vld [vmem:[#allocation41_spill] sm:$0xff] }
 0x39c   :  { %v5440_v41 = vmul.f32 %v4536_v11, %v4111_v48  ;;  %5355 = vbcast.lane.b32.xlu1 %v10262_v50, 312  ;;  %v4143_v49 = vmax.f32 %v3197_v52, 0.0 }
 0x39d   :  { %v5888_v40 = vsel %vm50_vm1, %v5503_v8, 0.0  ;;  %5091 = vbcast.lane.b32.xlu0 %v10172_v10, 320  ;;  %v3357_v8 = vadd.f32 %v10561_v42, %v11406_v22 }
 0x39e   :  { %v5889_v28 = vadd.f32 %v5888_v40, %v5887_v3  ;;  %v5752_v23 = vsel %vm50_vm1, %v5440_v41, 0.0  ;;  %v5328_v27 = vpop.permute.xlu1 %5327  ;;  %v3827_v3 = vadd.f32 %v10561_v42, %v11405_v4  ;;  %v11407_v41 = vld [vmem:[#allocation63_spill] sm:$0xff] }
 0x39f   :  { %v5753_v54 = vadd.f32 %v5752_v23, %v5751_v57  ;;  %v5629_v43 = vmul.f32 %v5328_v27, %v4300_v2  ;;  %v5064_v12 = vpop.permute.xlu0 %5063  ;;  %v4175_v23 = vmax.f32 %v3357_v8, 0.0  ;;  %v3987_v27 = vadd.f32 %v10561_v42, %v10374_v55 }
 0x3a0   :  { %v5566_v39 = vmul.f32 %v5064_v12, %v4237_v6  ;;  %4961 = vbcast.lane.b32.xlu1 %v10144_v16, 328  ;;  %v4269_v24 = vmax.f32 %v3827_v3, 0.0  ;;  %v11409_v3 = vld [vmem:[#allocation62_spill] sm:$0xff] }
 0x3a1   :  { %v6160_v29 = vsel %vm50_vm1, %v5629_v43, 0.0  ;;  %4697 = vbcast.lane.b32.xlu0 %v10018_v31, 336  ;;  %v3517_v55 = vadd.f32 %v10561_v42, %v11409_v3 }
 0x3a2   :  { %v6161_v26 = vadd.f32 %v6160_v29, %v6159_v35  ;;  %v6024_v57 = vsel %vm50_vm1, %v5566_v39, 0.0  ;;  %v4934_v15 = vpop.permute.xlu1 %4933  ;;  %v3042_v35 = vadd.f32 %v10561_v42, %v11407_v41  ;;  %v11408_v39 = vld [vmem:[#allocation110_spill] sm:$0xff] }
 0x3a3   :  { %v6025_v0 = vadd.f32 %v6024_v57, %v6023_v21  ;;  %v5535_v48 = vmul.f32 %v4934_v15, %v4206_v17  ;;  %v4670_v51 = vpop.permute.xlu0 %4669  ;;  %v4301_v57 = vmax.f32 %v3987_v27, 0.0 }
 0x3a4   :  { %v5472_v20 = vmul.f32 %v4670_v51, %v4143_v49  ;;  %4433 = vbcast.lane.b32.xlu1 %v9968_v44, 344  ;;  %v4112_v12 = vmax.f32 %v3042_v35, 0.0  ;;  %v11411_v35 = vld [vmem:[#allocation24_spill] sm:$0xff] }
 0x3a5   :  { %v5957_v11 = vsel %vm50_vm1, %v5535_v48, 0.0  ;;  %5225 = vbcast.lane.b32.xlu0 %v10190_v47, 320  ;;  %v11410_v48 = vld [vmem:[#allocation109_spill] sm:$0xff] }
 0x3a6   :  { %v5958_v32 = vadd.f32 %v5957_v11, %v5956_v38  ;;  %v5821_v21 = vsel %vm50_vm1, %v5472_v20, 0.0  ;;  %v4406_v2 = vpop.permute.xlu1 %4405  ;;  %v3672_v38 = vadd.f32 %v10561_v42, %v11408_v39 }
 0x3a7   :  { %v5822_v40 = vadd.f32 %v5821_v21, %v5820_v7  ;;  %v5409_v18 = vmul.f32 %v4406_v2, %v4080_v45  ;;  %v5198_v52 = vpop.permute.xlu0 %5197  ;;  %v4207_v21 = vmax.f32 %v3517_v55, 0.0 }
 0x3a8   :  { %v5598_v6 = vmul.f32 %v5198_v52, %v4269_v24  ;;  %4831 = vbcast.lane.b32.xlu1 %v10094_v19, 336  ;;  %v4238_v51 = vmax.f32 %v3672_v38, 0.0  ;;  %v2887_v24 = vadd.f32 %v10561_v42, %v11411_v35  ;;  %v11412_v52 = vld [vmem:[#allocation147_spill] sm:$0xff] }
 0x3a9   :  { %v5685_v43 = vsel %vm50_vm1, %v5409_v18, 0.0  ;;  %4567 = vbcast.lane.b32.xlu0 %v9987_v33, 344 }
 0x3aa   :  { %v5686_v61 = vadd.f32 %v5685_v43, %v5684_v36  ;;  %v6093_v7 = vsel %vm50_vm1, %v5598_v6, 0.0  ;;  %v4804_v37 = vpop.permute.xlu1 %4803  ;;  %v3202_v36 = vadd.f32 %v10561_v42, %v11410_v48  ;;  %v4081_v38 = vmax.f32 %v2887_v24, 0.0 }
 0x3ab   :  { %v6094_v17 = vadd.f32 %v6093_v7, %v6092_v53  ;;  %v5504_v29 = vmul.f32 %v4804_v37, %v4175_v23  ;;  %v4540_v49 = vpop.permute.xlu0 %4539  ;;  %v11413_v7 = vld [vmem:[#allocation146_spill] sm:$0xff] }
 0x3ac   :  { %v5441_v4 = vmul.f32 %v4540_v49, %v4112_v12  ;;  %5359 = vbcast.lane.b32.xlu1 %v10262_v50, 320  ;;  %v4144_v18 = vmax.f32 %v3202_v36, 0.0  ;;  %v3362_v37 = vadd.f32 %v10561_v42, %v11413_v7  ;;  %v11414_v49 = vld [vmem:[#allocation61_spill] sm:$0xff] }
 0x3ad   :  { %v5890_v15 = vsel %vm50_vm1, %v5504_v29, 0.0  ;;  %5095 = vbcast.lane.b32.xlu0 %v10172_v10, 328 }
 0x3ae   :  { %v5891_v20 = vadd.f32 %v5890_v15, %v5889_v28  ;;  %v5754_v53 = vsel %vm50_vm1, %v5441_v4, 0.0  ;;  %v5332_v45 = vpop.permute.xlu1 %5331  ;;  %v3832_v28 = vadd.f32 %v10561_v42, %v11412_v52  ;;  %v11416_v52 = vld [vmem:[#allocation68_spill] sm:$0xff] }
 0x3af   :  { %v5755_v22 = vadd.f32 %v5754_v53, %v5753_v54  ;;  %v5630_v8 = vmul.f32 %v5332_v45, %v4301_v57  ;;  %v5068_v11 = vpop.permute.xlu0 %5067  ;;  %v3992_v53 = vadd.f32 %v10561_v42, %v10397_v56  ;;  %v3522_v56 = vadd.f32 %v10561_v42, %v11416_v52 }
 0x3b0   :  { %v5567_v41 = vmul.f32 %v5068_v11, %v4238_v51  ;;  %4965 = vbcast.lane.b32.xlu1 %v10144_v16, 336  ;;  %v4270_v4 = vmax.f32 %v3832_v28, 0.0  ;;  %v4176_v51 = vmax.f32 %v3362_v37, 0.0  ;;  %v11415_v11 = vld [vmem:[#allocation108_spill] sm:$0xff] }
 0x3b1   :  { %v6162_v2 = vsel %vm50_vm1, %v5630_v8, 0.0  ;;  %4701 = vbcast.lane.b32.xlu0 %v10018_v31, 344  ;;  %v4302_v28 = vmax.f32 %v3992_v53, 0.0 }
 0x3b2   :  { %v6163_v6 = vadd.f32 %v6162_v2, %v6161_v26  ;;  %v6026_v54 = vsel %vm50_vm1, %v5567_v41, 0.0  ;;  %v4938_v23 = vpop.permute.xlu1 %4937  ;;  %v3047_v26 = vadd.f32 %v10561_v42, %v11414_v49  ;;  %v11418_v49 = vld [vmem:[#allocation27_spill] sm:$0xff] }
 0x3b3   :  { %v6027_v27 = vadd.f32 %v6026_v54, %v6025_v0  ;;  %v5536_v43 = vmul.f32 %v4938_v23, %v4207_v21  ;;  %v4674_v12 = vpop.permute.xlu0 %4673  ;;  %v11417_v23 = vld [vmem:[#allocation107_spill] sm:$0xff] }
 0x3b4   :  { %v5473_v39 = vmul.f32 %v4674_v12, %v4144_v18  ;;  %4437 = vbcast.lane.b32.xlu1 %v9968_v44, 352  ;;  %v4113_v8 = vmax.f32 %v3047_v26, 0.0  ;;  %v2892_v26 = vadd.f32 %v10561_v42, %v11418_v49 }
 0x3b5   :  { %v5959_v29 = vsel %vm50_vm1, %v5536_v43, 0.0  ;;  %5229 = vbcast.lane.b32.xlu0 %v10190_v47, 328 }
 0x3b6   :  { %v5960_v3 = vadd.f32 %v5959_v29, %v5958_v32  ;;  %v5823_v0 = vsel %vm50_vm1, %v5473_v39, 0.0  ;;  %v4410_v55 = vpop.permute.xlu1 %4409  ;;  %v3677_v32 = vadd.f32 %v10561_v42, %v11415_v11  ;;  %v4082_v11 = vmax.f32 %v2892_v26, 0.0 }
 0x3b7   :  { %v5824_v57 = vadd.f32 %v5823_v0, %v5822_v40  ;;  %v5410_v15 = vmul.f32 %v4410_v55, %v4081_v38  ;;  %v5202_v48 = vpop.permute.xlu0 %5201 }
 0x3b8   :  { %v5599_v36 = vmul.f32 %v5202_v48, %v4270_v4  ;;  %4835 = vbcast.lane.b32.xlu1 %v10094_v19, 344  ;;  %v4239_v43 = vmax.f32 %v3677_v32, 0.0  ;;  %v4208_v4 = vmax.f32 %v3522_v56, 0.0  ;;  %v11420_v32 = vld [vmem:[#allocation10_spill] sm:$0xff] }
 0x3b9   :  { %v5687_v45 = vsel %vm50_vm1, %v5410_v15, 0.0  ;;  %4571 = vbcast.lane.b32.xlu0 %v9987_v33, 352  ;;  %v11419_v15 = vld [vmem:[#allocation145_spill] sm:$0xff] }
 0x3ba   :  { %v5688_v41 = vadd.f32 %v5687_v45, %v5686_v61  ;;  %v6095_v40 = vsel %vm50_vm1, %v5599_v36, 0.0  ;;  %v4808_v35 = vpop.permute.xlu1 %4807  ;;  %v3207_v61 = vadd.f32 %v10561_v42, %v11417_v23 }
 0x3bb   :  { %v6096_v24 = vadd.f32 %v6095_v40, %v6094_v17  ;;  %v5505_v21 = vmul.f32 %v4808_v35, %v4176_v51  ;;  %v4544_v2 = vpop.permute.xlu0 %4543  ;;  %v3367_v40 = vadd.f32 %v10561_v42, %v11420_v32 }
 0x3bc   :  { %v5442_v18 = vmul.f32 %v4544_v2, %v4113_v8  ;;  %5363 = vbcast.lane.b32.xlu1 %v10262_v50, 328  ;;  %v4145_v55 = vmax.f32 %v3207_v61, 0.0 }
 0x3bd   :  { %v5892_v54 = vsel %vm50_vm1, %v5505_v21, 0.0  ;;  %5099 = vbcast.lane.b32.xlu0 %v10172_v10, 336  ;;  %v11421_v21 = vld [vmem:[#allocation67_spill] sm:$0xff]  ;;  %v4177_v61 = vmax.f32 %v3367_v40, 0.0 }
 0x3be   :  { %v5893_v12 = vadd.f32 %v5892_v54, %v5891_v20  ;;  %v5756_v17 = vsel %vm50_vm1, %v5442_v18, 0.0  ;;  %v5336_v39 = vpop.permute.xlu1 %5335  ;;  %v3837_v20 = vadd.f32 %v10561_v42, %v11419_v15 }
 0x3bf   :  { %v5757_v38 = vadd.f32 %v5756_v17, %v5755_v22  ;;  %v5631_v7 = vmul.f32 %v5336_v39, %v4302_v28  ;;  %v5072_v37 = vpop.permute.xlu0 %5071 }
 0x3c0   :  { %v5568_v29 = vmul.f32 %v5072_v37, %v4239_v43  ;;  %4969 = vbcast.lane.b32.xlu1 %v10144_v16, 344  ;;  %v4271_v2 = vmax.f32 %v3837_v20, 0.0  ;;  %v3997_v43 = vadd.f32 %v10561_v42, %v10392_v58 }
 0x3c1   :  { %v6164_v0 = vsel %vm50_vm1, %v5631_v7, 0.0  ;;  %4705 = vbcast.lane.b32.xlu0 %v10018_v31, 352  ;;  %v11422_v7 = vld [vmem:[#allocation114_spill] sm:$0xff] }
 0x3c2   :  { %v6165_v48 = vadd.f32 %v6164_v0, %v6163_v6  ;;  %v6028_v22 = vsel %vm50_vm1, %v5568_v29, 0.0  ;;  %v4942_v36 = vpop.permute.xlu1 %4941  ;;  %v3052_v6 = vadd.f32 %v10561_v42, %v11421_v21  ;;  %v4303_v15 = vmax.f32 %v3997_v43, 0.0 }
 0x3c3   :  { %v6029_v51 = vadd.f32 %v6028_v22, %v6027_v27  ;;  %v5537_v53 = vmul.f32 %v4942_v36, %v4208_v4  ;;  %v4678_v45 = vpop.permute.xlu0 %4677  ;;  %v11424_v22 = vld [vmem:[#allocation113_spill] sm:$0xff] }
 0x3c4   :  { %v5474_v8 = vmul.f32 %v4678_v45, %v4145_v55  ;;  %4441 = vbcast.lane.b32.xlu1 %v9968_v44, 360  ;;  %v4114_v39 = vmax.f32 %v3052_v6, 0.0  ;;  %v11423_v55 = vld [vmem:[#allocation66_spill] sm:$0xff] }
 0x3c5   :  { %v5961_v35 = vsel %vm50_vm1, %v5537_v53, 0.0  ;;  %5233 = vbcast.lane.b32.xlu0 %v10190_v47, 336  ;;  %v3527_v58 = vadd.f32 %v10561_v42, %v11423_v55 }
 0x3c6   :  { %v5962_v18 = vadd.f32 %v5961_v35, %v5960_v3  ;;  %v5825_v27 = vsel %vm50_vm1, %v5474_v8, 0.0  ;;  %v4414_v52 = vpop.permute.xlu1 %4413  ;;  %v3682_v3 = vadd.f32 %v10561_v42, %v11422_v7  ;;  %v11425_v35 = vld [vmem:[#allocation26_spill] sm:$0xff]  ;;  %v11427_v7 = vld [vmem:[#allocation149_spill] sm:$0xff] }
 0x3c7   :  { %v5826_v56 = vadd.f32 %v5825_v27, %v5824_v57  ;;  %v5411_v28 = vmul.f32 %v4414_v52, %v4082_v11  ;;  %v5206_v54 = vpop.permute.xlu0 %5205  ;;  %v2897_v21 = vadd.f32 %v10561_v42, %v11425_v35  ;;  %v4209_v6 = vmax.f32 %v3527_v58, 0.0  ;;  %v11426_v52 = vld [vmem:[#allocation150_spill] sm:$0xff] }
 0x3c8   :  { %v5600_v23 = vmul.f32 %v5206_v54, %v4271_v2  ;;  %4839 = vbcast.lane.b32.xlu1 %v10094_v19, 352  ;;  %v4240_v36 = vmax.f32 %v3682_v3, 0.0  ;;  %v3372_v3 = vadd.f32 %v10561_v42, %v11427_v7 }
 0x3c9   :  { %v5689_v17 = vsel %vm50_vm1, %v5411_v28, 0.0  ;;  %4575 = vbcast.lane.b32.xlu0 %v9987_v33, 360 }
 0x3ca   :  { %v5690_v37 = vadd.f32 %v5689_v17, %v5688_v41  ;;  %v6097_v57 = vsel %vm50_vm1, %v5600_v23, 0.0  ;;  %v4812_v29 = vpop.permute.xlu1 %4811  ;;  %v3212_v41 = vadd.f32 %v10561_v42, %v11424_v22  ;;  %v4178_v22 = vmax.f32 %v3372_v3, 0.0  ;;  %v11432_v3 = vld [vmem:[#allocation29_spill] sm:$0xff] }
 0x3cb   :  { %v6098_v49 = vadd.f32 %v6097_v57, %v6096_v24  ;;  %v5506_v26 = vmul.f32 %v4812_v29, %v4177_v61  ;;  %v4548_v4 = vpop.permute.xlu0 %4547  ;;  %v11428_v29 = vld [vmem:[#allocation65_spill] sm:$0xff] }
 0x3cc   :  { %v5443_v0 = vmul.f32 %v4548_v4, %v4114_v39  ;;  %5367 = vbcast.lane.b32.xlu1 %v10262_v50, 336  ;;  %v4146_v27 = vmax.f32 %v3212_v41, 0.0  ;;  %v4083_v39 = vmax.f32 %v2897_v21, 0.0  ;;  %v4002_v41 = vadd.f32 %v10561_v42, %v10415_v25 }
 0x3cd   :  { %v5894_v20 = vsel %vm50_vm1, %v5506_v26, 0.0  ;;  %5103 = vbcast.lane.b32.xlu0 %v10172_v10, 344 }
 0x3ce   :  { %v5895_v53 = vadd.f32 %v5894_v20, %v5893_v12  ;;  %v5758_v24 = vsel %vm50_vm1, %v5443_v0, 0.0  ;;  %v5340_v45 = vpop.permute.xlu1 %5339  ;;  %v3842_v12 = vadd.f32 %v10561_v42, %v11426_v52 }
 0x3cf   :  { %v5759_v8 = vadd.f32 %v5758_v24, %v5757_v38  ;;  %v5632_v11 = vmul.f32 %v5340_v45, %v4303_v15  ;;  %v5076_v32 = vpop.permute.xlu0 %5075  ;;  %v11429_v45 = vld [vmem:[#allocation112_spill] sm:$0xff] }
 0x3d0   :  { %v5569_v40 = vmul.f32 %v5076_v32, %v4240_v36  ;;  %4973 = vbcast.lane.b32.xlu1 %v10144_v16, 352  ;;  %v4272_v26 = vmax.f32 %v3842_v12, 0.0  ;;  %v11431_v12 = vld [vmem:[#allocation111_spill] sm:$0xff] }
 0x3d1   :  { %v6166_v2 = vsel %vm50_vm1, %v5632_v11, 0.0  ;;  %4709 = vbcast.lane.b32.xlu0 %v10018_v31, 360 }
 0x3d2   :  { %v6167_v28 = vadd.f32 %v6166_v2, %v6165_v48  ;;  %v6030_v38 = vsel %vm50_vm1, %v5569_v40, 0.0  ;;  %v4946_v54 = vpop.permute.xlu1 %4945  ;;  %v3057_v48 = vadd.f32 %v10561_v42, %v11428_v29  ;;  %v11430_v2 = vld [vmem:[#allocation72_spill] sm:$0xff] }
 0x3d3   :  { %v6031_v23 = vadd.f32 %v6030_v38, %v6029_v51  ;;  %v5538_v61 = vmul.f32 %v4946_v54, %v4209_v6  ;;  %v4682_v43 = vpop.permute.xlu0 %4681  ;;  %v3532_v25 = vadd.f32 %v10561_v42, %v11430_v2 }
 0x3d4   :  { %v5475_v17 = vmul.f32 %v4682_v43, %v4146_v27  ;;  %4445 = vbcast.lane.b32.xlu1 %v9968_v44, 368  ;;  %v4115_v24 = vmax.f32 %v3057_v48, 0.0  ;;  %v4304_v27 = vmax.f32 %v4002_v41, 0.0 }
 0x3d5   :  { %v5963_v57 = vsel %vm50_vm1, %v5538_v61, 0.0  ;;  %5237 = vbcast.lane.b32.xlu0 %v10190_v47, 344  ;;  %v4210_v29 = vmax.f32 %v3532_v25, 0.0 }
 0x3d6   :  { %v5964_v4 = vadd.f32 %v5963_v57, %v5962_v18  ;;  %v5827_v51 = vsel %vm50_vm1, %v5475_v17, 0.0  ;;  %v4418_v0 = vpop.permute.xlu1 %4417  ;;  %v3687_v18 = vadd.f32 %v10561_v42, %v11429_v45  ;;  %v2902_v57 = vadd.f32 %v10561_v42, %v11432_v3 }
 0x3d7   :  { %v5828_v55 = vadd.f32 %v5827_v51, %v5826_v56  ;;  %v5412_v58 = vmul.f32 %v4418_v0, %v4083_v39  ;;  %v5210_v15 = vpop.permute.xlu0 %5209  ;;  %v11433_v51 = vld [vmem:[#allocation148_spill] sm:$0xff] }
 0x3d8   :  { %v5601_v20 = vmul.f32 %v5210_v15, %v4272_v26  ;;  %4843 = vbcast.lane.b32.xlu1 %v10094_v19, 360  ;;  %v4241_v38 = vmax.f32 %v3687_v18, 0.0 }
 0x3d9   :  { %v5691_v36 = vsel %vm50_vm1, %v5412_v58, 0.0  ;;  %4579 = vbcast.lane.b32.xlu0 %v9987_v33, 368 }
 0x3da   :  { %v5692_v11 = vadd.f32 %v5691_v36, %v5690_v37  ;;  %v6099_v56 = vsel %vm50_vm1, %v5601_v20, 0.0  ;;  %v4816_v32 = vpop.permute.xlu1 %4815  ;;  %v3217_v37 = vadd.f32 %v10561_v42, %v11431_v12  ;;  %v4084_v36 = vmax.f32 %v2902_v57, 0.0  ;;  %v11437_v57 = vld [vmem:[#allocation70_spill] sm:$0xff] }
 0x3db   :  { %v6100_v40 = vadd.f32 %v6099_v56, %v6098_v49  ;;  %v5507_v35 = vmul.f32 %v4816_v32, %v4178_v22  ;;  %v4552_v21 = vpop.permute.xlu0 %4551  ;;  %v11435_v56 = vld [vmem:[#allocation71_spill] sm:$0xff] }
 0x3dc   :  { %v5444_v6 = vmul.f32 %v4552_v21, %v4115_v24  ;;  %5371 = vbcast.lane.b32.xlu1 %v10262_v50, 344  ;;  %v4147_v26 = vmax.f32 %v3217_v37, 0.0  ;;  %v11434_v24 = vld [vmem:[#allocation40_spill] sm:$0xff] }
 0x3dd   :  { %v5896_v52 = vsel %vm50_vm1, %v5507_v35, 0.0  ;;  %5107 = vbcast.lane.b32.xlu0 %v10172_v10, 352  ;;  %v3377_v45 = vadd.f32 %v10561_v42, %v11434_v24 }
 0x3de   :  { %v5897_v54 = vadd.f32 %v5896_v52, %v5895_v53  ;;  %v5760_v49 = vsel %vm50_vm1, %v5444_v6, 0.0  ;;  %v5344_v61 = vpop.permute.xlu1 %5343  ;;  %v3847_v53 = vadd.f32 %v10561_v42, %v11433_v51  ;;  %v4007_v52 = vadd.f32 %v10561_v42, %v10410_v62 }
 0x3df   :  { %v5761_v43 = vadd.f32 %v5760_v49, %v5759_v8  ;;  %v5633_v17 = vmul.f32 %v5344_v61, %v4304_v27  ;;  %v5080_v39 = vpop.permute.xlu0 %5079  ;;  %v4179_v27 = vmax.f32 %v3377_v45, 0.0  ;;  %v3537_v62 = vadd.f32 %v10561_v42, %v11437_v57 }
 0x3e0   :  { %v5570_v7 = vmul.f32 %v5080_v39, %v4241_v38  ;;  %4977 = vbcast.lane.b32.xlu1 %v10144_v16, 360  ;;  %v4273_v32 = vmax.f32 %v3847_v53, 0.0  ;;  %v11436_v38 = vld [vmem:[#allocation118_spill] sm:$0xff] }
 0x3e1   :  { %v6168_v48 = vsel %vm50_vm1, %v5633_v17, 0.0  ;;  %4713 = vbcast.lane.b32.xlu0 %v10018_v31, 368  ;;  %v4211_v24 = vmax.f32 %v3537_v62, 0.0 }
 0x3e2   :  { %v6169_v0 = vadd.f32 %v6168_v48, %v6167_v28  ;;  %v6032_v8 = vsel %vm50_vm1, %v5570_v7, 0.0  ;;  %v4950_v58 = vpop.permute.xlu1 %4949  ;;  %v3062_v28 = vadd.f32 %v10561_v42, %v11435_v56  ;;  %v11438_v48 = vld [vmem:[#allocation117_spill] sm:$0xff] }
 0x3e3   :  { %v6033_v15 = vadd.f32 %v6032_v8, %v6031_v23  ;;  %v5539_v20 = vmul.f32 %v4950_v58, %v4210_v29  ;;  %v4686_v22 = vpop.permute.xlu0 %4685  ;;  %v4305_v29 = vmax.f32 %v4007_v52, 0.0  ;;  %v11440_v56 = vld [vmem:[#allocation153_spill] sm:$0xff] }
 0x3e4   :  { %v5476_v41 = vmul.f32 %v4686_v22, %v4147_v26  ;;  %4449 = vbcast.lane.b32.xlu1 %v9968_v44, 376  ;;  %v4116_v37 = vmax.f32 %v3062_v28, 0.0 }
 0x3e5   :  { %v5965_v18 = vsel %vm50_vm1, %v5539_v20, 0.0  ;;  %5241 = vbcast.lane.b32.xlu0 %v10190_v47, 352 }
 0x3e6   :  { %v5966_v35 = vadd.f32 %v5965_v18, %v5964_v4  ;;  %v5829_v23 = vsel %vm50_vm1, %v5476_v41, 0.0  ;;  %v4422_v21 = vpop.permute.xlu1 %4421  ;;  %v3692_v4 = vadd.f32 %v10561_v42, %v11436_v38  ;;  %v11439_v41 = vld [vmem:[#allocation28_spill] sm:$0xff] }
 0x3e7   :  { %v5830_v6 = vadd.f32 %v5829_v23, %v5828_v55  ;;  %v5413_v2 = vmul.f32 %v4422_v21, %v4084_v36  ;;  %v5214_v25 = vpop.permute.xlu0 %5213  ;;  %v2907_v36 = vadd.f32 %v10561_v42, %v11439_v41  ;;  %v11445_v41 = vld [vmem:[#allocation115_spill] sm:$0xff] }
 0x3e8   :  { %v5602_v44 = vmul.f32 %v5214_v25, %v4273_v32  ;;  %4847 = vbcast.lane.b32.xlu1 %v10094_v19, 368  ;;  %v4242_v26 = vmax.f32 %v3692_v4, 0.0 }
 0x3e9   :  { %v5693_v12 = vsel %vm50_vm1, %v5413_v2, 0.0  ;;  %4583 = vbcast.lane.b32.xlu0 %v9987_v33, 376 }
 0x3ea   :  { %v5694_v49 = vadd.f32 %v5693_v12, %v5692_v11  ;;  %v6101_v55 = vsel %vm50_vm1, %v5602_v44, 0.0  ;;  %v4820_v61 = vpop.permute.xlu1 %4819  ;;  %v3222_v11 = vadd.f32 %v10561_v42, %v11438_v48  ;;  %v4085_v44 = vmax.f32 %v2907_v36, 0.0  ;;  %v11442_v12 = vld [vmem:[#allocation69_spill] sm:$0xff] }
 0x3eb   :  { %v6102_v17 = vadd.f32 %v6101_v55, %v6100_v40  ;;  %v5508_v39 = vmul.f32 %v4820_v61, %v4179_v27  ;;  %v4556_v7 = vpop.permute.xlu0 %4555  ;;  %v11441_v27 = vld [vmem:[#allocation152_spill] sm:$0xff] }
 0x3ec   :  { %v5445_v3 = vmul.f32 %v4556_v7, %v4116_v37  ;;  %5375 = vbcast.lane.b32.xlu1 %v10262_v50, 352  ;;  %v4148_v18 = vmax.f32 %v3222_v11, 0.0  ;;  %v3382_v52 = vadd.f32 %v10561_v42, %v11441_v27 }
 0x3ed   :  { %v5898_v33 = vsel %vm50_vm1, %v5508_v39, 0.0  ;;  %5111 = vbcast.lane.b32.xlu0 %v10172_v10, 360 }
 0x3ee   :  { %v5899_v51 = vadd.f32 %v5898_v33, %v5897_v54  ;;  %v5762_v40 = vsel %vm50_vm1, %v5445_v3, 0.0  ;;  %v5348_v53 = vpop.permute.xlu1 %5347  ;;  %v3852_v54 = vadd.f32 %v10561_v42, %v11440_v56  ;;  %v4180_v7 = vmax.f32 %v3382_v52, 0.0 }
 0x3ef   :  { %v5763_v8 = vadd.f32 %v5762_v40, %v5761_v43  ;;  %v5634_v58 = vmul.f32 %v5348_v53, %v4305_v29  ;;  %v5084_v20 = vpop.permute.xlu0 %5083  ;;  %v4012_v3 = vadd.f32 %v10561_v42, %v10433_v34  ;;  %v11443_v29 = vld [vmem:[#allocation116_spill] sm:$0xff] }
 0x3f0   :  { %v5571_v22 = vmul.f32 %v5084_v20, %v4242_v26  ;;  %4981 = vbcast.lane.b32.xlu1 %v10144_v16, 368  ;;  %v4274_v37 = vmax.f32 %v3852_v54, 0.0 }
 0x3f1   :  { %v6170_v45 = vsel %vm50_vm1, %v5634_v58, 0.0  ;;  %4717 = vbcast.lane.b32.xlu0 %v10018_v31, 376  ;;  %v11444_v58 = vld [vmem:[#allocation76_spill] sm:$0xff]  ;;  %v4306_v20 = vmax.f32 %v4012_v3, 0.0 }
 0x3f2   :  { %v6171_v28 = vadd.f32 %v6170_v45, %v6169_v0  ;;  %v6034_v43 = vsel %vm50_vm1, %v5571_v22, 0.0  ;;  %v4954_v32 = vpop.permute.xlu1 %4953  ;;  %v3067_v0 = vadd.f32 %v10561_v42, %v11442_v12  ;;  %v3542_v34 = vadd.f32 %v10561_v42, %v11444_v58 }
 0x3f3   :  { %v6035_v23 = vadd.f32 %v6034_v43, %v6033_v15  ;;  %v5540_v21 = vmul.f32 %v4954_v32, %v4211_v24  ;;  %v4690_v2 = vpop.permute.xlu0 %4689  ;;  %v11446_v32 = vld [vmem:[#allocation31_spill] sm:$0xff] }
 0x3f4   :  { %v5477_v25 = vmul.f32 %v4690_v2, %v4148_v18  ;;  %4851 = vbcast.lane.b32.xlu1 %v10094_v19, 376  ;;  %v4117_v62 = vmax.f32 %v3067_v0, 0.0  ;;  %v4212_v2 = vmax.f32 %v3542_v34, 0.0 }
 0x3f5   :  { %v5967_v31 = vsel %vm50_vm1, %v5540_v21, 0.0  ;;  %5245 = vbcast.lane.b32.xlu0 %v10190_v47, 360  ;;  %v2912_v21 = vadd.f32 %v10561_v42, %v11446_v32 }
 0x3f6   :  { %v5968_v38 = vadd.f32 %v5967_v31, %v5966_v35  ;;  %v5831_v15 = vsel %vm50_vm1, %v5477_v25, 0.0  ;;  %v4426_v4 = vpop.permute.xlu1 %4425  ;;  %v3697_v35 = vadd.f32 %v10561_v42, %v11443_v29 }
 0x3f7   :  { %v5832_v55 = vadd.f32 %v5831_v15, %v5830_v6  ;;  %v5414_v61 = vmul.f32 %v4426_v4, %v4085_v44  ;;  %v5218_v39 = vpop.permute.xlu0 %5217  ;;  %v11447_v44 = vld [vmem:[#allocation151_spill] sm:$0xff]  ;;  %v4086_v15 = vmax.f32 %v2912_v21, 0.0  ;;  %v10858_v4 = vld [vmem:[%s11116_s5] ss:$0 sm:$0xff] }
 0x3f8   :  { %v5603_v19 = vmul.f32 %v5218_v39, %v4274_v37  ;;  %5379 = vbcast.lane.b32.xlu1 %v10262_v50, 360  ;;  %v4243_v36 = vmax.f32 %v3697_v35, 0.0 }
 0x3f9   :  { %v5695_v57 = vsel %vm50_vm1, %v5414_v61, 0.0  ;;  %5115 = vbcast.lane.b32.xlu0 %v10172_v10, 368 }
 0x3fa   :  { %v5696_v33 = vadd.f32 %v5695_v57, %v5694_v49  ;;  %v6103_v6 = vsel %vm50_vm1, %v5603_v19, 0.0  ;;  %v4824_v48 = vpop.permute.xlu1 %4823  ;;  %v3227_v49 = vadd.f32 %v10561_v42, %v11445_v41 }
 0x3fb   :  { %v6104_v11 = vadd.f32 %v6103_v6, %v6102_v17  ;;  %v5509_v26 = vmul.f32 %v4824_v48, %v4180_v7  ;;  %v4560_v40 = vpop.permute.xlu0 %4559 }
 0x3fc   :  { %v5446_v53 = vmul.f32 %v4560_v40, %v4117_v62  ;;  %5249 = vbcast.lane.b32.xlu1 %v10190_v47, 368  ;;  %v4149_v25 = vmax.f32 %v3227_v49, 0.0  ;;  %v11450_v40 = vld [vmem:[#allocation122_spill] sm:$0xff] }
 0x3fd   :  { %v5900_v22 = vsel %vm50_vm1, %v5509_v26, 0.0  ;;  %4985 = vbcast.lane.b32.xlu0 %v10144_v16, 376  ;;  %v4017_v26 = vadd.f32 %v10858_v4, %v10428_v59  ;;  %v11451_v49 = vld [vmem:[#allocation74_spill] sm:$0xff] }
 0x3fe   :  { %v5901_v24 = vadd.f32 %v5900_v22, %v5899_v51  ;;  %v5764_v17 = vsel %vm50_vm1, %v5446_v53, 0.0  ;;  %v5352_v45 = vpop.permute.xlu1 %5351  ;;  %v3857_v51 = vadd.f32 %v10561_v42, %v11447_v44  ;;  %v11449_v42 = vld [vmem:[#allocation13_spill] sm:$0xff]  ;;  %v3702_v53 = vadd.f32 %v10858_v4, %v11450_v40 }
 0x3ff   :  { %v5765_v18 = vadd.f32 %v5764_v17, %v5763_v8  ;;  %v5635_v56 = vmul.f32 %v5352_v45, %v4306_v20  ;;  %v5088_v54 = vpop.permute.xlu0 %5087  ;;  %v3547_v59 = vadd.f32 %v10858_v4, %v11451_v49  ;;  %v11452_v45 = vld [vmem:[#allocation121_spill] sm:$0xff] }
 0x400   :  { %v5572_v43 = vmul.f32 %v5088_v54, %v4243_v36  ;;  %5383 = vbcast.lane.b32.xlu1 %v10262_v50, 368  ;;  %v4307_v36 = vmax.f32 %v4017_v26, 0.0 }
 0x401   :  { %v6172_v16 = vsel %vm50_vm1, %v5635_v56, 0.0  ;;  %5119 = vbcast.lane.b32.xlu0 %v10172_v10, 376  ;;  %v11448_v10 = vld [vmem:[#allocation75_spill] sm:$0xff]  ;;  %v4244_v56 = vmax.f32 %v3702_v53, 0.0  ;;  %v4022_v53 = vadd.f32 %v10858_v4, %v10451_v13 }
 0x402   :  { %v6173_v27 = vadd.f32 %v6172_v16, %v6171_v28  ;;  %v6036_v8 = vsel %vm50_vm1, %v5572_v43, 0.0  ;;  %v4958_v52 = vpop.permute.xlu1 %4957  ;;  %v3072_v61 = vadd.f32 %v10858_v4, %v11448_v10  ;;  %v3387_v28 = vadd.f32 %v10858_v4, %v11449_v42 }
 0x403   :  { %v6037_v31 = vadd.f32 %v6036_v8, %v6035_v23  ;;  %v5541_v12 = vmul.f32 %v4958_v52, %v4212_v2  ;;  %v4694_v0 = vpop.permute.xlu0 %4693  ;;  %v7656_v23 = vmov 0.0  }
 0x404   :  { %v5478_v37 = vmul.f32 %v4694_v0, %v4149_v25  ;;  %5387 = vbcast.lane.b32.xlu1 %v10262_v50, 376  ;;  %51 = vst.msk [vmem:[#allocation2] sm:$0xff] %vm50_vm1, %v7656_v23  ;;  %v4275_v50 = vmax.f32 %v3857_v51, 0.0  ;;  %v4118_v6 = vmax.f32 %v3072_v61, 0.0  ;;  %v4181_v48 = vmax.f32 %v3387_v28, 0.0  ;;  %7509 = vmatprep.mubr.msk.f32.mxu1 %vm7657_vm2, %v7656_v23  ;;  %v11453_v25 = vld [vmem:[#allocation30_spill] sm:$0xff] }
 0x405   :  { %v5969_v39 = vsel %vm50_vm1, %v5541_v12, 0.0  ;;  %5253 = vbcast.lane.b32.xlu0 %v10190_v47, 376  ;;  %v2917_v44 = vadd.f32 %v10858_v4, %v11453_v25  ;;  %v4213_v51 = vmax.f32 %v3547_v59, 0.0  ;;  %v11454_v12 = vld [vmem:[#allocation156_spill] sm:$0xff] }
 0x406   :  { %v5970_v19 = vadd.f32 %v5969_v39, %v5968_v38  ;;  %v5833_v7 = vsel %vm50_vm1, %v5478_v37, 0.0  ;;  %v4430_v3 = vpop.permute.xlu1 %4429  ;;  %v3862_v0 = vadd.f32 %v10858_v4, %v11454_v12  ;;  %v11455_v39 = vld [vmem:[#allocation155_spill] sm:$0xff] }
 0x407   :  { %v5834_v57 = vadd.f32 %v5833_v7, %v5832_v55  ;;  %v5415_v62 = vmul.f32 %v4430_v3, %v4086_v15  ;;  %v5222_v29 = vpop.permute.xlu0 %5221  ;;  %v4087_v28 = vmax.f32 %v2917_v44, 0.0  ;;  %v11456_v3 = vld [vmem:[#allocation73_spill] sm:$0xff] }
 0x408   :  { %v5604_v35 = vmul.f32 %v5222_v29, %v4275_v50  ;;  %v3392_v50 = vadd.f32 %v10858_v4, %v11455_v39  ;;  %v4276_v29 = vmax.f32 %v3862_v0, 0.0 }
 0x409   :  { %v5697_v47 = vsel %vm50_vm1, %v5415_v62, 0.0  ;;  %v3077_v62 = vadd.f32 %v10858_v4, %v11456_v3  ;;  %v11462_v3 = vld [vmem:[#allocation43_spill] sm:$0xff] }
 0x40a   :  { %v5698_v58 = vadd.f32 %v5697_v47, %v5696_v33  ;;  %v6105_v38 = vsel %vm50_vm1, %v5604_v35, 0.0  ;;  %v4828_v34 = vpop.permute.xlu1 %4827  ;;  %v3232_v33 = vadd.f32 %v10858_v4, %v11452_v45  ;;  %v4182_v40 = vmax.f32 %v3392_v50, 0.0  ;;  %v11458_v45 = vld [vmem:[#allocation80_spill] sm:$0xff] }
 0x40b   :  { %v6106_v20 = vadd.f32 %v6105_v38, %v6104_v11  ;;  %v5510_v22 = vmul.f32 %v4828_v34, %v4181_v48  ;;  %v4564_v55 = vpop.permute.xlu0 %4563  ;;  %v4119_v34 = vmax.f32 %v3077_v62, 0.0  ;;  %v3397_v62 = vadd.f32 %v10858_v4, %v11462_v3 }
 0x40c   :  { %v5447_v41 = vmul.f32 %v4564_v55, %v4118_v6  ;;  %v4150_v52 = vmax.f32 %v3232_v33, 0.0  ;;  %v3552_v33 = vadd.f32 %v10858_v4, %v11458_v45 }
 0x40d   :  { %v5902_v17 = vsel %vm50_vm1, %v5510_v22, 0.0  ;;  %v11457_v22 = vld [vmem:[#allocation120_spill] sm:$0xff] }
 0x40e   :  { %v5903_v54 = vadd.f32 %v5902_v17, %v5901_v24  ;;  %v5766_v11 = vsel %vm50_vm1, %v5447_v41, 0.0  ;;  %v5356_v43 = vpop.permute.xlu1 %5355  ;;  %v3707_v55 = vadd.f32 %v10858_v4, %v11457_v22  ;;  %v4214_v12 = vmax.f32 %v3552_v33, 0.0 }
 0x40f   :  { %v5767_v32 = vadd.f32 %v5766_v11, %v5765_v18  ;;  %v5636_v21 = vmul.f32 %v5356_v43, %v4307_v36  ;;  %v5092_v2 = vpop.permute.xlu0 %5091  ;;  %v11459_v11 = vld [vmem:[#allocation119_spill] sm:$0xff]  ;;  %v4027_v22 = vadd.f32 %v10858_v4, %v10446_v5 }
 0x410   :  { %v5573_v16 = vmul.f32 %v5092_v2, %v4244_v56  ;;  %v4308_v56 = vmax.f32 %v4022_v53, 0.0  ;;  %v3237_v43 = vadd.f32 %v10858_v4, %v11459_v11 }
 0x411   :  { %v6174_v8 = vsel %vm50_vm1, %v5636_v21, 0.0  ;;  %v4245_v21 = vmax.f32 %v3707_v55, 0.0 }
 0x412   :  { %v6175_v37 = vadd.f32 %v6174_v8, %v6173_v27  ;;  %v6038_v24 = vsel %vm50_vm1, %v5573_v16, 0.0  ;;  %v4962_v15 = vpop.permute.xlu1 %4961  ;;  %v11460_v8 = vld [vmem:[#allocation33_spill] sm:$0xff] }
 0x413   :  { %v6039_v10 = vadd.f32 %v6038_v24, %v6037_v31  ;;  %v5542_v61 = vmul.f32 %v4962_v15, %v4213_v51  ;;  %v4698_v18 = vpop.permute.xlu0 %4697  ;;  %v4151_v24 = vmax.f32 %v3237_v43, 0.0  ;;  %v11461_v15 = vld [vmem:[#allocation154_spill] sm:$0xff]  ;;  %v4309_v43 = vmax.f32 %v4027_v22, 0.0 }
 0x414   :  { %v5479_v42 = vmul.f32 %v4698_v18, %v4150_v52  ;;  %v2922_v52 = vadd.f32 %v10858_v4, %v11460_v8 }
 0x415   :  { %v5971_v7 = vsel %vm50_vm1, %v5542_v61, 0.0  ;;  %v3867_v61 = vadd.f32 %v10858_v4, %v11461_v15 }
 0x416   :  { %v5972_v35 = vadd.f32 %v5971_v7, %v5970_v19  ;;  %v5835_v27 = vsel %vm50_vm1, %v5479_v42, 0.0  ;;  %v4434_v6 = vpop.permute.xlu1 %4433  ;;  %v4088_v7 = vmax.f32 %v2922_v52, 0.0 }
 0x417   :  { %v5836_v48 = vadd.f32 %v5835_v27, %v5834_v57  ;;  %v5416_v26 = vmul.f32 %v4434_v6, %v4087_v28  ;;  %v5226_v31 = vpop.permute.xlu0 %5225  ;;  %v11463_v27 = vld [vmem:[#allocation79_spill] sm:$0xff] }
 0x418   :  { %v5605_v47 = vmul.f32 %v5226_v31, %v4276_v29  ;;  %v3082_v6 = vadd.f32 %v10858_v4, %v11463_v27 }
 0x419   :  { %v5699_v38 = vsel %vm50_vm1, %v5416_v26, 0.0  ;;  %v4277_v26 = vmax.f32 %v3867_v61, 0.0 }
 0x41a   :  { %v5700_v41 = vadd.f32 %v5699_v38, %v5698_v58  ;;  %v6107_v19 = vsel %vm50_vm1, %v5605_v47, 0.0  ;;  %v4832_v49 = vpop.permute.xlu1 %4831 }
 0x41b   :  { %v6108_v59 = vadd.f32 %v6107_v19, %v6106_v20  ;;  %v5511_v36 = vmul.f32 %v4832_v49, %v4182_v40  ;;  %v4568_v57 = vpop.permute.xlu0 %4567  ;;  %v4120_v19 = vmax.f32 %v3082_v6, 0.0  ;;  %v11464_v49 = vld [vmem:[#allocation126_spill] sm:$0xff] }
 0x41c   :  { %v5448_v17 = vmul.f32 %v4568_v57, %v4119_v34  ;;  %v4183_v34 = vmax.f32 %v3397_v62, 0.0 }
 0x41d   :  { %v5904_v13 = vsel %vm50_vm1, %v5511_v36, 0.0  ;;  %v3712_v36 = vadd.f32 %v10858_v4, %v11464_v49 }
 0x41e   :  { %v5905_v2 = vadd.f32 %v5904_v13, %v5903_v54  ;;  %v5768_v58 = vsel %vm50_vm1, %v5448_v17, 0.0  ;;  %v5360_v16 = vpop.permute.xlu1 %5359  ;;  %v11465_v13 = vld [vmem:[#allocation78_spill] sm:$0xff] }
 0x41f   :  { %v5769_v25 = vadd.f32 %v5768_v58, %v5767_v32  ;;  %v5637_v44 = vmul.f32 %v5360_v16, %v4308_v56  ;;  %v5096_v20 = vpop.permute.xlu0 %5095  ;;  %v3557_v11 = vadd.f32 %v10858_v4, %v11465_v13  ;;  %v4246_v16 = vmax.f32 %v3712_v36, 0.0 }
 0x420   :  { %v5574_v51 = vmul.f32 %v5096_v20, %v4245_v21  ;;  %v11466_v21 = vld [vmem:[#allocation125_spill] sm:$0xff] }
 0x421   :  { %v6176_v0 = vsel %vm50_vm1, %v5637_v44, 0.0  ;;  %v3242_v58 = vadd.f32 %v10858_v4, %v11466_v21 }
 0x422   :  { %v6177_v18 = vadd.f32 %v6176_v0, %v6175_v37  ;;  %v6040_v54 = vsel %vm50_vm1, %v5574_v51, 0.0  ;;  %v4966_v42 = vpop.permute.xlu1 %4965 }
 0x423   :  { %v6041_v28 = vadd.f32 %v6040_v54, %v6039_v10  ;;  %v5543_v39 = vmul.f32 %v4966_v42, %v4214_v12  ;;  %v4702_v32 = vpop.permute.xlu0 %4701  ;;  %v11467_v12 = vld [vmem:[#allocation32_spill] sm:$0xff]  ;;  %v4152_v61 = vmax.f32 %v3242_v58, 0.0  ;;  %v11468_v54 = vld [vmem:[#allocation159_spill] sm:$0xff] }
 0x424   :  { %v5480_v50 = vmul.f32 %v4702_v32, %v4151_v24  ;;  %v2927_v0 = vadd.f32 %v10858_v4, %v11467_v12  ;;  %v4215_v24 = vmax.f32 %v3557_v11, 0.0  ;;  %v3872_v42 = vadd.f32 %v10858_v4, %v11468_v54  ;;  %v11473_v58 = vld [vmem:[#allocation123_spill] sm:$0xff] }
 0x425   :  { %v5973_v29 = vsel %vm50_vm1, %v5543_v39, 0.0 }
 0x426   :  { %v5974_v31 = vadd.f32 %v5973_v29, %v5972_v35  ;;  %v5837_v37 = vsel %vm50_vm1, %v5480_v50, 0.0  ;;  %v4438_v47 = vpop.permute.xlu1 %4437  ;;  %v4089_v62 = vmax.f32 %v2927_v0, 0.0  ;;  %v11469_v29 = vld [vmem:[#allocation158_spill] sm:$0xff]  ;;  %v11474_v0 = vld [vmem:[#allocation35_spill] sm:$0xff] }
 0x427   :  { %v5838_v40 = vadd.f32 %v5837_v37, %v5836_v48  ;;  %v5417_v53 = vmul.f32 %v4438_v47, %v4088_v7  ;;  %v5230_v10 = vpop.permute.xlu0 %5229  ;;  %v3402_v27 = vadd.f32 %v10858_v4, %v11469_v29  ;;  %v4278_v47 = vmax.f32 %v3872_v42, 0.0  ;;  %v11475_v42 = vld [vmem:[#allocation157_spill] sm:$0xff] }
 0x428   :  { %v5606_v38 = vmul.f32 %v5230_v10, %v4277_v26  ;;  %v11470_v26 = vld [vmem:[#allocation77_spill] sm:$0xff] }
 0x429   :  { %v5701_v55 = vsel %vm50_vm1, %v5417_v53, 0.0  ;;  %v3087_v37 = vadd.f32 %v10858_v4, %v11470_v26 }
 0x42a   :  { %v5702_v57 = vadd.f32 %v5701_v55, %v5700_v41  ;;  %v6109_v35 = vsel %vm50_vm1, %v5606_v38, 0.0  ;;  %v4836_v17 = vpop.permute.xlu1 %4835  ;;  %v4184_v55 = vmax.f32 %v3402_v27, 0.0  ;;  %v11476_v27 = vld [vmem:[#allocation12_spill] sm:$0xff] }
 0x42b   :  { %v6110_v45 = vadd.f32 %v6109_v35, %v6108_v59  ;;  %v5512_v33 = vmul.f32 %v4836_v17, %v4183_v34  ;;  %v4572_v48 = vpop.permute.xlu0 %4571  ;;  %v4121_v36 = vmax.f32 %v3087_v37, 0.0  ;;  %v11471_v35 = vld [vmem:[#allocation124_spill] sm:$0xff]  ;;  %v11477_v37 = vld [vmem:[#allocation83_spill] sm:$0xff] }
 0x42c   :  { %v5449_v56 = vmul.f32 %v4572_v48, %v4120_v19  ;;  %v4032_v19 = vadd.f32 %v10858_v4, %v10465_v9  ;;  %v3717_v17 = vadd.f32 %v10858_v4, %v11471_v35 }
 0x42d   :  { %v5906_v5 = vsel %vm50_vm1, %v5512_v33, 0.0 }
 0x42e   :  { %v5907_v44 = vadd.f32 %v5906_v5, %v5905_v2  ;;  %v5770_v41 = vsel %vm50_vm1, %v5449_v56, 0.0  ;;  %v5364_v20 = vpop.permute.xlu1 %5363  ;;  %v4310_v21 = vmax.f32 %v4032_v19, 0.0 }
 0x42f   :  { %v5771_v51 = vadd.f32 %v5770_v41, %v5769_v25  ;;  %v5638_v8 = vmul.f32 %v5364_v20, %v4309_v43  ;;  %v5100_v59 = vpop.permute.xlu0 %5099  ;;  %v11472_v43 = vld [vmem:[#allocation84_spill] sm:$0xff]  ;;  %v4247_v41 = vmax.f32 %v3717_v17, 0.0  ;;  %v11478_v17 = vld [vmem:[#allocation130_spill] sm:$0xff] }
 0x430   :  { %v5575_v52 = vmul.f32 %v5100_v59, %v4246_v16  ;;  %v3562_v5 = vadd.f32 %v10858_v4, %v11472_v43  ;;  %v3247_v16 = vadd.f32 %v10858_v4, %v11473_v58  ;;  %v11480_v58 = vld [vmem:[#allocation129_spill] sm:$0xff] }
 0x431   :  { %v6178_v15 = vsel %vm50_vm1, %v5638_v8, 0.0 }
 0x432   :  { %v6179_v39 = vadd.f32 %v6178_v15, %v6177_v18  ;;  %v6042_v2 = vsel %vm50_vm1, %v5575_v52, 0.0  ;;  %v4970_v32 = vpop.permute.xlu1 %4969  ;;  %v4216_v15 = vmax.f32 %v3562_v5, 0.0  ;;  %v4153_v54 = vmax.f32 %v3247_v16, 0.0  ;;  %v11479_v5 = vld [vmem:[#allocation82_spill] sm:$0xff] }
 0x433   :  { %v6043_v50 = vadd.f32 %v6042_v2, %v6041_v28  ;;  %v5544_v7 = vmul.f32 %v4970_v32, %v4215_v24  ;;  %v4706_v25 = vpop.permute.xlu0 %4705  ;;  %v2932_v24 = vadd.f32 %v10858_v4, %v11474_v0  ;;  %v3877_v2 = vadd.f32 %v10858_v4, %v11475_v42  ;;  %v11481_v0 = vld [vmem:[#allocation34_spill] sm:$0xff]  ;;  %v11482_v42 = vld [vmem:[#allocation15_spill] sm:$0xff] }
 0x434   :  { %v5481_v3 = vmul.f32 %v4706_v25, %v4152_v61  ;;  %v3252_v16 = vadd.f32 %v10858_v4, %v11480_v58 }
 0x435   :  { %v5975_v6 = vsel %vm50_vm1, %v5544_v7, 0.0  ;;  %v4090_v29 = vmax.f32 %v2932_v24, 0.0  ;;  %v2937_v24 = vadd.f32 %v10858_v4, %v11481_v0 }
 0x436   :  { %v5976_v53 = vadd.f32 %v5975_v6, %v5974_v31  ;;  %v5839_v18 = vsel %vm50_vm1, %v5481_v3, 0.0  ;;  %v4442_v10 = vpop.permute.xlu1 %4441  ;;  %v3407_v6 = vadd.f32 %v10858_v4, %v11476_v27  ;;  %v11483_v27 = vld [vmem:[#allocation14_spill] sm:$0xff] }
 0x437   :  { %v5840_v38 = vadd.f32 %v5839_v18, %v5838_v40  ;;  %v5418_v34 = vmul.f32 %v4442_v10, %v4089_v62  ;;  %v5234_v28 = vpop.permute.xlu0 %5233  ;;  %v4279_v18 = vmax.f32 %v3877_v2, 0.0  ;;  %v3882_v2 = vadd.f32 %v10858_v4, %v11482_v42 }
 0x438   :  { %v5607_v22 = vmul.f32 %v5234_v28, %v4278_v47  ;;  %v3092_v47 = vadd.f32 %v10858_v4, %v11477_v37  ;;  %v4185_v19 = vmax.f32 %v3407_v6, 0.0  ;;  %v3412_v6 = vadd.f32 %v10858_v4, %v11483_v27  ;;  %v11484_v37 = vld [vmem:[#allocation81_spill] sm:$0xff] }
 0x439   :  { %v5703_v49 = vsel %vm50_vm1, %v5418_v34, 0.0 }
 0x43a   :  { %v5704_v33 = vadd.f32 %v5703_v49, %v5702_v57  ;;  %v6111_v31 = vsel %vm50_vm1, %v5607_v22, 0.0  ;;  %v4840_v48 = vpop.permute.xlu1 %4839  ;;  %v4037_v49 = vadd.f32 %v10858_v4, %v10462_v14  ;;  %v4122_v35 = vmax.f32 %v3092_v47, 0.0 }
 0x43b   :  { %v6112_v56 = vadd.f32 %v6111_v31, %v6110_v45  ;;  %v5513_v13 = vmul.f32 %v4840_v48, %v4184_v55  ;;  %v4576_v40 = vpop.permute.xlu0 %4575  ;;  %v3722_v31 = vadd.f32 %v10858_v4, %v11478_v17  ;;  %v3097_v47 = vadd.f32 %v10858_v4, %v11484_v37  ;;  %v11485_v17 = vld [vmem:[#allocation128_spill] sm:$0xff]  ;;  %v11490_v37 = vld [vmem:[#allocation7_spill] sm:$0xff] }
 0x43c   :  { %v5450_v11 = vmul.f32 %v4576_v40, %v4121_v36 }
 0x43d   :  { %v5908_v9 = vsel %vm50_vm1, %v5513_v13, 0.0 }
 0x43e   :  { %v5909_v20 = vadd.f32 %v5908_v9, %v5907_v44  ;;  %v5772_v57 = vsel %vm50_vm1, %v5450_v11, 0.0  ;;  %v5368_v8 = vpop.permute.xlu1 %5367  ;;  %v4311_v9 = vmax.f32 %v4037_v49, 0.0  ;;  %v4042_v49 = vadd.f32 %v10858_v4, %v10479_v63  ;;  %v11487_v63 = vld [vmem:[#allocation127_spill] sm:$0xff] }
 0x43f   :  { %v5773_v59 = vadd.f32 %v5772_v57, %v5771_v51  ;;  %v5639_v52 = vmul.f32 %v5368_v8, %v4310_v21  ;;  %v5104_v45 = vpop.permute.xlu0 %5103  ;;  %v3567_v21 = vadd.f32 %v10858_v4, %v11479_v5 }
 0x440   :  { %v5576_v12 = vmul.f32 %v5104_v45, %v4247_v41  ;;  %v4248_v41 = vmax.f32 %v3722_v31, 0.0  ;;  %v3727_v31 = vadd.f32 %v10858_v4, %v11485_v17  ;;  %v4312_v58 = vmax.f32 %v4042_v49, 0.0 }
 0x441   :  { %v6180_v61 = vsel %vm50_vm1, %v5639_v52, 0.0 }
 0x442   :  { %v6181_v32 = vadd.f32 %v6180_v61, %v6179_v39  ;;  %v6044_v44 = vsel %vm50_vm1, %v5576_v12, 0.0  ;;  %v4974_v7 = vpop.permute.xlu1 %4973 }
 0x443   :  { %v6045_v25 = vadd.f32 %v6044_v44, %v6043_v50  ;;  %v5545_v3 = vmul.f32 %v4974_v7, %v4216_v15  ;;  %v4710_v51 = vpop.permute.xlu0 %4709  ;;  %v4217_v15 = vmax.f32 %v3567_v21, 0.0 }
 0x444   :  { %v5482_v62 = vmul.f32 %v4710_v51, %v4153_v54  ;;  %v4154_v54 = vmax.f32 %v3252_v16, 0.0 }
 0x445   :  { %v5977_v26 = vsel %vm50_vm1, %v5545_v3, 0.0 }
 0x446   :  { %v5978_v10 = vadd.f32 %v5977_v26, %v5976_v53  ;;  %v5841_v39 = vsel %vm50_vm1, %v5482_v62, 0.0  ;;  %v4446_v34 = vpop.permute.xlu1 %4445 }
 0x447   :  { %v5842_v28 = vadd.f32 %v5841_v39, %v5840_v38  ;;  %v5419_v22 = vmul.f32 %v4446_v34, %v4090_v29  ;;  %v5238_v50 = vpop.permute.xlu0 %5237  ;;  %v4091_v29 = vmax.f32 %v2937_v24, 0.0 }
 0x448   :  { %v5608_v55 = vmul.f32 %v5238_v50, %v4279_v18  ;;  %v4280_v18 = vmax.f32 %v3882_v2, 0.0 }
 0x449   :  { %v5705_v36 = vsel %vm50_vm1, %v5419_v22, 0.0 }
 0x44a   :  { %v5706_v48 = vadd.f32 %v5705_v36, %v5704_v33  ;;  %v6113_v53 = vsel %vm50_vm1, %v5608_v55, 0.0  ;;  %v4844_v13 = vpop.permute.xlu1 %4843 }
 0x44b   :  { %v6114_v40 = vadd.f32 %v6113_v53, %v6112_v56  ;;  %v5514_v11 = vmul.f32 %v4844_v13, %v4185_v19  ;;  %v4580_v38 = vpop.permute.xlu0 %4579  ;;  %v4186_v19 = vmax.f32 %v3412_v6, 0.0 }
 0x44c   :  { %v5451_v43 = vmul.f32 %v4580_v38, %v4122_v35  ;;  %v4123_v35 = vmax.f32 %v3097_v47, 0.0  ;;  %v3732_v47 = vadd.f32 %v10858_v4, %v11490_v37 }
 0x44d   :  { %v5910_v14 = vsel %vm50_vm1, %v5514_v11, 0.0 }
 0x44e   :  { %v5911_v57 = vadd.f32 %v5910_v14, %v5909_v20  ;;  %v5774_v33 = vsel %vm50_vm1, %v5451_v43, 0.0  ;;  %v5372_v8 = vpop.permute.xlu1 %5371  ;;  %v11486_v43 = vld [vmem:[#allocation86_spill] sm:$0xff]  ;;  %v3257_v14 = vadd.f32 %v10858_v4, %v11487_v63 }
 0x44f   :  { %v5775_v52 = vadd.f32 %v5774_v33, %v5773_v59  ;;  %v5640_v45 = vmul.f32 %v5372_v8, %v4311_v9  ;;  %v5108_v56 = vpop.permute.xlu0 %5107  ;;  %v3572_v5 = vadd.f32 %v10858_v4, %v11486_v43 }
 0x450   :  { %v5577_v12 = vmul.f32 %v5108_v56, %v4248_v41  ;;  %v4249_v41 = vmax.f32 %v3727_v31, 0.0 }
 0x451   :  { %v6182_v61 = vsel %vm50_vm1, %v5640_v45, 0.0  ;;  %v4218_v0 = vmax.f32 %v3572_v5, 0.0 }
 0x452   :  { %v6183_v44 = vadd.f32 %v6182_v61, %v6181_v32  ;;  %v6046_v20 = vsel %vm50_vm1, %v5577_v12, 0.0  ;;  %v4978_v7 = vpop.permute.xlu1 %4977  ;;  %v4155_v61 = vmax.f32 %v3257_v14, 0.0 }
 0x453   :  { %v6047_v3 = vadd.f32 %v6046_v20, %v6045_v25  ;;  %v5546_v51 = vmul.f32 %v4978_v7, %v4217_v15  ;;  %v4714_v59 = vpop.permute.xlu0 %4713  ;;  %v11489_v7 = vld [vmem:[#allocation160_spill] sm:$0xff] }
 0x454   :  { %v5483_v62 = vmul.f32 %v4714_v59, %v4154_v54  ;;  %v11488_v54 = vld [vmem:[#allocation42_spill] sm:$0xff] }
 0x455   :  { %v5979_v26 = vsel %vm50_vm1, %v5546_v51, 0.0  ;;  %v3417_v42 = vadd.f32 %v10858_v4, %v11488_v54  ;;  %v3887_v51 = vadd.f32 %v10858_v4, %v11489_v7 }
 0x456   :  { %v5980_v39 = vadd.f32 %v5979_v26, %v5978_v10  ;;  %v5843_v32 = vsel %vm50_vm1, %v5483_v62, 0.0  ;;  %v4450_v34 = vpop.permute.xlu1 %4449 }
 0x457   :  { %v5844_v22 = vadd.f32 %v5843_v32, %v5842_v28  ;;  %v5420_v50 = vmul.f32 %v4450_v34, %v4091_v29  ;;  %v5242_v25 = vpop.permute.xlu0 %5241  ;;  %v4187_v32 = vmax.f32 %v3417_v42, 0.0  ;;  %v4047_v34 = vadd.f32 %v10858_v4, %v10476_v1 }
 0x458   :  { %v5609_v55 = vmul.f32 %v5242_v25, %v4280_v18 }
 0x459   :  { %v5707_v36 = vsel %vm50_vm1, %v5420_v50, 0.0  ;;  %v4313_v43 = vmax.f32 %v4047_v34, 0.0 }
 0x45a   :  { %v5708_v53 = vadd.f32 %v5707_v36, %v5706_v48  ;;  %v6115_v10 = vsel %vm50_vm1, %v5609_v55, 0.0  ;;  %v4848_v13 = vpop.permute.xlu1 %4847  ;;  %v4281_v55 = vmax.f32 %v3887_v51, 0.0 }
 0x45b   :  { %v10997_v11 = vadd.f32 %v6115_v10, %v6114_v40  ;;  %v5515_v28 = vmul.f32 %v4848_v13, %v4186_v19  ;;  %v4584_v38 = vpop.permute.xlu0 %4583  ;;  %v4250_v13 = vmax.f32 %v3732_v47, 0.0 }
 0x45c   :  { %v5709_v21 = vrot.slane %v5708_v53, 4  ;;  %v5452_v9 = vmul.f32 %v4584_v38, %v4123_v35 }
 0x45d   :  { %v5912_v16 = vsel %vm50_vm1, %v5515_v28, 0.0  ;;  %v11492_v28 = vld [vmem:[#allocation44_spill] sm:$0xff] }
 0x45e   :  { %v5710_v48 = vadd.f32 %v5709_v21, %v5708_v53  ;;  %v5913_v33 = vadd.f32 %v5912_v16, %v5911_v57  ;;  %v5776_v8 = vsel %vm50_vm1, %v5452_v9, 0.0  ;;  %v5376_v40 = vpop.permute.xlu1 %5375  ;;  %v11491_v53 = vld [vmem:[#allocation85_spill] sm:$0xff]  ;;  %v3892_v1 = vadd.f32 %v10858_v4, %v11492_v28 }
 0x45f   :  { %v5777_v45 = vadd.f32 %v5776_v8, %v5775_v52  ;;  %v5641_v56 = vmul.f32 %v5376_v40, %v4312_v58  ;;  %v5112_v12 = vpop.permute.xlu0 %5111  ;;  %v3577_v10 = vadd.f32 %v10858_v4, %v11491_v53  ;;  %v11493_v40 = vld [vmem:[#allocation37_spill] sm:$0xff] }
 0x460   :  { %v5711_v24 = vrot.slane %v5710_v48, 2  ;;  %v5578_v15 = vmul.f32 %v5112_v12, %v4249_v41 }
 0x461   :  { %v5778_v2 = vrot.slane %v5777_v45, 4  ;;  %v6184_v20 = vsel %vm50_vm1, %v5641_v56, 0.0  ;;  %v4282_v56 = vmax.f32 %v3892_v1, 0.0  ;;  %v4219_v54 = vmax.f32 %v3577_v10, 0.0 }
 0x462   :  { %v5712_v57 = vadd.f32 %v5711_v24, %v5710_v48  ;;  %v6185_v59 = vadd.f32 %v6184_v20, %v6183_v44  ;;  %v6048_v62 = vsel %vm50_vm1, %v5578_v15, 0.0  ;;  %v4982_v52 = vpop.permute.xlu1 %4981  ;;  %v4052_v24 = vadd.f32 %v10858_v4, %v10493_v30 }
 0x463   :  { %v5779_v29 = vadd.f32 %v5778_v2, %v5777_v45  ;;  %v6049_v27 = vadd.f32 %v6048_v62, %v6047_v3  ;;  %v5547_v6 = vmul.f32 %v4982_v52, %v4218_v0  ;;  %v4718_v26 = vpop.permute.xlu0 %4717  ;;  %v3737_v45 = vadd.f32 %v10858_v4, %v11493_v40 }
 0x464   :  { %v5484_v18 = vmul.f32 %v4718_v26, %v4155_v61  ;;  %v5713_v44 = vrot.slane %v5712_v57, 1  ;;  %v11494_v26 = vld [vmem:[#allocation17_spill] sm:$0xff]  ;;  %v4314_v47 = vmax.f32 %v4052_v24, 0.0 }
 0x465   :  { %v5780_v50 = vrot.slane %v5779_v29, 2  ;;  %v5981_v25 = vsel %vm50_vm1, %v5547_v6, 0.0  ;;  %v4251_v52 = vmax.f32 %v3737_v45, 0.0  ;;  %v3897_v37 = vadd.f32 %v10858_v4, %v11494_v26  ;;  %v6310_v26 = vld [vmem:[%s11118_s8] sm:$0xff] }
 0x466   :  { %v5982_v19 = vadd.f32 %v5981_v25, %v5980_v39  ;;  %v5845_v49 = vsel %vm50_vm1, %v5484_v18, 0.0  ;;  %v4852_v36 = vpop.permute.xlu1 %4851  ;;  %v5714_v9 = vadd.f32 %v5713_v44, %v5712_v57 }
 0x467   :  { %v5781_v3 = vadd.f32 %v5780_v50, %v5779_v29  ;;  %v5846_v35 = vadd.f32 %v5845_v49, %v5844_v22  ;;  %v5516_v17 = vmul.f32 %v4852_v36, %v4187_v32  ;;  %v5246_v31 = vpop.permute.xlu0 %5245  ;;  %v4057_v29 = vadd.f32 %v10858_v4, %v10490_v46 }
 0x468   :  { %v5610_v38 = vmul.f32 %v5246_v31, %v4281_v55  ;;  %v4283_v31 = vmax.f32 %v3897_v37, 0.0  ;;  %v6311_v37 = vld [vmem:[%s11118_s8 + $0x8] sm:$0xff] }
 0x469   :  { %v5782_v5 = vrot.slane %v5781_v3, 1  ;;  %v5847_v21 = vrot.slane %v5846_v35, 4  ;;  %v5914_v39 = vsel %vm50_vm1, %v5516_v17, 0.0  ;;  %v4315_v46 = vmax.f32 %v4057_v29, 0.0 }
 0x46a   :  { %v5915_v63 = vadd.f32 %v5914_v39, %v5913_v33  ;;  %v6117_v22 = vsel %vm50_vm1, %v5610_v38, 0.0  ;;  %v5380_v14 = vpop.permute.xlu1 %5379 }
 0x46b   :  { %v5783_v58 = vadd.f32 %v5782_v5, %v5781_v3  ;;  %v5848_v16 = vadd.f32 %v5847_v21, %v5846_v35  ;;  %v6118_v41 = vadd.f32 %v6117_v22, %v10997_v11  ;;  %v5642_v48 = vmul.f32 %v5380_v14, %v4313_v43  ;;  %v5116_v8 = vpop.permute.xlu0 %5115 }
 0x46c   :  { %v5916_v12 = vrot.slane %v5915_v63, 4  ;;  %v5579_v0 = vmul.f32 %v5116_v8, %v4250_v13 }
 0x46d   :  { %v6207_v15 = vsel %vm6206_vm3, %v5783_v58, %v5714_v9  ;;  %v5849_v33 = vrot.slane %v5848_v16, 2  ;;  %v6186_v61 = vsel %vm50_vm1, %v5642_v48, 0.0 }
 0x46e   :  { %v5917_v42 = vadd.f32 %v5916_v12, %v5915_v63  ;;  %v6187_v2 = vadd.f32 %v6186_v61, %v6185_v59  ;;  %v6050_v11 = vsel %vm50_vm1, %v5579_v0, 0.0  ;;  %v5250_v20 = vpop.permute.xlu1 %5249 }
 0x46f   :  { %v5850_v7 = vadd.f32 %v5849_v33, %v5848_v16  ;;  %v6051_v51 = vadd.f32 %v6050_v11, %v6049_v27  ;;  %v5611_v57 = vmul.f32 %v5250_v20, %v4282_v56  ;;  %v4986_v62 = vpop.permute.xlu0 %4985 }
 0x470   :  { %v5918_v6 = vrot.slane %v5917_v42, 2  ;;  %v5548_v30 = vmul.f32 %v4986_v62, %v4219_v54 }
 0x471   :  { %v5851_v18 = vrot.slane %v5850_v7, 1  ;;  %v6119_v59 = vsel %vm50_vm1, %v5611_v57, 0.0 }
 0x472   :  { %v5919_v32 = vadd.f32 %v5918_v6, %v5917_v42  ;;  %v6120_v34 = vadd.f32 %v6119_v59, %v6118_v41  ;;  %v5983_v27 = vsel %vm50_vm1, %v5548_v30, 0.0  ;;  %v5384_v50 = vpop.permute.xlu1 %5383  ;;  %v6313_v59 = vld [vmem:[%s11118_s8 + $0x18] sm:$0xff] }
 0x473   :  { %v5852_v25 = vadd.f32 %v5851_v18, %v5850_v7  ;;  %v5984_v55 = vadd.f32 %v5983_v27, %v5982_v19  ;;  %v5643_v44 = vmul.f32 %v5384_v50, %v4314_v47  ;;  %v5120_v49 = vpop.permute.xlu0 %5119  ;;  %v7559_v47 = vpack.c.bf16 %v6311_v37, %v6310_v26  ;;  %v6312_v18 = vld [vmem:[%s11118_s8 + $0x10] sm:$0xff]  ;;  %v6314_v27 = vld [vmem:[%s11118_s8 + $0x20] sm:$0xff]  ;;  %v6315_v50 = vld [vmem:[%s11118_s8 + $0x28] sm:$0xff] }
 0x474   :  { %v5920_v36 = vrot.slane %v5919_v32, 1  ;;  %v5580_v3 = vmul.f32 %v5120_v49, %v4251_v52  ;;  %v4316_v52 = vld [vmem:[#allocation2] sm:$0xff] }
 0x475   :  { %v6209_v35 = vsel %vm6208_vm4, %v5852_v25, %v6207_v15  ;;  %v5985_v4 = vrot.slane %v5984_v55, 4  ;;  %v6188_v17 = vsel %vm50_vm1, %v5643_v44, 0.0  ;;  %v7565_v25 = vpack.c.bf16 %v6315_v50, %v6314_v27  ;;  %v6317_v44 = vld [vmem:[%s11118_s8 + $0x38] sm:$0xff] }
 0x476   :  { %v5921_v53 = vadd.f32 %v5920_v36, %v5919_v32  ;;  %v6189_v10 = vadd.f32 %v6188_v17, %v6187_v2  ;;  %v6052_v13 = vsel %vm50_vm1, %v5580_v3, 0.0  ;;  %v5388_v28 = vpop.permute.xlu1 %5387  ;;  %v6400_v17 = vld [vmem:[%s11120_s10] sm:$0xff] }
 0x477   :  { %v5986_v1 = vadd.f32 %v5985_v4, %v5984_v55  ;;  %v6053_v38 = vadd.f32 %v6052_v13, %v6051_v51  ;;  %v5644_v43 = vmul.f32 %v5388_v28, %v4315_v46  ;;  %v5254_v19 = vpop.permute.xlu0 %5253  ;;  %v6316_v55 = vld [vmem:[%s11118_s8 + $0x30] sm:$0xff]  ;;  %v6827_v46 = vld [vmem:[%s11119_s7] ss:$0 sm:$0xff] }
 0x478   :  { %v6211_v5 = vsel %vm6210_vm5, %v5921_v53, %v6209_v35  ;;  %v5612_v21 = vmul.f32 %v5254_v19, %v4283_v31  ;;  %v7568_v49 = vpack.c.bf16 %v6317_v44, %v6316_v55  ;;  %v6483_v31 = vld [vmem:[%s11121_s12] sm:$0xff]  ;;  %v6484_v53 = vld [vmem:[%s11121_s12 + $0x8] sm:$0xff]  ;;  %v6486_v19 = vld [vmem:[%s11121_s12 + $0x18] sm:$0xff] }
 0x479   :  { %v5987_v39 = vrot.slane %v5986_v1, 2  ;;  %v6054_v9 = vrot.slane %v6053_v38, 4  ;;  %v6190_v63 = vsel %vm50_vm1, %v5644_v43, 0.0  ;;  %v7571_v28 = vpack.c.bf16 %v6484_v53, %v6483_v31  ;;  %v6485_v43 = vld [vmem:[%s11121_s12 + $0x10] sm:$0xff] }
 0x47a   :  { %v6191_v22 = vadd.f32 %v6190_v63, %v6189_v10  ;;  %v6121_v14 = vsel %vm50_vm1, %v5612_v21, 0.0  ;;  %v6829_v10 = vld [vmem:[%s11122_s9] ss:$0 sm:$0xff] }
 0x47b   :  { %v5988_v58 = vadd.f32 %v5987_v39, %v5986_v1  ;;  %v6055_v16 = vadd.f32 %v6054_v9, %v6053_v38  ;;  %v6122_v41 = vadd.f32 %v6121_v14, %v6120_v34  ;;  %v7562_v34 = vpack.c.bf16 %v6313_v59, %v6312_v18  ;;  %v6831_v21 = vld [vmem:[%s11124_s11] ss:$0 sm:$0xff] }
 0x47c   :  { %v6192_v48 = vrot.slane %v6191_v22, 4 }
 0x47d   :  { %v5989_v8 = vrot.slane %v5988_v58, 1  ;;  %v6056_v40 = vrot.slane %v6055_v16, 2  ;;  %v6123_v45 = vrot.slane %v6122_v41, 4 }
 0x47e   :  { %v6193_v56 = vadd.f32 %v6192_v48, %v6191_v22 }
 0x47f   :  { %v5990_v12 = vadd.f32 %v5989_v8, %v5988_v58  ;;  %v6057_v0 = vadd.f32 %v6056_v40, %v6055_v16  ;;  %v6124_v24 = vadd.f32 %v6123_v45, %v6122_v41 }
 0x480   :  { %v6194_v15 = vrot.slane %v6193_v56, 2 }
 0x481   :  { %v6213_v33 = vsel %vm6212_vm6, %v5990_v12, %v6211_v5  ;;  %v6058_v61 = vrot.slane %v6057_v0, 1  ;;  %v6125_v54 = vrot.slane %v6124_v24, 2  ;;  %v7574_v5 = vpack.c.bf16 %v6486_v19, %v6485_v43 }
 0x482   :  { %v6195_v42 = vadd.f32 %v6194_v15, %v6193_v56 }
 0x483   :  { %v6059_v2 = vadd.f32 %v6058_v61, %v6057_v0  ;;  %v6126_v11 = vadd.f32 %v6125_v54, %v6124_v24 }
 0x484   :  { %v6196_v20 = vrot.slane %v6195_v42, 1 }
 0x485   :  { %v6215_v7 = vsel %vm6214_vm7, %v6059_v2, %v6213_v33  ;;  %v6127_v51 = vrot.slane %v6126_v11, 1 }
 0x486   :  { %v6197_v57 = vadd.f32 %v6196_v20, %v6195_v42 }
 0x487   :  { %v6128_v62 = vadd.f32 %v6127_v51, %v6126_v11 }
 0x489   :  { %v6217_v29 = vsel %vm6216_vm8, %v6128_v62, %v6215_v7 }
 0x48a   :  { %v6219_v6 = vsel %vm6218_vm9, %v6197_v57, %v6217_v29 }
 0x48b   :  { %v6221_v30 = vadd.f32 %v6219_v6, %v4316_v52 }
 0x48d   :  { %6222 = vst.msk [vmem:[#allocation2] sm:$0xff] %vm50_vm1, %v6221_v30 }
 0x494   :  { %v6226_v32 = vld [vmem:[#allocation2] sm:$0xff] }
 0x495   :  { %7510 = vmatmul.mubr.msk.f32.vlgmr.msra.gmra.mrb[120].mxu1 %vm50_vm1, %v6226_v32 }
 0x496   :  { %7560 = vmatpush3.bf16.msra.mxu1 %v7559_v47  ;;  %7528 = vmatprep.mubr.msk.f32.mxu1 %vm7657_vm2, %v7656_v23 }
 0x497   :  { %7561 = vmatprep.subr.bf16.mxu1 %v7655_v60 }
 0x49a   :  { %7563 = vmatpush3.bf16.msra.mxu1 %v7562_v34 }
 0x49b   :  { %7564 = vmatprep.subr.bf16.mxu1 %v7655_v60 }
 0x49e   :  { %7566 = vmatpush3.bf16.msra.mxu1 %v7565_v25 }
 0x49f   :  { %7567 = vmatprep.subr.bf16.mxu1 %v7655_v60 }
 0x4a2   :  { %7569 = vmatpush3.bf16.msra.mxu1 %v7568_v49 }
 0x4a3   :  { %7531 = vmatprep.subr.mxu1 %v7656_v23 }
 0x568   :  { %v6305_v36 = vpop.f32.mrb[120].mxu1 }
 0x569   :  { %v6306_v3 = vadd.f32 %v6827_v46, %v6305_v36  ;;  %v7511_v35 = vpop.f32.mrb[121].mxu1 }
 0x56b   :  { %v6309_v4 = vmax.f32 %v6306_v3, 0.0 }
 0x56d   :  { %7529 = vmatmul.mubr.msk.f32.vlgmr.msra.gmra.mrb[122].mxu1 %vm6325_vm10, %v6309_v4 }
 0x56e   :  { %7532 = vmatpush3.msra.mxu1 %v6400_v17  ;;  %7533 = vmatprep.mubr.msk.f32.mxu1 %vm7657_vm2, %v7656_v23 }
 0x56f   :  { %7570 = vmatprep.subr.bf16.mxu1 %v7655_v60 }
 0x640   :  { %v6395_v13 = vpop.f32.mrb[122].mxu1 }
 0x641   :  { %v6396_v1 = vadd.f32 %v6829_v10, %v6395_v13  ;;  %v7530_v38 = vpop.f32.mrb[123].mxu1 }
 0x643   :  { %6399 = vst.msk [vmem:[%s11123_s13] sm:$0xff] %vm50_vm1, %v6396_v1  ;;  %7534 = vmatmul.mubr.msk.f32.vlgmr.msra.gmra.mrb[124].mxu1 %vm6408_vm11, %v6396_v1 }
 0x644   :  { %7572 = vmatpush3.bf16.msra.mxu1 %v7571_v28  ;;  %7544 = vmatprep.mubr.msk.f32.mxu1 %vm7657_vm2, %v7656_v23 }
 0x645   :  { %7573 = vmatprep.subr.bf16.mxu1 %v7655_v60 }
 0x648   :  { %7575 = vmatpush3.bf16.msra.mxu1 %v7574_v5 }
 0x716   :  { %v6478_v39 = vpop.f32.mrb[124].mxu1 }
 0x717   :  { %v6479_v9 = vadd.f32 %v6831_v21, %v6478_v39  ;;  %v7535_v63 = vpop.f32.mrb[125].mxu1 }
 0x719   :  { %v6482_v23 = vmax.f32 %v6479_v9, 0.0 }
 0x71b   :  { %7545 = vmatmul.mubr.msk.f32.vlgmr.msra.gmra.mrb[126].mxu1 %vm1946_vm0, %v6482_v23 }
 0x7ee   :  { %v6556_v60 = vpop.f32.mrb[126].mxu1 }
 0x7ef   :  { %6560 = vst.msk [vmem:[%s11125_s14] sm:$0xff] %vm1946_vm0, %v6556_v60  ;;  %v7546_v22 = vpop.f32.mrb[127].mxu1 }

</bundles_post_ra>
